<compile_context>
chip_gen: v7x
topology: tpu7x:2x2x1
jax: 0.10.0
libtpu: 0.0.40
codegen_flags: <defaults>
</compile_context>

<pallas_src>
import functools

import jax
import jax.numpy as jnp
from jax import lax
from jax.experimental import pallas as pl
from jax.experimental.pallas import tpu as pltpu


# ---------------------------------------------------------------------------
# Kernel 1: stacked LSTM recurrence + ReLU for one batch tile, layer-major.
# ---------------------------------------------------------------------------
def _lstm_kernel(emb_ref, w_ih_ref, w_hh_ref, b_ref, act_ref, gates_ref,
                 *, S, TB, H, L):
    """emb_ref:   (S, TB, E)  bf16  embedded tokens for this batch tile
       w_ih_ref:  (L, E, 4H)  bf16  input-to-hidden weights ((in, out) layout)
       w_hh_ref:  (L, H, 4H)  bf16  hidden-to-hidden weights
       b_ref:     (L, 1, 4H)  f32   pre-summed biases (b_ih + b_hh)
       act_ref:   (S, TB, H)  bf16  OUTPUT: relu(top-layer h); also the
                                    inter-layer activation buffer
       gates_ref: (S*TB, 4H)  f32   scratch: hoisted pre-gates of current layer
    """
    bf16 = jnp.bfloat16
    f32 = jnp.float32
    M = S * TB

    for l in range(L):  # static, small L
        if l == 0:
            x2d = emb_ref[...].reshape(M, -1)          # (M, E) bf16
        else:
            x2d = act_ref[...].reshape(M, H)           # previous layer h, bf16

        # Hoisted input-to-hidden matmul for ALL timesteps of this layer:
        # one big MXU matmul instead of S tiny ones on the critical path.
        gates_ref[...] = (
            jnp.dot(x2d, w_ih_ref[l], preferred_element_type=f32) + b_ref[l])

        def step(t, carry, l=l):
            h_prev, c_prev = carry                     # bf16 (TB,H), f32 (TB,H)
            r = pl.multiple_of(t * TB, TB)             # sublane-aligned offset
            # Only the recurrent matmul remains inside the sequential loop.
            g = gates_ref[pl.ds(r, TB), :] + jnp.dot(
                h_prev, w_hh_ref[l], preferred_element_type=f32)
            # PyTorch gate order [i, f, g, o]; H % 128 == 0 keeps every slice
            # a lane-aligned chunk (no cross-lane extraction).
            i_g = jax.nn.sigmoid(g[:, 0 * H:1 * H])
            f_g = jax.nn.sigmoid(g[:, 1 * H:2 * H])
            g_g = jnp.tanh(g[:, 2 * H:3 * H])
            o_g = jax.nn.sigmoid(g[:, 3 * H:4 * H])
            c_new = f_g * c_prev + i_g * g_g           # f32 cell state
            h_new = (o_g * jnp.tanh(c_new)).astype(bf16)   # bf16 h carry/store
            act_ref[t] = h_new                         # one (TB, H) tile store
            return h_new, c_new

        carry0 = (jnp.zeros((TB, H), bf16), jnp.zeros((TB, H), f32))
        # Unrolled so the scheduler can overlap gate math with the next step's
        # recurrent matmul (visible, non-unrolled inner loops cost ~35%).
        lax.fori_loop(0, S, step, carry0, unroll=True)

    # ReLU on the top layer's outputs (done once, in place, stored as bf16).
    act_ref[...] = jnp.maximum(act_ref[...], 0.0)


# ---------------------------------------------------------------------------
# Kernel 2: output projection, tiled over (padded) vocab with a parallel grid.
# ---------------------------------------------------------------------------
def _proj_kernel(h_ref, w_ref, b_ref, o_ref):
    """h_ref: (S*B, H) bf16, w_ref: (H, TV) bf16, b_ref: (1, TV) f32,
       o_ref: (S*B, TV) f32 (lane-dense store)."""
    o_ref[...] = (
        jnp.dot(h_ref[...], w_ref[...], preferred_element_type=jnp.float32)
        + b_ref[...])


# ---------------------------------------------------------------------------
# Parameter prep (shared by kernel wrapper and reference): (in, out) layouts,
# bf16 matmul operands, pre-summed f32 biases.
# ---------------------------------------------------------------------------
def _prep_params(w_ih, w_hh, b_ih, b_hh, w_out, b_out):
    w_ih_t = jnp.transpose(w_ih, (0, 2, 1)).astype(jnp.bfloat16)   # (L, E, 4H)
    w_hh_t = jnp.transpose(w_hh, (0, 2, 1)).astype(jnp.bfloat16)   # (L, H, 4H)
    b = (b_ih + b_hh).astype(jnp.float32)[:, None, :]              # (L, 1, 4H)
    w_out_t = jnp.transpose(w_out, (1, 0)).astype(jnp.bfloat16)    # (H, V)
    b_out_2d = b_out.astype(jnp.float32)[None, :]                  # (1, V)
    return w_ih_t, w_hh_t, b, w_out_t, b_out_2d


def lstm_predictor_forward(tokens, embedding_table, w_ih, w_hh, b_ih, b_hh,
                           w_out, b_out, *, batch_tile=None):
    """tokens: (S, B) int32 (seq-first, like nn.LSTM batch_first=False).
    Weights in PyTorch layout: w_ih/w_hh (L, 4H, in), w_out (V, H).
    Returns logits (S, B, V) float32."""
    S, B = tokens.shape
    V, E = embedding_table.shape
    L = w_ih.shape[0]
    H = w_hh.shape[2]

    # Alignment requirements (fail loudly instead of producing bad stores):
    assert E == H, "stacked per-layer weights assume embedding_dim == h_dim"
    assert H % 128 == 0 and E % 128 == 0, "H/E must be lane-aligned (x128)"
    assert B % 16 == 0, "B must be a multiple of 16 (bf16 native (16,128) tile)"

    # Batch tiling: >=2 tiles when possible (shards the recurrence over v7x's
    # two TensorCores, bounds per-step VMEM, pipelines the embedding DMA).
    if batch_tile is None:
        batch_tile = B // 2 if (B >= 32 and B % 32 == 0) else B
    TB = batch_tile
    assert B % TB == 0 and TB % 16 == 0
    NB = B // TB

    # Embedding lookup (gather) in plain JAX glue.
    embedded = jnp.take(embedding_table, tokens, axis=0)           # (S, B, E)

    w_ih_t, w_hh_t, b, w_out_t, b_out_2d = _prep_params(
        w_ih, w_hh, b_ih, b_hh, w_out, b_out)
    emb_bf16 = embedded.astype(jnp.bfloat16)                       # (S, B, E)

    vmem_cap = 48 * 1024 * 1024  # < v7x 64 MiB physical, > v5e 16 MiB default

    # --- Kernel 1: LSTM recurrence + ReLU, parallel over batch tiles.
    # (At realistic sizes the grid-invariant weight specs would also be
    #  single-buffered; double-buffering them is negligible at these shapes.)
    act = pl.pallas_call(
        functools.partial(_lstm_kernel, S=S, TB=TB, H=H, L=L),
        out_shape=jax.ShapeDtypeStruct((S, B, H), jnp.bfloat16),
        grid_spec=pltpu.PrefetchScalarGridSpec(
            num_scalar_prefetch=0,
            grid=(NB,),
            in_specs=[
                pl.BlockSpec((S, TB, E), lambda nb: (0, nb, 0)),     # embedded
                pl.BlockSpec((L, E, 4 * H), lambda nb: (0, 0, 0)),   # w_ih
                pl.BlockSpec((L, H, 4 * H), lambda nb: (0, 0, 0)),   # w_hh
                pl.BlockSpec((L, 1, 4 * H), lambda nb: (0, 0, 0)),   # b_ih+b_hh
            ],
            out_specs=pl.BlockSpec((S, TB, H), lambda nb: (0, nb, 0)),
            scratch_shapes=[pltpu.VMEM((S * TB, 4 * H), jnp.float32)],
        ),
        compiler_params=pltpu.CompilerParams(
            dimension_semantics=("parallel",),     # batch tiles are independent
            vmem_limit_bytes=vmem_cap),
    )(emb_bf16, w_ih_t, w_hh_t, b)

    # --- Kernel 2: vocab projection, padded to lane-dense width, vocab-parallel.
    M = S * B
    TV = 512                                        # wider tile: fewer grid steps
    Vp = ((V + TV - 1) // TV) * TV
    if Vp != V:
        w_out_t = jnp.pad(w_out_t, ((0, 0), (0, Vp - V)))
        b_out_2d = jnp.pad(b_out_2d, ((0, 0), (0, Vp - V)))
    act2d = act.reshape(M, H)                       # bf16 handoff, no extra cast

    logits = pl.pallas_call(
        _proj_kernel,
        out_shape=jax.ShapeDtypeStruct((M, Vp), jnp.float32),
        grid_spec=pltpu.PrefetchScalarGridSpec(
            num_scalar_prefetch=0,
            grid=(Vp // TV,),
            in_specs=[
                pl.BlockSpec((M, H), lambda j: (0, 0)),      # relu(h), resident
                pl.BlockSpec((H, TV), lambda j: (0, j)),     # w_out tile
                pl.BlockSpec((1, TV), lambda j: (0, j)),     # b_out tile
            ],
            out_specs=pl.BlockSpec((M, TV), lambda j: (0, j)),
        ),
        compiler_params=pltpu.CompilerParams(
            dimension_semantics=("parallel",),   # shards over v7x's 2 TCs
            vmem_limit_bytes=vmem_cap),
    )(act2d, w_out_t, b_out_2d)

    return logits.reshape(S, B, Vp)[:, :, :V]


# ---------------------------------------------------------------------------
# Pure-JAX reference with identical math / casting points, for correctness.
# ---------------------------------------------------------------------------
def reference_forward(tokens, embedding_table, w_ih, w_hh, b_ih, b_hh,
                      w_out, b_out):
    S, B = tokens.shape
    V, E = embedding_table.shape
    L = w_ih.shape[0]
    H = w_hh.shape[2]

    w_ih_t, w_hh_t, b, w_out_t, b_out_2d = _prep_params(
        w_ih, w_hh, b_ih, b_hh, w_out, b_out)
    embedded = jnp.take(embedding_table, tokens, axis=0)
    x = embedded.astype(jnp.bfloat16)                      # (S, B, E)

    hs = None
    for l in range(L):
        pre = jnp.dot(x.reshape(S * B, -1), w_ih_t[l],
                      preferred_element_type=jnp.float32).reshape(S, B, 4 * H)
        pre = pre + b[l]

        def step(carry, g_t, l=l):
            h_prev, c_prev = carry
            g = g_t + jnp.dot(h_prev.astype(jnp.bfloat16), w_hh_t[l],
                              preferred_element_type=jnp.float32)
            i_g = jax.nn.sigmoid(g[:, 0 * H:1 * H])
            f_g = jax.nn.sigmoid(g[:, 1 * H:2 * H])
            g_g = jnp.tanh(g[:, 2 * H:3 * H])
            o_g = jax.nn.sigmoid(g[:, 3 * H:4 * H])
            c = f_g * c_prev + i_g * g_g
            h = o_g * jnp.tanh(c)
            return (h, c), h

        init = (jnp.zeros((B, H), jnp.float32), jnp.zeros((B, H), jnp.float32))
        (_, _), hs = lax.scan(step, init, pre)             # (S, B, H) f32
        x = hs.astype(jnp.bfloat16)

    out = jnp.maximum(hs, 0.0)
    logits = jnp.dot(out.reshape(S * B, H).astype(jnp.bfloat16), w_out_t,
                     preferred_element_type=jnp.float32) + b_out_2d
    return logits.reshape(S, B, V)


if __name__ == "__main__":
    # Small but aligned shapes: H, E multiples of 128 keep gate slices
    # lane-aligned; B = 32 gives two batch tiles of 16 rows (bf16-tile aligned).
    VOCAB = 1000     # not a multiple of 128/512: exercises the vocab padding
    EMB = 128        # embedding_dim == h_dim for stacked per-layer weights
    HID = 128
    LAYERS = 2
    SEQ = 12
    BATCH = 32

    key = jax.random.PRNGKey(0)
    keys = jax.random.split(key, 8)
    scale = 1.0 / jnp.sqrt(HID)

    # PyTorch-style parameter layouts and init.
    embedding_table = 0.1 * jax.random.normal(keys[0], (VOCAB, EMB), jnp.float32)
    w_ih = jax.random.uniform(keys[1], (LAYERS, 4 * HID, EMB), jnp.float32, -scale, scale)
    w_hh = jax.random.uniform(keys[2], (LAYERS, 4 * HID, HID), jnp.float32, -scale, scale)
    b_ih = jax.random.uniform(keys[3], (LAYERS, 4 * HID), jnp.float32, -scale, scale)
    b_hh = jax.random.uniform(keys[4], (LAYERS, 4 * HID), jnp.float32, -scale, scale)
    w_out = jax.random.uniform(keys[5], (VOCAB, HID), jnp.float32, -scale, scale)
    b_out = jax.random.uniform(keys[6], (VOCAB,), jnp.float32, -scale, scale)

    # Token ids: (S, B), seq-first like PyTorch nn.LSTM default.
    tokens = jax.random.randint(keys[7], (SEQ, BATCH), 0, VOCAB, dtype=jnp.int32)

    logits = lstm_predictor_forward(tokens, embedding_table, w_ih, w_hh,
                                    b_ih, b_hh, w_out, b_out)
    logits = jax.block_until_ready(logits)

    ref = reference_forward(tokens, embedding_table, w_ih, w_hh,
                            b_ih, b_hh, w_out, b_out)

    assert logits.shape == (SEQ, BATCH, VOCAB)
    max_err = jnp.max(jnp.abs(logits - ref))
    assert jnp.allclose(logits, ref, atol=5e-3, rtol=5e-3), (
        f"mismatch vs reference, max abs err = {max_err}")

    print("KERNEL_OK")
</pallas_src>

<mosaic_0001>
module attributes {stable_mosaic.version = 11 : i64} {
  func.func @_lstm_kernel(%arg0: i32, %arg1: memref<12x16x128xbf16, #tpu.memory_space<vmem>>, %arg2: memref<2x128x512xbf16, #tpu.memory_space<vmem>>, %arg3: memref<2x128x512xbf16, #tpu.memory_space<vmem>>, %arg4: memref<2x1x512xf32, #tpu.memory_space<vmem>>, %arg5: memref<12x16x128xbf16, #tpu.memory_space<vmem>>, %arg6: memref<192x512xf32, #tpu.memory_space<vmem>>) attributes {dimension_semantics = [#tpu.dimension_semantics<parallel>], iteration_bounds = array<i64: 2>, scalar_prefetch = 0 : i64, scratch_operands = 1 : i64, tpu.core_type = #tpu.core_type<tc>, window_params = [{transform_indices = @transform_0, window_bounds = array<i64: 12, 16, 128>}, {pipeline_mode = #tpu.pipeline_mode<synchronous>, transform_indices = @transform_1, window_bounds = array<i64: 2, 128, 512>}, {pipeline_mode = #tpu.pipeline_mode<synchronous>, transform_indices = @transform_2, window_bounds = array<i64: 2, 128, 512>}, {pipeline_mode = #tpu.pipeline_mode<synchronous>, transform_indices = @transform_3, window_bounds = array<i64: 2, 1, 512>}, {transform_indices = @transform_4, window_bounds = array<i64: 12, 16, 128>}]} {
    %c0 = arith.constant 0 : index
    %c0_0 = arith.constant 0 : index
    %c0_1 = arith.constant 0 : index
    %0 = vector.load %arg1[%c0, %c0_0, %c0_1] : memref<12x16x128xbf16, #tpu.memory_space<vmem>>, vector<12x16x128xbf16>
    %1 = vector.shape_cast %0 : vector<12x16x128xbf16> to vector<192x128xbf16>
    %c0_2 = arith.constant 0 : index
    %c0_3 = arith.constant 0 : index
    %c0_4 = arith.constant 0 : index
    %2 = vector.load %arg2[%c0_2, %c0_3, %c0_4] : memref<2x128x512xbf16, #tpu.memory_space<vmem>>, vector<1x128x512xbf16>
    %3 = vector.shape_cast %2 : vector<1x128x512xbf16> to vector<128x512xbf16>
    %cst = arith.constant dense<0.000000e+00> : vector<192x512xf32>
    %4 = tpu.matmul %1, %3, %cst {dimension_numbers = #tpu.dot_dimension_numbers<[1], [0], [0], [1], [0, 0, 1, 1], [], []>} : vector<192x128xbf16>, vector<128x512xbf16>, vector<192x512xf32> -> vector<192x512xf32>
    %c0_5 = arith.constant 0 : index
    %c0_6 = arith.constant 0 : index
    %c0_7 = arith.constant 0 : index
    %5 = vector.load %arg4[%c0_5, %c0_6, %c0_7] : memref<2x1x512xf32, #tpu.memory_space<vmem>>, vector<1x1x512xf32>
    %6 = vector.shape_cast %5 : vector<1x1x512xf32> to vector<1x512xf32>
    %7 = vector.broadcast %6 : vector<1x512xf32> to vector<192x512xf32>
    %8 = arith.addf %4, %7 : vector<192x512xf32>
    %c0_8 = arith.constant 0 : index
    %c0_9 = arith.constant 0 : index
    %9 = vector.load %arg6[%c0_8, %c0_9] : memref<192x512xf32, #tpu.memory_space<vmem>>, vector<192x512xf32>
    tpu.vector_store %arg6[%c0_8, %c0_9], %8 {strides = array<i32>} : memref<192x512xf32, #tpu.memory_space<vmem>>, vector<192x512xf32>,
    %cst_10 = arith.constant 0.000000e+00 : bf16
    %10 = vector.broadcast %cst_10 : bf16 to vector<16x128xbf16>
    %cst_11 = arith.constant 0.000000e+00 : f32
    %11 = vector.broadcast %cst_11 : f32 to vector<16x128xf32>
    %c0_i32 = arith.constant 0 : i32
    %c16_i32 = arith.constant 16 : i32
    %12 = arith.muli %c0_i32, %c16_i32 : i32
    %13 = tpu.assume_multiple %12, 16 : i32
    %14 = arith.index_cast %13 : i32 to index
    %c0_12 = arith.constant 0 : index
    %15 = vector.load %arg6[%14, %c0_12] : memref<192x512xf32, #tpu.memory_space<vmem>>, vector<16x512xf32>
    %c0_13 = arith.constant 0 : index
    %c0_14 = arith.constant 0 : index
    %c0_15 = arith.constant 0 : index
    %16 = vector.load %arg3[%c0_13, %c0_14, %c0_15] : memref<2x128x512xbf16, #tpu.memory_space<vmem>>, vector<1x128x512xbf16>
    %17 = vector.shape_cast %16 : vector<1x128x512xbf16> to vector<128x512xbf16>
    %cst_16 = arith.constant dense<0.000000e+00> : vector<16x512xf32>
    %18 = tpu.matmul %10, %17, %cst_16 {dimension_numbers = #tpu.dot_dimension_numbers<[1], [0], [0], [1], [0, 0, 1, 1], [], []>} : vector<16x128xbf16>, vector<128x512xbf16>, vector<16x512xf32> -> vector<16x512xf32>
    %19 = arith.addf %15, %18 : vector<16x512xf32>
    %20 = vector.extract_strided_slice %19 {offsets = [0, 0], sizes = [16, 128], strides = [1, 1]} : vector<16x512xf32> to vector<16x128xf32>
    %21 = arith.negf %20 : vector<16x128xf32>
    %22 = math.exp %21 : vector<16x128xf32>
    %cst_17 = arith.constant 1.000000e+00 : f32
    %23 = vector.broadcast %cst_17 : f32 to vector<16x128xf32>
    %24 = arith.addf %23, %22 : vector<16x128xf32>
    %25 = arith.divf %23, %24 : vector<16x128xf32>
    %26 = vector.extract_strided_slice %19 {offsets = [0, 128], sizes = [16, 128], strides = [1, 1]} : vector<16x512xf32> to vector<16x128xf32>
    %27 = arith.negf %26 : vector<16x128xf32>
    %28 = math.exp %27 : vector<16x128xf32>
    %cst_18 = arith.constant 1.000000e+00 : f32
    %29 = vector.broadcast %cst_18 : f32 to vector<16x128xf32>
    %30 = arith.addf %29, %28 : vector<16x128xf32>
    %31 = arith.divf %29, %30 : vector<16x128xf32>
    %32 = vector.extract_strided_slice %19 {offsets = [0, 256], sizes = [16, 128], strides = [1, 1]} : vector<16x512xf32> to vector<16x128xf32>
    %33 = math.tanh %32 : vector<16x128xf32>
    %34 = vector.extract_strided_slice %19 {offsets = [0, 384], sizes = [16, 128], strides = [1, 1]} : vector<16x512xf32> to vector<16x128xf32>
    %35 = arith.negf %34 : vector<16x128xf32>
    %36 = math.exp %35 : vector<16x128xf32>
    %cst_19 = arith.constant 1.000000e+00 : f32
    %37 = vector.broadcast %cst_19 : f32 to vector<16x128xf32>
    %38 = arith.addf %37, %36 : vector<16x128xf32>
    %39 = arith.divf %37, %38 : vector<16x128xf32>
    %40 = arith.mulf %31, %11 : vector<16x128xf32>
    %41 = arith.mulf %25, %33 : vector<16x128xf32>
    %42 = arith.addf %40, %41 : vector<16x128xf32>
    %43 = math.tanh %42 : vector<16x128xf32>
    %44 = arith.mulf %39, %43 : vector<16x128xf32>
    %45 = arith.truncf %44 : vector<16x128xf32> to vector<16x128xbf16>
    %46 = arith.index_cast %c0_i32 : i32 to index
    %c0_20 = arith.constant 0 : index
    %c0_21 = arith.constant 0 : index
    %47 = vector.load %arg5[%46, %c0_20, %c0_21] : memref<12x16x128xbf16, #tpu.memory_space<vmem>>, vector<1x16x128xbf16>
    %48 = vector.shape_cast %47 : vector<1x16x128xbf16> to vector<16x128xbf16>
    %49 = vector.shape_cast %45 : vector<16x128xbf16> to vector<1x16x128xbf16>
    tpu.vector_store %arg5[%46, %c0_20, %c0_21], %49 {strides = array<i32>} : memref<12x16x128xbf16, #tpu.memory_space<vmem>>, vector<1x16x128xbf16>,
    %c1_i32 = arith.constant 1 : i32
    %c16_i32_22 = arith.constant 16 : i32
    %50 = arith.muli %c1_i32, %c16_i32_22 : i32
    %51 = tpu.assume_multiple %50, 16 : i32
    %52 = arith.index_cast %51 : i32 to index
    %c0_23 = arith.constant 0 : index
    %53 = vector.load %arg6[%52, %c0_23] : memref<192x512xf32, #tpu.memory_space<vmem>>, vector<16x512xf32>
    %c0_24 = arith.constant 0 : index
    %c0_25 = arith.constant 0 : index
    %c0_26 = arith.constant 0 : index
    %54 = vector.load %arg3[%c0_24, %c0_25, %c0_26] : memref<2x128x512xbf16, #tpu.memory_space<vmem>>, vector<1x128x512xbf16>
    %55 = vector.shape_cast %54 : vector<1x128x512xbf16> to vector<128x512xbf16>
    %cst_27 = arith.constant dense<0.000000e+00> : vector<16x512xf32>
    %56 = tpu.matmul %45, %55, %cst_27 {dimension_numbers = #tpu.dot_dimension_numbers<[1], [0], [0], [1], [0, 0, 1, 1], [], []>} : vector<16x128xbf16>, vector<128x512xbf16>, vector<16x512xf32> -> vector<16x512xf32>
    %57 = arith.addf %53, %56 : vector<16x512xf32>
    %58 = vector.extract_strided_slice %57 {offsets = [0, 0], sizes = [16, 128], strides = [1, 1]} : vector<16x512xf32> to vector<16x128xf32>
    %59 = arith.negf %58 : vector<16x128xf32>
    %60 = math.exp %59 : vector<16x128xf32>
    %cst_28 = arith.constant 1.000000e+00 : f32
    %61 = vector.broadcast %cst_28 : f32 to vector<16x128xf32>
    %62 = arith.addf %61, %60 : vector<16x128xf32>
    %63 = arith.divf %61, %62 : vector<16x128xf32>
    %64 = vector.extract_strided_slice %57 {offsets = [0, 128], sizes = [16, 128], strides = [1, 1]} : vector<16x512xf32> to vector<16x128xf32>
    %65 = arith.negf %64 : vector<16x128xf32>
    %66 = math.exp %65 : vector<16x128xf32>
    %cst_29 = arith.constant 1.000000e+00 : f32
    %67 = vector.broadcast %cst_29 : f32 to vector<16x128xf32>
    %68 = arith.addf %67, %66 : vector<16x128xf32>
    %69 = arith.divf %67, %68 : vector<16x128xf32>
    %70 = vector.extract_strided_slice %57 {offsets = [0, 256], sizes = [16, 128], strides = [1, 1]} : vector<16x512xf32> to vector<16x128xf32>
    %71 = math.tanh %70 : vector<16x128xf32>
    %72 = vector.extract_strided_slice %57 {offsets = [0, 384], sizes = [16, 128], strides = [1, 1]} : vector<16x512xf32> to vector<16x128xf32>
    %73 = arith.negf %72 : vector<16x128xf32>
    %74 = math.exp %73 : vector<16x128xf32>
    %cst_30 = arith.constant 1.000000e+00 : f32
    %75 = vector.broadcast %cst_30 : f32 to vector<16x128xf32>
    %76 = arith.addf %75, %74 : vector<16x128xf32>
    %77 = arith.divf %75, %76 : vector<16x128xf32>
    %78 = arith.mulf %69, %42 : vector<16x128xf32>
    %79 = arith.mulf %63, %71 : vector<16x128xf32>
    %80 = arith.addf %78, %79 : vector<16x128xf32>
    %81 = math.tanh %80 : vector<16x128xf32>
    %82 = arith.mulf %77, %81 : vector<16x128xf32>
    %83 = arith.truncf %82 : vector<16x128xf32> to vector<16x128xbf16>
    %84 = arith.index_cast %c1_i32 : i32 to index
    %c0_31 = arith.constant 0 : index
    %c0_32 = arith.constant 0 : index
    %85 = vector.load %arg5[%84, %c0_31, %c0_32] : memref<12x16x128xbf16, #tpu.memory_space<vmem>>, vector<1x16x128xbf16>
    %86 = vector.shape_cast %85 : vector<1x16x128xbf16> to vector<16x128xbf16>
    %87 = vector.shape_cast %83 : vector<16x128xbf16> to vector<1x16x128xbf16>
    tpu.vector_store %arg5[%84, %c0_31, %c0_32], %87 {strides = array<i32>} : memref<12x16x128xbf16, #tpu.memory_space<vmem>>, vector<1x16x128xbf16>,
    %c2_i32 = arith.constant 2 : i32
    %c16_i32_33 = arith.constant 16 : i32
    %88 = arith.muli %c2_i32, %c16_i32_33 : i32
    %89 = tpu.assume_multiple %88, 16 : i32
    %90 = arith.index_cast %89 : i32 to index
    %c0_34 = arith.constant 0 : index
    %91 = vector.load %arg6[%90, %c0_34] : memref<192x512xf32, #tpu.memory_space<vmem>>, vector<16x512xf32>
    %c0_35 = arith.constant 0 : index
    %c0_36 = arith.constant 0 : index
    %c0_37 = arith.constant 0 : index
    %92 = vector.load %arg3[%c0_35, %c0_36, %c0_37] : memref<2x128x512xbf16, #tpu.memory_space<vmem>>, vector<1x128x512xbf16>
    %93 = vector.shape_cast %92 : vector<1x128x512xbf16> to vector<128x512xbf16>
    %cst_38 = arith.constant dense<0.000000e+00> : vector<16x512xf32>
    %94 = tpu.matmul %83, %93, %cst_38 {dimension_numbers = #tpu.dot_dimension_numbers<[1], [0], [0], [1], [0, 0, 1, 1], [], []>} : vector<16x128xbf16>, vector<128x512xbf16>, vector<16x512xf32> -> vector<16x512xf32>
    %95 = arith.addf %91, %94 : vector<16x512xf32>
    %96 = vector.extract_strided_slice %95 {offsets = [0, 0], sizes = [16, 128], strides = [1, 1]} : vector<16x512xf32> to vector<16x128xf32>
    %97 = arith.negf %96 : vector<16x128xf32>
    %98 = math.exp %97 : vector<16x128xf32>
    %cst_39 = arith.constant 1.000000e+00 : f32
    %99 = vector.broadcast %cst_39 : f32 to vector<16x128xf32>
    %100 = arith.addf %99, %98 : vector<16x128xf32>
    %101 = arith.divf %99, %100 : vector<16x128xf32>
    %102 = vector.extract_strided_slice %95 {offsets = [0, 128], sizes = [16, 128], strides = [1, 1]} : vector<16x512xf32> to vector<16x128xf32>
    %103 = arith.negf %102 : vector<16x128xf32>
    %104 = math.exp %103 : vector<16x128xf32>
    %cst_40 = arith.constant 1.000000e+00 : f32
    %105 = vector.broadcast %cst_40 : f32 to vector<16x128xf32>
    %106 = arith.addf %105, %104 : vector<16x128xf32>
    %107 = arith.divf %105, %106 : vector<16x128xf32>
    %108 = vector.extract_strided_slice %95 {offsets = [0, 256], sizes = [16, 128], strides = [1, 1]} : vector<16x512xf32> to vector<16x128xf32>
    %109 = math.tanh %108 : vector<16x128xf32>
    %110 = vector.extract_strided_slice %95 {offsets = [0, 384], sizes = [16, 128], strides = [1, 1]} : vector<16x512xf32> to vector<16x128xf32>
    %111 = arith.negf %110 : vector<16x128xf32>
    %112 = math.exp %111 : vector<16x128xf32>
    %cst_41 = arith.constant 1.000000e+00 : f32
    %113 = vector.broadcast %cst_41 : f32 to vector<16x128xf32>
    %114 = arith.addf %113, %112 : vector<16x128xf32>
    %115 = arith.divf %113, %114 : vector<16x128xf32>
    %116 = arith.mulf %107, %80 : vector<16x128xf32>
    %117 = arith.mulf %101, %109 : vector<16x128xf32>
    %118 = arith.addf %116, %117 : vector<16x128xf32>
    %119 = math.tanh %118 : vector<16x128xf32>
    %120 = arith.mulf %115, %119 : vector<16x128xf32>
    %121 = arith.truncf %120 : vector<16x128xf32> to vector<16x128xbf16>
    %122 = arith.index_cast %c2_i32 : i32 to index
    %c0_42 = arith.constant 0 : index
    %c0_43 = arith.constant 0 : index
    %123 = vector.load %arg5[%122, %c0_42, %c0_43] : memref<12x16x128xbf16, #tpu.memory_space<vmem>>, vector<1x16x128xbf16>
    %124 = vector.shape_cast %123 : vector<1x16x128xbf16> to vector<16x128xbf16>
    %125 = vector.shape_cast %121 : vector<16x128xbf16> to vector<1x16x128xbf16>
    tpu.vector_store %arg5[%122, %c0_42, %c0_43], %125 {strides = array<i32>} : memref<12x16x128xbf16, #tpu.memory_space<vmem>>, vector<1x16x128xbf16>,
    %c3_i32 = arith.constant 3 : i32
    %c16_i32_44 = arith.constant 16 : i32
    %126 = arith.muli %c3_i32, %c16_i32_44 : i32
    %127 = tpu.assume_multiple %126, 16 : i32
    %128 = arith.index_cast %127 : i32 to index
    %c0_45 = arith.constant 0 : index
    %129 = vector.load %arg6[%128, %c0_45] : memref<192x512xf32, #tpu.memory_space<vmem>>, vector<16x512xf32>
    %c0_46 = arith.constant 0 : index
    %c0_47 = arith.constant 0 : index
    %c0_48 = arith.constant 0 : index
    %130 = vector.load %arg3[%c0_46, %c0_47, %c0_48] : memref<2x128x512xbf16, #tpu.memory_space<vmem>>, vector<1x128x512xbf16>
    %131 = vector.shape_cast %130 : vector<1x128x512xbf16> to vector<128x512xbf16>
    %cst_49 = arith.constant dense<0.000000e+00> : vector<16x512xf32>
    %132 = tpu.matmul %121, %131, %cst_49 {dimension_numbers = #tpu.dot_dimension_numbers<[1], [0], [0], [1], [0, 0, 1, 1], [], []>} : vector<16x128xbf16>, vector<128x512xbf16>, vector<16x512xf32> -> vector<16x512xf32>
    %133 = arith.addf %129, %132 : vector<16x512xf32>
    %134 = vector.extract_strided_slice %133 {offsets = [0, 0], sizes = [16, 128], strides = [1, 1]} : vector<16x512xf32> to vector<16x128xf32>
    %135 = arith.negf %134 : vector<16x128xf32>
    %136 = math.exp %135 : vector<16x128xf32>
    %cst_50 = arith.constant 1.000000e+00 : f32
    %137 = vector.broadcast %cst_50 : f32 to vector<16x128xf32>
    %138 = arith.addf %137, %136 : vector<16x128xf32>
    %139 = arith.divf %137, %138 : vector<16x128xf32>
    %140 = vector.extract_strided_slice %133 {offsets = [0, 128], sizes = [16, 128], strides = [1, 1]} : vector<16x512xf32> to vector<16x128xf32>
    %141 = arith.negf %140 : vector<16x128xf32>
    %142 = math.exp %141 : vector<16x128xf32>
    %cst_51 = arith.constant 1.000000e+00 : f32
    %143 = vector.broadcast %cst_51 : f32 to vector<16x128xf32>
    %144 = arith.addf %143, %142 : vector<16x128xf32>
    %145 = arith.divf %143, %144 : vector<16x128xf32>
    %146 = vector.extract_strided_slice %133 {offsets = [0, 256], sizes = [16, 128], strides = [1, 1]} : vector<16x512xf32> to vector<16x128xf32>
    %147 = math.tanh %146 : vector<16x128xf32>
    %148 = vector.extract_strided_slice %133 {offsets = [0, 384], sizes = [16, 128], strides = [1, 1]} : vector<16x512xf32> to vector<16x128xf32>
    %149 = arith.negf %148 : vector<16x128xf32>
    %150 = math.exp %149 : vector<16x128xf32>
    %cst_52 = arith.constant 1.000000e+00 : f32
    %151 = vector.broadcast %cst_52 : f32 to vector<16x128xf32>
    %152 = arith.addf %151, %150 : vector<16x128xf32>
    %153 = arith.divf %151, %152 : vector<16x128xf32>
    %154 = arith.mulf %145, %118 : vector<16x128xf32>
    %155 = arith.mulf %139, %147 : vector<16x128xf32>
    %156 = arith.addf %154, %155 : vector<16x128xf32>
    %157 = math.tanh %156 : vector<16x128xf32>
    %158 = arith.mulf %153, %157 : vector<16x128xf32>
    %159 = arith.truncf %158 : vector<16x128xf32> to vector<16x128xbf16>
    %160 = arith.index_cast %c3_i32 : i32 to index
    %c0_53 = arith.constant 0 : index
    %c0_54 = arith.constant 0 : index
    %161 = vector.load %arg5[%160, %c0_53, %c0_54] : memref<12x16x128xbf16, #tpu.memory_space<vmem>>, vector<1x16x128xbf16>
    %162 = vector.shape_cast %161 : vector<1x16x128xbf16> to vector<16x128xbf16>
    %163 = vector.shape_cast %159 : vector<16x128xbf16> to vector<1x16x128xbf16>
    tpu.vector_store %arg5[%160, %c0_53, %c0_54], %163 {strides = array<i32>} : memref<12x16x128xbf16, #tpu.memory_space<vmem>>, vector<1x16x128xbf16>,
    %c4_i32 = arith.constant 4 : i32
    %c16_i32_55 = arith.constant 16 : i32
    %164 = arith.muli %c4_i32, %c16_i32_55 : i32
    %165 = tpu.assume_multiple %164, 16 : i32
    %166 = arith.index_cast %165 : i32 to index
    %c0_56 = arith.constant 0 : index
    %167 = vector.load %arg6[%166, %c0_56] : memref<192x512xf32, #tpu.memory_space<vmem>>, vector<16x512xf32>
    %c0_57 = arith.constant 0 : index
    %c0_58 = arith.constant 0 : index
    %c0_59 = arith.constant 0 : index
    %168 = vector.load %arg3[%c0_57, %c0_58, %c0_59] : memref<2x128x512xbf16, #tpu.memory_space<vmem>>, vector<1x128x512xbf16>
    %169 = vector.shape_cast %168 : vector<1x128x512xbf16> to vector<128x512xbf16>
    %cst_60 = arith.constant dense<0.000000e+00> : vector<16x512xf32>
    %170 = tpu.matmul %159, %169, %cst_60 {dimension_numbers = #tpu.dot_dimension_numbers<[1], [0], [0], [1], [0, 0, 1, 1], [], []>} : vector<16x128xbf16>, vector<128x512xbf16>, vector<16x512xf32> -> vector<16x512xf32>
    %171 = arith.addf %167, %170 : vector<16x512xf32>
    %172 = vector.extract_strided_slice %171 {offsets = [0, 0], sizes = [16, 128], strides = [1, 1]} : vector<16x512xf32> to vector<16x128xf32>
    %173 = arith.negf %172 : vector<16x128xf32>
    %174 = math.exp %173 : vector<16x128xf32>
    %cst_61 = arith.constant 1.000000e+00 : f32
    %175 = vector.broadcast %cst_61 : f32 to vector<16x128xf32>
    %176 = arith.addf %175, %174 : vector<16x128xf32>
    %177 = arith.divf %175, %176 : vector<16x128xf32>
    %178 = vector.extract_strided_slice %171 {offsets = [0, 128], sizes = [16, 128], strides = [1, 1]} : vector<16x512xf32> to vector<16x128xf32>
    %179 = arith.negf %178 : vector<16x128xf32>
    %180 = math.exp %179 : vector<16x128xf32>
    %cst_62 = arith.constant 1.000000e+00 : f32
    %181 = vector.broadcast %cst_62 : f32 to vector<16x128xf32>
    %182 = arith.addf %181, %180 : vector<16x128xf32>
    %183 = arith.divf %181, %182 : vector<16x128xf32>
    %184 = vector.extract_strided_slice %171 {offsets = [0, 256], sizes = [16, 128], strides = [1, 1]} : vector<16x512xf32> to vector<16x128xf32>
    %185 = math.tanh %184 : vector<16x128xf32>
    %186 = vector.extract_strided_slice %171 {offsets = [0, 384], sizes = [16, 128], strides = [1, 1]} : vector<16x512xf32> to vector<16x128xf32>
    %187 = arith.negf %186 : vector<16x128xf32>
    %188 = math.exp %187 : vector<16x128xf32>
    %cst_63 = arith.constant 1.000000e+00 : f32
    %189 = vector.broadcast %cst_63 : f32 to vector<16x128xf32>
    %190 = arith.addf %189, %188 : vector<16x128xf32>
    %191 = arith.divf %189, %190 : vector<16x128xf32>
    %192 = arith.mulf %183, %156 : vector<16x128xf32>
    %193 = arith.mulf %177, %185 : vector<16x128xf32>
    %194 = arith.addf %192, %193 : vector<16x128xf32>
    %195 = math.tanh %194 : vector<16x128xf32>
    %196 = arith.mulf %191, %195 : vector<16x128xf32>
    %197 = arith.truncf %196 : vector<16x128xf32> to vector<16x128xbf16>
    %198 = arith.index_cast %c4_i32 : i32 to index
    %c0_64 = arith.constant 0 : index
    %c0_65 = arith.constant 0 : index
    %199 = vector.load %arg5[%198, %c0_64, %c0_65] : memref<12x16x128xbf16, #tpu.memory_space<vmem>>, vector<1x16x128xbf16>
    %200 = vector.shape_cast %199 : vector<1x16x128xbf16> to vector<16x128xbf16>
    %201 = vector.shape_cast %197 : vector<16x128xbf16> to vector<1x16x128xbf16>
    tpu.vector_store %arg5[%198, %c0_64, %c0_65], %201 {strides = array<i32>} : memref<12x16x128xbf16, #tpu.memory_space<vmem>>, vector<1x16x128xbf16>,
    %c5_i32 = arith.constant 5 : i32
    %c16_i32_66 = arith.constant 16 : i32
    %202 = arith.muli %c5_i32, %c16_i32_66 : i32
    %203 = tpu.assume_multiple %202, 16 : i32
    %204 = arith.index_cast %203 : i32 to index
    %c0_67 = arith.constant 0 : index
    %205 = vector.load %arg6[%204, %c0_67] : memref<192x512xf32, #tpu.memory_space<vmem>>, vector<16x512xf32>
    %c0_68 = arith.constant 0 : index
    %c0_69 = arith.constant 0 : index
    %c0_70 = arith.constant 0 : index
    %206 = vector.load %arg3[%c0_68, %c0_69, %c0_70] : memref<2x128x512xbf16, #tpu.memory_space<vmem>>, vector<1x128x512xbf16>
    %207 = vector.shape_cast %206 : vector<1x128x512xbf16> to vector<128x512xbf16>
    %cst_71 = arith.constant dense<0.000000e+00> : vector<16x512xf32>
    %208 = tpu.matmul %197, %207, %cst_71 {dimension_numbers = #tpu.dot_dimension_numbers<[1], [0], [0], [1], [0, 0, 1, 1], [], []>} : vector<16x128xbf16>, vector<128x512xbf16>, vector<16x512xf32> -> vector<16x512xf32>
    %209 = arith.addf %205, %208 : vector<16x512xf32>
    %210 = vector.extract_strided_slice %209 {offsets = [0, 0], sizes = [16, 128], strides = [1, 1]} : vector<16x512xf32> to vector<16x128xf32>
    %211 = arith.negf %210 : vector<16x128xf32>
    %212 = math.exp %211 : vector<16x128xf32>
    %cst_72 = arith.constant 1.000000e+00 : f32
    %213 = vector.broadcast %cst_72 : f32 to vector<16x128xf32>
    %214 = arith.addf %213, %212 : vector<16x128xf32>
    %215 = arith.divf %213, %214 : vector<16x128xf32>
    %216 = vector.extract_strided_slice %209 {offsets = [0, 128], sizes = [16, 128], strides = [1, 1]} : vector<16x512xf32> to vector<16x128xf32>
    %217 = arith.negf %216 : vector<16x128xf32>
    %218 = math.exp %217 : vector<16x128xf32>
    %cst_73 = arith.constant 1.000000e+00 : f32
    %219 = vector.broadcast %cst_73 : f32 to vector<16x128xf32>
    %220 = arith.addf %219, %218 : vector<16x128xf32>
    %221 = arith.divf %219, %220 : vector<16x128xf32>
    %222 = vector.extract_strided_slice %209 {offsets = [0, 256], sizes = [16, 128], strides = [1, 1]} : vector<16x512xf32> to vector<16x128xf32>
    %223 = math.tanh %222 : vector<16x128xf32>
    %224 = vector.extract_strided_slice %209 {offsets = [0, 384], sizes = [16, 128], strides = [1, 1]} : vector<16x512xf32> to vector<16x128xf32>
    %225 = arith.negf %224 : vector<16x128xf32>
    %226 = math.exp %225 : vector<16x128xf32>
    %cst_74 = arith.constant 1.000000e+00 : f32
    %227 = vector.broadcast %cst_74 : f32 to vector<16x128xf32>
    %228 = arith.addf %227, %226 : vector<16x128xf32>
    %229 = arith.divf %227, %228 : vector<16x128xf32>
    %230 = arith.mulf %221, %194 : vector<16x128xf32>
    %231 = arith.mulf %215, %223 : vector<16x128xf32>
    %232 = arith.addf %230, %231 : vector<16x128xf32>
    %233 = math.tanh %232 : vector<16x128xf32>
    %234 = arith.mulf %229, %233 : vector<16x128xf32>
    %235 = arith.truncf %234 : vector<16x128xf32> to vector<16x128xbf16>
    %236 = arith.index_cast %c5_i32 : i32 to index
    %c0_75 = arith.constant 0 : index
    %c0_76 = arith.constant 0 : index
    %237 = vector.load %arg5[%236, %c0_75, %c0_76] : memref<12x16x128xbf16, #tpu.memory_space<vmem>>, vector<1x16x128xbf16>
    %238 = vector.shape_cast %237 : vector<1x16x128xbf16> to vector<16x128xbf16>
    %239 = vector.shape_cast %235 : vector<16x128xbf16> to vector<1x16x128xbf16>
    tpu.vector_store %arg5[%236, %c0_75, %c0_76], %239 {strides = array<i32>} : memref<12x16x128xbf16, #tpu.memory_space<vmem>>, vector<1x16x128xbf16>,
    %c6_i32 = arith.constant 6 : i32
    %c16_i32_77 = arith.constant 16 : i32
    %240 = arith.muli %c6_i32, %c16_i32_77 : i32
    %241 = tpu.assume_multiple %240, 16 : i32
    %242 = arith.index_cast %241 : i32 to index
    %c0_78 = arith.constant 0 : index
    %243 = vector.load %arg6[%242, %c0_78] : memref<192x512xf32, #tpu.memory_space<vmem>>, vector<16x512xf32>
    %c0_79 = arith.constant 0 : index
    %c0_80 = arith.constant 0 : index
    %c0_81 = arith.constant 0 : index
    %244 = vector.load %arg3[%c0_79, %c0_80, %c0_81] : memref<2x128x512xbf16, #tpu.memory_space<vmem>>, vector<1x128x512xbf16>
    %245 = vector.shape_cast %244 : vector<1x128x512xbf16> to vector<128x512xbf16>
    %cst_82 = arith.constant dense<0.000000e+00> : vector<16x512xf32>
    %246 = tpu.matmul %235, %245, %cst_82 {dimension_numbers = #tpu.dot_dimension_numbers<[1], [0], [0], [1], [0, 0, 1, 1], [], []>} : vector<16x128xbf16>, vector<128x512xbf16>, vector<16x512xf32> -> vector<16x512xf32>
    %247 = arith.addf %243, %246 : vector<16x512xf32>
    %248 = vector.extract_strided_slice %247 {offsets = [0, 0], sizes = [16, 128], strides = [1, 1]} : vector<16x512xf32> to vector<16x128xf32>
    %249 = arith.negf %248 : vector<16x128xf32>
    %250 = math.exp %249 : vector<16x128xf32>
    %cst_83 = arith.constant 1.000000e+00 : f32
    %251 = vector.broadcast %cst_83 : f32 to vector<16x128xf32>
    %252 = arith.addf %251, %250 : vector<16x128xf32>
    %253 = arith.divf %251, %252 : vector<16x128xf32>
    %254 = vector.extract_strided_slice %247 {offsets = [0, 128], sizes = [16, 128], strides = [1, 1]} : vector<16x512xf32> to vector<16x128xf32>
    %255 = arith.negf %254 : vector<16x128xf32>
    %256 = math.exp %255 : vector<16x128xf32>
    %cst_84 = arith.constant 1.000000e+00 : f32
    %257 = vector.broadcast %cst_84 : f32 to vector<16x128xf32>
    %258 = arith.addf %257, %256 : vector<16x128xf32>
    %259 = arith.divf %257, %258 : vector<16x128xf32>
    %260 = vector.extract_strided_slice %247 {offsets = [0, 256], sizes = [16, 128], strides = [1, 1]} : vector<16x512xf32> to vector<16x128xf32>
    %261 = math.tanh %260 : vector<16x128xf32>
    %262 = vector.extract_strided_slice %247 {offsets = [0, 384], sizes = [16, 128], strides = [1, 1]} : vector<16x512xf32> to vector<16x128xf32>
    %263 = arith.negf %262 : vector<16x128xf32>
    %264 = math.exp %263 : vector<16x128xf32>
    %cst_85 = arith.constant 1.000000e+00 : f32
    %265 = vector.broadcast %cst_85 : f32 to vector<16x128xf32>
    %266 = arith.addf %265, %264 : vector<16x128xf32>
    %267 = arith.divf %265, %266 : vector<16x128xf32>
    %268 = arith.mulf %259, %232 : vector<16x128xf32>
    %269 = arith.mulf %253, %261 : vector<16x128xf32>
    %270 = arith.addf %268, %269 : vector<16x128xf32>
    %271 = math.tanh %270 : vector<16x128xf32>
    %272 = arith.mulf %267, %271 : vector<16x128xf32>
    %273 = arith.truncf %272 : vector<16x128xf32> to vector<16x128xbf16>
    %274 = arith.index_cast %c6_i32 : i32 to index
    %c0_86 = arith.constant 0 : index
    %c0_87 = arith.constant 0 : index
    %275 = vector.load %arg5[%274, %c0_86, %c0_87] : memref<12x16x128xbf16, #tpu.memory_space<vmem>>, vector<1x16x128xbf16>
    %276 = vector.shape_cast %275 : vector<1x16x128xbf16> to vector<16x128xbf16>
    %277 = vector.shape_cast %273 : vector<16x128xbf16> to vector<1x16x128xbf16>
    tpu.vector_store %arg5[%274, %c0_86, %c0_87], %277 {strides = array<i32>} : memref<12x16x128xbf16, #tpu.memory_space<vmem>>, vector<1x16x128xbf16>,
    %c7_i32 = arith.constant 7 : i32
    %c16_i32_88 = arith.constant 16 : i32
    %278 = arith.muli %c7_i32, %c16_i32_88 : i32
    %279 = tpu.assume_multiple %278, 16 : i32
    %280 = arith.index_cast %279 : i32 to index
    %c0_89 = arith.constant 0 : index
    %281 = vector.load %arg6[%280, %c0_89] : memref<192x512xf32, #tpu.memory_space<vmem>>, vector<16x512xf32>
    %c0_90 = arith.constant 0 : index
    %c0_91 = arith.constant 0 : index
    %c0_92 = arith.constant 0 : index
    %282 = vector.load %arg3[%c0_90, %c0_91, %c0_92] : memref<2x128x512xbf16, #tpu.memory_space<vmem>>, vector<1x128x512xbf16>
    %283 = vector.shape_cast %282 : vector<1x128x512xbf16> to vector<128x512xbf16>
    %cst_93 = arith.constant dense<0.000000e+00> : vector<16x512xf32>
    %284 = tpu.matmul %273, %283, %cst_93 {dimension_numbers = #tpu.dot_dimension_numbers<[1], [0], [0], [1], [0, 0, 1, 1], [], []>} : vector<16x128xbf16>, vector<128x512xbf16>, vector<16x512xf32> -> vector<16x512xf32>
    %285 = arith.addf %281, %284 : vector<16x512xf32>
    %286 = vector.extract_strided_slice %285 {offsets = [0, 0], sizes = [16, 128], strides = [1, 1]} : vector<16x512xf32> to vector<16x128xf32>
    %287 = arith.negf %286 : vector<16x128xf32>
    %288 = math.exp %287 : vector<16x128xf32>
    %cst_94 = arith.constant 1.000000e+00 : f32
    %289 = vector.broadcast %cst_94 : f32 to vector<16x128xf32>
    %290 = arith.addf %289, %288 : vector<16x128xf32>
    %291 = arith.divf %289, %290 : vector<16x128xf32>
    %292 = vector.extract_strided_slice %285 {offsets = [0, 128], sizes = [16, 128], strides = [1, 1]} : vector<16x512xf32> to vector<16x128xf32>
    %293 = arith.negf %292 : vector<16x128xf32>
    %294 = math.exp %293 : vector<16x128xf32>
    %cst_95 = arith.constant 1.000000e+00 : f32
    %295 = vector.broadcast %cst_95 : f32 to vector<16x128xf32>
    %296 = arith.addf %295, %294 : vector<16x128xf32>
    %297 = arith.divf %295, %296 : vector<16x128xf32>
    %298 = vector.extract_strided_slice %285 {offsets = [0, 256], sizes = [16, 128], strides = [1, 1]} : vector<16x512xf32> to vector<16x128xf32>
    %299 = math.tanh %298 : vector<16x128xf32>
    %300 = vector.extract_strided_slice %285 {offsets = [0, 384], sizes = [16, 128], strides = [1, 1]} : vector<16x512xf32> to vector<16x128xf32>
    %301 = arith.negf %300 : vector<16x128xf32>
    %302 = math.exp %301 : vector<16x128xf32>
    %cst_96 = arith.constant 1.000000e+00 : f32
    %303 = vector.broadcast %cst_96 : f32 to vector<16x128xf32>
    %304 = arith.addf %303, %302 : vector<16x128xf32>
    %305 = arith.divf %303, %304 : vector<16x128xf32>
    %306 = arith.mulf %297, %270 : vector<16x128xf32>
    %307 = arith.mulf %291, %299 : vector<16x128xf32>
    %308 = arith.addf %306, %307 : vector<16x128xf32>
    %309 = math.tanh %308 : vector<16x128xf32>
    %310 = arith.mulf %305, %309 : vector<16x128xf32>
    %311 = arith.truncf %310 : vector<16x128xf32> to vector<16x128xbf16>
    %312 = arith.index_cast %c7_i32 : i32 to index
    %c0_97 = arith.constant 0 : index
    %c0_98 = arith.constant 0 : index
    %313 = vector.load %arg5[%312, %c0_97, %c0_98] : memref<12x16x128xbf16, #tpu.memory_space<vmem>>, vector<1x16x128xbf16>
    %314 = vector.shape_cast %313 : vector<1x16x128xbf16> to vector<16x128xbf16>
    %315 = vector.shape_cast %311 : vector<16x128xbf16> to vector<1x16x128xbf16>
    tpu.vector_store %arg5[%312, %c0_97, %c0_98], %315 {strides = array<i32>} : memref<12x16x128xbf16, #tpu.memory_space<vmem>>, vector<1x16x128xbf16>,
    %c8_i32 = arith.constant 8 : i32
    %c16_i32_99 = arith.constant 16 : i32
    %316 = arith.muli %c8_i32, %c16_i32_99 : i32
    %317 = tpu.assume_multiple %316, 16 : i32
    %318 = arith.index_cast %317 : i32 to index
    %c0_100 = arith.constant 0 : index
    %319 = vector.load %arg6[%318, %c0_100] : memref<192x512xf32, #tpu.memory_space<vmem>>, vector<16x512xf32>
    %c0_101 = arith.constant 0 : index
    %c0_102 = arith.constant 0 : index
    %c0_103 = arith.constant 0 : index
    %320 = vector.load %arg3[%c0_101, %c0_102, %c0_103] : memref<2x128x512xbf16, #tpu.memory_space<vmem>>, vector<1x128x512xbf16>
    %321 = vector.shape_cast %320 : vector<1x128x512xbf16> to vector<128x512xbf16>
    %cst_104 = arith.constant dense<0.000000e+00> : vector<16x512xf32>
    %322 = tpu.matmul %311, %321, %cst_104 {dimension_numbers = #tpu.dot_dimension_numbers<[1], [0], [0], [1], [0, 0, 1, 1], [], []>} : vector<16x128xbf16>, vector<128x512xbf16>, vector<16x512xf32> -> vector<16x512xf32>
    %323 = arith.addf %319, %322 : vector<16x512xf32>
    %324 = vector.extract_strided_slice %323 {offsets = [0, 0], sizes = [16, 128], strides = [1, 1]} : vector<16x512xf32> to vector<16x128xf32>
    %325 = arith.negf %324 : vector<16x128xf32>
    %326 = math.exp %325 : vector<16x128xf32>
    %cst_105 = arith.constant 1.000000e+00 : f32
    %327 = vector.broadcast %cst_105 : f32 to vector<16x128xf32>
    %328 = arith.addf %327, %326 : vector<16x128xf32>
    %329 = arith.divf %327, %328 : vector<16x128xf32>
    %330 = vector.extract_strided_slice %323 {offsets = [0, 128], sizes = [16, 128], strides = [1, 1]} : vector<16x512xf32> to vector<16x128xf32>
    %331 = arith.negf %330 : vector<16x128xf32>
    %332 = math.exp %331 : vector<16x128xf32>
    %cst_106 = arith.constant 1.000000e+00 : f32
    %333 = vector.broadcast %cst_106 : f32 to vector<16x128xf32>
    %334 = arith.addf %333, %332 : vector<16x128xf32>
    %335 = arith.divf %333, %334 : vector<16x128xf32>
    %336 = vector.extract_strided_slice %323 {offsets = [0, 256], sizes = [16, 128], strides = [1, 1]} : vector<16x512xf32> to vector<16x128xf32>
    %337 = math.tanh %336 : vector<16x128xf32>
    %338 = vector.extract_strided_slice %323 {offsets = [0, 384], sizes = [16, 128], strides = [1, 1]} : vector<16x512xf32> to vector<16x128xf32>
    %339 = arith.negf %338 : vector<16x128xf32>
    %340 = math.exp %339 : vector<16x128xf32>
    %cst_107 = arith.constant 1.000000e+00 : f32
    %341 = vector.broadcast %cst_107 : f32 to vector<16x128xf32>
    %342 = arith.addf %341, %340 : vector<16x128xf32>
    %343 = arith.divf %341, %342 : vector<16x128xf32>
    %344 = arith.mulf %335, %308 : vector<16x128xf32>
    %345 = arith.mulf %329, %337 : vector<16x128xf32>
    %346 = arith.addf %344, %345 : vector<16x128xf32>
    %347 = math.tanh %346 : vector<16x128xf32>
    %348 = arith.mulf %343, %347 : vector<16x128xf32>
    %349 = arith.truncf %348 : vector<16x128xf32> to vector<16x128xbf16>
    %350 = arith.index_cast %c8_i32 : i32 to index
    %c0_108 = arith.constant 0 : index
    %c0_109 = arith.constant 0 : index
    %351 = vector.load %arg5[%350, %c0_108, %c0_109] : memref<12x16x128xbf16, #tpu.memory_space<vmem>>, vector<1x16x128xbf16>
    %352 = vector.shape_cast %351 : vector<1x16x128xbf16> to vector<16x128xbf16>
    %353 = vector.shape_cast %349 : vector<16x128xbf16> to vector<1x16x128xbf16>
    tpu.vector_store %arg5[%350, %c0_108, %c0_109], %353 {strides = array<i32>} : memref<12x16x128xbf16, #tpu.memory_space<vmem>>, vector<1x16x128xbf16>,
    %c9_i32 = arith.constant 9 : i32
    %c16_i32_110 = arith.constant 16 : i32
    %354 = arith.muli %c9_i32, %c16_i32_110 : i32
    %355 = tpu.assume_multiple %354, 16 : i32
    %356 = arith.index_cast %355 : i32 to index
    %c0_111 = arith.constant 0 : index
    %357 = vector.load %arg6[%356, %c0_111] : memref<192x512xf32, #tpu.memory_space<vmem>>, vector<16x512xf32>
    %c0_112 = arith.constant 0 : index
    %c0_113 = arith.constant 0 : index
    %c0_114 = arith.constant 0 : index
    %358 = vector.load %arg3[%c0_112, %c0_113, %c0_114] : memref<2x128x512xbf16, #tpu.memory_space<vmem>>, vector<1x128x512xbf16>
    %359 = vector.shape_cast %358 : vector<1x128x512xbf16> to vector<128x512xbf16>
    %cst_115 = arith.constant dense<0.000000e+00> : vector<16x512xf32>
    %360 = tpu.matmul %349, %359, %cst_115 {dimension_numbers = #tpu.dot_dimension_numbers<[1], [0], [0], [1], [0, 0, 1, 1], [], []>} : vector<16x128xbf16>, vector<128x512xbf16>, vector<16x512xf32> -> vector<16x512xf32>
    %361 = arith.addf %357, %360 : vector<16x512xf32>
    %362 = vector.extract_strided_slice %361 {offsets = [0, 0], sizes = [16, 128], strides = [1, 1]} : vector<16x512xf32> to vector<16x128xf32>
    %363 = arith.negf %362 : vector<16x128xf32>
    %364 = math.exp %363 : vector<16x128xf32>
    %cst_116 = arith.constant 1.000000e+00 : f32
    %365 = vector.broadcast %cst_116 : f32 to vector<16x128xf32>
    %366 = arith.addf %365, %364 : vector<16x128xf32>
    %367 = arith.divf %365, %366 : vector<16x128xf32>
    %368 = vector.extract_strided_slice %361 {offsets = [0, 128], sizes = [16, 128], strides = [1, 1]} : vector<16x512xf32> to vector<16x128xf32>
    %369 = arith.negf %368 : vector<16x128xf32>
    %370 = math.exp %369 : vector<16x128xf32>
    %cst_117 = arith.constant 1.000000e+00 : f32
    %371 = vector.broadcast %cst_117 : f32 to vector<16x128xf32>
    %372 = arith.addf %371, %370 : vector<16x128xf32>
    %373 = arith.divf %371, %372 : vector<16x128xf32>
    %374 = vector.extract_strided_slice %361 {offsets = [0, 256], sizes = [16, 128], strides = [1, 1]} : vector<16x512xf32> to vector<16x128xf32>
    %375 = math.tanh %374 : vector<16x128xf32>
    %376 = vector.extract_strided_slice %361 {offsets = [0, 384], sizes = [16, 128], strides = [1, 1]} : vector<16x512xf32> to vector<16x128xf32>
    %377 = arith.negf %376 : vector<16x128xf32>
    %378 = math.exp %377 : vector<16x128xf32>
    %cst_118 = arith.constant 1.000000e+00 : f32
    %379 = vector.broadcast %cst_118 : f32 to vector<16x128xf32>
    %380 = arith.addf %379, %378 : vector<16x128xf32>
    %381 = arith.divf %379, %380 : vector<16x128xf32>
    %382 = arith.mulf %373, %346 : vector<16x128xf32>
    %383 = arith.mulf %367, %375 : vector<16x128xf32>
    %384 = arith.addf %382, %383 : vector<16x128xf32>
    %385 = math.tanh %384 : vector<16x128xf32>
    %386 = arith.mulf %381, %385 : vector<16x128xf32>
    %387 = arith.truncf %386 : vector<16x128xf32> to vector<16x128xbf16>
    %388 = arith.index_cast %c9_i32 : i32 to index
    %c0_119 = arith.constant 0 : index
    %c0_120 = arith.constant 0 : index
    %389 = vector.load %arg5[%388, %c0_119, %c0_120] : memref<12x16x128xbf16, #tpu.memory_space<vmem>>, vector<1x16x128xbf16>
    %390 = vector.shape_cast %389 : vector<1x16x128xbf16> to vector<16x128xbf16>
    %391 = vector.shape_cast %387 : vector<16x128xbf16> to vector<1x16x128xbf16>
    tpu.vector_store %arg5[%388, %c0_119, %c0_120], %391 {strides = array<i32>} : memref<12x16x128xbf16, #tpu.memory_space<vmem>>, vector<1x16x128xbf16>,
    %c10_i32 = arith.constant 10 : i32
    %c16_i32_121 = arith.constant 16 : i32
    %392 = arith.muli %c10_i32, %c16_i32_121 : i32
    %393 = tpu.assume_multiple %392, 16 : i32
    %394 = arith.index_cast %393 : i32 to index
    %c0_122 = arith.constant 0 : index
    %395 = vector.load %arg6[%394, %c0_122] : memref<192x512xf32, #tpu.memory_space<vmem>>, vector<16x512xf32>
    %c0_123 = arith.constant 0 : index
    %c0_124 = arith.constant 0 : index
    %c0_125 = arith.constant 0 : index
    %396 = vector.load %arg3[%c0_123, %c0_124, %c0_125] : memref<2x128x512xbf16, #tpu.memory_space<vmem>>, vector<1x128x512xbf16>
    %397 = vector.shape_cast %396 : vector<1x128x512xbf16> to vector<128x512xbf16>
    %cst_126 = arith.constant dense<0.000000e+00> : vector<16x512xf32>
    %398 = tpu.matmul %387, %397, %cst_126 {dimension_numbers = #tpu.dot_dimension_numbers<[1], [0], [0], [1], [0, 0, 1, 1], [], []>} : vector<16x128xbf16>, vector<128x512xbf16>, vector<16x512xf32> -> vector<16x512xf32>
    %399 = arith.addf %395, %398 : vector<16x512xf32>
    %400 = vector.extract_strided_slice %399 {offsets = [0, 0], sizes = [16, 128], strides = [1, 1]} : vector<16x512xf32> to vector<16x128xf32>
    %401 = arith.negf %400 : vector<16x128xf32>
    %402 = math.exp %401 : vector<16x128xf32>
    %cst_127 = arith.constant 1.000000e+00 : f32
    %403 = vector.broadcast %cst_127 : f32 to vector<16x128xf32>
    %404 = arith.addf %403, %402 : vector<16x128xf32>
    %405 = arith.divf %403, %404 : vector<16x128xf32>
    %406 = vector.extract_strided_slice %399 {offsets = [0, 128], sizes = [16, 128], strides = [1, 1]} : vector<16x512xf32> to vector<16x128xf32>
    %407 = arith.negf %406 : vector<16x128xf32>
    %408 = math.exp %407 : vector<16x128xf32>
    %cst_128 = arith.constant 1.000000e+00 : f32
    %409 = vector.broadcast %cst_128 : f32 to vector<16x128xf32>
    %410 = arith.addf %409, %408 : vector<16x128xf32>
    %411 = arith.divf %409, %410 : vector<16x128xf32>
    %412 = vector.extract_strided_slice %399 {offsets = [0, 256], sizes = [16, 128], strides = [1, 1]} : vector<16x512xf32> to vector<16x128xf32>
    %413 = math.tanh %412 : vector<16x128xf32>
    %414 = vector.extract_strided_slice %399 {offsets = [0, 384], sizes = [16, 128], strides = [1, 1]} : vector<16x512xf32> to vector<16x128xf32>
    %415 = arith.negf %414 : vector<16x128xf32>
    %416 = math.exp %415 : vector<16x128xf32>
    %cst_129 = arith.constant 1.000000e+00 : f32
    %417 = vector.broadcast %cst_129 : f32 to vector<16x128xf32>
    %418 = arith.addf %417, %416 : vector<16x128xf32>
    %419 = arith.divf %417, %418 : vector<16x128xf32>
    %420 = arith.mulf %411, %384 : vector<16x128xf32>
    %421 = arith.mulf %405, %413 : vector<16x128xf32>
    %422 = arith.addf %420, %421 : vector<16x128xf32>
    %423 = math.tanh %422 : vector<16x128xf32>
    %424 = arith.mulf %419, %423 : vector<16x128xf32>
    %425 = arith.truncf %424 : vector<16x128xf32> to vector<16x128xbf16>
    %426 = arith.index_cast %c10_i32 : i32 to index
    %c0_130 = arith.constant 0 : index
    %c0_131 = arith.constant 0 : index
    %427 = vector.load %arg5[%426, %c0_130, %c0_131] : memref<12x16x128xbf16, #tpu.memory_space<vmem>>, vector<1x16x128xbf16>
    %428 = vector.shape_cast %427 : vector<1x16x128xbf16> to vector<16x128xbf16>
    %429 = vector.shape_cast %425 : vector<16x128xbf16> to vector<1x16x128xbf16>
    tpu.vector_store %arg5[%426, %c0_130, %c0_131], %429 {strides = array<i32>} : memref<12x16x128xbf16, #tpu.memory_space<vmem>>, vector<1x16x128xbf16>,
    %c11_i32 = arith.constant 11 : i32
    %c16_i32_132 = arith.constant 16 : i32
    %430 = arith.muli %c11_i32, %c16_i32_132 : i32
    %431 = tpu.assume_multiple %430, 16 : i32
    %432 = arith.index_cast %431 : i32 to index
    %c0_133 = arith.constant 0 : index
    %433 = vector.load %arg6[%432, %c0_133] : memref<192x512xf32, #tpu.memory_space<vmem>>, vector<16x512xf32>
    %c0_134 = arith.constant 0 : index
    %c0_135 = arith.constant 0 : index
    %c0_136 = arith.constant 0 : index
    %434 = vector.load %arg3[%c0_134, %c0_135, %c0_136] : memref<2x128x512xbf16, #tpu.memory_space<vmem>>, vector<1x128x512xbf16>
    %435 = vector.shape_cast %434 : vector<1x128x512xbf16> to vector<128x512xbf16>
    %cst_137 = arith.constant dense<0.000000e+00> : vector<16x512xf32>
    %436 = tpu.matmul %425, %435, %cst_137 {dimension_numbers = #tpu.dot_dimension_numbers<[1], [0], [0], [1], [0, 0, 1, 1], [], []>} : vector<16x128xbf16>, vector<128x512xbf16>, vector<16x512xf32> -> vector<16x512xf32>
    %437 = arith.addf %433, %436 : vector<16x512xf32>
    %438 = vector.extract_strided_slice %437 {offsets = [0, 0], sizes = [16, 128], strides = [1, 1]} : vector<16x512xf32> to vector<16x128xf32>
    %439 = arith.negf %438 : vector<16x128xf32>
    %440 = math.exp %439 : vector<16x128xf32>
    %cst_138 = arith.constant 1.000000e+00 : f32
    %441 = vector.broadcast %cst_138 : f32 to vector<16x128xf32>
    %442 = arith.addf %441, %440 : vector<16x128xf32>
    %443 = arith.divf %441, %442 : vector<16x128xf32>
    %444 = vector.extract_strided_slice %437 {offsets = [0, 128], sizes = [16, 128], strides = [1, 1]} : vector<16x512xf32> to vector<16x128xf32>
    %445 = arith.negf %444 : vector<16x128xf32>
    %446 = math.exp %445 : vector<16x128xf32>
    %cst_139 = arith.constant 1.000000e+00 : f32
    %447 = vector.broadcast %cst_139 : f32 to vector<16x128xf32>
    %448 = arith.addf %447, %446 : vector<16x128xf32>
    %449 = arith.divf %447, %448 : vector<16x128xf32>
    %450 = vector.extract_strided_slice %437 {offsets = [0, 256], sizes = [16, 128], strides = [1, 1]} : vector<16x512xf32> to vector<16x128xf32>
    %451 = math.tanh %450 : vector<16x128xf32>
    %452 = vector.extract_strided_slice %437 {offsets = [0, 384], sizes = [16, 128], strides = [1, 1]} : vector<16x512xf32> to vector<16x128xf32>
    %453 = arith.negf %452 : vector<16x128xf32>
    %454 = math.exp %453 : vector<16x128xf32>
    %cst_140 = arith.constant 1.000000e+00 : f32
    %455 = vector.broadcast %cst_140 : f32 to vector<16x128xf32>
    %456 = arith.addf %455, %454 : vector<16x128xf32>
    %457 = arith.divf %455, %456 : vector<16x128xf32>
    %458 = arith.mulf %449, %422 : vector<16x128xf32>
    %459 = arith.mulf %443, %451 : vector<16x128xf32>
    %460 = arith.addf %458, %459 : vector<16x128xf32>
    %461 = math.tanh %460 : vector<16x128xf32>
    %462 = arith.mulf %457, %461 : vector<16x128xf32>
    %463 = arith.truncf %462 : vector<16x128xf32> to vector<16x128xbf16>
    %464 = arith.index_cast %c11_i32 : i32 to index
    %c0_141 = arith.constant 0 : index
    %c0_142 = arith.constant 0 : index
    %465 = vector.load %arg5[%464, %c0_141, %c0_142] : memref<12x16x128xbf16, #tpu.memory_space<vmem>>, vector<1x16x128xbf16>
    %466 = vector.shape_cast %465 : vector<1x16x128xbf16> to vector<16x128xbf16>
    %467 = vector.shape_cast %463 : vector<16x128xbf16> to vector<1x16x128xbf16>
    tpu.vector_store %arg5[%464, %c0_141, %c0_142], %467 {strides = array<i32>} : memref<12x16x128xbf16, #tpu.memory_space<vmem>>, vector<1x16x128xbf16>,
    %c12_i32 = arith.constant 12 : i32
    %c0_143 = arith.constant 0 : index
    %c0_144 = arith.constant 0 : index
    %c0_145 = arith.constant 0 : index
    %468 = vector.load %arg5[%c0_143, %c0_144, %c0_145] : memref<12x16x128xbf16, #tpu.memory_space<vmem>>, vector<12x16x128xbf16>
    %469 = vector.shape_cast %468 : vector<12x16x128xbf16> to vector<192x128xbf16>
    %c1 = arith.constant 1 : index
    %c0_146 = arith.constant 0 : index
    %c0_147 = arith.constant 0 : index
    %470 = vector.load %arg2[%c1, %c0_146, %c0_147] : memref<2x128x512xbf16, #tpu.memory_space<vmem>>, vector<1x128x512xbf16>
    %471 = vector.shape_cast %470 : vector<1x128x512xbf16> to vector<128x512xbf16>
    %cst_148 = arith.constant dense<0.000000e+00> : vector<192x512xf32>
    %472 = tpu.matmul %469, %471, %cst_148 {dimension_numbers = #tpu.dot_dimension_numbers<[1], [0], [0], [1], [0, 0, 1, 1], [], []>} : vector<192x128xbf16>, vector<128x512xbf16>, vector<192x512xf32> -> vector<192x512xf32>
    %c1_149 = arith.constant 1 : index
    %c0_150 = arith.constant 0 : index
    %c0_151 = arith.constant 0 : index
    %473 = vector.load %arg4[%c1_149, %c0_150, %c0_151] : memref<2x1x512xf32, #tpu.memory_space<vmem>>, vector<1x1x512xf32>
    %474 = vector.shape_cast %473 : vector<1x1x512xf32> to vector<1x512xf32>
    %475 = vector.broadcast %474 : vector<1x512xf32> to vector<192x512xf32>
    %476 = arith.addf %472, %475 : vector<192x512xf32>
    %c0_152 = arith.constant 0 : index
    %c0_153 = arith.constant 0 : index
    %477 = vector.load %arg6[%c0_152, %c0_153] : memref<192x512xf32, #tpu.memory_space<vmem>>, vector<192x512xf32>
    tpu.vector_store %arg6[%c0_152, %c0_153], %476 {strides = array<i32>} : memref<192x512xf32, #tpu.memory_space<vmem>>, vector<192x512xf32>,
    %cst_154 = arith.constant 0.000000e+00 : bf16
    %478 = vector.broadcast %cst_154 : bf16 to vector<16x128xbf16>
    %cst_155 = arith.constant 0.000000e+00 : f32
    %479 = vector.broadcast %cst_155 : f32 to vector<16x128xf32>
    %c0_i32_156 = arith.constant 0 : i32
    %c16_i32_157 = arith.constant 16 : i32
    %480 = arith.muli %c0_i32_156, %c16_i32_157 : i32
    %481 = tpu.assume_multiple %480, 16 : i32
    %482 = arith.index_cast %481 : i32 to index
    %c0_158 = arith.constant 0 : index
    %483 = vector.load %arg6[%482, %c0_158] : memref<192x512xf32, #tpu.memory_space<vmem>>, vector<16x512xf32>
    %c1_159 = arith.constant 1 : index
    %c0_160 = arith.constant 0 : index
    %c0_161 = arith.constant 0 : index
    %484 = vector.load %arg3[%c1_159, %c0_160, %c0_161] : memref<2x128x512xbf16, #tpu.memory_space<vmem>>, vector<1x128x512xbf16>
    %485 = vector.shape_cast %484 : vector<1x128x512xbf16> to vector<128x512xbf16>
    %cst_162 = arith.constant dense<0.000000e+00> : vector<16x512xf32>
    %486 = tpu.matmul %478, %485, %cst_162 {dimension_numbers = #tpu.dot_dimension_numbers<[1], [0], [0], [1], [0, 0, 1, 1], [], []>} : vector<16x128xbf16>, vector<128x512xbf16>, vector<16x512xf32> -> vector<16x512xf32>
    %487 = arith.addf %483, %486 : vector<16x512xf32>
    %488 = vector.extract_strided_slice %487 {offsets = [0, 0], sizes = [16, 128], strides = [1, 1]} : vector<16x512xf32> to vector<16x128xf32>
    %489 = arith.negf %488 : vector<16x128xf32>
    %490 = math.exp %489 : vector<16x128xf32>
    %cst_163 = arith.constant 1.000000e+00 : f32
    %491 = vector.broadcast %cst_163 : f32 to vector<16x128xf32>
    %492 = arith.addf %491, %490 : vector<16x128xf32>
    %493 = arith.divf %491, %492 : vector<16x128xf32>
    %494 = vector.extract_strided_slice %487 {offsets = [0, 128], sizes = [16, 128], strides = [1, 1]} : vector<16x512xf32> to vector<16x128xf32>
    %495 = arith.negf %494 : vector<16x128xf32>
    %496 = math.exp %495 : vector<16x128xf32>
    %cst_164 = arith.constant 1.000000e+00 : f32
    %497 = vector.broadcast %cst_164 : f32 to vector<16x128xf32>
    %498 = arith.addf %497, %496 : vector<16x128xf32>
    %499 = arith.divf %497, %498 : vector<16x128xf32>
    %500 = vector.extract_strided_slice %487 {offsets = [0, 256], sizes = [16, 128], strides = [1, 1]} : vector<16x512xf32> to vector<16x128xf32>
    %501 = math.tanh %500 : vector<16x128xf32>
    %502 = vector.extract_strided_slice %487 {offsets = [0, 384], sizes = [16, 128], strides = [1, 1]} : vector<16x512xf32> to vector<16x128xf32>
    %503 = arith.negf %502 : vector<16x128xf32>
    %504 = math.exp %503 : vector<16x128xf32>
    %cst_165 = arith.constant 1.000000e+00 : f32
    %505 = vector.broadcast %cst_165 : f32 to vector<16x128xf32>
    %506 = arith.addf %505, %504 : vector<16x128xf32>
    %507 = arith.divf %505, %506 : vector<16x128xf32>
    %508 = arith.mulf %499, %479 : vector<16x128xf32>
    %509 = arith.mulf %493, %501 : vector<16x128xf32>
    %510 = arith.addf %508, %509 : vector<16x128xf32>
    %511 = math.tanh %510 : vector<16x128xf32>
    %512 = arith.mulf %507, %511 : vector<16x128xf32>
    %513 = arith.truncf %512 : vector<16x128xf32> to vector<16x128xbf16>
    %514 = arith.index_cast %c0_i32_156 : i32 to index
    %c0_166 = arith.constant 0 : index
    %c0_167 = arith.constant 0 : index
    %515 = vector.load %arg5[%514, %c0_166, %c0_167] : memref<12x16x128xbf16, #tpu.memory_space<vmem>>, vector<1x16x128xbf16>
    %516 = vector.shape_cast %515 : vector<1x16x128xbf16> to vector<16x128xbf16>
    %517 = vector.shape_cast %513 : vector<16x128xbf16> to vector<1x16x128xbf16>
    tpu.vector_store %arg5[%514, %c0_166, %c0_167], %517 {strides = array<i32>} : memref<12x16x128xbf16, #tpu.memory_space<vmem>>, vector<1x16x128xbf16>,
    %c1_i32_168 = arith.constant 1 : i32
    %c16_i32_169 = arith.constant 16 : i32
    %518 = arith.muli %c1_i32_168, %c16_i32_169 : i32
    %519 = tpu.assume_multiple %518, 16 : i32
    %520 = arith.index_cast %519 : i32 to index
    %c0_170 = arith.constant 0 : index
    %521 = vector.load %arg6[%520, %c0_170] : memref<192x512xf32, #tpu.memory_space<vmem>>, vector<16x512xf32>
    %c1_171 = arith.constant 1 : index
    %c0_172 = arith.constant 0 : index
    %c0_173 = arith.constant 0 : index
    %522 = vector.load %arg3[%c1_171, %c0_172, %c0_173] : memref<2x128x512xbf16, #tpu.memory_space<vmem>>, vector<1x128x512xbf16>
    %523 = vector.shape_cast %522 : vector<1x128x512xbf16> to vector<128x512xbf16>
    %cst_174 = arith.constant dense<0.000000e+00> : vector<16x512xf32>
    %524 = tpu.matmul %513, %523, %cst_174 {dimension_numbers = #tpu.dot_dimension_numbers<[1], [0], [0], [1], [0, 0, 1, 1], [], []>} : vector<16x128xbf16>, vector<128x512xbf16>, vector<16x512xf32> -> vector<16x512xf32>
    %525 = arith.addf %521, %524 : vector<16x512xf32>
    %526 = vector.extract_strided_slice %525 {offsets = [0, 0], sizes = [16, 128], strides = [1, 1]} : vector<16x512xf32> to vector<16x128xf32>
    %527 = arith.negf %526 : vector<16x128xf32>
    %528 = math.exp %527 : vector<16x128xf32>
    %cst_175 = arith.constant 1.000000e+00 : f32
    %529 = vector.broadcast %cst_175 : f32 to vector<16x128xf32>
    %530 = arith.addf %529, %528 : vector<16x128xf32>
    %531 = arith.divf %529, %530 : vector<16x128xf32>
    %532 = vector.extract_strided_slice %525 {offsets = [0, 128], sizes = [16, 128], strides = [1, 1]} : vector<16x512xf32> to vector<16x128xf32>
    %533 = arith.negf %532 : vector<16x128xf32>
    %534 = math.exp %533 : vector<16x128xf32>
    %cst_176 = arith.constant 1.000000e+00 : f32
    %535 = vector.broadcast %cst_176 : f32 to vector<16x128xf32>
    %536 = arith.addf %535, %534 : vector<16x128xf32>
    %537 = arith.divf %535, %536 : vector<16x128xf32>
    %538 = vector.extract_strided_slice %525 {offsets = [0, 256], sizes = [16, 128], strides = [1, 1]} : vector<16x512xf32> to vector<16x128xf32>
    %539 = math.tanh %538 : vector<16x128xf32>
    %540 = vector.extract_strided_slice %525 {offsets = [0, 384], sizes = [16, 128], strides = [1, 1]} : vector<16x512xf32> to vector<16x128xf32>
    %541 = arith.negf %540 : vector<16x128xf32>
    %542 = math.exp %541 : vector<16x128xf32>
    %cst_177 = arith.constant 1.000000e+00 : f32
    %543 = vector.broadcast %cst_177 : f32 to vector<16x128xf32>
    %544 = arith.addf %543, %542 : vector<16x128xf32>
    %545 = arith.divf %543, %544 : vector<16x128xf32>
    %546 = arith.mulf %537, %510 : vector<16x128xf32>
    %547 = arith.mulf %531, %539 : vector<16x128xf32>
    %548 = arith.addf %546, %547 : vector<16x128xf32>
    %549 = math.tanh %548 : vector<16x128xf32>
    %550 = arith.mulf %545, %549 : vector<16x128xf32>
    %551 = arith.truncf %550 : vector<16x128xf32> to vector<16x128xbf16>
    %552 = arith.index_cast %c1_i32_168 : i32 to index
    %c0_178 = arith.constant 0 : index
    %c0_179 = arith.constant 0 : index
    %553 = vector.load %arg5[%552, %c0_178, %c0_179] : memref<12x16x128xbf16, #tpu.memory_space<vmem>>, vector<1x16x128xbf16>
    %554 = vector.shape_cast %553 : vector<1x16x128xbf16> to vector<16x128xbf16>
    %555 = vector.shape_cast %551 : vector<16x128xbf16> to vector<1x16x128xbf16>
    tpu.vector_store %arg5[%552, %c0_178, %c0_179], %555 {strides = array<i32>} : memref<12x16x128xbf16, #tpu.memory_space<vmem>>, vector<1x16x128xbf16>,
    %c2_i32_180 = arith.constant 2 : i32
    %c16_i32_181 = arith.constant 16 : i32
    %556 = arith.muli %c2_i32_180, %c16_i32_181 : i32
    %557 = tpu.assume_multiple %556, 16 : i32
    %558 = arith.index_cast %557 : i32 to index
    %c0_182 = arith.constant 0 : index
    %559 = vector.load %arg6[%558, %c0_182] : memref<192x512xf32, #tpu.memory_space<vmem>>, vector<16x512xf32>
    %c1_183 = arith.constant 1 : index
    %c0_184 = arith.constant 0 : index
    %c0_185 = arith.constant 0 : index
    %560 = vector.load %arg3[%c1_183, %c0_184, %c0_185] : memref<2x128x512xbf16, #tpu.memory_space<vmem>>, vector<1x128x512xbf16>
    %561 = vector.shape_cast %560 : vector<1x128x512xbf16> to vector<128x512xbf16>
    %cst_186 = arith.constant dense<0.000000e+00> : vector<16x512xf32>
    %562 = tpu.matmul %551, %561, %cst_186 {dimension_numbers = #tpu.dot_dimension_numbers<[1], [0], [0], [1], [0, 0, 1, 1], [], []>} : vector<16x128xbf16>, vector<128x512xbf16>, vector<16x512xf32> -> vector<16x512xf32>
    %563 = arith.addf %559, %562 : vector<16x512xf32>
    %564 = vector.extract_strided_slice %563 {offsets = [0, 0], sizes = [16, 128], strides = [1, 1]} : vector<16x512xf32> to vector<16x128xf32>
    %565 = arith.negf %564 : vector<16x128xf32>
    %566 = math.exp %565 : vector<16x128xf32>
    %cst_187 = arith.constant 1.000000e+00 : f32
    %567 = vector.broadcast %cst_187 : f32 to vector<16x128xf32>
    %568 = arith.addf %567, %566 : vector<16x128xf32>
    %569 = arith.divf %567, %568 : vector<16x128xf32>
    %570 = vector.extract_strided_slice %563 {offsets = [0, 128], sizes = [16, 128], strides = [1, 1]} : vector<16x512xf32> to vector<16x128xf32>
    %571 = arith.negf %570 : vector<16x128xf32>
    %572 = math.exp %571 : vector<16x128xf32>
    %cst_188 = arith.constant 1.000000e+00 : f32
    %573 = vector.broadcast %cst_188 : f32 to vector<16x128xf32>
    %574 = arith.addf %573, %572 : vector<16x128xf32>
    %575 = arith.divf %573, %574 : vector<16x128xf32>
    %576 = vector.extract_strided_slice %563 {offsets = [0, 256], sizes = [16, 128], strides = [1, 1]} : vector<16x512xf32> to vector<16x128xf32>
    %577 = math.tanh %576 : vector<16x128xf32>
    %578 = vector.extract_strided_slice %563 {offsets = [0, 384], sizes = [16, 128], strides = [1, 1]} : vector<16x512xf32> to vector<16x128xf32>
    %579 = arith.negf %578 : vector<16x128xf32>
    %580 = math.exp %579 : vector<16x128xf32>
    %cst_189 = arith.constant 1.000000e+00 : f32
    %581 = vector.broadcast %cst_189 : f32 to vector<16x128xf32>
    %582 = arith.addf %581, %580 : vector<16x128xf32>
    %583 = arith.divf %581, %582 : vector<16x128xf32>
    %584 = arith.mulf %575, %548 : vector<16x128xf32>
    %585 = arith.mulf %569, %577 : vector<16x128xf32>
    %586 = arith.addf %584, %585 : vector<16x128xf32>
    %587 = math.tanh %586 : vector<16x128xf32>
    %588 = arith.mulf %583, %587 : vector<16x128xf32>
    %589 = arith.truncf %588 : vector<16x128xf32> to vector<16x128xbf16>
    %590 = arith.index_cast %c2_i32_180 : i32 to index
    %c0_190 = arith.constant 0 : index
    %c0_191 = arith.constant 0 : index
    %591 = vector.load %arg5[%590, %c0_190, %c0_191] : memref<12x16x128xbf16, #tpu.memory_space<vmem>>, vector<1x16x128xbf16>
    %592 = vector.shape_cast %591 : vector<1x16x128xbf16> to vector<16x128xbf16>
    %593 = vector.shape_cast %589 : vector<16x128xbf16> to vector<1x16x128xbf16>
    tpu.vector_store %arg5[%590, %c0_190, %c0_191], %593 {strides = array<i32>} : memref<12x16x128xbf16, #tpu.memory_space<vmem>>, vector<1x16x128xbf16>,
    %c3_i32_192 = arith.constant 3 : i32
    %c16_i32_193 = arith.constant 16 : i32
    %594 = arith.muli %c3_i32_192, %c16_i32_193 : i32
    %595 = tpu.assume_multiple %594, 16 : i32
    %596 = arith.index_cast %595 : i32 to index
    %c0_194 = arith.constant 0 : index
    %597 = vector.load %arg6[%596, %c0_194] : memref<192x512xf32, #tpu.memory_space<vmem>>, vector<16x512xf32>
    %c1_195 = arith.constant 1 : index
    %c0_196 = arith.constant 0 : index
    %c0_197 = arith.constant 0 : index
    %598 = vector.load %arg3[%c1_195, %c0_196, %c0_197] : memref<2x128x512xbf16, #tpu.memory_space<vmem>>, vector<1x128x512xbf16>
    %599 = vector.shape_cast %598 : vector<1x128x512xbf16> to vector<128x512xbf16>
    %cst_198 = arith.constant dense<0.000000e+00> : vector<16x512xf32>
    %600 = tpu.matmul %589, %599, %cst_198 {dimension_numbers = #tpu.dot_dimension_numbers<[1], [0], [0], [1], [0, 0, 1, 1], [], []>} : vector<16x128xbf16>, vector<128x512xbf16>, vector<16x512xf32> -> vector<16x512xf32>
    %601 = arith.addf %597, %600 : vector<16x512xf32>
    %602 = vector.extract_strided_slice %601 {offsets = [0, 0], sizes = [16, 128], strides = [1, 1]} : vector<16x512xf32> to vector<16x128xf32>
    %603 = arith.negf %602 : vector<16x128xf32>
    %604 = math.exp %603 : vector<16x128xf32>
    %cst_199 = arith.constant 1.000000e+00 : f32
    %605 = vector.broadcast %cst_199 : f32 to vector<16x128xf32>
    %606 = arith.addf %605, %604 : vector<16x128xf32>
    %607 = arith.divf %605, %606 : vector<16x128xf32>
    %608 = vector.extract_strided_slice %601 {offsets = [0, 128], sizes = [16, 128], strides = [1, 1]} : vector<16x512xf32> to vector<16x128xf32>
    %609 = arith.negf %608 : vector<16x128xf32>
    %610 = math.exp %609 : vector<16x128xf32>
    %cst_200 = arith.constant 1.000000e+00 : f32
    %611 = vector.broadcast %cst_200 : f32 to vector<16x128xf32>
    %612 = arith.addf %611, %610 : vector<16x128xf32>
    %613 = arith.divf %611, %612 : vector<16x128xf32>
    %614 = vector.extract_strided_slice %601 {offsets = [0, 256], sizes = [16, 128], strides = [1, 1]} : vector<16x512xf32> to vector<16x128xf32>
    %615 = math.tanh %614 : vector<16x128xf32>
    %616 = vector.extract_strided_slice %601 {offsets = [0, 384], sizes = [16, 128], strides = [1, 1]} : vector<16x512xf32> to vector<16x128xf32>
    %617 = arith.negf %616 : vector<16x128xf32>
    %618 = math.exp %617 : vector<16x128xf32>
    %cst_201 = arith.constant 1.000000e+00 : f32
    %619 = vector.broadcast %cst_201 : f32 to vector<16x128xf32>
    %620 = arith.addf %619, %618 : vector<16x128xf32>
    %621 = arith.divf %619, %620 : vector<16x128xf32>
    %622 = arith.mulf %613, %586 : vector<16x128xf32>
    %623 = arith.mulf %607, %615 : vector<16x128xf32>
    %624 = arith.addf %622, %623 : vector<16x128xf32>
    %625 = math.tanh %624 : vector<16x128xf32>
    %626 = arith.mulf %621, %625 : vector<16x128xf32>
    %627 = arith.truncf %626 : vector<16x128xf32> to vector<16x128xbf16>
    %628 = arith.index_cast %c3_i32_192 : i32 to index
    %c0_202 = arith.constant 0 : index
    %c0_203 = arith.constant 0 : index
    %629 = vector.load %arg5[%628, %c0_202, %c0_203] : memref<12x16x128xbf16, #tpu.memory_space<vmem>>, vector<1x16x128xbf16>
    %630 = vector.shape_cast %629 : vector<1x16x128xbf16> to vector<16x128xbf16>
    %631 = vector.shape_cast %627 : vector<16x128xbf16> to vector<1x16x128xbf16>
    tpu.vector_store %arg5[%628, %c0_202, %c0_203], %631 {strides = array<i32>} : memref<12x16x128xbf16, #tpu.memory_space<vmem>>, vector<1x16x128xbf16>,
    %c4_i32_204 = arith.constant 4 : i32
    %c16_i32_205 = arith.constant 16 : i32
    %632 = arith.muli %c4_i32_204, %c16_i32_205 : i32
    %633 = tpu.assume_multiple %632, 16 : i32
    %634 = arith.index_cast %633 : i32 to index
    %c0_206 = arith.constant 0 : index
    %635 = vector.load %arg6[%634, %c0_206] : memref<192x512xf32, #tpu.memory_space<vmem>>, vector<16x512xf32>
    %c1_207 = arith.constant 1 : index
    %c0_208 = arith.constant 0 : index
    %c0_209 = arith.constant 0 : index
    %636 = vector.load %arg3[%c1_207, %c0_208, %c0_209] : memref<2x128x512xbf16, #tpu.memory_space<vmem>>, vector<1x128x512xbf16>
    %637 = vector.shape_cast %636 : vector<1x128x512xbf16> to vector<128x512xbf16>
    %cst_210 = arith.constant dense<0.000000e+00> : vector<16x512xf32>
    %638 = tpu.matmul %627, %637, %cst_210 {dimension_numbers = #tpu.dot_dimension_numbers<[1], [0], [0], [1], [0, 0, 1, 1], [], []>} : vector<16x128xbf16>, vector<128x512xbf16>, vector<16x512xf32> -> vector<16x512xf32>
    %639 = arith.addf %635, %638 : vector<16x512xf32>
    %640 = vector.extract_strided_slice %639 {offsets = [0, 0], sizes = [16, 128], strides = [1, 1]} : vector<16x512xf32> to vector<16x128xf32>
    %641 = arith.negf %640 : vector<16x128xf32>
    %642 = math.exp %641 : vector<16x128xf32>
    %cst_211 = arith.constant 1.000000e+00 : f32
    %643 = vector.broadcast %cst_211 : f32 to vector<16x128xf32>
    %644 = arith.addf %643, %642 : vector<16x128xf32>
    %645 = arith.divf %643, %644 : vector<16x128xf32>
    %646 = vector.extract_strided_slice %639 {offsets = [0, 128], sizes = [16, 128], strides = [1, 1]} : vector<16x512xf32> to vector<16x128xf32>
    %647 = arith.negf %646 : vector<16x128xf32>
    %648 = math.exp %647 : vector<16x128xf32>
    %cst_212 = arith.constant 1.000000e+00 : f32
    %649 = vector.broadcast %cst_212 : f32 to vector<16x128xf32>
    %650 = arith.addf %649, %648 : vector<16x128xf32>
    %651 = arith.divf %649, %650 : vector<16x128xf32>
    %652 = vector.extract_strided_slice %639 {offsets = [0, 256], sizes = [16, 128], strides = [1, 1]} : vector<16x512xf32> to vector<16x128xf32>
    %653 = math.tanh %652 : vector<16x128xf32>
    %654 = vector.extract_strided_slice %639 {offsets = [0, 384], sizes = [16, 128], strides = [1, 1]} : vector<16x512xf32> to vector<16x128xf32>
    %655 = arith.negf %654 : vector<16x128xf32>
    %656 = math.exp %655 : vector<16x128xf32>
    %cst_213 = arith.constant 1.000000e+00 : f32
    %657 = vector.broadcast %cst_213 : f32 to vector<16x128xf32>
    %658 = arith.addf %657, %656 : vector<16x128xf32>
    %659 = arith.divf %657, %658 : vector<16x128xf32>
    %660 = arith.mulf %651, %624 : vector<16x128xf32>
    %661 = arith.mulf %645, %653 : vector<16x128xf32>
    %662 = arith.addf %660, %661 : vector<16x128xf32>
    %663 = math.tanh %662 : vector<16x128xf32>
    %664 = arith.mulf %659, %663 : vector<16x128xf32>
    %665 = arith.truncf %664 : vector<16x128xf32> to vector<16x128xbf16>
    %666 = arith.index_cast %c4_i32_204 : i32 to index
    %c0_214 = arith.constant 0 : index
    %c0_215 = arith.constant 0 : index
    %667 = vector.load %arg5[%666, %c0_214, %c0_215] : memref<12x16x128xbf16, #tpu.memory_space<vmem>>, vector<1x16x128xbf16>
    %668 = vector.shape_cast %667 : vector<1x16x128xbf16> to vector<16x128xbf16>
    %669 = vector.shape_cast %665 : vector<16x128xbf16> to vector<1x16x128xbf16>
    tpu.vector_store %arg5[%666, %c0_214, %c0_215], %669 {strides = array<i32>} : memref<12x16x128xbf16, #tpu.memory_space<vmem>>, vector<1x16x128xbf16>,
    %c5_i32_216 = arith.constant 5 : i32
    %c16_i32_217 = arith.constant 16 : i32
    %670 = arith.muli %c5_i32_216, %c16_i32_217 : i32
    %671 = tpu.assume_multiple %670, 16 : i32
    %672 = arith.index_cast %671 : i32 to index
    %c0_218 = arith.constant 0 : index
    %673 = vector.load %arg6[%672, %c0_218] : memref<192x512xf32, #tpu.memory_space<vmem>>, vector<16x512xf32>
    %c1_219 = arith.constant 1 : index
    %c0_220 = arith.constant 0 : index
    %c0_221 = arith.constant 0 : index
    %674 = vector.load %arg3[%c1_219, %c0_220, %c0_221] : memref<2x128x512xbf16, #tpu.memory_space<vmem>>, vector<1x128x512xbf16>
    %675 = vector.shape_cast %674 : vector<1x128x512xbf16> to vector<128x512xbf16>
    %cst_222 = arith.constant dense<0.000000e+00> : vector<16x512xf32>
    %676 = tpu.matmul %665, %675, %cst_222 {dimension_numbers = #tpu.dot_dimension_numbers<[1], [0], [0], [1], [0, 0, 1, 1], [], []>} : vector<16x128xbf16>, vector<128x512xbf16>, vector<16x512xf32> -> vector<16x512xf32>
    %677 = arith.addf %673, %676 : vector<16x512xf32>
    %678 = vector.extract_strided_slice %677 {offsets = [0, 0], sizes = [16, 128], strides = [1, 1]} : vector<16x512xf32> to vector<16x128xf32>
    %679 = arith.negf %678 : vector<16x128xf32>
    %680 = math.exp %679 : vector<16x128xf32>
    %cst_223 = arith.constant 1.000000e+00 : f32
    %681 = vector.broadcast %cst_223 : f32 to vector<16x128xf32>
    %682 = arith.addf %681, %680 : vector<16x128xf32>
    %683 = arith.divf %681, %682 : vector<16x128xf32>
    %684 = vector.extract_strided_slice %677 {offsets = [0, 128], sizes = [16, 128], strides = [1, 1]} : vector<16x512xf32> to vector<16x128xf32>
    %685 = arith.negf %684 : vector<16x128xf32>
    %686 = math.exp %685 : vector<16x128xf32>
    %cst_224 = arith.constant 1.000000e+00 : f32
    %687 = vector.broadcast %cst_224 : f32 to vector<16x128xf32>
    %688 = arith.addf %687, %686 : vector<16x128xf32>
    %689 = arith.divf %687, %688 : vector<16x128xf32>
    %690 = vector.extract_strided_slice %677 {offsets = [0, 256], sizes = [16, 128], strides = [1, 1]} : vector<16x512xf32> to vector<16x128xf32>
    %691 = math.tanh %690 : vector<16x128xf32>
    %692 = vector.extract_strided_slice %677 {offsets = [0, 384], sizes = [16, 128], strides = [1, 1]} : vector<16x512xf32> to vector<16x128xf32>
    %693 = arith.negf %692 : vector<16x128xf32>
    %694 = math.exp %693 : vector<16x128xf32>
    %cst_225 = arith.constant 1.000000e+00 : f32
    %695 = vector.broadcast %cst_225 : f32 to vector<16x128xf32>
    %696 = arith.addf %695, %694 : vector<16x128xf32>
    %697 = arith.divf %695, %696 : vector<16x128xf32>
    %698 = arith.mulf %689, %662 : vector<16x128xf32>
    %699 = arith.mulf %683, %691 : vector<16x128xf32>
    %700 = arith.addf %698, %699 : vector<16x128xf32>
    %701 = math.tanh %700 : vector<16x128xf32>
    %702 = arith.mulf %697, %701 : vector<16x128xf32>
    %703 = arith.truncf %702 : vector<16x128xf32> to vector<16x128xbf16>
    %704 = arith.index_cast %c5_i32_216 : i32 to index
    %c0_226 = arith.constant 0 : index
    %c0_227 = arith.constant 0 : index
    %705 = vector.load %arg5[%704, %c0_226, %c0_227] : memref<12x16x128xbf16, #tpu.memory_space<vmem>>, vector<1x16x128xbf16>
    %706 = vector.shape_cast %705 : vector<1x16x128xbf16> to vector<16x128xbf16>
    %707 = vector.shape_cast %703 : vector<16x128xbf16> to vector<1x16x128xbf16>
    tpu.vector_store %arg5[%704, %c0_226, %c0_227], %707 {strides = array<i32>} : memref<12x16x128xbf16, #tpu.memory_space<vmem>>, vector<1x16x128xbf16>,
    %c6_i32_228 = arith.constant 6 : i32
    %c16_i32_229 = arith.constant 16 : i32
    %708 = arith.muli %c6_i32_228, %c16_i32_229 : i32
    %709 = tpu.assume_multiple %708, 16 : i32
    %710 = arith.index_cast %709 : i32 to index
    %c0_230 = arith.constant 0 : index
    %711 = vector.load %arg6[%710, %c0_230] : memref<192x512xf32, #tpu.memory_space<vmem>>, vector<16x512xf32>
    %c1_231 = arith.constant 1 : index
    %c0_232 = arith.constant 0 : index
    %c0_233 = arith.constant 0 : index
    %712 = vector.load %arg3[%c1_231, %c0_232, %c0_233] : memref<2x128x512xbf16, #tpu.memory_space<vmem>>, vector<1x128x512xbf16>
    %713 = vector.shape_cast %712 : vector<1x128x512xbf16> to vector<128x512xbf16>
    %cst_234 = arith.constant dense<0.000000e+00> : vector<16x512xf32>
    %714 = tpu.matmul %703, %713, %cst_234 {dimension_numbers = #tpu.dot_dimension_numbers<[1], [0], [0], [1], [0, 0, 1, 1], [], []>} : vector<16x128xbf16>, vector<128x512xbf16>, vector<16x512xf32> -> vector<16x512xf32>
    %715 = arith.addf %711, %714 : vector<16x512xf32>
    %716 = vector.extract_strided_slice %715 {offsets = [0, 0], sizes = [16, 128], strides = [1, 1]} : vector<16x512xf32> to vector<16x128xf32>
    %717 = arith.negf %716 : vector<16x128xf32>
    %718 = math.exp %717 : vector<16x128xf32>
    %cst_235 = arith.constant 1.000000e+00 : f32
    %719 = vector.broadcast %cst_235 : f32 to vector<16x128xf32>
    %720 = arith.addf %719, %718 : vector<16x128xf32>
    %721 = arith.divf %719, %720 : vector<16x128xf32>
    %722 = vector.extract_strided_slice %715 {offsets = [0, 128], sizes = [16, 128], strides = [1, 1]} : vector<16x512xf32> to vector<16x128xf32>
    %723 = arith.negf %722 : vector<16x128xf32>
    %724 = math.exp %723 : vector<16x128xf32>
    %cst_236 = arith.constant 1.000000e+00 : f32
    %725 = vector.broadcast %cst_236 : f32 to vector<16x128xf32>
    %726 = arith.addf %725, %724 : vector<16x128xf32>
    %727 = arith.divf %725, %726 : vector<16x128xf32>
    %728 = vector.extract_strided_slice %715 {offsets = [0, 256], sizes = [16, 128], strides = [1, 1]} : vector<16x512xf32> to vector<16x128xf32>
    %729 = math.tanh %728 : vector<16x128xf32>
    %730 = vector.extract_strided_slice %715 {offsets = [0, 384], sizes = [16, 128], strides = [1, 1]} : vector<16x512xf32> to vector<16x128xf32>
    %731 = arith.negf %730 : vector<16x128xf32>
    %732 = math.exp %731 : vector<16x128xf32>
    %cst_237 = arith.constant 1.000000e+00 : f32
    %733 = vector.broadcast %cst_237 : f32 to vector<16x128xf32>
    %734 = arith.addf %733, %732 : vector<16x128xf32>
    %735 = arith.divf %733, %734 : vector<16x128xf32>
    %736 = arith.mulf %727, %700 : vector<16x128xf32>
    %737 = arith.mulf %721, %729 : vector<16x128xf32>
    %738 = arith.addf %736, %737 : vector<16x128xf32>
    %739 = math.tanh %738 : vector<16x128xf32>
    %740 = arith.mulf %735, %739 : vector<16x128xf32>
    %741 = arith.truncf %740 : vector<16x128xf32> to vector<16x128xbf16>
    %742 = arith.index_cast %c6_i32_228 : i32 to index
    %c0_238 = arith.constant 0 : index
    %c0_239 = arith.constant 0 : index
    %743 = vector.load %arg5[%742, %c0_238, %c0_239] : memref<12x16x128xbf16, #tpu.memory_space<vmem>>, vector<1x16x128xbf16>
    %744 = vector.shape_cast %743 : vector<1x16x128xbf16> to vector<16x128xbf16>
    %745 = vector.shape_cast %741 : vector<16x128xbf16> to vector<1x16x128xbf16>
    tpu.vector_store %arg5[%742, %c0_238, %c0_239], %745 {strides = array<i32>} : memref<12x16x128xbf16, #tpu.memory_space<vmem>>, vector<1x16x128xbf16>,
    %c7_i32_240 = arith.constant 7 : i32
    %c16_i32_241 = arith.constant 16 : i32
    %746 = arith.muli %c7_i32_240, %c16_i32_241 : i32
    %747 = tpu.assume_multiple %746, 16 : i32
    %748 = arith.index_cast %747 : i32 to index
    %c0_242 = arith.constant 0 : index
    %749 = vector.load %arg6[%748, %c0_242] : memref<192x512xf32, #tpu.memory_space<vmem>>, vector<16x512xf32>
    %c1_243 = arith.constant 1 : index
    %c0_244 = arith.constant 0 : index
    %c0_245 = arith.constant 0 : index
    %750 = vector.load %arg3[%c1_243, %c0_244, %c0_245] : memref<2x128x512xbf16, #tpu.memory_space<vmem>>, vector<1x128x512xbf16>
    %751 = vector.shape_cast %750 : vector<1x128x512xbf16> to vector<128x512xbf16>
    %cst_246 = arith.constant dense<0.000000e+00> : vector<16x512xf32>
    %752 = tpu.matmul %741, %751, %cst_246 {dimension_numbers = #tpu.dot_dimension_numbers<[1], [0], [0], [1], [0, 0, 1, 1], [], []>} : vector<16x128xbf16>, vector<128x512xbf16>, vector<16x512xf32> -> vector<16x512xf32>
    %753 = arith.addf %749, %752 : vector<16x512xf32>
    %754 = vector.extract_strided_slice %753 {offsets = [0, 0], sizes = [16, 128], strides = [1, 1]} : vector<16x512xf32> to vector<16x128xf32>
    %755 = arith.negf %754 : vector<16x128xf32>
    %756 = math.exp %755 : vector<16x128xf32>
    %cst_247 = arith.constant 1.000000e+00 : f32
    %757 = vector.broadcast %cst_247 : f32 to vector<16x128xf32>
    %758 = arith.addf %757, %756 : vector<16x128xf32>
    %759 = arith.divf %757, %758 : vector<16x128xf32>
    %760 = vector.extract_strided_slice %753 {offsets = [0, 128], sizes = [16, 128], strides = [1, 1]} : vector<16x512xf32> to vector<16x128xf32>
    %761 = arith.negf %760 : vector<16x128xf32>
    %762 = math.exp %761 : vector<16x128xf32>
    %cst_248 = arith.constant 1.000000e+00 : f32
    %763 = vector.broadcast %cst_248 : f32 to vector<16x128xf32>
    %764 = arith.addf %763, %762 : vector<16x128xf32>
    %765 = arith.divf %763, %764 : vector<16x128xf32>
    %766 = vector.extract_strided_slice %753 {offsets = [0, 256], sizes = [16, 128], strides = [1, 1]} : vector<16x512xf32> to vector<16x128xf32>
    %767 = math.tanh %766 : vector<16x128xf32>
    %768 = vector.extract_strided_slice %753 {offsets = [0, 384], sizes = [16, 128], strides = [1, 1]} : vector<16x512xf32> to vector<16x128xf32>
    %769 = arith.negf %768 : vector<16x128xf32>
    %770 = math.exp %769 : vector<16x128xf32>
    %cst_249 = arith.constant 1.000000e+00 : f32
    %771 = vector.broadcast %cst_249 : f32 to vector<16x128xf32>
    %772 = arith.addf %771, %770 : vector<16x128xf32>
    %773 = arith.divf %771, %772 : vector<16x128xf32>
    %774 = arith.mulf %765, %738 : vector<16x128xf32>
    %775 = arith.mulf %759, %767 : vector<16x128xf32>
    %776 = arith.addf %774, %775 : vector<16x128xf32>
    %777 = math.tanh %776 : vector<16x128xf32>
    %778 = arith.mulf %773, %777 : vector<16x128xf32>
    %779 = arith.truncf %778 : vector<16x128xf32> to vector<16x128xbf16>
    %780 = arith.index_cast %c7_i32_240 : i32 to index
    %c0_250 = arith.constant 0 : index
    %c0_251 = arith.constant 0 : index
    %781 = vector.load %arg5[%780, %c0_250, %c0_251] : memref<12x16x128xbf16, #tpu.memory_space<vmem>>, vector<1x16x128xbf16>
    %782 = vector.shape_cast %781 : vector<1x16x128xbf16> to vector<16x128xbf16>
    %783 = vector.shape_cast %779 : vector<16x128xbf16> to vector<1x16x128xbf16>
    tpu.vector_store %arg5[%780, %c0_250, %c0_251], %783 {strides = array<i32>} : memref<12x16x128xbf16, #tpu.memory_space<vmem>>, vector<1x16x128xbf16>,
    %c8_i32_252 = arith.constant 8 : i32
    %c16_i32_253 = arith.constant 16 : i32
    %784 = arith.muli %c8_i32_252, %c16_i32_253 : i32
    %785 = tpu.assume_multiple %784, 16 : i32
    %786 = arith.index_cast %785 : i32 to index
    %c0_254 = arith.constant 0 : index
    %787 = vector.load %arg6[%786, %c0_254] : memref<192x512xf32, #tpu.memory_space<vmem>>, vector<16x512xf32>
    %c1_255 = arith.constant 1 : index
    %c0_256 = arith.constant 0 : index
    %c0_257 = arith.constant 0 : index
    %788 = vector.load %arg3[%c1_255, %c0_256, %c0_257] : memref<2x128x512xbf16, #tpu.memory_space<vmem>>, vector<1x128x512xbf16>
    %789 = vector.shape_cast %788 : vector<1x128x512xbf16> to vector<128x512xbf16>
    %cst_258 = arith.constant dense<0.000000e+00> : vector<16x512xf32>
    %790 = tpu.matmul %779, %789, %cst_258 {dimension_numbers = #tpu.dot_dimension_numbers<[1], [0], [0], [1], [0, 0, 1, 1], [], []>} : vector<16x128xbf16>, vector<128x512xbf16>, vector<16x512xf32> -> vector<16x512xf32>
    %791 = arith.addf %787, %790 : vector<16x512xf32>
    %792 = vector.extract_strided_slice %791 {offsets = [0, 0], sizes = [16, 128], strides = [1, 1]} : vector<16x512xf32> to vector<16x128xf32>
    %793 = arith.negf %792 : vector<16x128xf32>
    %794 = math.exp %793 : vector<16x128xf32>
    %cst_259 = arith.constant 1.000000e+00 : f32
    %795 = vector.broadcast %cst_259 : f32 to vector<16x128xf32>
    %796 = arith.addf %795, %794 : vector<16x128xf32>
    %797 = arith.divf %795, %796 : vector<16x128xf32>
    %798 = vector.extract_strided_slice %791 {offsets = [0, 128], sizes = [16, 128], strides = [1, 1]} : vector<16x512xf32> to vector<16x128xf32>
    %799 = arith.negf %798 : vector<16x128xf32>
    %800 = math.exp %799 : vector<16x128xf32>
    %cst_260 = arith.constant 1.000000e+00 : f32
    %801 = vector.broadcast %cst_260 : f32 to vector<16x128xf32>
    %802 = arith.addf %801, %800 : vector<16x128xf32>
    %803 = arith.divf %801, %802 : vector<16x128xf32>
    %804 = vector.extract_strided_slice %791 {offsets = [0, 256], sizes = [16, 128], strides = [1, 1]} : vector<16x512xf32> to vector<16x128xf32>
    %805 = math.tanh %804 : vector<16x128xf32>
    %806 = vector.extract_strided_slice %791 {offsets = [0, 384], sizes = [16, 128], strides = [1, 1]} : vector<16x512xf32> to vector<16x128xf32>
    %807 = arith.negf %806 : vector<16x128xf32>
    %808 = math.exp %807 : vector<16x128xf32>
    %cst_261 = arith.constant 1.000000e+00 : f32
    %809 = vector.broadcast %cst_261 : f32 to vector<16x128xf32>
    %810 = arith.addf %809, %808 : vector<16x128xf32>
    %811 = arith.divf %809, %810 : vector<16x128xf32>
    %812 = arith.mulf %803, %776 : vector<16x128xf32>
    %813 = arith.mulf %797, %805 : vector<16x128xf32>
    %814 = arith.addf %812, %813 : vector<16x128xf32>
    %815 = math.tanh %814 : vector<16x128xf32>
    %816 = arith.mulf %811, %815 : vector<16x128xf32>
    %817 = arith.truncf %816 : vector<16x128xf32> to vector<16x128xbf16>
    %818 = arith.index_cast %c8_i32_252 : i32 to index
    %c0_262 = arith.constant 0 : index
    %c0_263 = arith.constant 0 : index
    %819 = vector.load %arg5[%818, %c0_262, %c0_263] : memref<12x16x128xbf16, #tpu.memory_space<vmem>>, vector<1x16x128xbf16>
    %820 = vector.shape_cast %819 : vector<1x16x128xbf16> to vector<16x128xbf16>
    %821 = vector.shape_cast %817 : vector<16x128xbf16> to vector<1x16x128xbf16>
    tpu.vector_store %arg5[%818, %c0_262, %c0_263], %821 {strides = array<i32>} : memref<12x16x128xbf16, #tpu.memory_space<vmem>>, vector<1x16x128xbf16>,
    %c9_i32_264 = arith.constant 9 : i32
    %c16_i32_265 = arith.constant 16 : i32
    %822 = arith.muli %c9_i32_264, %c16_i32_265 : i32
    %823 = tpu.assume_multiple %822, 16 : i32
    %824 = arith.index_cast %823 : i32 to index
    %c0_266 = arith.constant 0 : index
    %825 = vector.load %arg6[%824, %c0_266] : memref<192x512xf32, #tpu.memory_space<vmem>>, vector<16x512xf32>
    %c1_267 = arith.constant 1 : index
    %c0_268 = arith.constant 0 : index
    %c0_269 = arith.constant 0 : index
    %826 = vector.load %arg3[%c1_267, %c0_268, %c0_269] : memref<2x128x512xbf16, #tpu.memory_space<vmem>>, vector<1x128x512xbf16>
    %827 = vector.shape_cast %826 : vector<1x128x512xbf16> to vector<128x512xbf16>
    %cst_270 = arith.constant dense<0.000000e+00> : vector<16x512xf32>
    %828 = tpu.matmul %817, %827, %cst_270 {dimension_numbers = #tpu.dot_dimension_numbers<[1], [0], [0], [1], [0, 0, 1, 1], [], []>} : vector<16x128xbf16>, vector<128x512xbf16>, vector<16x512xf32> -> vector<16x512xf32>
    %829 = arith.addf %825, %828 : vector<16x512xf32>
    %830 = vector.extract_strided_slice %829 {offsets = [0, 0], sizes = [16, 128], strides = [1, 1]} : vector<16x512xf32> to vector<16x128xf32>
    %831 = arith.negf %830 : vector<16x128xf32>
    %832 = math.exp %831 : vector<16x128xf32>
    %cst_271 = arith.constant 1.000000e+00 : f32
    %833 = vector.broadcast %cst_271 : f32 to vector<16x128xf32>
    %834 = arith.addf %833, %832 : vector<16x128xf32>
    %835 = arith.divf %833, %834 : vector<16x128xf32>
    %836 = vector.extract_strided_slice %829 {offsets = [0, 128], sizes = [16, 128], strides = [1, 1]} : vector<16x512xf32> to vector<16x128xf32>
    %837 = arith.negf %836 : vector<16x128xf32>
    %838 = math.exp %837 : vector<16x128xf32>
    %cst_272 = arith.constant 1.000000e+00 : f32
    %839 = vector.broadcast %cst_272 : f32 to vector<16x128xf32>
    %840 = arith.addf %839, %838 : vector<16x128xf32>
    %841 = arith.divf %839, %840 : vector<16x128xf32>
    %842 = vector.extract_strided_slice %829 {offsets = [0, 256], sizes = [16, 128], strides = [1, 1]} : vector<16x512xf32> to vector<16x128xf32>
    %843 = math.tanh %842 : vector<16x128xf32>
    %844 = vector.extract_strided_slice %829 {offsets = [0, 384], sizes = [16, 128], strides = [1, 1]} : vector<16x512xf32> to vector<16x128xf32>
    %845 = arith.negf %844 : vector<16x128xf32>
    %846 = math.exp %845 : vector<16x128xf32>
    %cst_273 = arith.constant 1.000000e+00 : f32
    %847 = vector.broadcast %cst_273 : f32 to vector<16x128xf32>
    %848 = arith.addf %847, %846 : vector<16x128xf32>
    %849 = arith.divf %847, %848 : vector<16x128xf32>
    %850 = arith.mulf %841, %814 : vector<16x128xf32>
    %851 = arith.mulf %835, %843 : vector<16x128xf32>
    %852 = arith.addf %850, %851 : vector<16x128xf32>
    %853 = math.tanh %852 : vector<16x128xf32>
    %854 = arith.mulf %849, %853 : vector<16x128xf32>
    %855 = arith.truncf %854 : vector<16x128xf32> to vector<16x128xbf16>
    %856 = arith.index_cast %c9_i32_264 : i32 to index
    %c0_274 = arith.constant 0 : index
    %c0_275 = arith.constant 0 : index
    %857 = vector.load %arg5[%856, %c0_274, %c0_275] : memref<12x16x128xbf16, #tpu.memory_space<vmem>>, vector<1x16x128xbf16>
    %858 = vector.shape_cast %857 : vector<1x16x128xbf16> to vector<16x128xbf16>
    %859 = vector.shape_cast %855 : vector<16x128xbf16> to vector<1x16x128xbf16>
    tpu.vector_store %arg5[%856, %c0_274, %c0_275], %859 {strides = array<i32>} : memref<12x16x128xbf16, #tpu.memory_space<vmem>>, vector<1x16x128xbf16>,
    %c10_i32_276 = arith.constant 10 : i32
    %c16_i32_277 = arith.constant 16 : i32
    %860 = arith.muli %c10_i32_276, %c16_i32_277 : i32
    %861 = tpu.assume_multiple %860, 16 : i32
    %862 = arith.index_cast %861 : i32 to index
    %c0_278 = arith.constant 0 : index
    %863 = vector.load %arg6[%862, %c0_278] : memref<192x512xf32, #tpu.memory_space<vmem>>, vector<16x512xf32>
    %c1_279 = arith.constant 1 : index
    %c0_280 = arith.constant 0 : index
    %c0_281 = arith.constant 0 : index
    %864 = vector.load %arg3[%c1_279, %c0_280, %c0_281] : memref<2x128x512xbf16, #tpu.memory_space<vmem>>, vector<1x128x512xbf16>
    %865 = vector.shape_cast %864 : vector<1x128x512xbf16> to vector<128x512xbf16>
    %cst_282 = arith.constant dense<0.000000e+00> : vector<16x512xf32>
    %866 = tpu.matmul %855, %865, %cst_282 {dimension_numbers = #tpu.dot_dimension_numbers<[1], [0], [0], [1], [0, 0, 1, 1], [], []>} : vector<16x128xbf16>, vector<128x512xbf16>, vector<16x512xf32> -> vector<16x512xf32>
    %867 = arith.addf %863, %866 : vector<16x512xf32>
    %868 = vector.extract_strided_slice %867 {offsets = [0, 0], sizes = [16, 128], strides = [1, 1]} : vector<16x512xf32> to vector<16x128xf32>
    %869 = arith.negf %868 : vector<16x128xf32>
    %870 = math.exp %869 : vector<16x128xf32>
    %cst_283 = arith.constant 1.000000e+00 : f32
    %871 = vector.broadcast %cst_283 : f32 to vector<16x128xf32>
    %872 = arith.addf %871, %870 : vector<16x128xf32>
    %873 = arith.divf %871, %872 : vector<16x128xf32>
    %874 = vector.extract_strided_slice %867 {offsets = [0, 128], sizes = [16, 128], strides = [1, 1]} : vector<16x512xf32> to vector<16x128xf32>
    %875 = arith.negf %874 : vector<16x128xf32>
    %876 = math.exp %875 : vector<16x128xf32>
    %cst_284 = arith.constant 1.000000e+00 : f32
    %877 = vector.broadcast %cst_284 : f32 to vector<16x128xf32>
    %878 = arith.addf %877, %876 : vector<16x128xf32>
    %879 = arith.divf %877, %878 : vector<16x128xf32>
    %880 = vector.extract_strided_slice %867 {offsets = [0, 256], sizes = [16, 128], strides = [1, 1]} : vector<16x512xf32> to vector<16x128xf32>
    %881 = math.tanh %880 : vector<16x128xf32>
    %882 = vector.extract_strided_slice %867 {offsets = [0, 384], sizes = [16, 128], strides = [1, 1]} : vector<16x512xf32> to vector<16x128xf32>
    %883 = arith.negf %882 : vector<16x128xf32>
    %884 = math.exp %883 : vector<16x128xf32>
    %cst_285 = arith.constant 1.000000e+00 : f32
    %885 = vector.broadcast %cst_285 : f32 to vector<16x128xf32>
    %886 = arith.addf %885, %884 : vector<16x128xf32>
    %887 = arith.divf %885, %886 : vector<16x128xf32>
    %888 = arith.mulf %879, %852 : vector<16x128xf32>
    %889 = arith.mulf %873, %881 : vector<16x128xf32>
    %890 = arith.addf %888, %889 : vector<16x128xf32>
    %891 = math.tanh %890 : vector<16x128xf32>
    %892 = arith.mulf %887, %891 : vector<16x128xf32>
    %893 = arith.truncf %892 : vector<16x128xf32> to vector<16x128xbf16>
    %894 = arith.index_cast %c10_i32_276 : i32 to index
    %c0_286 = arith.constant 0 : index
    %c0_287 = arith.constant 0 : index
    %895 = vector.load %arg5[%894, %c0_286, %c0_287] : memref<12x16x128xbf16, #tpu.memory_space<vmem>>, vector<1x16x128xbf16>
    %896 = vector.shape_cast %895 : vector<1x16x128xbf16> to vector<16x128xbf16>
    %897 = vector.shape_cast %893 : vector<16x128xbf16> to vector<1x16x128xbf16>
    tpu.vector_store %arg5[%894, %c0_286, %c0_287], %897 {strides = array<i32>} : memref<12x16x128xbf16, #tpu.memory_space<vmem>>, vector<1x16x128xbf16>,
    %c11_i32_288 = arith.constant 11 : i32
    %c16_i32_289 = arith.constant 16 : i32
    %898 = arith.muli %c11_i32_288, %c16_i32_289 : i32
    %899 = tpu.assume_multiple %898, 16 : i32
    %900 = arith.index_cast %899 : i32 to index
    %c0_290 = arith.constant 0 : index
    %901 = vector.load %arg6[%900, %c0_290] : memref<192x512xf32, #tpu.memory_space<vmem>>, vector<16x512xf32>
    %c1_291 = arith.constant 1 : index
    %c0_292 = arith.constant 0 : index
    %c0_293 = arith.constant 0 : index
    %902 = vector.load %arg3[%c1_291, %c0_292, %c0_293] : memref<2x128x512xbf16, #tpu.memory_space<vmem>>, vector<1x128x512xbf16>
    %903 = vector.shape_cast %902 : vector<1x128x512xbf16> to vector<128x512xbf16>
    %cst_294 = arith.constant dense<0.000000e+00> : vector<16x512xf32>
    %904 = tpu.matmul %893, %903, %cst_294 {dimension_numbers = #tpu.dot_dimension_numbers<[1], [0], [0], [1], [0, 0, 1, 1], [], []>} : vector<16x128xbf16>, vector<128x512xbf16>, vector<16x512xf32> -> vector<16x512xf32>
    %905 = arith.addf %901, %904 : vector<16x512xf32>
    %906 = vector.extract_strided_slice %905 {offsets = [0, 0], sizes = [16, 128], strides = [1, 1]} : vector<16x512xf32> to vector<16x128xf32>
    %907 = arith.negf %906 : vector<16x128xf32>
    %908 = math.exp %907 : vector<16x128xf32>
    %cst_295 = arith.constant 1.000000e+00 : f32
    %909 = vector.broadcast %cst_295 : f32 to vector<16x128xf32>
    %910 = arith.addf %909, %908 : vector<16x128xf32>
    %911 = arith.divf %909, %910 : vector<16x128xf32>
    %912 = vector.extract_strided_slice %905 {offsets = [0, 128], sizes = [16, 128], strides = [1, 1]} : vector<16x512xf32> to vector<16x128xf32>
    %913 = arith.negf %912 : vector<16x128xf32>
    %914 = math.exp %913 : vector<16x128xf32>
    %cst_296 = arith.constant 1.000000e+00 : f32
    %915 = vector.broadcast %cst_296 : f32 to vector<16x128xf32>
    %916 = arith.addf %915, %914 : vector<16x128xf32>
    %917 = arith.divf %915, %916 : vector<16x128xf32>
    %918 = vector.extract_strided_slice %905 {offsets = [0, 256], sizes = [16, 128], strides = [1, 1]} : vector<16x512xf32> to vector<16x128xf32>
    %919 = math.tanh %918 : vector<16x128xf32>
    %920 = vector.extract_strided_slice %905 {offsets = [0, 384], sizes = [16, 128], strides = [1, 1]} : vector<16x512xf32> to vector<16x128xf32>
    %921 = arith.negf %920 : vector<16x128xf32>
    %922 = math.exp %921 : vector<16x128xf32>
    %cst_297 = arith.constant 1.000000e+00 : f32
    %923 = vector.broadcast %cst_297 : f32 to vector<16x128xf32>
    %924 = arith.addf %923, %922 : vector<16x128xf32>
    %925 = arith.divf %923, %924 : vector<16x128xf32>
    %926 = arith.mulf %917, %890 : vector<16x128xf32>
    %927 = arith.mulf %911, %919 : vector<16x128xf32>
    %928 = arith.addf %926, %927 : vector<16x128xf32>
    %929 = math.tanh %928 : vector<16x128xf32>
    %930 = arith.mulf %925, %929 : vector<16x128xf32>
    %931 = arith.truncf %930 : vector<16x128xf32> to vector<16x128xbf16>
    %932 = arith.index_cast %c11_i32_288 : i32 to index
    %c0_298 = arith.constant 0 : index
    %c0_299 = arith.constant 0 : index
    %933 = vector.load %arg5[%932, %c0_298, %c0_299] : memref<12x16x128xbf16, #tpu.memory_space<vmem>>, vector<1x16x128xbf16>
    %934 = vector.shape_cast %933 : vector<1x16x128xbf16> to vector<16x128xbf16>
    %935 = vector.shape_cast %931 : vector<16x128xbf16> to vector<1x16x128xbf16>
    tpu.vector_store %arg5[%932, %c0_298, %c0_299], %935 {strides = array<i32>} : memref<12x16x128xbf16, #tpu.memory_space<vmem>>, vector<1x16x128xbf16>,
    %c12_i32_300 = arith.constant 12 : i32
    %c0_301 = arith.constant 0 : index
    %c0_302 = arith.constant 0 : index
    %c0_303 = arith.constant 0 : index
    %936 = vector.load %arg5[%c0_301, %c0_302, %c0_303] : memref<12x16x128xbf16, #tpu.memory_space<vmem>>, vector<12x16x128xbf16>
    %cst_304 = arith.constant 0.000000e+00 : bf16
    %937 = vector.broadcast %cst_304 : bf16 to vector<12x16x128xbf16>
    %938 = arith.maximumf %936, %937 : vector<12x16x128xbf16>
    %c0_305 = arith.constant 0 : index
    %c0_306 = arith.constant 0 : index
    %c0_307 = arith.constant 0 : index
    %939 = vector.load %arg5[%c0_305, %c0_306, %c0_307] : memref<12x16x128xbf16, #tpu.memory_space<vmem>>, vector<12x16x128xbf16>
    tpu.vector_store %arg5[%c0_305, %c0_306, %c0_307], %938 {strides = array<i32>} : memref<12x16x128xbf16, #tpu.memory_space<vmem>>, vector<12x16x128xbf16>,
    return
  }
  func.func @transform_0(%arg0: i32) -> (i32, i32, i32) {
    %c0_i32 = arith.constant 0 : i32
    %c0_i32_0 = arith.constant 0 : i32
    %c0_i32_1 = arith.constant 0 : i32
    return %c0_i32, %arg0, %c0_i32_0 : i32, i32, i32
  }
  func.func @transform_1(%arg0: i32) -> (i32, i32, i32) {
    %c0_i32 = arith.constant 0 : i32
    %c0_i32_0 = arith.constant 0 : i32
    %c0_i32_1 = arith.constant 0 : i32
    %c0_i32_2 = arith.constant 0 : i32
    return %c0_i32, %c0_i32_0, %c0_i32_1 : i32, i32, i32
  }
  func.func @transform_2(%arg0: i32) -> (i32, i32, i32) {
    %c0_i32 = arith.constant 0 : i32
    %c0_i32_0 = arith.constant 0 : i32
    %c0_i32_1 = arith.constant 0 : i32
    %c0_i32_2 = arith.constant 0 : i32
    return %c0_i32, %c0_i32_0, %c0_i32_1 : i32, i32, i32
  }
  func.func @transform_3(%arg0: i32) -> (i32, i32, i32) {
    %c0_i32 = arith.constant 0 : i32
    %c0_i32_0 = arith.constant 0 : i32
    %c0_i32_1 = arith.constant 0 : i32
    %c0_i32_2 = arith.constant 0 : i32
    return %c0_i32, %c0_i32_0, %c0_i32_1 : i32, i32, i32
  }
  func.func @transform_4(%arg0: i32) -> (i32, i32, i32) {
    %c0_i32 = arith.constant 0 : i32
    %c0_i32_0 = arith.constant 0 : i32
    %c0_i32_1 = arith.constant 0 : i32
    return %c0_i32, %arg0, %c0_i32_0 : i32, i32, i32
  }
}

</mosaic_0001>

<bundles_post_ra>
// kernel: tpu_custom_call.1
= control target key start
LH: loop header
LB: loop body
LE: loop exit
PB: predicated region body
PF: predicated region fallthrough
CT: control target
= control target key end

     0   :  { %9 = vsyncpa [#allocation4], 0  ;;  %s15582_s0 = inlined_call_operand.hbm [shape: bf16[12,32,128], index: 0, kind: input, shape index: {}]   ;;  %s15583_s1 = inlined_call_operand.hbm [shape: bf16[2,128,512], index: 1, kind: input, shape index: {}]   ;;  %s15584_s2 = inlined_call_operand.hbm [shape: bf16[2,128,512], index: 2, kind: input, shape index: {}]   ;;  %s15585_s3 = inlined_call_operand.vmem [shape: f32[2,1,512], index: 3, kind: input, shape index: {}]   ;;  %s15586_s4 = inlined_call_operand.hbm [shape: bf16[12,32,128], index: 4, kind: output, shape index: {}]  }
   0x1   :  { %11 = vsyncpa [#allocation4 + $0x1], 0 }
   0x2   :  { %12 = vsyncpa [#allocation7], 0 }
   0x3   :  { %13 = vsyncpa [#allocation5], 0 }
   0x4   :  { %15 = vsyncpa [#allocation5 + $0x1], 0  ;;  %s13646_s15 = smov 0   ;;  %s13648_s16 = smov 0  }
   0x5   :  { %s13650_s17 = smov 0   ;;  %s13652_s18 = smov 0  }
   0x6 LB: > { %s13667_s19 = sadd.s32 4294967295, %s13601_s18   ;;  %s10413_s20 = sadd.s32 4294967294, %s13601_s18   ;;  %s13601_s18 = sphi %s13652_s18, %s15608_s18   ;;  %s13597_s17 = sphi %s13650_s17, %s15607_s17   ;;  %s13593_s16 = sphi %s13648_s16, %s15606_s16   ;;  %s13589_s15 = sphi %s13646_s15, %s15605_s15  }
   0x7   : > { %s13671_s21 = sadd.s32 1, %s13601_s18   ;;  %s28_s22 = sadd.s32 1, %s13597_s17 }
   0x8   : > { %s25_s23 = ssub.s32 %s13601_s18, %s13671_s21  ;;  %p35_p0 = scmp.ne.s32.totalorder %s13597_s17, %s13593_s16 }
   0x9   : > { %p26_p1 = scmp.eq.s32.totalorder %s25_s23, 0  ;;  %p36_p2 = scmp.eq.s32.totalorder %s13601_s18, 0 }
   0xa   : > { %p41_p3 = scmp.ne.s32.totalorder %s13593_s16, %s13589_s15  ;;  %p15587_p4 = scmp.eq.s32.totalorder %s13667_s19, 0 }
   0xb   : > { %s13683_s24 = scalar_select %p26_p1, %s13597_s17, %s28_s22  }
   0xc   : > { %p13685_p5 = por %p36_p2, %p35_p0  ;;  %p13691_p6 = por %p15587_p4, %p41_p3 }
   0xd   : > { %p128_p7 = scmp.eq.s32.totalorder %s13667_s19, 1  ;;  %p134_p8 = scmp.eq.s32.totalorder %s10413_s20, 1 }
   0xe   : > { %s15592_s25 = scalar_select %p13685_p5, 1, 0 }
   0xf   : > { %s15593_s26 = scalar_select %p13691_p6, 1, 0 }
  0x10   : > { %p10414_p9 = scmp.ge.s32.totalorder %s13601_s18, 1  ;;  %p141_p10 = scmp.lt.s32.totalorder %s13601_s18, 3 }
  0x11   : > { %p13698_p11 = por %p128_p7, %p35_p0  ;;  %p13702_p12 = por %p134_p8, %p41_p3 }
  0x12   : > { %p13706_p13 = pnand %p10414_p9, %p141_p10  ;;  %s13603_s30 = smov [#allocation6]  }
  0x13   : > { %s15594_s27 = scalar_select %p13698_p11, 1, 0 }
  0x14   : > { %s15595_s28 = scalar_select %p13702_p12, 1, 0 }
  0x15   : > { %s15596_s29 = scalar_select %p13706_p13, 1, 0 }
  0x16   : > { %p12208_p1 = pneg %p13706_p13  ;;  %s153_s5 = sshll.u32 %s13603_s30, 4  ;;  %s154_s5 = int_to_ptr.vmem [resolvable:$true] %s153_s5 }
  0x17   : > { %s13604_s7 = smov [#allocation8]   ;;  %s13503_s11 = scalar_lea.hbm %s15583_s1, 8192 }
  0x18   : > { %p13714_p2 = pnand %p12208_p1, %p15587_p4  ;;  %s166_s8 = sshll.u32 %s13604_s7, 4  ;;  %s13718_s8 = int_to_ptr.vmem [resolvable:$true] %s166_s8 }
  0x19   : > { %p13504_p0 = scmp.ne.s32.totalorder %s15583_s1, %s13503_s11  ;;  %p13510_p9 = scmp.lt.u32.totalorder %s13503_s11, %s15583_s1 }
  0x1a   : > { %p13505_p3 = pneg %p13714_p2 }
  0x1c   : > { %p13506_p7 = pnand %p13505_p3, %p13504_p0 }
  0x1e   : > { %p13507_p8 = pneg %p13506_p7 }
  0x20   : > { %p13512_p10 = pnand %p13510_p9, %p13507_p8 }
  0x22   : > { %13515 = shalt.err (!%p13512_p10)
}
  0x23   : > { %s13516_s22 = scalar_lea.vmem %s154_s5, 8192  ;;  %p13524_p11 = scmp.lt.s32.totalorder %s154_s5, %s154_s5 }
  0x24   : > { %p13517_p1 = scmp.ne.s32.totalorder %s154_s5, %s13516_s22  ;;  %p13525_p6 = scmp.lt.s32.totalorder %s13516_s22, %s13516_s22 }
  0x26   : > { %p13519_p4 = pnand %p13517_p1, %p13505_p3  ;;  %p13526_p13 = por %p13525_p6, %p13524_p11 }
  0x28   : > { %p13520_p12 = pneg %p13519_p4 }
  0x2a   : > { %p13527_p5 = pnand %p13526_p13, %p13520_p12 }
  0x2c   : > { %13530 = shalt.err (!%p13527_p5)
}
  0x2d   : > { %s13605_s23 = smov 256   ;;  %s13606_s30 = smov 16  }
  0x2e   : > { %12211 = dma.hbm_to_vmem [thread:$0]  (!%p13714_p2), %s15583_s1, 8192, %s154_s5, [#allocation7], %s13605_s23, %s13605_s23, %s13606_s30  }
  0x2f   : > { %s13531_s12 = scalar_lea.hbm %s15584_s2, 8192 }
  0x30   : > { %p13532_p4 = scmp.ne.s32.totalorder %s15584_s2, %s13531_s12  ;;  %p13538_p11 = scmp.lt.u32.totalorder %s13531_s12, %s15584_s2 }
  0x32   : > { %p13534_p5 = pnand %p13532_p4, %p13505_p3 }
  0x34   : > { %p13535_p6 = pneg %p13534_p5 }
  0x36   : > { %p13540_p12 = pnand %p13538_p11, %p13535_p6 }
  0x38   : > { %13543 = shalt.err (!%p13540_p12)
}
  0x39   : > { %s13544_s5 = scalar_lea.vmem %s13718_s8, 8192  ;;  %p13552_p8 = scmp.lt.s32.totalorder %s13718_s8, %s13718_s8 }
  0x3a   : > { %p13545_p13 = scmp.ne.s32.totalorder %s13718_s8, %s13544_s5  ;;  %p13553_p9 = scmp.lt.s32.totalorder %s13544_s5, %s13544_s5 }
  0x3c   : > { %p13547_p0 = pnand %p13545_p13, %p13505_p3  ;;  %p13554_p10 = por %p13553_p9, %p13552_p8 }
  0x3e   : > { %p13548_p7 = pneg %p13547_p0 }
  0x40   : > { %p13555_p1 = pnand %p13554_p10, %p13548_p7 }
  0x42   : > { %13558 = shalt.err (!%p13555_p1)
}
  0x43   : > { %12214 = dma.hbm_to_vmem [thread:$0]  (!%p13714_p2), %s15584_s2, 8192, %s13718_s8, [#allocation7], %s13605_s23, %s13605_s23, %s13606_s30  }
  0x44   : > { %p10417_p4 = scmp.ge.s32.totalorder %s13601_s18, 2 }
  0x46   : > { %179 = sbr.rel (%p10417_p4) target bundleno = 93 (0x5d), region = 28 }
  0x4d   : > { %s183_s10 = sand.u32 1, %s13597_s17   ;;  %s11522_s6 = sshll.u32 %s13601_s18, 7 }
  0x4e   : > { %s12181_s11 = smul.u32 96, %s183_s10  ;;  %s13607_s12 = smov 256  }
  0x4f   : > { %p15598_p3 = scmp.ne.s32.totalorder %s15592_s25, 0  ;;  %s193_s13 = scalar_lea.hbm %s15582_s0, %s11522_s6 }
  0x50   : > { %s187_s20 = scalar_lea.vmem [#allocation3], %s12181_s11  ;;  %s13608_s5 = smov 128  }
  0x51   : > { %12188 = sst [smem:[#allocation11]] (%p15598_p3), %s13607_s12  ;;  %s206_s22 = sshll.u32 %s187_s20, 4  ;;  %s207_s22 = int_to_ptr.vmem [resolvable:$true] %s206_s22 }
  0x52   : > { %s12187_s8 = scalar_select %p15598_p3, [#allocation0], [#allocation14] }
  0x53   : > { %12189 = sst [smem:[#allocation11 + $0x1]] (%p15598_p3), %s13608_s5  ;;  %s13609_s7 = smov 2  }
  0x54   : > { %s198_s14 = sld [smem:[%s12187_s8]]   ;;  %s13610_s9 = smov 64  }
  0x55   : > { %12190 = sst [smem:[#allocation11 + $0x2]] (%p15598_p3), %s13609_s7  ;;  %s13611_s12 = smov 4  }
  0x56   : > { %12191 = sst [smem:[#allocation11 + $0x3]] (%p15598_p3), %s13610_s9  ;;  %s184_s11 = scalar_lea.sflag [#allocation4], %s183_s10 }
  0x57   : > { %12192 = sst [smem:[#allocation11 + $0x4]] (%p15598_p3), %s13610_s9  ;;  %s13612_s23 = smov [#allocation10]  }
  0x58   : > { %12193 = sst [smem:[#allocation11 + $0x5]] (%p15598_p3), %s13611_s12 }
  0x5a   : > { %s10420_s6 = sshll.u32 %s198_s14, 26 }
  0x5b   : > { %s10421_s8 = sadd.s32 134217728, %s10420_s6 }
  0x5c   : > { %12194 = dma.general (%p15598_p3), %s193_s13, 1536, %s207_s22, %s184_s11, %s13612_s23, [#allocation11], %s10421_s8, 0  }
  0x5d PF: > { %p15599_p2 = scmp.ne.s32.totalorder %s15596_s29, 0 }
  0x5e   : > { %s13794_s30 = sand.u32 (!%p15599_p2), 1, %s13593_s16   ;;  %p15600_p5 = scmp.ne.s32.totalorder (!%p15599_p2), %s15593_s26, 0 }
  0x5f   : > { %231 = sbr.rel (%p15599_p2) target bundleno = 6588 (0x19bc), region = 36  ;;  %s234_s5 = scalar_lea.sflag (!%p15599_p2), [#allocation4], %s13794_s30 }
  0x60   : > { %s12182_s20 = smul.u32 (!%p15599_p2), 96, %s13794_s30 }
  0x62   : > { %s13800_s14 = scalar_lea.vmem (!%p15599_p2), [#allocation3], %s12182_s20 }
  0x66   : > { %13576 = dma.done.wait (%p15600_p5), %s234_s5, 1536  }
  0x67   : > { %13578 = vsyncadd (%p15600_p5), %s234_s5, 4294965760  ;;  %p15601_p6 = scmp.eq.s32.totalorder %s13667_s19, 0 }
  0x69   : > { %13580 = dma.done.wait (%p15601_p6), [#allocation7], 16384   ;;  %p15602_p11 = pmov %p15601_p6 }
  0x6a   : > { %v13613_v0 = vmov 0   ;;  %v12274_v1 = vld [vmem:[#allocation6 + $0x4] ss:$16 sps:$4 sm:$0xff]   ;;  %v12276_v2 = vld [vmem:[#allocation6 + $0xc] ss:$16 sps:$4 sm:$0xff]   ;;  %s14023_s29 = scalar_lea.vmem [#allocation9], %s12182_s20 }
  0x6b   : > { %13582 = vsyncadd (%p15602_p11), [#allocation7], 4294950912  ;;  %615 = vmatprep.mubr.bf16.mxu0 %v13613_v0  ;;  %768 = vmatprep.mubr.bf16.mxu1 %v13613_v0  ;;  %v12278_v3 = vld [vmem:[#allocation6] ss:$16 sps:$4 sm:$0xff]   ;;  %v12279_v4 = vld [vmem:[#allocation6 + $0x8] ss:$16 sps:$4 sm:$0xff]  }
  0x6c   : > { %583 = vmatprep.subr.bf16.mxu0 %v12274_v1  ;;  %736 = vmatprep.subr.bf16.mxu1 %v12276_v2  ;;  %v12280_v5 = vld [vmem:[#allocation6 + $0x24] ss:$16 sps:$4 sm:$0xff]   ;;  %v12282_v6 = vld [vmem:[#allocation6 + $0x2c] ss:$16 sps:$4 sm:$0xff]   ;;  %v12284_v7 = vld [vmem:[#allocation6 + $0x20] ss:$16 sps:$4 sm:$0xff]  }
  0x6d   : > { %584 = vmatpush1.bf16.msra.mxu0 %v12278_v3  ;;  %737 = vmatpush1.bf16.msra.mxu1 %v12279_v4  ;;  %v12285_v8 = vld [vmem:[#allocation6 + $0x28] ss:$16 sps:$4 sm:$0xff]   ;;  %v12286_v9 = vld [vmem:[#allocation6 + $0x44] ss:$16 sps:$4 sm:$0xff]   ;;  %v12288_v10 = vld [vmem:[#allocation6 + $0x4c] ss:$16 sps:$4 sm:$0xff]  }
  0x6e   : > { %585 = vmatprep.subr.bf16.mxu0 %v12280_v5  ;;  %738 = vmatprep.subr.bf16.mxu1 %v12282_v6  ;;  %v12290_v11 = vld [vmem:[#allocation6 + $0x40] ss:$16 sps:$4 sm:$0xff]   ;;  %v12291_v12 = vld [vmem:[#allocation6 + $0x48] ss:$16 sps:$4 sm:$0xff]   ;;  %v12292_v13 = vld [vmem:[#allocation6 + $0x64] ss:$16 sps:$4 sm:$0xff]  }
  0x6f   : > { %v12294_v14 = vld [vmem:[#allocation6 + $0x6c] ss:$16 sps:$4 sm:$0xff]   ;;  %v12296_v15 = vld [vmem:[#allocation6 + $0x60] ss:$16 sps:$4 sm:$0xff]   ;;  %v12297_v16 = vld [vmem:[#allocation6 + $0x68] ss:$16 sps:$4 sm:$0xff]  }
  0x70   : > { %v12298_v17 = vld [vmem:[#allocation6 + $0x84] ss:$16 sps:$4 sm:$0xff]   ;;  %v12300_v18 = vld [vmem:[#allocation6 + $0x8c] ss:$16 sps:$4 sm:$0xff]   ;;  %v12302_v19 = vld [vmem:[#allocation6 + $0x80] ss:$16 sps:$4 sm:$0xff]  }
  0x71   : > { %586 = vmatpush1.bf16.msra.mxu0 %v12284_v7  ;;  %739 = vmatpush1.bf16.msra.mxu1 %v12285_v8  ;;  %v12303_v20 = vld [vmem:[#allocation6 + $0x88] ss:$16 sps:$4 sm:$0xff]   ;;  %v12304_v21 = vld [vmem:[#allocation6 + $0xa4] ss:$16 sps:$4 sm:$0xff]   ;;  %v12306_v22 = vld [vmem:[#allocation6 + $0xac] ss:$16 sps:$4 sm:$0xff]  }
  0x72   : > { %587 = vmatprep.subr.bf16.mxu0 %v12286_v9  ;;  %740 = vmatprep.subr.bf16.mxu1 %v12288_v10  ;;  %v12308_v23 = vld [vmem:[#allocation6 + $0xa0] ss:$16 sps:$4 sm:$0xff]   ;;  %v12309_v24 = vld [vmem:[#allocation6 + $0xa8] ss:$16 sps:$4 sm:$0xff]   ;;  %v12310_v25 = vld [vmem:[#allocation6 + $0xc4] ss:$16 sps:$4 sm:$0xff]  }
  0x73   : > { %v12312_v26 = vld [vmem:[#allocation6 + $0xcc] ss:$16 sps:$4 sm:$0xff]   ;;  %v12314_v27 = vld [vmem:[#allocation6 + $0xc0] ss:$16 sps:$4 sm:$0xff]   ;;  %v12315_v28 = vld [vmem:[#allocation6 + $0xc8] ss:$16 sps:$4 sm:$0xff]  }
  0x74   : > { %v12316_v29 = vld [vmem:[#allocation6 + $0xe4] ss:$16 sps:$4 sm:$0xff]   ;;  %v12318_v30 = vld [vmem:[#allocation6 + $0xec] ss:$16 sps:$4 sm:$0xff]   ;;  %v12320_v31 = vld [vmem:[#allocation6 + $0xe0] ss:$16 sps:$4 sm:$0xff]  }
  0x75   : > { %588 = vmatpush1.bf16.msra.mxu0 %v12290_v11  ;;  %741 = vmatpush1.bf16.msra.mxu1 %v12291_v12  ;;  %v12321_v32 = vld [vmem:[#allocation6 + $0xe8] ss:$16 sps:$4 sm:$0xff]   ;;  %v13812_v33 = vld [vmem:[#allocation8 + $0x4] ss:$16 sps:$4 sm:$0xff]   ;;  %v13814_v34 = vld [vmem:[#allocation8 + $0xc] ss:$16 sps:$4 sm:$0xff]  }
  0x76   : > { %589 = vmatprep.subr.bf16.mxu0 %v12292_v13  ;;  %742 = vmatprep.subr.bf16.mxu1 %v12294_v14  ;;  %v12322_v35 = vld [vmem:[%s13800_s14] sm:$0xff]   ;;  %v13823_v38 = vld [vmem:[#allocation8 + $0x8] ss:$16 sps:$4 sm:$0xff]   ;;  %v13825_v39 = vld [vmem:[#allocation8 + $0x2c] ss:$16 sps:$4 sm:$0xff]   ;;  %v331_v14 = vlaneseq  ;;  %s10268_s22 = scalar_lea.sflag [#allocation5], %s13794_s30 }
  0x77   : > { %v13817_v36 = vld [vmem:[#allocation8] ss:$16 sps:$4 sm:$0xff]   ;;  %v13820_v37 = vld [vmem:[#allocation8 + $0x24] ss:$16 sps:$4 sm:$0xff]   ;;  %v13836_v42 = vld [vmem:[#allocation8 + $0x28] ss:$16 sps:$4 sm:$0xff]  }
  0x78   : > { %v13829_v40 = vld [vmem:[#allocation8 + $0x20] ss:$16 sps:$4 sm:$0xff]   ;;  %v13833_v41 = vld [vmem:[#allocation8 + $0x44] ss:$16 sps:$4 sm:$0xff]   ;;  %v12326_v43 = vld [vmem:[%s13800_s14 + $0x8] sm:$0xff]  }
  0x79   : > { %590 = vmatpush1.bf16.msra.mxu0 %v12296_v15  ;;  %743 = vmatpush1.bf16.msra.mxu1 %v12297_v16  ;;  %v13841_v44 = vld [vmem:[#allocation8 + $0x40] ss:$16 sps:$4 sm:$0xff]   ;;  %v13844_v45 = vld [vmem:[#allocation8 + $0x4c] ss:$16 sps:$4 sm:$0xff]   ;;  %v13847_v46 = vld [vmem:[#allocation8 + $0x64] ss:$16 sps:$4 sm:$0xff]  }
  0x7a   : > { %591 = vmatprep.subr.bf16.mxu0 %v12298_v17  ;;  %744 = vmatprep.subr.bf16.mxu1 %v12300_v18  ;;  %v13849_v47 = vld [vmem:[#allocation8 + $0x48] ss:$16 sps:$4 sm:$0xff]   ;;  %v13851_v48 = vld [vmem:[#allocation8 + $0x6c] ss:$16 sps:$4 sm:$0xff]   ;;  %v13855_v49 = vld [vmem:[#allocation8 + $0x60] ss:$16 sps:$4 sm:$0xff]  }
  0x7b   : > { %v13859_v50 = vld [vmem:[#allocation8 + $0x84] ss:$16 sps:$4 sm:$0xff]   ;;  %v13863_v51 = vld [vmem:[#allocation8 + $0x68] ss:$16 sps:$4 sm:$0xff]   ;;  %v13867_v53 = vld [vmem:[#allocation8 + $0x80] ss:$16 sps:$4 sm:$0xff]  }
  0x7c   : > { %v12333_v52 = vld [vmem:[%s13800_s14 + $0x10] sm:$0xff]   ;;  %v13870_v54 = vld [vmem:[#allocation8 + $0x8c] ss:$16 sps:$4 sm:$0xff]   ;;  %v13876_v56 = vld [vmem:[#allocation8 + $0x88] ss:$16 sps:$4 sm:$0xff]   ;;  %v13982_v15 = vshrl.u32 %v331_v14, 7 }
  0x7d   : > { %592 = vmatpush1.bf16.msra.mxu0 %v12302_v19  ;;  %745 = vmatpush1.bf16.msra.mxu1 %v12303_v20  ;;  %v13874_v55 = vld [vmem:[#allocation8 + $0xa4] ss:$16 sps:$4 sm:$0xff]   ;;  %v13878_v57 = vld [vmem:[#allocation8 + $0xac] ss:$16 sps:$4 sm:$0xff]   ;;  %v13883_v58 = vld [vmem:[#allocation8 + $0xa0] ss:$16 sps:$4 sm:$0xff]  }
  0x7e   : > { %593 = vmatprep.subr.bf16.mxu0 %v12304_v21  ;;  %746 = vmatprep.subr.bf16.mxu1 %v12306_v22  ;;  %v12334_v59 = vld [vmem:[%s13800_s14 + $0x18] sm:$0xff]   ;;  %v13889_v60 = vld [vmem:[#allocation8 + $0xc4] ss:$16 sps:$4 sm:$0xff]   ;;  %v13893_v62 = vld [vmem:[#allocation8 + $0xc0] ss:$16 sps:$4 sm:$0xff]   ;;  %v333_v16 = vsub.s32 0, %v13982_v15 }
  0x7f   : > { %v13891_v61 = vld [vmem:[#allocation8 + $0xa8] ss:$16 sps:$4 sm:$0xff]   ;;  %v13896_v63 = vld [vmem:[#allocation8 + $0xcc] ss:$16 sps:$4 sm:$0xff]   ;;  %v13898_v1 = vld [vmem:[#allocation8 + $0xe4] ss:$16 sps:$4 sm:$0xff]  }
  0x80   : > { %v13900_v2 = vld [vmem:[#allocation8 + $0xc8] ss:$16 sps:$4 sm:$0xff]   ;;  %v13903_v3 = vld [vmem:[#allocation8 + $0xec] ss:$16 sps:$4 sm:$0xff]   ;;  %v13907_v4 = vld [vmem:[#allocation8 + $0xe0] ss:$16 sps:$4 sm:$0xff]  }
  0x81   : > { %594 = vmatpush1.bf16.msra.mxu0 %v12308_v23  ;;  %747 = vmatpush1.bf16.msra.mxu1 %v12309_v24  ;;  %v13911_v5 = vld [vmem:[#allocation8 + $0xe8] ss:$16 sps:$4 sm:$0xff]   ;;  %v12341_v6 = vld [vmem:[%s13800_s14 + $0x20] sm:$0xff]   ;;  %v12349_v8 = vld [vmem:[%s13800_s14 + $0x30] sm:$0xff]   ;;  %v337_v18 = vsub.s32 1, %v13982_v15  ;;  %v345_v23 = vsub.s32 3, %v13982_v15 }
  0x82   : > { %595 = vmatprep.subr.bf16.mxu0 %v12310_v25  ;;  %748 = vmatprep.subr.bf16.mxu1 %v12312_v26  ;;  %v12348_v7 = vld [vmem:[%s13800_s14 + $0x28] sm:$0xff]   ;;  %v12356_v9 = vld [vmem:[%s13800_s14 + $0x38] sm:$0xff]   ;;  %v12363_v10 = vld [vmem:[%s13800_s14 + $0x40] sm:$0xff]  }
  0x83   : > { %v12364_v11 = vld [vmem:[%s13800_s14 + $0x48] sm:$0xff]   ;;  %v12371_v12 = vld [vmem:[%s13800_s14 + $0x50] sm:$0xff]   ;;  %v12378_v13 = vld [vmem:[%s13800_s14 + $0x58] sm:$0xff]  }
  0x84   : > { %v329_v17 = vld [vmem:[%s15585_s3] sm:$0xf] }
  0x85   : > { %596 = vmatpush1.bf16.msra.mxu0 %v12314_v27  ;;  %749 = vmatpush1.bf16.msra.mxu1 %v12315_v28  ;;  %v13991_v19 = vrot.slane %v329_v17, %v333_v16  ;;  %v13995_v20 = vrot.slane %v329_v17, %v337_v18 }
  0x86   : > { %597 = vmatprep.subr.bf16.mxu0 %v12316_v29  ;;  %750 = vmatprep.subr.bf16.mxu1 %v12318_v30 }
  0x89   : > { %598 = vmatpush1.bf16.msra.mxu0 %v12320_v31  ;;  %751 = vmatpush1.bf16.msra.mxu1 %v12321_v32  ;;  %v341_v31 = vsub.s32 2, %v13982_v15 }
  0x8a   : > { %1188 = vmatprep.subr.bf16.mxu0 %v13812_v33  ;;  %1231 = vmatprep.subr.bf16.mxu1 %v13814_v34 }
  0x8c   : > { %616 = vmatmul.mubr.bf16.vlgmr.msra.gmra.mrb[0].mxu0 %v12322_v35  ;;  %769 = vmatmul.mubr.bf16.vlgmr.msra.gmra.mrb[0].mxu1 %v12322_v35 }
  0x8d   : > { %1189 = vmatpush1.bf16.msra.mxu0 %v13817_v36  ;;  %625 = vmatprep.mubr.bf16.mxu0 %v13613_v0 }
  0x8e   : > { %778 = vmatprep.mubr.bf16.mxu1 %v13613_v0  ;;  %1190 = vmatprep.subr.bf16.mxu0 %v13820_v37 }
  0x8f   : > { %1232 = vmatpush1.bf16.msra.mxu1 %v13823_v38 }
  0x90   : > { %1233 = vmatprep.subr.bf16.mxu1 %v13825_v39 }
  0x91   : > { %1191 = vmatpush1.bf16.msra.mxu0 %v13829_v40 }
  0x92   : > { %1192 = vmatprep.subr.bf16.mxu0 %v13833_v41 }
  0x93   : > { %1234 = vmatpush1.bf16.msra.mxu1 %v13836_v42 }
  0x94   : > { %626 = vmatmul.mubr.bf16.gmra.mrb[4].mxu0 %v12326_v43  ;;  %779 = vmatmul.mubr.bf16.gmra.mrb[4].mxu1 %v12326_v43  ;;  %v14004_v43 = vrot.slane %v329_v17, %v345_v23 }
  0x95   : > { %635 = vmatprep.mubr.bf16.mxu0 %v13613_v0  ;;  %788 = vmatprep.mubr.bf16.mxu1 %v13613_v0 }
  0x96   : > { %1193 = vmatpush1.bf16.msra.mxu0 %v13841_v44  ;;  %1235 = vmatprep.subr.bf16.mxu1 %v13844_v45 }
  0x97   : > { %1194 = vmatprep.subr.bf16.mxu0 %v13847_v46  ;;  %1236 = vmatpush1.bf16.msra.mxu1 %v13849_v47 }
  0x98   : > { %1237 = vmatprep.subr.bf16.mxu1 %v13851_v48 }
  0x9a   : > { %1195 = vmatpush1.bf16.msra.mxu0 %v13855_v49 }
  0x9b   : > { %1196 = vmatprep.subr.bf16.mxu0 %v13859_v50  ;;  %1238 = vmatpush1.bf16.msra.mxu1 %v13863_v51 }
  0x9c   : > { %636 = vmatmul.mubr.bf16.gmra.mrb[8].mxu0 %v12333_v52  ;;  %789 = vmatmul.mubr.bf16.gmra.mrb[8].mxu1 %v12333_v52 }
  0x9d   : > { %645 = vmatprep.mubr.bf16.mxu0 %v13613_v0  ;;  %798 = vmatprep.mubr.bf16.mxu1 %v13613_v0 }
  0x9e   : > { %1197 = vmatpush1.bf16.msra.mxu0 %v13867_v53  ;;  %1239 = vmatprep.subr.bf16.mxu1 %v13870_v54 }
  0x9f   : > { %1198 = vmatprep.subr.bf16.mxu0 %v13874_v55  ;;  %1240 = vmatpush1.bf16.msra.mxu1 %v13876_v56 }
  0xa0   : > { %1241 = vmatprep.subr.bf16.mxu1 %v13878_v57 }
  0xa2   : > { %1199 = vmatpush1.bf16.msra.mxu0 %v13883_v58 }
  0xa3   : > { %1200 = vmatprep.subr.bf16.mxu0 %v13889_v60  ;;  %1242 = vmatpush1.bf16.msra.mxu1 %v13891_v61 }
  0xa4   : > { %646 = vmatmul.mubr.bf16.gmra.mrb[12].mxu0 %v12334_v59  ;;  %799 = vmatmul.mubr.bf16.gmra.mrb[12].mxu1 %v12334_v59 }
  0xa5   : > { %655 = vmatprep.mubr.bf16.mxu0 %v13613_v0  ;;  %808 = vmatprep.mubr.bf16.mxu1 %v13613_v0 }
  0xa6   : > { %1201 = vmatpush1.bf16.msra.mxu0 %v13893_v62  ;;  %1243 = vmatprep.subr.bf16.mxu1 %v13896_v63 }
  0xa7   : > { %1202 = vmatprep.subr.bf16.mxu0 %v13898_v1  ;;  %1244 = vmatpush1.bf16.msra.mxu1 %v13900_v2 }
  0xa8   : > { %1245 = vmatprep.subr.bf16.mxu1 %v13903_v3 }
  0xaa   : > { %1203 = vmatpush1.bf16.msra.mxu0 %v13907_v4 }
  0xab   : > { %1246 = vmatpush1.bf16.msra.mxu1 %v13911_v5  ;;  %1543 = vmatprep.subr.bf16.mxu0 %v13812_v33 }
  0xac   : > { %656 = vmatmul.mubr.bf16.gmra.mrb[16].mxu0 %v12341_v6  ;;  %809 = vmatmul.mubr.bf16.gmra.mrb[16].mxu1 %v12341_v6 }
  0xad   : > { %665 = vmatprep.mubr.bf16.mxu0 %v13613_v0  ;;  %818 = vmatprep.mubr.bf16.mxu1 %v13613_v0 }
  0xae   : > { %1586 = vmatprep.subr.bf16.mxu1 %v13814_v34 }
  0xb4   : > { %666 = vmatmul.mubr.bf16.gmra.mrb[20].mxu0 %v12348_v7  ;;  %819 = vmatmul.mubr.bf16.gmra.mrb[20].mxu1 %v12348_v7  ;;  %v14009_v7 = vrot.slane %v329_v17, %v341_v31 }
  0xb5   : > { %675 = vmatprep.mubr.bf16.mxu0 %v13613_v0  ;;  %828 = vmatprep.mubr.bf16.mxu1 %v13613_v0 }
  0xbc   : > { %676 = vmatmul.mubr.bf16.gmra.mrb[24].mxu0 %v12349_v8  ;;  %829 = vmatmul.mubr.bf16.gmra.mrb[24].mxu1 %v12349_v8 }
  0xbd   : > { %685 = vmatprep.mubr.bf16.mxu0 %v13613_v0  ;;  %838 = vmatprep.mubr.bf16.mxu1 %v13613_v0 }
  0xc4   : > { %686 = vmatmul.mubr.bf16.gmra.mrb[28].mxu0 %v12356_v9  ;;  %839 = vmatmul.mubr.bf16.gmra.mrb[28].mxu1 %v12356_v9 }
  0xc5   : > { %695 = vmatprep.mubr.bf16.mxu0 %v13613_v0  ;;  %848 = vmatprep.mubr.bf16.mxu1 %v13613_v0 }
  0xcc   : > { %696 = vmatmul.mubr.bf16.gmra.mrb[32].mxu0 %v12363_v10  ;;  %849 = vmatmul.mubr.bf16.gmra.mrb[32].mxu1 %v12363_v10 }
  0xcd   : > { %705 = vmatprep.mubr.bf16.mxu0 %v13613_v0  ;;  %858 = vmatprep.mubr.bf16.mxu1 %v13613_v0 }
  0xd4   : > { %706 = vmatmul.mubr.bf16.gmra.mrb[36].mxu0 %v12364_v11  ;;  %859 = vmatmul.mubr.bf16.gmra.mrb[36].mxu1 %v12364_v11 }
  0xd5   : > { %715 = vmatprep.mubr.bf16.mxu0 %v13613_v0  ;;  %868 = vmatprep.mubr.bf16.mxu1 %v13613_v0 }
  0xdc   : > { %716 = vmatmul.mubr.bf16.gmra.mrb[40].mxu0 %v12371_v12  ;;  %869 = vmatmul.mubr.bf16.gmra.mrb[40].mxu1 %v12371_v12 }
  0xdd   : > { %725 = vmatprep.mubr.bf16.mxu0 %v13613_v0  ;;  %878 = vmatprep.mubr.bf16.mxu1 %v13613_v0 }
  0xe4   : > { %726 = vmatmul.mubr.bf16.gmra.mrb[44].mxu0 %v12378_v13  ;;  %879 = vmatmul.mubr.bf16.gmra.mrb[44].mxu1 %v12378_v13 }
  0xe5   : > { %1220 = vmatprep.mubr.bf16.mxu0 %v13613_v0  ;;  %1263 = vmatprep.mubr.bf16.mxu1 %v13613_v0 }
  0xec   : > { %1221 = vmatmul.mubr.bf16.vlgmr.msra.gmra.mrb[0].mxu0 %v13613_v0  ;;  %1264 = vmatmul.mubr.bf16.vlgmr.msra.gmra.mrb[0].mxu1 %v13613_v0 }
  0xed   : > { %1544 = vmatpush1.bf16.msra.mxu0 %v13817_v36  ;;  %1587 = vmatpush1.bf16.msra.mxu1 %v13823_v38 }
  0xee   : > { %1545 = vmatprep.subr.bf16.mxu0 %v13820_v37  ;;  %1588 = vmatprep.subr.bf16.mxu1 %v13825_v39 }
  0xef   : > { %1575 = vmatprep.mubr.bf16.mxu0 %v13613_v0  ;;  %1618 = vmatprep.mubr.bf16.mxu1 %v13613_v0 }
  0xf1   : > { %1546 = vmatpush1.bf16.msra.mxu0 %v13829_v40  ;;  %1589 = vmatpush1.bf16.msra.mxu1 %v13836_v42 }
  0xf2   : > { %1547 = vmatprep.subr.bf16.mxu0 %v13833_v41  ;;  %1590 = vmatprep.subr.bf16.mxu1 %v13844_v45 }
  0xf5   : > { %1548 = vmatpush1.bf16.msra.mxu0 %v13841_v44  ;;  %1591 = vmatpush1.bf16.msra.mxu1 %v13849_v47 }
  0xf6   : > { %1549 = vmatprep.subr.bf16.mxu0 %v13847_v46  ;;  %1592 = vmatprep.subr.bf16.mxu1 %v13851_v48 }
  0xf9   : > { %1550 = vmatpush1.bf16.msra.mxu0 %v13855_v49  ;;  %1593 = vmatpush1.bf16.msra.mxu1 %v13863_v51 }
  0xfa   : > { %1551 = vmatprep.subr.bf16.mxu0 %v13859_v50  ;;  %1594 = vmatprep.subr.bf16.mxu1 %v13870_v54 }
  0xfd   : > { %1552 = vmatpush1.bf16.msra.mxu0 %v13867_v53  ;;  %1595 = vmatpush1.bf16.msra.mxu1 %v13876_v56 }
  0xfe   : > { %1553 = vmatprep.subr.bf16.mxu0 %v13874_v55  ;;  %1596 = vmatprep.subr.bf16.mxu1 %v13878_v57 }
 0x101   : > { %1554 = vmatpush1.bf16.msra.mxu0 %v13883_v58  ;;  %1597 = vmatpush1.bf16.msra.mxu1 %v13891_v61 }
 0x102   : > { %1555 = vmatprep.subr.bf16.mxu0 %v13889_v60  ;;  %1598 = vmatprep.subr.bf16.mxu1 %v13896_v63 }
 0x105   : > { %1556 = vmatpush1.bf16.msra.mxu0 %v13893_v62  ;;  %1599 = vmatpush1.bf16.msra.mxu1 %v13900_v2 }
 0x106   : > { %1557 = vmatprep.subr.bf16.mxu0 %v13898_v1  ;;  %1600 = vmatprep.subr.bf16.mxu1 %v13903_v3 }
 0x109   : > { %1558 = vmatpush1.bf16.msra.mxu0 %v13907_v4  ;;  %1601 = vmatpush1.bf16.msra.mxu1 %v13911_v5 }
 0x10a   : > { %1899 = vmatprep.subr.bf16.mxu0 %v13812_v33  ;;  %1942 = vmatprep.subr.bf16.mxu1 %v13814_v34 }
 0x1bf   : > { %v1222_v21 = vpop.f32.mrb[0].mxu0  ;;  %v1265_v22 = vpop.f32.mrb[0].mxu1 }
 0x1c0   : > { %v11797_v24 = vadd.f32 %v1222_v21, %v13991_v19  ;;  %v1224_v25 = vpop.f32.mrb[1].mxu0  ;;  %v1267_v26 = vpop.f32.mrb[1].mxu1  ;;  %v11845_v9 = vadd.f32 %v1265_v22, %v14009_v7 }
 0x1c1   : > { %v11798_v27 = vadd.f32 %v1224_v25, %v13995_v20  ;;  %v1226_v28 = vpop.f32.mrb[2].mxu0  ;;  %v1269_v29 = vpop.f32.mrb[2].mxu1  ;;  %v11846_v8 = vadd.f32 %v1267_v26, %v14004_v43 }
 0x1c2   : > { %v10501_v30 = vmul.f32 -1.442695, %v11797_v24  ;;  %v11799_v32 = vadd.f32 %v1226_v28, %v13991_v19  ;;  %v1228_v33 = vpop.f32.mrb[3].mxu0  ;;  %v1271_v34 = vpop.f32.mrb[3].mxu1  ;;  %v11847_v12 = vadd.f32 %v1269_v29, %v14009_v7 }
 0x1c3   : > { %v10503_v35 = vmul.f32 -1.442695, %v11798_v27  ;;  %v11800_v52 = vadd.f32 %v1228_v33, %v13995_v20  ;;  %v10505_v10 = vmul.f32 -1.442695, %v11846_v8  ;;  %v11848_v11 = vadd.f32 %v1271_v34, %v14004_v43 }
 0x1c4   : > { %12715 = vpow2.f32 %v10501_v30  ;;  %v10502_v59 = vmul.f32 -1.442695, %v11799_v32 }
 0x1c5   : > { %12717 = vpow2.f32 %v10503_v35  ;;  %v10504_v6 = vmul.f32 -1.442695, %v11800_v52  ;;  %v10506_v24 = vmul.f32 -1.442695, %v11848_v11 }
 0x1c6   : > { %12719 = vpow2.f32 %v10502_v59 }
 0x1c7   : > { %12721 = vpow2.f32 %v10504_v6 }
 0x1c8   : > { %12723 = vtanh.f32 %v11845_v9 }
 0x1c9   : > { %12725 = vpow2.f32 %v10505_v10 }
 0x1ca   : > { %12727 = vtanh.f32 %v11847_v12 }
 0x1ce   : > { %v12716_v13 = vpop.eup %12715 }
 0x1cf   : > { %v12718_v14 = vpop.eup %12717  ;;  %v1288_v21 = vadd.f32 1.0, %v12716_v13 }
 0x1d0   : > { %v1300_v25 = vadd.f32 1.0, %v12718_v14  ;;  %v12720_v17 = vpop.eup %12719 }
 0x1d1   : > { %12729 = vrcp.f32 %v1288_v21  ;;  %v1289_v26 = vadd.f32 1.0, %v12720_v17  ;;  %v12722_v27 = vpop.eup %12721 }
 0x1d2   : > { %12731 = vrcp.f32 %v1300_v25  ;;  %v1301_v22 = vadd.f32 1.0, %v12722_v27  ;;  %v12724_v28 = vpop.eup %12723 }
 0x1d3   : > { %12733 = vpow2.f32 %v10506_v24  ;;  %v12726_v30 = vpop.eup %12725 }
 0x1d4   : > { %12735 = vrcp.f32 %v1289_v26  ;;  %v12728_v29 = vpop.eup %12727  ;;  %v1314_v6 = vadd.f32 1.0, %v12726_v30 }
 0x1d5   : > { %12737 = vrcp.f32 %v1301_v22 }
 0x1d6   : > { %12739 = vrcp.f32 %v1314_v6 }
 0x1db   : > { %v12730_v32 = vpop.eup %12729 }
 0x1dc   : > { %v12732_v33 = vpop.eup %12731  ;;  %v1322_v34 = vmul.f32 %v12730_v32, %v12724_v28 }
 0x1dd   : > { %v12734_v35 = vpop.eup %12733  ;;  %v1320_v52 = vmul.f32 0.0, %v12732_v33 }
 0x1de   : > { %v12736_v59 = vpop.eup %12735  ;;  %v1315_v11 = vadd.f32 1.0, %v12734_v35 }
 0x1df   : > { %v14015_v8 = vadd.f32 %v1322_v34, %v1320_v52  ;;  %v1323_v9 = vmul.f32 %v12736_v59, %v12728_v29  ;;  %v12738_v10 = vpop.eup %12737 }
 0x1e0   : > { %v1321_v12 = vmul.f32 0.0, %v12738_v10  ;;  %v12740_v14 = vpop.eup %12739 }
 0x1e1   : > { %12741 = vtanh.f32 %v14015_v8 }
 0x1e2   : > { %v14018_v13 = vadd.f32 %v1323_v9, %v1321_v12  ;;  %12743 = vrcp.f32 %v1315_v11 }
 0x1e4   : > { %12745 = vtanh.f32 %v14018_v13 }
 0x1eb   : > { %v12742_v21 = vpop.eup %12741 }
 0x1ec   : > { %v12744_v24 = vpop.eup %12743  ;;  %v1328_v17 = vmul.f32 %v12742_v21, %v12740_v14 }
 0x1ee   : > { %v12746_v25 = vpop.eup %12745 }
 0x1ef   : > { %v1329_v26 = vmul.f32 %v12746_v25, %v12744_v24 }
 0x1f1   : > { %v1330_v27 = vpack.c.bf16 %v1329_v26, %v1328_v17 }
 0x1f3   : > { %11576 = vst [vmem:[%s14023_s29] sm:$0xff] %v1330_v27   ;;  %1576 = vmatmul.mubr.bf16.vlgmr.msra.gmra.mrb[4].mxu0 %v1330_v27  ;;  %1619 = vmatmul.mubr.bf16.vlgmr.msra.gmra.mrb[4].mxu1 %v1330_v27 }
 0x1f4   : > { %1900 = vmatpush1.bf16.msra.mxu0 %v13817_v36  ;;  %1943 = vmatpush1.bf16.msra.mxu1 %v13823_v38 }
 0x1f5   : > { %1901 = vmatprep.subr.bf16.mxu0 %v13820_v37  ;;  %1944 = vmatprep.subr.bf16.mxu1 %v13825_v39 }
 0x1f6   : > { %1931 = vmatprep.mubr.bf16.mxu0 %v13613_v0  ;;  %1974 = vmatprep.mubr.bf16.mxu1 %v13613_v0 }
 0x1f8   : > { %1902 = vmatpush1.bf16.msra.mxu0 %v13829_v40  ;;  %1945 = vmatpush1.bf16.msra.mxu1 %v13836_v42 }
 0x1f9   : > { %1903 = vmatprep.subr.bf16.mxu0 %v13833_v41  ;;  %1946 = vmatprep.subr.bf16.mxu1 %v13844_v45 }
 0x1fc   : > { %1904 = vmatpush1.bf16.msra.mxu0 %v13841_v44  ;;  %1947 = vmatpush1.bf16.msra.mxu1 %v13849_v47 }
 0x1fd   : > { %1905 = vmatprep.subr.bf16.mxu0 %v13847_v46  ;;  %1948 = vmatprep.subr.bf16.mxu1 %v13851_v48 }
 0x200   : > { %1906 = vmatpush1.bf16.msra.mxu0 %v13855_v49  ;;  %1949 = vmatpush1.bf16.msra.mxu1 %v13863_v51 }
 0x201   : > { %1907 = vmatprep.subr.bf16.mxu0 %v13859_v50  ;;  %1950 = vmatprep.subr.bf16.mxu1 %v13870_v54 }
 0x204   : > { %1908 = vmatpush1.bf16.msra.mxu0 %v13867_v53  ;;  %1951 = vmatpush1.bf16.msra.mxu1 %v13876_v56 }
 0x205   : > { %1909 = vmatprep.subr.bf16.mxu0 %v13874_v55  ;;  %1952 = vmatprep.subr.bf16.mxu1 %v13878_v57 }
 0x208   : > { %1910 = vmatpush1.bf16.msra.mxu0 %v13883_v58  ;;  %1953 = vmatpush1.bf16.msra.mxu1 %v13891_v61 }
 0x209   : > { %1911 = vmatprep.subr.bf16.mxu0 %v13889_v60  ;;  %1954 = vmatprep.subr.bf16.mxu1 %v13896_v63 }
 0x20c   : > { %1912 = vmatpush1.bf16.msra.mxu0 %v13893_v62  ;;  %1955 = vmatpush1.bf16.msra.mxu1 %v13900_v2 }
 0x20d   : > { %1913 = vmatprep.subr.bf16.mxu0 %v13898_v1  ;;  %1956 = vmatprep.subr.bf16.mxu1 %v13903_v3 }
 0x210   : > { %1914 = vmatpush1.bf16.msra.mxu0 %v13907_v4  ;;  %1957 = vmatpush1.bf16.msra.mxu1 %v13911_v5 }
 0x2c6   : > { %v1577_v36 = vpop.f32.mrb[4].mxu0  ;;  %v1620_v37 = vpop.f32.mrb[4].mxu1 }
 0x2c7   : > { %v11801_v38 = vadd.f32 %v1577_v36, %v13991_v19  ;;  %v1579_v39 = vpop.f32.mrb[5].mxu0  ;;  %v1622_v40 = vpop.f32.mrb[5].mxu1  ;;  %v11849_v55 = vadd.f32 %v1620_v37, %v14009_v7  ;;  %v14079_v36 = vld [vmem:[#allocation8 + $0xc] ss:$16 sps:$4 sm:$0xff]   ;;  %v14081_v37 = vld [vmem:[#allocation8] ss:$16 sps:$4 sm:$0xff]  }
 0x2c8   : > { %v11802_v41 = vadd.f32 %v1579_v39, %v13995_v20  ;;  %v1581_v42 = vpop.f32.mrb[6].mxu0  ;;  %v1624_v44 = vpop.f32.mrb[6].mxu1  ;;  %v11850_v54 = vadd.f32 %v1622_v40, %v14004_v43  ;;  %2298 = vmatprep.subr.bf16.mxu1 %v14079_v36  ;;  %v14089_v39 = vld [vmem:[#allocation8 + $0x24] ss:$16 sps:$4 sm:$0xff]   ;;  %v14091_v40 = vld [vmem:[#allocation8 + $0x2c] ss:$16 sps:$4 sm:$0xff]  }
 0x2c9   : > { %v10541_v45 = vmul.f32 -1.442695, %v11801_v38  ;;  %v11803_v46 = vadd.f32 %v1581_v42, %v13991_v19  ;;  %v1583_v47 = vpop.f32.mrb[7].mxu0  ;;  %v1626_v48 = vpop.f32.mrb[7].mxu1  ;;  %v11851_v58 = vadd.f32 %v1624_v44, %v14009_v7  ;;  %v14083_v38 = vld [vmem:[#allocation8 + $0x8] ss:$16 sps:$4 sm:$0xff]  }
 0x2ca   : > { %v10543_v49 = vmul.f32 -1.442695, %v11802_v41  ;;  %v11804_v50 = vadd.f32 %v1583_v47, %v13995_v20  ;;  %v10545_v56 = vmul.f32 -1.442695, %v11850_v54  ;;  %v11852_v57 = vadd.f32 %v1626_v48, %v14004_v43  ;;  %v14093_v41 = vld [vmem:[#allocation8 + $0x20] ss:$16 sps:$4 sm:$0xff]  }
 0x2cb   : > { %12747 = vpow2.f32 %v10541_v45  ;;  %v10542_v51 = vmul.f32 -1.442695, %v11803_v46  ;;  %v14095_v42 = vld [vmem:[#allocation8 + $0x28] ss:$16 sps:$4 sm:$0xff]   ;;  %v14101_v44 = vld [vmem:[#allocation8 + $0x44] ss:$16 sps:$4 sm:$0xff]  }
 0x2cc   : > { %12749 = vpow2.f32 %v10543_v49  ;;  %v10544_v53 = vmul.f32 -1.442695, %v11804_v50  ;;  %v10546_v63 = vmul.f32 -1.442695, %v11852_v57  ;;  %v13483_v45 = vld [vmem:[#allocation8 + $0x4c] ss:$16 sps:$4 sm:$0xff]  }
 0x2cd   : > { %12751 = vpow2.f32 %v10542_v51  ;;  %v14103_v46 = vld [vmem:[#allocation8 + $0x40] ss:$16 sps:$4 sm:$0xff]   ;;  %v13484_v47 = vld [vmem:[#allocation8 + $0x48] ss:$16 sps:$4 sm:$0xff]   ;;  %v14107_v48 = vld [vmem:[#allocation8 + $0x64] ss:$16 sps:$4 sm:$0xff]  }
 0x2ce   : > { %12753 = vpow2.f32 %v10544_v53  ;;  %v13485_v49 = vld [vmem:[#allocation8 + $0x6c] ss:$16 sps:$4 sm:$0xff]   ;;  %v14109_v50 = vld [vmem:[#allocation8 + $0x60] ss:$16 sps:$4 sm:$0xff]   ;;  %v13486_v51 = vld [vmem:[#allocation8 + $0x68] ss:$16 sps:$4 sm:$0xff]  }
 0x2cf   : > { %12755 = vtanh.f32 %v11849_v55  ;;  %v13487_v53 = vld [vmem:[#allocation8 + $0x84] ss:$16 sps:$4 sm:$0xff]   ;;  %v13488_v54 = vld [vmem:[#allocation8 + $0x8c] ss:$16 sps:$4 sm:$0xff]   ;;  %v13489_v55 = vld [vmem:[#allocation8 + $0x80] ss:$16 sps:$4 sm:$0xff]  }
 0x2d0   : > { %12757 = vpow2.f32 %v10545_v56  ;;  %v13490_v56 = vld [vmem:[#allocation8 + $0x88] ss:$16 sps:$4 sm:$0xff]   ;;  %v13491_v57 = vld [vmem:[#allocation8 + $0xa4] ss:$16 sps:$4 sm:$0xff]  }
 0x2d1   : > { %12759 = vtanh.f32 %v11851_v58  ;;  %v13492_v58 = vld [vmem:[#allocation8 + $0xac] ss:$16 sps:$4 sm:$0xff]  }
 0x2d5   : > { %v12748_v60 = vpop.eup %12747 }
 0x2d6   : > { %v12750_v61 = vpop.eup %12749  ;;  %v1643_v62 = vadd.f32 1.0, %v12748_v60  ;;  %v13493_v60 = vld [vmem:[#allocation8 + $0xa0] ss:$16 sps:$4 sm:$0xff]  }
 0x2d7   : > { %v1655_v1 = vadd.f32 1.0, %v12750_v61  ;;  %v12752_v2 = vpop.eup %12751  ;;  %v13494_v61 = vld [vmem:[#allocation8 + $0xa8] ss:$16 sps:$4 sm:$0xff]  }
 0x2d8   : > { %12761 = vrcp.f32 %v1643_v62  ;;  %v1644_v3 = vadd.f32 1.0, %v12752_v2  ;;  %v12754_v4 = vpop.eup %12753  ;;  %v13495_v62 = vld [vmem:[#allocation8 + $0xc4] ss:$16 sps:$4 sm:$0xff]   ;;  %v13498_v2 = vld [vmem:[#allocation8 + $0xc8] ss:$16 sps:$4 sm:$0xff]  }
 0x2d9   : > { %12763 = vrcp.f32 %v1655_v1  ;;  %v1656_v5 = vadd.f32 1.0, %v12754_v4  ;;  %v12756_v22 = vpop.eup %12755  ;;  %v13497_v1 = vld [vmem:[#allocation8 + $0xc0] ss:$16 sps:$4 sm:$0xff]   ;;  %v13500_v4 = vld [vmem:[#allocation8 + $0xec] ss:$16 sps:$4 sm:$0xff]  }
 0x2da   : > { %12765 = vpow2.f32 %v10546_v63  ;;  %v12758_v28 = vpop.eup %12757  ;;  %v13496_v63 = vld [vmem:[#allocation8 + $0xcc] ss:$16 sps:$4 sm:$0xff]  }
 0x2db   : > { %12767 = vrcp.f32 %v1644_v3  ;;  %v12760_v30 = vpop.eup %12759  ;;  %v1669_v59 = vadd.f32 1.0, %v12758_v28  ;;  %v13499_v3 = vld [vmem:[#allocation8 + $0xe4] ss:$16 sps:$4 sm:$0xff]  }
 0x2dc   : > { %12769 = vrcp.f32 %v1656_v5  ;;  %v13501_v5 = vld [vmem:[#allocation8 + $0xe0] ss:$16 sps:$4 sm:$0xff]  }
 0x2dd   : > { %12771 = vrcp.f32 %v1669_v59 }
 0x2e2   : > { %v12762_v29 = vpop.eup %12761 }
 0x2e3   : > { %v12764_v32 = vpop.eup %12763  ;;  %v1677_v33 = vmul.f32 %v12762_v29, %v12756_v22  ;;  %v13502_v22 = vld [vmem:[#allocation8 + $0xe8] ss:$16 sps:$4 sm:$0xff]  }
 0x2e4   : > { %v12766_v34 = vpop.eup %12765  ;;  %v1675_v35 = vmul.f32 %v12764_v32, %v14015_v8 }
 0x2e5   : > { %v12768_v52 = vpop.eup %12767  ;;  %v1670_v11 = vadd.f32 1.0, %v12766_v34 }
 0x2e6   : > { %v14067_v6 = vadd.f32 %v1677_v33, %v1675_v35  ;;  %v1678_v9 = vmul.f32 %v12768_v52, %v12760_v30  ;;  %v12770_v10 = vpop.eup %12769 }
 0x2e7   : > { %v1676_v12 = vmul.f32 %v12770_v10, %v14018_v13  ;;  %v12772_v21 = vpop.eup %12771  ;;  %v14077_v13 = vld [vmem:[#allocation8 + $0x4] ss:$16 sps:$4 sm:$0xff]  }
 0x2e8   : > { %12773 = vtanh.f32 %v14067_v6  ;;  %2255 = vmatprep.subr.bf16.mxu0 %v14077_v13 }
 0x2e9   : > { %v14071_v14 = vadd.f32 %v1678_v9, %v1676_v12  ;;  %12775 = vrcp.f32 %v1670_v11 }
 0x2eb   : > { %12777 = vtanh.f32 %v14071_v14 }
 0x2f2   : > { %v12774_v8 = vpop.eup %12773 }
 0x2f3   : > { %v12776_v24 = vpop.eup %12775  ;;  %v1683_v17 = vmul.f32 %v12774_v8, %v12772_v21 }
 0x2f5   : > { %v12778_v25 = vpop.eup %12777 }
 0x2f6   : > { %v1684_v26 = vmul.f32 %v12778_v25, %v12776_v24 }
 0x2f8   : > { %v1685_v27 = vpack.c.bf16 %v1684_v26, %v1683_v17 }
 0x2fa   : > { %11752 = vst [vmem:[%s14023_s29 + $0x8] sm:$0xff] %v1685_v27   ;;  %1932 = vmatmul.mubr.bf16.vlgmr.msra.gmra.mrb[8].mxu0 %v1685_v27  ;;  %1975 = vmatmul.mubr.bf16.vlgmr.msra.gmra.mrb[8].mxu1 %v1685_v27 }
 0x2fb   : > { %2287 = vmatprep.mubr.bf16.mxu0 %v13613_v0  ;;  %2330 = vmatprep.mubr.bf16.mxu1 %v13613_v0 }
 0x2fc   : > { %2256 = vmatpush1.bf16.msra.mxu0 %v14081_v37  ;;  %2299 = vmatpush1.bf16.msra.mxu1 %v14083_v38 }
 0x2fd   : > { %2257 = vmatprep.subr.bf16.mxu0 %v14089_v39  ;;  %2300 = vmatprep.subr.bf16.mxu1 %v14091_v40 }
 0x300   : > { %2258 = vmatpush1.bf16.msra.mxu0 %v14093_v41  ;;  %2301 = vmatpush1.bf16.msra.mxu1 %v14095_v42 }
 0x301   : > { %2302 = vmatprep.subr.bf16.mxu1 %v13483_v45  ;;  %2259 = vmatprep.subr.bf16.mxu0 %v14101_v44 }
 0x304   : > { %2260 = vmatpush1.bf16.msra.mxu0 %v14103_v46  ;;  %2303 = vmatpush1.bf16.msra.mxu1 %v13484_v47 }
 0x305   : > { %2304 = vmatprep.subr.bf16.mxu1 %v13485_v49  ;;  %2261 = vmatprep.subr.bf16.mxu0 %v14107_v48 }
 0x308   : > { %2262 = vmatpush1.bf16.msra.mxu0 %v14109_v50  ;;  %2305 = vmatpush1.bf16.msra.mxu1 %v13486_v51 }
 0x309   : > { %2263 = vmatprep.subr.bf16.mxu0 %v13487_v53  ;;  %2306 = vmatprep.subr.bf16.mxu1 %v13488_v54 }
 0x30c   : > { %2264 = vmatpush1.bf16.msra.mxu0 %v13489_v55  ;;  %2307 = vmatpush1.bf16.msra.mxu1 %v13490_v56 }
 0x30d   : > { %2265 = vmatprep.subr.bf16.mxu0 %v13491_v57  ;;  %2308 = vmatprep.subr.bf16.mxu1 %v13492_v58 }
 0x310   : > { %2266 = vmatpush1.bf16.msra.mxu0 %v13493_v60  ;;  %2309 = vmatpush1.bf16.msra.mxu1 %v13494_v61 }
 0x311   : > { %2267 = vmatprep.subr.bf16.mxu0 %v13495_v62  ;;  %2310 = vmatprep.subr.bf16.mxu1 %v13496_v63 }
 0x314   : > { %2268 = vmatpush1.bf16.msra.mxu0 %v13497_v1  ;;  %2311 = vmatpush1.bf16.msra.mxu1 %v13498_v2 }
 0x315   : > { %2269 = vmatprep.subr.bf16.mxu0 %v13499_v3  ;;  %2312 = vmatprep.subr.bf16.mxu1 %v13500_v4 }
 0x318   : > { %2270 = vmatpush1.bf16.msra.mxu0 %v13501_v5  ;;  %2313 = vmatpush1.bf16.msra.mxu1 %v13502_v22 }
 0x319   : > { %2611 = vmatprep.subr.bf16.mxu0 %v14077_v13  ;;  %2654 = vmatprep.subr.bf16.mxu1 %v14079_v36 }
 0x3cd   : > { %v1933_v28 = vpop.f32.mrb[8].mxu0  ;;  %v1976_v30 = vpop.f32.mrb[8].mxu1 }
 0x3ce   : > { %v11805_v29 = vadd.f32 %v1933_v28, %v13991_v19  ;;  %v1935_v32 = vpop.f32.mrb[9].mxu0  ;;  %v1978_v33 = vpop.f32.mrb[9].mxu1  ;;  %v11853_v17 = vadd.f32 %v1976_v30, %v14009_v7 }
 0x3cf   : > { %v11806_v34 = vadd.f32 %v1935_v32, %v13995_v20  ;;  %v1937_v35 = vpop.f32.mrb[10].mxu0  ;;  %v1980_v52 = vpop.f32.mrb[10].mxu1  ;;  %v11854_v25 = vadd.f32 %v1978_v33, %v14004_v43 }
 0x3d0   : > { %v10583_v59 = vmul.f32 -1.442695, %v11805_v29  ;;  %v11807_v9 = vadd.f32 %v1937_v35, %v13991_v19  ;;  %v1939_v10 = vpop.f32.mrb[11].mxu0  ;;  %v1982_v11 = vpop.f32.mrb[11].mxu1  ;;  %v11855_v45 = vadd.f32 %v1980_v52, %v14009_v7 }
 0x3d1   : > { %v10585_v12 = vmul.f32 -1.442695, %v11806_v34  ;;  %v11808_v21 = vadd.f32 %v1939_v10, %v13995_v20  ;;  %v10587_v26 = vmul.f32 -1.442695, %v11854_v25  ;;  %v11856_v27 = vadd.f32 %v1982_v11, %v14004_v43  ;;  %v14158_v25 = vld [vmem:[#allocation8 + $0x8c] ss:$16 sps:$4 sm:$0xff]  }
 0x3d2   : > { %12779 = vpow2.f32 %v10583_v59  ;;  %v10584_v8 = vmul.f32 -1.442695, %v11807_v9 }
 0x3d3   : > { %12781 = vpow2.f32 %v10585_v12  ;;  %v10586_v24 = vmul.f32 -1.442695, %v11808_v21  ;;  %v10588_v53 = vmul.f32 -1.442695, %v11856_v27  ;;  %v14146_v12 = vld [vmem:[#allocation8 + $0x48] ss:$16 sps:$4 sm:$0xff]  }
 0x3d4   : > { %12783 = vpow2.f32 %v10584_v8  ;;  %v14150_v21 = vld [vmem:[#allocation8 + $0x6c] ss:$16 sps:$4 sm:$0xff]   ;;  %v14152_v8 = vld [vmem:[#allocation8 + $0x68] ss:$16 sps:$4 sm:$0xff]   ;;  %v14166_v27 = vld [vmem:[#allocation8 + $0xa4] ss:$16 sps:$4 sm:$0xff]  }
 0x3d5   : > { %12785 = vpow2.f32 %v10586_v24  ;;  %v14156_v24 = vld [vmem:[#allocation8 + $0x84] ss:$16 sps:$4 sm:$0xff]  }
 0x3d6   : > { %12787 = vtanh.f32 %v11853_v17  ;;  %v14160_v17 = vld [vmem:[#allocation8 + $0x80] ss:$16 sps:$4 sm:$0xff]  }
 0x3d7   : > { %12789 = vpow2.f32 %v10587_v26  ;;  %v14162_v26 = vld [vmem:[#allocation8 + $0x88] ss:$16 sps:$4 sm:$0xff]  }
 0x3d8   : > { %12791 = vtanh.f32 %v11855_v45  ;;  %v14168_v45 = vld [vmem:[#allocation8 + $0xac] ss:$16 sps:$4 sm:$0xff]  }
 0x3dc   : > { %v12780_v47 = vpop.eup %12779 }
 0x3dd   : > { %v12782_v49 = vpop.eup %12781  ;;  %v1999_v51 = vadd.f32 1.0, %v12780_v47  ;;  %v14172_v47 = vld [vmem:[#allocation8 + $0xa0] ss:$16 sps:$4 sm:$0xff]  }
 0x3de   : > { %v2011_v54 = vadd.f32 1.0, %v12782_v49  ;;  %v12784_v55 = vpop.eup %12783  ;;  %v14174_v49 = vld [vmem:[#allocation8 + $0xa8] ss:$16 sps:$4 sm:$0xff]  }
 0x3df   : > { %12793 = vrcp.f32 %v1999_v51  ;;  %v2000_v56 = vadd.f32 1.0, %v12784_v55  ;;  %v12786_v57 = vpop.eup %12785  ;;  %v14178_v51 = vld [vmem:[#allocation8 + $0xc4] ss:$16 sps:$4 sm:$0xff]   ;;  %v14186_v55 = vld [vmem:[#allocation8 + $0xc8] ss:$16 sps:$4 sm:$0xff]  }
 0x3e0   : > { %12795 = vrcp.f32 %v2011_v54  ;;  %v2012_v58 = vadd.f32 1.0, %v12786_v57  ;;  %v12788_v60 = vpop.eup %12787  ;;  %v14184_v54 = vld [vmem:[#allocation8 + $0xc0] ss:$16 sps:$4 sm:$0xff]   ;;  %v14192_v57 = vld [vmem:[#allocation8 + $0xec] ss:$16 sps:$4 sm:$0xff]  }
 0x3e1   : > { %12797 = vpow2.f32 %v10588_v53  ;;  %v12790_v61 = vpop.eup %12789  ;;  %v14180_v53 = vld [vmem:[#allocation8 + $0xcc] ss:$16 sps:$4 sm:$0xff]  }
 0x3e2   : > { %12799 = vrcp.f32 %v2000_v56  ;;  %v12792_v62 = vpop.eup %12791  ;;  %v2025_v22 = vadd.f32 1.0, %v12790_v61  ;;  %v14190_v56 = vld [vmem:[#allocation8 + $0xe4] ss:$16 sps:$4 sm:$0xff]  }
 0x3e3   : > { %12801 = vrcp.f32 %v2012_v58  ;;  %v14196_v58 = vld [vmem:[#allocation8 + $0xe0] ss:$16 sps:$4 sm:$0xff]  }
 0x3e4   : > { %12803 = vrcp.f32 %v2025_v22 }
 0x3e9   : > { %v12794_v63 = vpop.eup %12793 }
 0x3ea   : > { %v12796_v1 = vpop.eup %12795  ;;  %v2033_v2 = vmul.f32 %v12794_v63, %v12788_v60  ;;  %v14198_v60 = vld [vmem:[#allocation8 + $0xe8] ss:$16 sps:$4 sm:$0xff]  }
 0x3eb   : > { %v12798_v3 = vpop.eup %12797  ;;  %v2031_v4 = vmul.f32 %v12796_v1, %v14067_v6 }
 0x3ec   : > { %v12800_v5 = vpop.eup %12799  ;;  %v2026_v32 = vadd.f32 1.0, %v12798_v3 }
 0x3ed   : > { %v14124_v28 = vadd.f32 %v2033_v2, %v2031_v4  ;;  %v2034_v30 = vmul.f32 %v12800_v5, %v12792_v62  ;;  %v12802_v29 = vpop.eup %12801 }
 0x3ee   : > { %v2032_v33 = vmul.f32 %v12802_v29, %v14071_v14  ;;  %v12804_v35 = vpop.eup %12803  ;;  %v14144_v14 = vld [vmem:[#allocation8 + $0x4c] ss:$16 sps:$4 sm:$0xff]  }
 0x3ef   : > { %12805 = vtanh.f32 %v14124_v28 }
 0x3f0   : > { %v14128_v34 = vadd.f32 %v2034_v30, %v2032_v33  ;;  %12807 = vrcp.f32 %v2026_v32 }
 0x3f2   : > { %12809 = vtanh.f32 %v14128_v34 }
 0x3f9   : > { %v12806_v6 = vpop.eup %12805 }
 0x3fa   : > { %v12808_v52 = vpop.eup %12807  ;;  %v2039_v9 = vmul.f32 %v12806_v6, %v12804_v35 }
 0x3fc   : > { %v12810_v59 = vpop.eup %12809 }
 0x3fd   : > { %v2040_v10 = vmul.f32 %v12810_v59, %v12808_v52 }
 0x3ff   : > { %v2041_v11 = vpack.c.bf16 %v2040_v10, %v2039_v9 }
 0x401   : > { %11753 = vst [vmem:[%s14023_s29 + $0x10] sm:$0xff] %v2041_v11   ;;  %2288 = vmatmul.mubr.bf16.vlgmr.msra.gmra.mrb[12].mxu0 %v2041_v11  ;;  %2331 = vmatmul.mubr.bf16.vlgmr.msra.gmra.mrb[12].mxu1 %v2041_v11 }
 0x402   : > { %2612 = vmatpush1.bf16.msra.mxu0 %v14081_v37  ;;  %2655 = vmatpush1.bf16.msra.mxu1 %v14083_v38 }
 0x403   : > { %2613 = vmatprep.subr.bf16.mxu0 %v14089_v39  ;;  %2656 = vmatprep.subr.bf16.mxu1 %v14091_v40 }
 0x404   : > { %2643 = vmatprep.mubr.bf16.mxu0 %v13613_v0  ;;  %2686 = vmatprep.mubr.bf16.mxu1 %v13613_v0 }
 0x406   : > { %2614 = vmatpush1.bf16.msra.mxu0 %v14093_v41  ;;  %2657 = vmatpush1.bf16.msra.mxu1 %v14095_v42 }
 0x407   : > { %2615 = vmatprep.subr.bf16.mxu0 %v14101_v44  ;;  %2658 = vmatprep.subr.bf16.mxu1 %v14144_v14 }
 0x40a   : > { %2616 = vmatpush1.bf16.msra.mxu0 %v14103_v46  ;;  %2659 = vmatpush1.bf16.msra.mxu1 %v14146_v12 }
 0x40b   : > { %2617 = vmatprep.subr.bf16.mxu0 %v14107_v48  ;;  %2660 = vmatprep.subr.bf16.mxu1 %v14150_v21 }
 0x40e   : > { %2618 = vmatpush1.bf16.msra.mxu0 %v14109_v50  ;;  %2661 = vmatpush1.bf16.msra.mxu1 %v14152_v8 }
 0x40f   : > { %2619 = vmatprep.subr.bf16.mxu0 %v14156_v24  ;;  %2662 = vmatprep.subr.bf16.mxu1 %v14158_v25 }
 0x412   : > { %2620 = vmatpush1.bf16.msra.mxu0 %v14160_v17  ;;  %2663 = vmatpush1.bf16.msra.mxu1 %v14162_v26 }
 0x413   : > { %2621 = vmatprep.subr.bf16.mxu0 %v14166_v27  ;;  %2664 = vmatprep.subr.bf16.mxu1 %v14168_v45 }
 0x416   : > { %2622 = vmatpush1.bf16.msra.mxu0 %v14172_v47  ;;  %2665 = vmatpush1.bf16.msra.mxu1 %v14174_v49 }
 0x417   : > { %2623 = vmatprep.subr.bf16.mxu0 %v14178_v51  ;;  %2666 = vmatprep.subr.bf16.mxu1 %v14180_v53 }
 0x41a   : > { %2624 = vmatpush1.bf16.msra.mxu0 %v14184_v54  ;;  %2667 = vmatpush1.bf16.msra.mxu1 %v14186_v55 }
 0x41b   : > { %2625 = vmatprep.subr.bf16.mxu0 %v14190_v56  ;;  %2668 = vmatprep.subr.bf16.mxu1 %v14192_v57 }
 0x41e   : > { %2626 = vmatpush1.bf16.msra.mxu0 %v14196_v58  ;;  %2669 = vmatpush1.bf16.msra.mxu1 %v14198_v60 }
 0x41f   : > { %2967 = vmatprep.subr.bf16.mxu0 %v14077_v13  ;;  %3010 = vmatprep.subr.bf16.mxu1 %v14079_v36 }
 0x4d4   : > { %v2289_v61 = vpop.f32.mrb[12].mxu0  ;;  %v2332_v62 = vpop.f32.mrb[12].mxu1 }
 0x4d5   : > { %v11809_v63 = vadd.f32 %v2289_v61, %v13991_v19  ;;  %v2291_v1 = vpop.f32.mrb[13].mxu0  ;;  %v2334_v2 = vpop.f32.mrb[13].mxu1  ;;  %v11857_v9 = vadd.f32 %v2332_v62, %v14009_v7 }
 0x4d6   : > { %v11810_v3 = vadd.f32 %v2291_v1, %v13995_v20  ;;  %v2293_v4 = vpop.f32.mrb[14].mxu0  ;;  %v2336_v5 = vpop.f32.mrb[14].mxu1  ;;  %v11858_v59 = vadd.f32 %v2334_v2, %v14004_v43 }
 0x4d7   : > { %v10625_v22 = vmul.f32 -1.442695, %v11809_v63  ;;  %v11811_v30 = vadd.f32 %v2293_v4, %v13991_v19  ;;  %v2295_v29 = vpop.f32.mrb[15].mxu0  ;;  %v2338_v32 = vpop.f32.mrb[15].mxu1  ;;  %v11859_v61 = vadd.f32 %v2336_v5, %v14009_v7 }
 0x4d8   : > { %v10627_v33 = vmul.f32 -1.442695, %v11810_v3  ;;  %v11812_v35 = vadd.f32 %v2295_v29, %v13995_v20  ;;  %v10629_v10 = vmul.f32 -1.442695, %v11858_v59  ;;  %v11860_v11 = vadd.f32 %v2338_v32, %v14004_v43 }
 0x4d9   : > { %12811 = vpow2.f32 %v10625_v22  ;;  %v10626_v6 = vmul.f32 -1.442695, %v11811_v30 }
 0x4da   : > { %12813 = vpow2.f32 %v10627_v33  ;;  %v10628_v52 = vmul.f32 -1.442695, %v11812_v35  ;;  %v10630_v4 = vmul.f32 -1.442695, %v11860_v11 }
 0x4db   : > { %12815 = vpow2.f32 %v10626_v6 }
 0x4dc   : > { %12817 = vpow2.f32 %v10628_v52 }
 0x4dd   : > { %12819 = vtanh.f32 %v11857_v9 }
 0x4de   : > { %12821 = vpow2.f32 %v10629_v10 }
 0x4df   : > { %12823 = vtanh.f32 %v11859_v61 }
 0x4e3   : > { %v12812_v63 = vpop.eup %12811 }
 0x4e4   : > { %v12814_v1 = vpop.eup %12813  ;;  %v2355_v3 = vadd.f32 1.0, %v12812_v63 }
 0x4e5   : > { %v2367_v22 = vadd.f32 1.0, %v12814_v1  ;;  %v12816_v30 = vpop.eup %12815 }
 0x4e6   : > { %12825 = vrcp.f32 %v2355_v3  ;;  %v2356_v2 = vadd.f32 1.0, %v12816_v30  ;;  %v12818_v29 = vpop.eup %12817 }
 0x4e7   : > { %12827 = vrcp.f32 %v2367_v22  ;;  %v2368_v62 = vadd.f32 1.0, %v12818_v29  ;;  %v12820_v32 = vpop.eup %12819 }
 0x4e8   : > { %12829 = vpow2.f32 %v10630_v4  ;;  %v12822_v33 = vpop.eup %12821 }
 0x4e9   : > { %12831 = vrcp.f32 %v2356_v2  ;;  %v12824_v5 = vpop.eup %12823  ;;  %v2381_v11 = vadd.f32 1.0, %v12822_v33 }
 0x4ea   : > { %12833 = vrcp.f32 %v2368_v62 }
 0x4eb   : > { %12835 = vrcp.f32 %v2381_v11 }
 0x4f0   : > { %v12826_v35 = vpop.eup %12825 }
 0x4f1   : > { %v12828_v6 = vpop.eup %12827  ;;  %v2389_v52 = vmul.f32 %v12826_v35, %v12820_v32 }
 0x4f2   : > { %v12830_v59 = vpop.eup %12829  ;;  %v2387_v9 = vmul.f32 %v12828_v6, %v14124_v28 }
 0x4f3   : > { %v12832_v10 = vpop.eup %12831  ;;  %v2382_v3 = vadd.f32 1.0, %v12830_v59 }
 0x4f4   : > { %v14215_v61 = vadd.f32 %v2389_v52, %v2387_v9  ;;  %v2390_v63 = vmul.f32 %v12832_v10, %v12824_v5  ;;  %v12834_v1 = vpop.eup %12833 }
 0x4f5   : > { %v2388_v4 = vmul.f32 %v12834_v1, %v14128_v34  ;;  %v12836_v30 = vpop.eup %12835 }
 0x4f6   : > { %12837 = vtanh.f32 %v14215_v61 }
 0x4f7   : > { %v14219_v22 = vadd.f32 %v2390_v63, %v2388_v4  ;;  %12839 = vrcp.f32 %v2382_v3 }
 0x4f9   : > { %12841 = vtanh.f32 %v14219_v22 }
 0x500   : > { %v12838_v28 = vpop.eup %12837 }
 0x501   : > { %v12840_v2 = vpop.eup %12839  ;;  %v2395_v62 = vmul.f32 %v12838_v28, %v12836_v30 }
 0x503   : > { %v12842_v29 = vpop.eup %12841 }
 0x504   : > { %v2396_v32 = vmul.f32 %v12842_v29, %v12840_v2 }
 0x506   : > { %v2397_v33 = vpack.c.bf16 %v2396_v32, %v2395_v62 }
 0x508   : > { %11754 = vst [vmem:[%s14023_s29 + $0x18] sm:$0xff] %v2397_v33   ;;  %2644 = vmatmul.mubr.bf16.vlgmr.msra.gmra.mrb[16].mxu0 %v2397_v33  ;;  %2687 = vmatmul.mubr.bf16.vlgmr.msra.gmra.mrb[16].mxu1 %v2397_v33 }
 0x509   : > { %2968 = vmatpush1.bf16.msra.mxu0 %v14081_v37  ;;  %3011 = vmatpush1.bf16.msra.mxu1 %v14083_v38 }
 0x50a   : > { %2969 = vmatprep.subr.bf16.mxu0 %v14089_v39  ;;  %3012 = vmatprep.subr.bf16.mxu1 %v14091_v40 }
 0x50b   : > { %2999 = vmatprep.mubr.bf16.mxu0 %v13613_v0  ;;  %3042 = vmatprep.mubr.bf16.mxu1 %v13613_v0 }
 0x50d   : > { %2970 = vmatpush1.bf16.msra.mxu0 %v14093_v41  ;;  %3013 = vmatpush1.bf16.msra.mxu1 %v14095_v42 }
 0x50e   : > { %2971 = vmatprep.subr.bf16.mxu0 %v14101_v44  ;;  %3014 = vmatprep.subr.bf16.mxu1 %v14144_v14 }
 0x511   : > { %2972 = vmatpush1.bf16.msra.mxu0 %v14103_v46  ;;  %3015 = vmatpush1.bf16.msra.mxu1 %v14146_v12 }
 0x512   : > { %2973 = vmatprep.subr.bf16.mxu0 %v14107_v48  ;;  %3016 = vmatprep.subr.bf16.mxu1 %v14150_v21 }
 0x515   : > { %2974 = vmatpush1.bf16.msra.mxu0 %v14109_v50  ;;  %3017 = vmatpush1.bf16.msra.mxu1 %v14152_v8 }
 0x516   : > { %2975 = vmatprep.subr.bf16.mxu0 %v14156_v24  ;;  %3018 = vmatprep.subr.bf16.mxu1 %v14158_v25 }
 0x519   : > { %2976 = vmatpush1.bf16.msra.mxu0 %v14160_v17  ;;  %3019 = vmatpush1.bf16.msra.mxu1 %v14162_v26 }
 0x51a   : > { %2977 = vmatprep.subr.bf16.mxu0 %v14166_v27  ;;  %3020 = vmatprep.subr.bf16.mxu1 %v14168_v45 }
 0x51d   : > { %2978 = vmatpush1.bf16.msra.mxu0 %v14172_v47  ;;  %3021 = vmatpush1.bf16.msra.mxu1 %v14174_v49 }
 0x51e   : > { %2979 = vmatprep.subr.bf16.mxu0 %v14178_v51  ;;  %3022 = vmatprep.subr.bf16.mxu1 %v14180_v53 }
 0x521   : > { %2980 = vmatpush1.bf16.msra.mxu0 %v14184_v54  ;;  %3023 = vmatpush1.bf16.msra.mxu1 %v14186_v55 }
 0x522   : > { %2981 = vmatprep.subr.bf16.mxu0 %v14190_v56  ;;  %3024 = vmatprep.subr.bf16.mxu1 %v14192_v57 }
 0x525   : > { %2982 = vmatpush1.bf16.msra.mxu0 %v14196_v58  ;;  %3025 = vmatpush1.bf16.msra.mxu1 %v14198_v60 }
 0x526   : > { %3323 = vmatprep.subr.bf16.mxu0 %v14077_v13  ;;  %3366 = vmatprep.subr.bf16.mxu1 %v14079_v36 }
 0x5db   : > { %v2645_v34 = vpop.f32.mrb[16].mxu0  ;;  %v2688_v5 = vpop.f32.mrb[16].mxu1 }
 0x5dc   : > { %v11813_v35 = vadd.f32 %v2645_v34, %v13991_v19  ;;  %v2647_v6 = vpop.f32.mrb[17].mxu0  ;;  %v2690_v52 = vpop.f32.mrb[17].mxu1  ;;  %v11861_v2 = vadd.f32 %v2688_v5, %v14009_v7 }
 0x5dd   : > { %v11814_v59 = vadd.f32 %v2647_v6, %v13995_v20  ;;  %v2649_v9 = vpop.f32.mrb[18].mxu0  ;;  %v2692_v10 = vpop.f32.mrb[18].mxu1  ;;  %v11862_v28 = vadd.f32 %v2690_v52, %v14004_v43 }
 0x5de   : > { %v10667_v11 = vmul.f32 -1.442695, %v11813_v35  ;;  %v11815_v63 = vadd.f32 %v2649_v9, %v13991_v19  ;;  %v2651_v1 = vpop.f32.mrb[19].mxu0  ;;  %v2694_v3 = vpop.f32.mrb[19].mxu1  ;;  %v11863_v32 = vadd.f32 %v2692_v10, %v14009_v7 }
 0x5df   : > { %v10669_v4 = vmul.f32 -1.442695, %v11814_v59  ;;  %v11816_v13 = vadd.f32 %v2651_v1, %v13995_v20  ;;  %v10671_v29 = vmul.f32 -1.442695, %v11862_v28  ;;  %v11864_v62 = vadd.f32 %v2694_v3, %v14004_v43 }
 0x5e0   : > { %12843 = vpow2.f32 %v10667_v11  ;;  %v10668_v36 = vmul.f32 -1.442695, %v11815_v63 }
 0x5e1   : > { %12845 = vpow2.f32 %v10669_v4  ;;  %v10670_v30 = vmul.f32 -1.442695, %v11816_v13  ;;  %v10672_v6 = vmul.f32 -1.442695, %v11864_v62 }
 0x5e2   : > { %12847 = vpow2.f32 %v10668_v36 }
 0x5e3   : > { %12849 = vpow2.f32 %v10670_v30 }
 0x5e4   : > { %12851 = vtanh.f32 %v11861_v2 }
 0x5e5   : > { %12853 = vpow2.f32 %v10671_v29 }
 0x5e6   : > { %12855 = vtanh.f32 %v11863_v32 }
 0x5ea   : > { %v12844_v33 = vpop.eup %12843 }
 0x5eb   : > { %v12846_v34 = vpop.eup %12845  ;;  %v2711_v35 = vadd.f32 1.0, %v12844_v33 }
 0x5ec   : > { %v2723_v59 = vadd.f32 1.0, %v12846_v34  ;;  %v12848_v9 = vpop.eup %12847 }
 0x5ed   : > { %12857 = vrcp.f32 %v2711_v35  ;;  %v2712_v52 = vadd.f32 1.0, %v12848_v9  ;;  %v12850_v11 = vpop.eup %12849 }
 0x5ee   : > { %12859 = vrcp.f32 %v2723_v59  ;;  %v2724_v5 = vadd.f32 1.0, %v12850_v11  ;;  %v12852_v63 = vpop.eup %12851 }
 0x5ef   : > { %12861 = vpow2.f32 %v10672_v6  ;;  %v12854_v1 = vpop.eup %12853 }
 0x5f0   : > { %12863 = vrcp.f32 %v2712_v52  ;;  %v12856_v10 = vpop.eup %12855  ;;  %v2737_v2 = vadd.f32 1.0, %v12854_v1 }
 0x5f1   : > { %12865 = vrcp.f32 %v2724_v5 }
 0x5f2   : > { %12867 = vrcp.f32 %v2737_v2 }
 0x5f7   : > { %v12858_v3 = vpop.eup %12857 }
 0x5f8   : > { %v12860_v4 = vpop.eup %12859  ;;  %v2745_v13 = vmul.f32 %v12858_v3, %v12852_v63 }
 0x5f9   : > { %v12862_v36 = vpop.eup %12861  ;;  %v2743_v30 = vmul.f32 %v12860_v4, %v14215_v61 }
 0x5fa   : > { %v12864_v28 = vpop.eup %12863  ;;  %v2738_v33 = vadd.f32 1.0, %v12862_v36 }
 0x5fb   : > { %v14266_v29 = vadd.f32 %v2745_v13, %v2743_v30  ;;  %v2746_v62 = vmul.f32 %v12864_v28, %v12856_v10  ;;  %v12866_v32 = vpop.eup %12865 }
 0x5fc   : > { %v2744_v34 = vmul.f32 %v12866_v32, %v14219_v22  ;;  %v12868_v6 = vpop.eup %12867 }
 0x5fd   : > { %12869 = vtanh.f32 %v14266_v29 }
 0x5fe   : > { %v14270_v35 = vadd.f32 %v2746_v62, %v2744_v34  ;;  %12871 = vrcp.f32 %v2738_v33 }
 0x600   : > { %12873 = vtanh.f32 %v14270_v35 }
 0x607   : > { %v12870_v61 = vpop.eup %12869 }
 0x608   : > { %v12872_v59 = vpop.eup %12871  ;;  %v2751_v52 = vmul.f32 %v12870_v61, %v12868_v6 }
 0x60a   : > { %v12874_v9 = vpop.eup %12873 }
 0x60b   : > { %v2752_v11 = vmul.f32 %v12874_v9, %v12872_v59 }
 0x60d   : > { %v2753_v5 = vpack.c.bf16 %v2752_v11, %v2751_v52 }
 0x60f   : > { %11755 = vst [vmem:[%s14023_s29 + $0x20] sm:$0xff] %v2753_v5   ;;  %3000 = vmatmul.mubr.bf16.vlgmr.msra.gmra.mrb[20].mxu0 %v2753_v5  ;;  %3043 = vmatmul.mubr.bf16.vlgmr.msra.gmra.mrb[20].mxu1 %v2753_v5 }
 0x610   : > { %3324 = vmatpush1.bf16.msra.mxu0 %v14081_v37  ;;  %3367 = vmatpush1.bf16.msra.mxu1 %v14083_v38 }
 0x611   : > { %3325 = vmatprep.subr.bf16.mxu0 %v14089_v39  ;;  %3368 = vmatprep.subr.bf16.mxu1 %v14091_v40 }
 0x612   : > { %3355 = vmatprep.mubr.bf16.mxu0 %v13613_v0  ;;  %3398 = vmatprep.mubr.bf16.mxu1 %v13613_v0 }
 0x614   : > { %3326 = vmatpush1.bf16.msra.mxu0 %v14093_v41  ;;  %3369 = vmatpush1.bf16.msra.mxu1 %v14095_v42 }
 0x615   : > { %3327 = vmatprep.subr.bf16.mxu0 %v14101_v44  ;;  %3370 = vmatprep.subr.bf16.mxu1 %v14144_v14 }
 0x618   : > { %3328 = vmatpush1.bf16.msra.mxu0 %v14103_v46  ;;  %3371 = vmatpush1.bf16.msra.mxu1 %v14146_v12 }
 0x619   : > { %3329 = vmatprep.subr.bf16.mxu0 %v14107_v48  ;;  %3372 = vmatprep.subr.bf16.mxu1 %v14150_v21 }
 0x61c   : > { %3330 = vmatpush1.bf16.msra.mxu0 %v14109_v50  ;;  %3373 = vmatpush1.bf16.msra.mxu1 %v14152_v8 }
 0x61d   : > { %3331 = vmatprep.subr.bf16.mxu0 %v14156_v24  ;;  %3374 = vmatprep.subr.bf16.mxu1 %v14158_v25 }
 0x620   : > { %3332 = vmatpush1.bf16.msra.mxu0 %v14160_v17  ;;  %3375 = vmatpush1.bf16.msra.mxu1 %v14162_v26 }
 0x621   : > { %3333 = vmatprep.subr.bf16.mxu0 %v14166_v27  ;;  %3376 = vmatprep.subr.bf16.mxu1 %v14168_v45 }
 0x624   : > { %3334 = vmatpush1.bf16.msra.mxu0 %v14172_v47  ;;  %3377 = vmatpush1.bf16.msra.mxu1 %v14174_v49 }
 0x625   : > { %3335 = vmatprep.subr.bf16.mxu0 %v14178_v51  ;;  %3378 = vmatprep.subr.bf16.mxu1 %v14180_v53 }
 0x628   : > { %3336 = vmatpush1.bf16.msra.mxu0 %v14184_v54  ;;  %3379 = vmatpush1.bf16.msra.mxu1 %v14186_v55 }
 0x629   : > { %3337 = vmatprep.subr.bf16.mxu0 %v14190_v56  ;;  %3380 = vmatprep.subr.bf16.mxu1 %v14192_v57 }
 0x62c   : > { %3338 = vmatpush1.bf16.msra.mxu0 %v14196_v58  ;;  %3381 = vmatpush1.bf16.msra.mxu1 %v14198_v60 }
 0x6e2   : > { %v3001_v37 = vpop.f32.mrb[20].mxu0  ;;  %v3044_v38 = vpop.f32.mrb[20].mxu1 }
 0x6e3   : > { %v11817_v39 = vadd.f32 %v3001_v37, %v13991_v19  ;;  %v3003_v40 = vpop.f32.mrb[21].mxu0  ;;  %v3046_v41 = vpop.f32.mrb[21].mxu1  ;;  %v11865_v36 = vadd.f32 %v3044_v38, %v14009_v7 }
 0x6e4   : > { %v11818_v42 = vadd.f32 %v3003_v40, %v13995_v20  ;;  %v3005_v44 = vpop.f32.mrb[22].mxu0  ;;  %v3048_v46 = vpop.f32.mrb[22].mxu1  ;;  %v11866_v13 = vadd.f32 %v3046_v41, %v14004_v43 }
 0x6e5   : > { %v10709_v48 = vmul.f32 -1.442695, %v11817_v39  ;;  %v11819_v50 = vadd.f32 %v3005_v44, %v13991_v19  ;;  %v3007_v22 = vpop.f32.mrb[23].mxu0  ;;  %v3050_v63 = vpop.f32.mrb[23].mxu1  ;;  %v11867_v2 = vadd.f32 %v3048_v46, %v14009_v7 }
 0x6e6   : > { %v10711_v1 = vmul.f32 -1.442695, %v11818_v42  ;;  %v11820_v10 = vadd.f32 %v3007_v22, %v13995_v20  ;;  %v10713_v30 = vmul.f32 -1.442695, %v11866_v13  ;;  %v11868_v28 = vadd.f32 %v3050_v63, %v14004_v43 }
 0x6e7   : > { %12875 = vpow2.f32 %v10709_v48  ;;  %v10710_v3 = vmul.f32 -1.442695, %v11819_v50 }
 0x6e8   : > { %12877 = vpow2.f32 %v10711_v1  ;;  %v10712_v4 = vmul.f32 -1.442695, %v11820_v10  ;;  %v10714_v34 = vmul.f32 -1.442695, %v11868_v28 }
 0x6e9   : > { %12879 = vpow2.f32 %v10710_v3 }
 0x6ea   : > { %12881 = vpow2.f32 %v10712_v4 }
 0x6eb   : > { %12883 = vtanh.f32 %v11865_v36 }
 0x6ec   : > { %12885 = vpow2.f32 %v10713_v30 }
 0x6ed   : > { %12887 = vtanh.f32 %v11867_v2  ;;  %v14327_v2 = vld [vmem:[#allocation8 + $0xc] ss:$16 sps:$4 sm:$0xff]  }
 0x6ee   : > { %3722 = vmatprep.subr.bf16.mxu1 %v14327_v2 }
 0x6f1   : > { %v12876_v62 = vpop.eup %12875 }
 0x6f2   : > { %v12878_v32 = vpop.eup %12877  ;;  %v3067_v33 = vadd.f32 1.0, %v12876_v62  ;;  %v14329_v62 = vld [vmem:[#allocation8] ss:$16 sps:$4 sm:$0xff]  }
 0x6f3   : > { %v3079_v6 = vadd.f32 1.0, %v12878_v32  ;;  %v12880_v61 = vpop.eup %12879  ;;  %v14331_v32 = vld [vmem:[#allocation8 + $0x8] ss:$16 sps:$4 sm:$0xff]  }
 0x6f4   : > { %12889 = vrcp.f32 %v3067_v33  ;;  %v3068_v59 = vadd.f32 1.0, %v12880_v61  ;;  %v12882_v9 = vpop.eup %12881  ;;  %v14337_v33 = vld [vmem:[#allocation8 + $0x24] ss:$16 sps:$4 sm:$0xff]   ;;  %v14343_v61 = vld [vmem:[#allocation8 + $0x28] ss:$16 sps:$4 sm:$0xff]  }
 0x6f5   : > { %12891 = vrcp.f32 %v3079_v6  ;;  %v3080_v52 = vadd.f32 1.0, %v12882_v9  ;;  %v12884_v11 = vpop.eup %12883  ;;  %v14341_v6 = vld [vmem:[#allocation8 + $0x20] ss:$16 sps:$4 sm:$0xff]  }
 0x6f6   : > { %12893 = vpow2.f32 %v10714_v34  ;;  %v12886_v5 = vpop.eup %12885  ;;  %v14339_v34 = vld [vmem:[#allocation8 + $0x2c] ss:$16 sps:$4 sm:$0xff]   ;;  %v14352_v9 = vld [vmem:[#allocation8 + $0x40] ss:$16 sps:$4 sm:$0xff]  }
 0x6f7   : > { %12895 = vrcp.f32 %v3068_v59  ;;  %v12888_v37 = vpop.eup %12887  ;;  %v3093_v46 = vadd.f32 1.0, %v12886_v5  ;;  %v14349_v59 = vld [vmem:[#allocation8 + $0x44] ss:$16 sps:$4 sm:$0xff]  }
 0x6f8   : > { %12897 = vrcp.f32 %v3080_v52  ;;  %v14357_v52 = vld [vmem:[#allocation8 + $0x64] ss:$16 sps:$4 sm:$0xff]  }
 0x6f9   : > { %12899 = vrcp.f32 %v3093_v46 }
 0x6fe   : > { %v12890_v38 = vpop.eup %12889 }
 0x6ff   : > { %v12892_v39 = vpop.eup %12891  ;;  %v3101_v40 = vmul.f32 %v12890_v38, %v12884_v11  ;;  %v14360_v11 = vld [vmem:[#allocation8 + $0x60] ss:$16 sps:$4 sm:$0xff]  }
 0x700   : > { %v12894_v41 = vpop.eup %12893  ;;  %v3099_v42 = vmul.f32 %v12892_v39, %v14266_v29 }
 0x701   : > { %v12896_v44 = vpop.eup %12895  ;;  %v3094_v63 = vadd.f32 1.0, %v12894_v41 }
 0x702   : > { %v14315_v48 = vadd.f32 %v3101_v40, %v3099_v42  ;;  %v3102_v50 = vmul.f32 %v12896_v44, %v12888_v37  ;;  %v12898_v22 = vpop.eup %12897 }
 0x703   : > { %v3100_v1 = vmul.f32 %v12898_v22, %v14270_v35  ;;  %v12900_v3 = vpop.eup %12899  ;;  %v14325_v35 = vld [vmem:[#allocation8 + $0x4] ss:$16 sps:$4 sm:$0xff]  }
 0x704   : > { %12901 = vtanh.f32 %v14315_v48  ;;  %3679 = vmatprep.subr.bf16.mxu0 %v14325_v35 }
 0x705   : > { %v14319_v10 = vadd.f32 %v3102_v50, %v3100_v1  ;;  %12903 = vrcp.f32 %v3094_v63 }
 0x707   : > { %12905 = vtanh.f32 %v14319_v10 }
 0x70e   : > { %v12902_v29 = vpop.eup %12901 }
 0x70f   : > { %v12904_v4 = vpop.eup %12903  ;;  %v3107_v36 = vmul.f32 %v12902_v29, %v12900_v3 }
 0x711   : > { %v12906_v13 = vpop.eup %12905 }
 0x712   : > { %v3108_v30 = vmul.f32 %v12906_v13, %v12904_v4 }
 0x714   : > { %v3109_v28 = vpack.c.bf16 %v3108_v30, %v3107_v36 }
 0x716   : > { %11756 = vst [vmem:[%s14023_s29 + $0x28] sm:$0xff] %v3109_v28   ;;  %3356 = vmatmul.mubr.bf16.vlgmr.msra.gmra.mrb[24].mxu0 %v3109_v28  ;;  %3399 = vmatmul.mubr.bf16.vlgmr.msra.gmra.mrb[24].mxu1 %v3109_v28 }
 0x717   : > { %3711 = vmatprep.mubr.bf16.mxu0 %v13613_v0  ;;  %3754 = vmatprep.mubr.bf16.mxu1 %v13613_v0 }
 0x718   : > { %3680 = vmatpush1.bf16.msra.mxu0 %v14329_v62  ;;  %3723 = vmatpush1.bf16.msra.mxu1 %v14331_v32 }
 0x719   : > { %3681 = vmatprep.subr.bf16.mxu0 %v14337_v33  ;;  %3724 = vmatprep.subr.bf16.mxu1 %v14339_v34 }
 0x71c   : > { %3682 = vmatpush1.bf16.msra.mxu0 %v14341_v6  ;;  %3725 = vmatpush1.bf16.msra.mxu1 %v14343_v61 }
 0x71d   : > { %3726 = vmatprep.subr.bf16.mxu1 %v14144_v14  ;;  %3683 = vmatprep.subr.bf16.mxu0 %v14349_v59 }
 0x720   : > { %3684 = vmatpush1.bf16.msra.mxu0 %v14352_v9  ;;  %3727 = vmatpush1.bf16.msra.mxu1 %v14146_v12 }
 0x721   : > { %3728 = vmatprep.subr.bf16.mxu1 %v14150_v21  ;;  %3685 = vmatprep.subr.bf16.mxu0 %v14357_v52 }
 0x724   : > { %3686 = vmatpush1.bf16.msra.mxu0 %v14360_v11  ;;  %3729 = vmatpush1.bf16.msra.mxu1 %v14152_v8 }
 0x725   : > { %3687 = vmatprep.subr.bf16.mxu0 %v14156_v24  ;;  %3730 = vmatprep.subr.bf16.mxu1 %v14158_v25 }
 0x728   : > { %3688 = vmatpush1.bf16.msra.mxu0 %v14160_v17  ;;  %3731 = vmatpush1.bf16.msra.mxu1 %v14162_v26 }
 0x729   : > { %3689 = vmatprep.subr.bf16.mxu0 %v14166_v27  ;;  %3732 = vmatprep.subr.bf16.mxu1 %v14168_v45 }
 0x72c   : > { %3690 = vmatpush1.bf16.msra.mxu0 %v14172_v47  ;;  %3733 = vmatpush1.bf16.msra.mxu1 %v14174_v49 }
 0x72d   : > { %3691 = vmatprep.subr.bf16.mxu0 %v14178_v51  ;;  %3734 = vmatprep.subr.bf16.mxu1 %v14180_v53 }
 0x730   : > { %3692 = vmatpush1.bf16.msra.mxu0 %v14184_v54  ;;  %3735 = vmatpush1.bf16.msra.mxu1 %v14186_v55 }
 0x731   : > { %3693 = vmatprep.subr.bf16.mxu0 %v14190_v56  ;;  %3736 = vmatprep.subr.bf16.mxu1 %v14192_v57 }
 0x734   : > { %3694 = vmatpush1.bf16.msra.mxu0 %v14196_v58  ;;  %3737 = vmatpush1.bf16.msra.mxu1 %v14198_v60 }
 0x735   : > { %4035 = vmatprep.subr.bf16.mxu0 %v14325_v35  ;;  %4078 = vmatprep.subr.bf16.mxu1 %v14327_v2 }
 0x7e9   : > { %v3357_v14 = vpop.f32.mrb[24].mxu0  ;;  %v3400_v12 = vpop.f32.mrb[24].mxu1 }
 0x7ea   : > { %v11821_v21 = vadd.f32 %v3357_v14, %v13991_v19  ;;  %v3359_v8 = vpop.f32.mrb[25].mxu0  ;;  %v3402_v24 = vpop.f32.mrb[25].mxu1  ;;  %v11869_v57 = vadd.f32 %v3400_v12, %v14009_v7 }
 0x7eb   : > { %v11822_v25 = vadd.f32 %v3359_v8, %v13995_v20  ;;  %v3361_v17 = vpop.f32.mrb[26].mxu0  ;;  %v3404_v26 = vpop.f32.mrb[26].mxu1  ;;  %v11870_v56 = vadd.f32 %v3402_v24, %v14004_v43 }
 0x7ec   : > { %v10751_v27 = vmul.f32 -1.442695, %v11821_v21  ;;  %v11823_v45 = vadd.f32 %v3361_v17, %v13991_v19  ;;  %v3363_v47 = vpop.f32.mrb[27].mxu0  ;;  %v3406_v49 = vpop.f32.mrb[27].mxu1  ;;  %v11871_v5 = vadd.f32 %v3404_v26, %v14009_v7 }
 0x7ed   : > { %v10753_v51 = vmul.f32 -1.442695, %v11822_v25  ;;  %v11824_v53 = vadd.f32 %v3363_v47, %v13995_v20  ;;  %v10755_v58 = vmul.f32 -1.442695, %v11870_v56  ;;  %v11872_v60 = vadd.f32 %v3406_v49, %v14004_v43  ;;  %v14426_v56 = vld [vmem:[#allocation8 + $0x8c] ss:$16 sps:$4 sm:$0xff]  }
 0x7ee   : > { %12907 = vpow2.f32 %v10751_v27  ;;  %v10752_v54 = vmul.f32 -1.442695, %v11823_v45 }
 0x7ef   : > { %12909 = vpow2.f32 %v10753_v51  ;;  %v10754_v55 = vmul.f32 -1.442695, %v11824_v53  ;;  %v10756_v40 = vmul.f32 -1.442695, %v11872_v60  ;;  %v14414_v51 = vld [vmem:[#allocation8 + $0x48] ss:$16 sps:$4 sm:$0xff]  }
 0x7f0   : > { %12911 = vpow2.f32 %v10752_v54  ;;  %v14418_v53 = vld [vmem:[#allocation8 + $0x6c] ss:$16 sps:$4 sm:$0xff]   ;;  %v14420_v54 = vld [vmem:[#allocation8 + $0x68] ss:$16 sps:$4 sm:$0xff]   ;;  %v14434_v60 = vld [vmem:[#allocation8 + $0xa4] ss:$16 sps:$4 sm:$0xff]  }
 0x7f1   : > { %12913 = vpow2.f32 %v10754_v55  ;;  %v14424_v55 = vld [vmem:[#allocation8 + $0x84] ss:$16 sps:$4 sm:$0xff]  }
 0x7f2   : > { %12915 = vtanh.f32 %v11869_v57  ;;  %v14428_v57 = vld [vmem:[#allocation8 + $0x80] ss:$16 sps:$4 sm:$0xff]  }
 0x7f3   : > { %12917 = vpow2.f32 %v10755_v58  ;;  %v14430_v58 = vld [vmem:[#allocation8 + $0x88] ss:$16 sps:$4 sm:$0xff]  }
 0x7f4   : > { %12919 = vtanh.f32 %v11871_v5  ;;  %v14436_v5 = vld [vmem:[#allocation8 + $0xac] ss:$16 sps:$4 sm:$0xff]  }
 0x7f8   : > { %v12908_v37 = vpop.eup %12907 }
 0x7f9   : > { %v12910_v38 = vpop.eup %12909  ;;  %v3423_v39 = vadd.f32 1.0, %v12908_v37  ;;  %v14440_v37 = vld [vmem:[#allocation8 + $0xa0] ss:$16 sps:$4 sm:$0xff]  }
 0x7fa   : > { %v3435_v41 = vadd.f32 1.0, %v12910_v38  ;;  %v12912_v42 = vpop.eup %12911  ;;  %v14442_v38 = vld [vmem:[#allocation8 + $0xa8] ss:$16 sps:$4 sm:$0xff]  }
 0x7fb   : > { %12921 = vrcp.f32 %v3423_v39  ;;  %v3424_v44 = vadd.f32 1.0, %v12912_v42  ;;  %v12914_v46 = vpop.eup %12913  ;;  %v14446_v39 = vld [vmem:[#allocation8 + $0xc4] ss:$16 sps:$4 sm:$0xff]   ;;  %v14454_v42 = vld [vmem:[#allocation8 + $0xc8] ss:$16 sps:$4 sm:$0xff]  }
 0x7fc   : > { %12923 = vrcp.f32 %v3435_v41  ;;  %v3436_v50 = vadd.f32 1.0, %v12914_v46  ;;  %v12916_v22 = vpop.eup %12915  ;;  %v14452_v41 = vld [vmem:[#allocation8 + $0xc0] ss:$16 sps:$4 sm:$0xff]   ;;  %v14460_v46 = vld [vmem:[#allocation8 + $0xec] ss:$16 sps:$4 sm:$0xff]  }
 0x7fd   : > { %12925 = vpow2.f32 %v10756_v40  ;;  %v12918_v63 = vpop.eup %12917  ;;  %v14448_v40 = vld [vmem:[#allocation8 + $0xcc] ss:$16 sps:$4 sm:$0xff]  }
 0x7fe   : > { %12927 = vrcp.f32 %v3424_v44  ;;  %v12920_v1 = vpop.eup %12919  ;;  %v3449_v28 = vadd.f32 1.0, %v12918_v63  ;;  %v14458_v44 = vld [vmem:[#allocation8 + $0xe4] ss:$16 sps:$4 sm:$0xff]  }
 0x7ff   : > { %12929 = vrcp.f32 %v3436_v50  ;;  %v14464_v50 = vld [vmem:[#allocation8 + $0xe0] ss:$16 sps:$4 sm:$0xff]  }
 0x800   : > { %12931 = vrcp.f32 %v3449_v28 }
 0x805   : > { %v12922_v3 = vpop.eup %12921 }
 0x806   : > { %v12924_v29 = vpop.eup %12923  ;;  %v3457_v4 = vmul.f32 %v12922_v3, %v12916_v22  ;;  %v14466_v22 = vld [vmem:[#allocation8 + $0xe8] ss:$16 sps:$4 sm:$0xff]  }
 0x807   : > { %v12926_v13 = vpop.eup %12925  ;;  %v3455_v36 = vmul.f32 %v12924_v29, %v14315_v48 }
 0x808   : > { %v12928_v30 = vpop.eup %12927  ;;  %v3450_v8 = vadd.f32 1.0, %v12926_v13 }
 0x809   : > { %v14392_v14 = vadd.f32 %v3457_v4, %v3455_v36  ;;  %v3458_v12 = vmul.f32 %v12928_v30, %v12920_v1  ;;  %v12930_v21 = vpop.eup %12929 }
 0x80a   : > { %v3456_v24 = vmul.f32 %v12930_v21, %v14319_v10  ;;  %v12932_v17 = vpop.eup %12931  ;;  %v14412_v10 = vld [vmem:[#allocation8 + $0x4c] ss:$16 sps:$4 sm:$0xff]  }
 0x80b   : > { %12933 = vtanh.f32 %v14392_v14 }
 0x80c   : > { %v14396_v25 = vadd.f32 %v3458_v12, %v3456_v24  ;;  %12935 = vrcp.f32 %v3450_v8 }
 0x80e   : > { %12937 = vtanh.f32 %v14396_v25 }
 0x815   : > { %v12934_v48 = vpop.eup %12933 }
 0x816   : > { %v12936_v26 = vpop.eup %12935  ;;  %v3463_v45 = vmul.f32 %v12934_v48, %v12932_v17 }
 0x818   : > { %v12938_v27 = vpop.eup %12937 }
 0x819   : > { %v3464_v47 = vmul.f32 %v12938_v27, %v12936_v26 }
 0x81b   : > { %v3465_v49 = vpack.c.bf16 %v3464_v47, %v3463_v45 }
 0x81d   : > { %11757 = vst [vmem:[%s14023_s29 + $0x30] sm:$0xff] %v3465_v49   ;;  %3712 = vmatmul.mubr.bf16.vlgmr.msra.gmra.mrb[28].mxu0 %v3465_v49  ;;  %3755 = vmatmul.mubr.bf16.vlgmr.msra.gmra.mrb[28].mxu1 %v3465_v49 }
 0x81e   : > { %4036 = vmatpush1.bf16.msra.mxu0 %v14329_v62  ;;  %4079 = vmatpush1.bf16.msra.mxu1 %v14331_v32 }
 0x81f   : > { %4037 = vmatprep.subr.bf16.mxu0 %v14337_v33  ;;  %4080 = vmatprep.subr.bf16.mxu1 %v14339_v34 }
 0x820   : > { %4067 = vmatprep.mubr.bf16.mxu0 %v13613_v0  ;;  %4110 = vmatprep.mubr.bf16.mxu1 %v13613_v0 }
 0x822   : > { %4038 = vmatpush1.bf16.msra.mxu0 %v14341_v6  ;;  %4081 = vmatpush1.bf16.msra.mxu1 %v14343_v61 }
 0x823   : > { %4039 = vmatprep.subr.bf16.mxu0 %v14349_v59  ;;  %4082 = vmatprep.subr.bf16.mxu1 %v14412_v10 }
 0x826   : > { %4040 = vmatpush1.bf16.msra.mxu0 %v14352_v9  ;;  %4083 = vmatpush1.bf16.msra.mxu1 %v14414_v51 }
 0x827   : > { %4041 = vmatprep.subr.bf16.mxu0 %v14357_v52  ;;  %4084 = vmatprep.subr.bf16.mxu1 %v14418_v53 }
 0x82a   : > { %4042 = vmatpush1.bf16.msra.mxu0 %v14360_v11  ;;  %4085 = vmatpush1.bf16.msra.mxu1 %v14420_v54 }
 0x82b   : > { %4043 = vmatprep.subr.bf16.mxu0 %v14424_v55  ;;  %4086 = vmatprep.subr.bf16.mxu1 %v14426_v56 }
 0x82e   : > { %4044 = vmatpush1.bf16.msra.mxu0 %v14428_v57  ;;  %4087 = vmatpush1.bf16.msra.mxu1 %v14430_v58 }
 0x82f   : > { %4045 = vmatprep.subr.bf16.mxu0 %v14434_v60  ;;  %4088 = vmatprep.subr.bf16.mxu1 %v14436_v5 }
 0x832   : > { %4046 = vmatpush1.bf16.msra.mxu0 %v14440_v37  ;;  %4089 = vmatpush1.bf16.msra.mxu1 %v14442_v38 }
 0x833   : > { %4047 = vmatprep.subr.bf16.mxu0 %v14446_v39  ;;  %4090 = vmatprep.subr.bf16.mxu1 %v14448_v40 }
 0x836   : > { %4048 = vmatpush1.bf16.msra.mxu0 %v14452_v41  ;;  %4091 = vmatpush1.bf16.msra.mxu1 %v14454_v42 }
 0x837   : > { %4049 = vmatprep.subr.bf16.mxu0 %v14458_v44  ;;  %4092 = vmatprep.subr.bf16.mxu1 %v14460_v46 }
 0x83a   : > { %4050 = vmatpush1.bf16.msra.mxu0 %v14464_v50  ;;  %4093 = vmatpush1.bf16.msra.mxu1 %v14466_v22 }
 0x83b   : > { %4391 = vmatprep.subr.bf16.mxu0 %v14325_v35  ;;  %4434 = vmatprep.subr.bf16.mxu1 %v14327_v2 }
 0x8f0   : > { %v3713_v63 = vpop.f32.mrb[28].mxu0  ;;  %v3756_v1 = vpop.f32.mrb[28].mxu1 }
 0x8f1   : > { %v11825_v3 = vadd.f32 %v3713_v63, %v13991_v19  ;;  %v3715_v29 = vpop.f32.mrb[29].mxu0  ;;  %v3758_v4 = vpop.f32.mrb[29].mxu1  ;;  %v11873_v45 = vadd.f32 %v3756_v1, %v14009_v7 }
 0x8f2   : > { %v11826_v13 = vadd.f32 %v3715_v29, %v13995_v20  ;;  %v3717_v36 = vpop.f32.mrb[30].mxu0  ;;  %v3760_v30 = vpop.f32.mrb[30].mxu1  ;;  %v11874_v27 = vadd.f32 %v3758_v4, %v14004_v43 }
 0x8f3   : > { %v10793_v28 = vmul.f32 -1.442695, %v11825_v3  ;;  %v11827_v12 = vadd.f32 %v3717_v36, %v13991_v19  ;;  %v3719_v21 = vpop.f32.mrb[31].mxu0  ;;  %v3762_v8 = vpop.f32.mrb[31].mxu1  ;;  %v11875_v63 = vadd.f32 %v3760_v30, %v14009_v7 }
 0x8f4   : > { %v10795_v24 = vmul.f32 -1.442695, %v11826_v13  ;;  %v11828_v17 = vadd.f32 %v3719_v21, %v13995_v20  ;;  %v10797_v47 = vmul.f32 -1.442695, %v11874_v27  ;;  %v11876_v49 = vadd.f32 %v3762_v8, %v14004_v43 }
 0x8f5   : > { %12939 = vpow2.f32 %v10793_v28  ;;  %v10794_v48 = vmul.f32 -1.442695, %v11827_v12 }
 0x8f6   : > { %12941 = vpow2.f32 %v10795_v24  ;;  %v10796_v26 = vmul.f32 -1.442695, %v11828_v17  ;;  %v10798_v36 = vmul.f32 -1.442695, %v11876_v49 }
 0x8f7   : > { %12943 = vpow2.f32 %v10794_v48 }
 0x8f8   : > { %12945 = vpow2.f32 %v10796_v26 }
 0x8f9   : > { %12947 = vtanh.f32 %v11873_v45 }
 0x8fa   : > { %12949 = vpow2.f32 %v10797_v47 }
 0x8fb   : > { %12951 = vtanh.f32 %v11875_v63 }
 0x8ff   : > { %v12940_v3 = vpop.eup %12939 }
 0x900   : > { %v12942_v29 = vpop.eup %12941  ;;  %v3779_v13 = vadd.f32 1.0, %v12940_v3 }
 0x901   : > { %v3791_v28 = vadd.f32 1.0, %v12942_v29  ;;  %v12944_v12 = vpop.eup %12943 }
 0x902   : > { %12953 = vrcp.f32 %v3779_v13  ;;  %v3780_v4 = vadd.f32 1.0, %v12944_v12  ;;  %v12946_v21 = vpop.eup %12945 }
 0x903   : > { %12955 = vrcp.f32 %v3791_v28  ;;  %v3792_v1 = vadd.f32 1.0, %v12946_v21  ;;  %v12948_v8 = vpop.eup %12947 }
 0x904   : > { %12957 = vpow2.f32 %v10798_v36  ;;  %v12950_v24 = vpop.eup %12949 }
 0x905   : > { %12959 = vrcp.f32 %v3780_v4  ;;  %v12952_v30 = vpop.eup %12951  ;;  %v3805_v49 = vadd.f32 1.0, %v12950_v24 }
 0x906   : > { %12961 = vrcp.f32 %v3792_v1 }
 0x907   : > { %12963 = vrcp.f32 %v3805_v49 }
 0x90c   : > { %v12954_v17 = vpop.eup %12953 }
 0x90d   : > { %v12956_v48 = vpop.eup %12955  ;;  %v3813_v26 = vmul.f32 %v12954_v17, %v12948_v8 }
 0x90e   : > { %v12958_v27 = vpop.eup %12957  ;;  %v3811_v45 = vmul.f32 %v12956_v48, %v14392_v14 }
 0x90f   : > { %v12960_v47 = vpop.eup %12959  ;;  %v3806_v13 = vadd.f32 1.0, %v12958_v27 }
 0x910   : > { %v14483_v63 = vadd.f32 %v3813_v26, %v3811_v45  ;;  %v3814_v3 = vmul.f32 %v12960_v47, %v12952_v30  ;;  %v12962_v29 = vpop.eup %12961 }
 0x911   : > { %v3812_v36 = vmul.f32 %v12962_v29, %v14396_v25  ;;  %v12964_v12 = vpop.eup %12963 }
 0x912   : > { %12965 = vtanh.f32 %v14483_v63 }
 0x913   : > { %v14487_v28 = vadd.f32 %v3814_v3, %v3812_v36  ;;  %12967 = vrcp.f32 %v3806_v13 }
 0x915   : > { %12969 = vtanh.f32 %v14487_v28 }
 0x91c   : > { %v12966_v14 = vpop.eup %12965 }
 0x91d   : > { %v12968_v4 = vpop.eup %12967  ;;  %v3819_v1 = vmul.f32 %v12966_v14, %v12964_v12 }
 0x91f   : > { %v12970_v21 = vpop.eup %12969 }
 0x920   : > { %v3820_v8 = vmul.f32 %v12970_v21, %v12968_v4 }
 0x922   : > { %v3821_v24 = vpack.c.bf16 %v3820_v8, %v3819_v1 }
 0x924   : > { %11758 = vst [vmem:[%s14023_s29 + $0x38] sm:$0xff] %v3821_v24   ;;  %4068 = vmatmul.mubr.bf16.vlgmr.msra.gmra.mrb[32].mxu0 %v3821_v24  ;;  %4111 = vmatmul.mubr.bf16.vlgmr.msra.gmra.mrb[32].mxu1 %v3821_v24 }
 0x925   : > { %4392 = vmatpush1.bf16.msra.mxu0 %v14329_v62  ;;  %4435 = vmatpush1.bf16.msra.mxu1 %v14331_v32 }
 0x926   : > { %4393 = vmatprep.subr.bf16.mxu0 %v14337_v33  ;;  %4436 = vmatprep.subr.bf16.mxu1 %v14339_v34 }
 0x927   : > { %4423 = vmatprep.mubr.bf16.mxu0 %v13613_v0  ;;  %4466 = vmatprep.mubr.bf16.mxu1 %v13613_v0 }
 0x929   : > { %4394 = vmatpush1.bf16.msra.mxu0 %v14341_v6  ;;  %4437 = vmatpush1.bf16.msra.mxu1 %v14343_v61 }
 0x92a   : > { %4395 = vmatprep.subr.bf16.mxu0 %v14349_v59  ;;  %4438 = vmatprep.subr.bf16.mxu1 %v14412_v10 }
 0x92d   : > { %4396 = vmatpush1.bf16.msra.mxu0 %v14352_v9  ;;  %4439 = vmatpush1.bf16.msra.mxu1 %v14414_v51 }
 0x92e   : > { %4397 = vmatprep.subr.bf16.mxu0 %v14357_v52  ;;  %4440 = vmatprep.subr.bf16.mxu1 %v14418_v53 }
 0x931   : > { %4398 = vmatpush1.bf16.msra.mxu0 %v14360_v11  ;;  %4441 = vmatpush1.bf16.msra.mxu1 %v14420_v54 }
 0x932   : > { %4399 = vmatprep.subr.bf16.mxu0 %v14424_v55  ;;  %4442 = vmatprep.subr.bf16.mxu1 %v14426_v56 }
 0x935   : > { %4400 = vmatpush1.bf16.msra.mxu0 %v14428_v57  ;;  %4443 = vmatpush1.bf16.msra.mxu1 %v14430_v58 }
 0x936   : > { %4401 = vmatprep.subr.bf16.mxu0 %v14434_v60  ;;  %4444 = vmatprep.subr.bf16.mxu1 %v14436_v5 }
 0x939   : > { %4402 = vmatpush1.bf16.msra.mxu0 %v14440_v37  ;;  %4445 = vmatpush1.bf16.msra.mxu1 %v14442_v38 }
 0x93a   : > { %4403 = vmatprep.subr.bf16.mxu0 %v14446_v39  ;;  %4446 = vmatprep.subr.bf16.mxu1 %v14448_v40 }
 0x93d   : > { %4404 = vmatpush1.bf16.msra.mxu0 %v14452_v41  ;;  %4447 = vmatpush1.bf16.msra.mxu1 %v14454_v42 }
 0x93e   : > { %4405 = vmatprep.subr.bf16.mxu0 %v14458_v44  ;;  %4448 = vmatprep.subr.bf16.mxu1 %v14460_v46 }
 0x941   : > { %4406 = vmatpush1.bf16.msra.mxu0 %v14464_v50  ;;  %4449 = vmatpush1.bf16.msra.mxu1 %v14466_v22 }
 0x942   : > { %4747 = vmatprep.subr.bf16.mxu0 %v14325_v35  ;;  %4790 = vmatprep.subr.bf16.mxu1 %v14327_v2 }
 0x9f7   : > { %v4069_v25 = vpop.f32.mrb[32].mxu0  ;;  %v4112_v30 = vpop.f32.mrb[32].mxu1 }
 0x9f8   : > { %v11829_v17 = vadd.f32 %v4069_v25, %v13991_v19  ;;  %v4071_v48 = vpop.f32.mrb[33].mxu0  ;;  %v4114_v26 = vpop.f32.mrb[33].mxu1  ;;  %v11877_v4 = vadd.f32 %v4112_v30, %v14009_v7 }
 0x9f9   : > { %v11830_v27 = vadd.f32 %v4071_v48, %v13995_v20  ;;  %v4073_v45 = vpop.f32.mrb[34].mxu0  ;;  %v4116_v47 = vpop.f32.mrb[34].mxu1  ;;  %v11878_v14 = vadd.f32 %v4114_v26, %v14004_v43 }
 0x9fa   : > { %v10835_v49 = vmul.f32 -1.442695, %v11829_v17  ;;  %v11831_v3 = vadd.f32 %v4073_v45, %v13991_v19  ;;  %v4075_v29 = vpop.f32.mrb[35].mxu0  ;;  %v4118_v13 = vpop.f32.mrb[35].mxu1  ;;  %v11879_v8 = vadd.f32 %v4116_v47, %v14009_v7 }
 0x9fb   : > { %v10837_v36 = vmul.f32 -1.442695, %v11830_v27  ;;  %v11832_v35 = vadd.f32 %v4075_v29, %v13995_v20  ;;  %v10839_v21 = vmul.f32 -1.442695, %v11878_v14  ;;  %v11880_v1 = vadd.f32 %v4118_v13, %v14004_v43 }
 0x9fc   : > { %12971 = vpow2.f32 %v10835_v49  ;;  %v10836_v2 = vmul.f32 -1.442695, %v11831_v3 }
 0x9fd   : > { %12973 = vpow2.f32 %v10837_v36  ;;  %v10838_v12 = vmul.f32 -1.442695, %v11832_v35  ;;  %v10840_v48 = vmul.f32 -1.442695, %v11880_v1 }
 0x9fe   : > { %12975 = vpow2.f32 %v10836_v2 }
 0x9ff   : > { %12977 = vpow2.f32 %v10838_v12 }
 0xa00   : > { %12979 = vtanh.f32 %v11877_v4 }
 0xa01   : > { %12981 = vpow2.f32 %v10839_v21 }
 0xa02   : > { %12983 = vtanh.f32 %v11879_v8 }
 0xa06   : > { %v12972_v24 = vpop.eup %12971 }
 0xa07   : > { %v12974_v25 = vpop.eup %12973  ;;  %v4135_v17 = vadd.f32 1.0, %v12972_v24 }
 0xa08   : > { %v4147_v27 = vadd.f32 1.0, %v12974_v25  ;;  %v12976_v45 = vpop.eup %12975 }
 0xa09   : > { %12985 = vrcp.f32 %v4135_v17  ;;  %v4136_v26 = vadd.f32 1.0, %v12976_v45  ;;  %v12978_v49 = vpop.eup %12977 }
 0xa0a   : > { %12987 = vrcp.f32 %v4147_v27  ;;  %v4148_v30 = vadd.f32 1.0, %v12978_v49  ;;  %v12980_v3 = vpop.eup %12979 }
 0xa0b   : > { %12989 = vpow2.f32 %v10840_v48  ;;  %v12982_v29 = vpop.eup %12981 }
 0xa0c   : > { %12991 = vrcp.f32 %v4136_v26  ;;  %v12984_v47 = vpop.eup %12983  ;;  %v4161_v4 = vadd.f32 1.0, %v12982_v29 }
 0xa0d   : > { %12993 = vrcp.f32 %v4148_v30 }
 0xa0e   : > { %12995 = vrcp.f32 %v4161_v4 }
 0xa13   : > { %v12986_v13 = vpop.eup %12985 }
 0xa14   : > { %v12988_v36 = vpop.eup %12987  ;;  %v4169_v35 = vmul.f32 %v12986_v13, %v12980_v3 }
 0xa15   : > { %v12990_v2 = vpop.eup %12989  ;;  %v4167_v12 = vmul.f32 %v12988_v36, %v14483_v63 }
 0xa16   : > { %v12992_v14 = vpop.eup %12991  ;;  %v4162_v24 = vadd.f32 1.0, %v12990_v2 }
 0xa17   : > { %v14534_v21 = vadd.f32 %v4169_v35, %v4167_v12  ;;  %v4170_v1 = vmul.f32 %v12992_v14, %v12984_v47  ;;  %v12994_v8 = vpop.eup %12993 }
 0xa18   : > { %v4168_v25 = vmul.f32 %v12994_v8, %v14487_v28  ;;  %v12996_v48 = vpop.eup %12995 }
 0xa19   : > { %12997 = vtanh.f32 %v14534_v21 }
 0xa1a   : > { %v14538_v17 = vadd.f32 %v4170_v1, %v4168_v25  ;;  %12999 = vrcp.f32 %v4162_v24 }
 0xa1c   : > { %13001 = vtanh.f32 %v14538_v17 }
 0xa23   : > { %v12998_v63 = vpop.eup %12997 }
 0xa24   : > { %v13000_v27 = vpop.eup %12999  ;;  %v4175_v26 = vmul.f32 %v12998_v63, %v12996_v48 }
 0xa26   : > { %v13002_v45 = vpop.eup %13001 }
 0xa27   : > { %v4176_v49 = vmul.f32 %v13002_v45, %v13000_v27 }
 0xa29   : > { %v4177_v30 = vpack.c.bf16 %v4176_v49, %v4175_v26 }
 0xa2b   : > { %11759 = vst [vmem:[%s14023_s29 + $0x40] sm:$0xff] %v4177_v30   ;;  %4424 = vmatmul.mubr.bf16.vlgmr.msra.gmra.mrb[36].mxu0 %v4177_v30  ;;  %4467 = vmatmul.mubr.bf16.vlgmr.msra.gmra.mrb[36].mxu1 %v4177_v30 }
 0xa2c   : > { %4748 = vmatpush1.bf16.msra.mxu0 %v14329_v62  ;;  %4791 = vmatpush1.bf16.msra.mxu1 %v14331_v32 }
 0xa2d   : > { %4749 = vmatprep.subr.bf16.mxu0 %v14337_v33  ;;  %4792 = vmatprep.subr.bf16.mxu1 %v14339_v34 }
 0xa2e   : > { %4779 = vmatprep.mubr.bf16.mxu0 %v13613_v0  ;;  %4822 = vmatprep.mubr.bf16.mxu1 %v13613_v0 }
 0xa30   : > { %4750 = vmatpush1.bf16.msra.mxu0 %v14341_v6  ;;  %4793 = vmatpush1.bf16.msra.mxu1 %v14343_v61 }
 0xa31   : > { %4751 = vmatprep.subr.bf16.mxu0 %v14349_v59  ;;  %4794 = vmatprep.subr.bf16.mxu1 %v14412_v10 }
 0xa34   : > { %4752 = vmatpush1.bf16.msra.mxu0 %v14352_v9  ;;  %4795 = vmatpush1.bf16.msra.mxu1 %v14414_v51 }
 0xa35   : > { %4753 = vmatprep.subr.bf16.mxu0 %v14357_v52  ;;  %4796 = vmatprep.subr.bf16.mxu1 %v14418_v53 }
 0xa38   : > { %4754 = vmatpush1.bf16.msra.mxu0 %v14360_v11  ;;  %4797 = vmatpush1.bf16.msra.mxu1 %v14420_v54 }
 0xa39   : > { %4755 = vmatprep.subr.bf16.mxu0 %v14424_v55  ;;  %4798 = vmatprep.subr.bf16.mxu1 %v14426_v56 }
 0xa3c   : > { %4756 = vmatpush1.bf16.msra.mxu0 %v14428_v57  ;;  %4799 = vmatpush1.bf16.msra.mxu1 %v14430_v58 }
 0xa3d   : > { %4757 = vmatprep.subr.bf16.mxu0 %v14434_v60  ;;  %4800 = vmatprep.subr.bf16.mxu1 %v14436_v5 }
 0xa40   : > { %4758 = vmatpush1.bf16.msra.mxu0 %v14440_v37  ;;  %4801 = vmatpush1.bf16.msra.mxu1 %v14442_v38 }
 0xa41   : > { %4759 = vmatprep.subr.bf16.mxu0 %v14446_v39  ;;  %4802 = vmatprep.subr.bf16.mxu1 %v14448_v40 }
 0xa44   : > { %4760 = vmatpush1.bf16.msra.mxu0 %v14452_v41  ;;  %4803 = vmatpush1.bf16.msra.mxu1 %v14454_v42 }
 0xa45   : > { %4761 = vmatprep.subr.bf16.mxu0 %v14458_v44  ;;  %4804 = vmatprep.subr.bf16.mxu1 %v14460_v46 }
 0xa48   : > { %4762 = vmatpush1.bf16.msra.mxu0 %v14464_v50  ;;  %4805 = vmatpush1.bf16.msra.mxu1 %v14466_v22 }
 0xafe   : > { %v4425_v62 = vpop.f32.mrb[36].mxu0  ;;  %v4468_v32 = vpop.f32.mrb[36].mxu1 }
 0xaff   : > { %v11833_v33 = vadd.f32 %v4425_v62, %v13991_v19  ;;  %v4427_v34 = vpop.f32.mrb[37].mxu0  ;;  %v4470_v6 = vpop.f32.mrb[37].mxu1  ;;  %v11881_v2 = vadd.f32 %v4468_v32, %v14009_v7 }
 0xb00   : > { %v11834_v61 = vadd.f32 %v4427_v34, %v13995_v20  ;;  %v4429_v59 = vpop.f32.mrb[38].mxu0  ;;  %v4472_v9 = vpop.f32.mrb[38].mxu1  ;;  %v11882_v35 = vadd.f32 %v4470_v6, %v14004_v43 }
 0xb01   : > { %v10877_v52 = vmul.f32 -1.442695, %v11833_v33  ;;  %v11835_v11 = vadd.f32 %v4429_v59, %v13991_v19  ;;  %v4431_v28 = vpop.f32.mrb[39].mxu0  ;;  %v4474_v3 = vpop.f32.mrb[39].mxu1  ;;  %v11883_v4 = vadd.f32 %v4472_v9, %v14009_v7 }
 0xb02   : > { %v10879_v29 = vmul.f32 -1.442695, %v11834_v61  ;;  %v11836_v47 = vadd.f32 %v4431_v28, %v13995_v20  ;;  %v10881_v12 = vmul.f32 -1.442695, %v11882_v35  ;;  %v11884_v14 = vadd.f32 %v4474_v3, %v14004_v43 }
 0xb03   : > { %13003 = vpow2.f32 %v10877_v52  ;;  %v10878_v13 = vmul.f32 -1.442695, %v11835_v11 }
 0xb04   : > { %13005 = vpow2.f32 %v10879_v29  ;;  %v10880_v36 = vmul.f32 -1.442695, %v11836_v47  ;;  %v10882_v25 = vmul.f32 -1.442695, %v11884_v14 }
 0xb05   : > { %13007 = vpow2.f32 %v10878_v13 }
 0xb06   : > { %13009 = vpow2.f32 %v10880_v36 }
 0xb07   : > { %13011 = vtanh.f32 %v11881_v2 }
 0xb08   : > { %13013 = vpow2.f32 %v10881_v12 }
 0xb09   : > { %13015 = vtanh.f32 %v11883_v4  ;;  %v12483_v4 = vld [vmem:[#allocation8 + $0xc] ss:$16 sps:$4 sm:$0xff]  }
 0xb0a   : > { %5146 = vmatprep.subr.bf16.mxu1 %v12483_v4 }
 0xb0d   : > { %v13004_v1 = vpop.eup %13003 }
 0xb0e   : > { %v13006_v8 = vpop.eup %13005  ;;  %v4491_v24 = vadd.f32 1.0, %v13004_v1  ;;  %v12478_v1 = vld [vmem:[#allocation8] ss:$16 sps:$4 sm:$0xff]  }
 0xb0f   : > { %v4503_v48 = vadd.f32 1.0, %v13006_v8  ;;  %v13008_v63 = vpop.eup %13007  ;;  %v12481_v8 = vld [vmem:[#allocation8 + $0x8] ss:$16 sps:$4 sm:$0xff]  }
 0xb10   : > { %13017 = vrcp.f32 %v4491_v24  ;;  %v4492_v27 = vadd.f32 1.0, %v13008_v63  ;;  %v13010_v45 = vpop.eup %13009  ;;  %v12486_v24 = vld [vmem:[#allocation8 + $0x24] ss:$16 sps:$4 sm:$0xff]   ;;  %v12487_v63 = vld [vmem:[#allocation8 + $0x28] ss:$16 sps:$4 sm:$0xff]  }
 0xb11   : > { %13019 = vrcp.f32 %v4503_v48  ;;  %v4504_v26 = vadd.f32 1.0, %v13010_v45  ;;  %v13012_v49 = vpop.eup %13011  ;;  %v12484_v48 = vld [vmem:[#allocation8 + $0x20] ss:$16 sps:$4 sm:$0xff]  }
 0xb12   : > { %13021 = vpow2.f32 %v10882_v25  ;;  %v13014_v30 = vpop.eup %13013  ;;  %v12489_v25 = vld [vmem:[#allocation8 + $0x2c] ss:$16 sps:$4 sm:$0xff]   ;;  %v12490_v45 = vld [vmem:[#allocation8 + $0x40] ss:$16 sps:$4 sm:$0xff]  }
 0xb13   : > { %13023 = vrcp.f32 %v4492_v27  ;;  %v13016_v62 = vpop.eup %13015  ;;  %v4517_v9 = vadd.f32 1.0, %v13014_v30  ;;  %v12492_v27 = vld [vmem:[#allocation8 + $0x44] ss:$16 sps:$4 sm:$0xff]  }
 0xb14   : > { %13025 = vrcp.f32 %v4504_v26  ;;  %v12495_v26 = vld [vmem:[#allocation8 + $0x64] ss:$16 sps:$4 sm:$0xff]  }
 0xb15   : > { %13027 = vrcp.f32 %v4517_v9 }
 0xb1a   : > { %v13018_v32 = vpop.eup %13017 }
 0xb1b   : > { %v13020_v33 = vpop.eup %13019  ;;  %v4525_v34 = vmul.f32 %v13018_v32, %v13012_v49  ;;  %v12493_v49 = vld [vmem:[#allocation8 + $0x60] ss:$16 sps:$4 sm:$0xff]  }
 0xb1c   : > { %v13022_v6 = vpop.eup %13021  ;;  %v4523_v61 = vmul.f32 %v13020_v33, %v14534_v21 }
 0xb1d   : > { %v13024_v59 = vpop.eup %13023  ;;  %v4518_v3 = vadd.f32 1.0, %v13022_v6 }
 0xb1e   : > { %v14583_v52 = vadd.f32 %v4525_v34, %v4523_v61  ;;  %v4526_v11 = vmul.f32 %v13024_v59, %v13016_v62  ;;  %v13026_v28 = vpop.eup %13025 }
 0xb1f   : > { %v4524_v29 = vmul.f32 %v13026_v28, %v14538_v17  ;;  %v13028_v13 = vpop.eup %13027  ;;  %v12480_v17 = vld [vmem:[#allocation8 + $0x4] ss:$16 sps:$4 sm:$0xff]  }
 0xb20   : > { %13029 = vtanh.f32 %v14583_v52  ;;  %5103 = vmatprep.subr.bf16.mxu0 %v12480_v17 }
 0xb21   : > { %v14587_v47 = vadd.f32 %v4526_v11, %v4524_v29  ;;  %13031 = vrcp.f32 %v4518_v3 }
 0xb23   : > { %13033 = vtanh.f32 %v14587_v47 }
 0xb2a   : > { %v13030_v21 = vpop.eup %13029 }
 0xb2b   : > { %v13032_v36 = vpop.eup %13031  ;;  %v4531_v2 = vmul.f32 %v13030_v21, %v13028_v13 }
 0xb2d   : > { %v13034_v35 = vpop.eup %13033 }
 0xb2e   : > { %v4532_v12 = vmul.f32 %v13034_v35, %v13032_v36 }
 0xb30   : > { %v4533_v14 = vpack.c.bf16 %v4532_v12, %v4531_v2 }
 0xb32   : > { %11760 = vst [vmem:[%s14023_s29 + $0x48] sm:$0xff] %v4533_v14   ;;  %4780 = vmatmul.mubr.bf16.vlgmr.msra.gmra.mrb[40].mxu0 %v4533_v14  ;;  %4823 = vmatmul.mubr.bf16.vlgmr.msra.gmra.mrb[40].mxu1 %v4533_v14 }
 0xb33   : > { %5135 = vmatprep.mubr.bf16.mxu0 %v13613_v0  ;;  %5178 = vmatprep.mubr.bf16.mxu1 %v13613_v0 }
 0xb34   : > { %5104 = vmatpush1.bf16.msra.mxu0 %v12478_v1  ;;  %5147 = vmatpush1.bf16.msra.mxu1 %v12481_v8 }
 0xb35   : > { %5105 = vmatprep.subr.bf16.mxu0 %v12486_v24  ;;  %5148 = vmatprep.subr.bf16.mxu1 %v12489_v25 }
 0xb38   : > { %5106 = vmatpush1.bf16.msra.mxu0 %v12484_v48  ;;  %5149 = vmatpush1.bf16.msra.mxu1 %v12487_v63 }
 0xb39   : > { %5150 = vmatprep.subr.bf16.mxu1 %v14412_v10  ;;  %5107 = vmatprep.subr.bf16.mxu0 %v12492_v27  ;;  %v12498_v10 = vld [vmem:[#allocation6 + $0x104] ss:$16 sps:$4 sm:$0xff]  }
 0xb3c   : > { %5108 = vmatpush1.bf16.msra.mxu0 %v12490_v45  ;;  %5151 = vmatpush1.bf16.msra.mxu1 %v14414_v51  ;;  %v12501_v51 = vld [vmem:[#allocation6 + $0x10c] ss:$16 sps:$4 sm:$0xff]  }
 0xb3d   : > { %5152 = vmatprep.subr.bf16.mxu1 %v14418_v53  ;;  %5109 = vmatprep.subr.bf16.mxu0 %v12495_v26 }
 0xb40   : > { %5110 = vmatpush1.bf16.msra.mxu0 %v12493_v49  ;;  %5153 = vmatpush1.bf16.msra.mxu1 %v14420_v54 }
 0xb41   : > { %5111 = vmatprep.subr.bf16.mxu0 %v14424_v55  ;;  %5154 = vmatprep.subr.bf16.mxu1 %v14426_v56 }
 0xb44   : > { %5112 = vmatpush1.bf16.msra.mxu0 %v14428_v57  ;;  %5155 = vmatpush1.bf16.msra.mxu1 %v14430_v58 }
 0xb45   : > { %5113 = vmatprep.subr.bf16.mxu0 %v14434_v60  ;;  %5156 = vmatprep.subr.bf16.mxu1 %v14436_v5 }
 0xb48   : > { %5114 = vmatpush1.bf16.msra.mxu0 %v14440_v37  ;;  %5157 = vmatpush1.bf16.msra.mxu1 %v14442_v38 }
 0xb49   : > { %5115 = vmatprep.subr.bf16.mxu0 %v14446_v39  ;;  %5158 = vmatprep.subr.bf16.mxu1 %v14448_v40 }
 0xb4c   : > { %5116 = vmatpush1.bf16.msra.mxu0 %v14452_v41  ;;  %5159 = vmatpush1.bf16.msra.mxu1 %v14454_v42 }
 0xb4d   : > { %5117 = vmatprep.subr.bf16.mxu0 %v14458_v44  ;;  %5160 = vmatprep.subr.bf16.mxu1 %v14460_v46 }
 0xb50   : > { %5118 = vmatpush1.bf16.msra.mxu0 %v14464_v50  ;;  %5161 = vmatpush1.bf16.msra.mxu1 %v14466_v22 }
 0xb51   : > { %5568 = vmatprep.subr.bf16.mxu0 %v12498_v10  ;;  %5721 = vmatprep.subr.bf16.mxu1 %v12501_v51  ;;  %v12496_v51 = vld [vmem:[#allocation6 + $0x100] ss:$16 sps:$4 sm:$0xff]  }
 0xc05   : > { %v4781_v53 = vpop.f32.mrb[40].mxu0  ;;  %v4824_v54 = vpop.f32.mrb[40].mxu1 }
 0xc06   : > { %v11837_v55 = vadd.f32 %v4781_v53, %v13991_v19  ;;  %v4783_v56 = vpop.f32.mrb[41].mxu0  ;;  %v4826_v57 = vpop.f32.mrb[41].mxu1  ;;  %v11885_v22 = vadd.f32 %v4824_v54, %v14009_v7  ;;  %v12499_v53 = vld [vmem:[#allocation6 + $0x108] ss:$16 sps:$4 sm:$0xff]  }
 0xc07   : > { %v11838_v58 = vadd.f32 %v4783_v56, %v13995_v20  ;;  %v4785_v60 = vpop.f32.mrb[42].mxu0  ;;  %v4828_v5 = vpop.f32.mrb[42].mxu1  ;;  %v11886_v50 = vadd.f32 %v4826_v57, %v14004_v43  ;;  %v12502_v56 = vld [vmem:[#allocation6 + $0x120] ss:$16 sps:$4 sm:$0xff]   ;;  %v12505_v57 = vld [vmem:[#allocation6 + $0x128] ss:$16 sps:$4 sm:$0xff]  }
 0xc08   : > { %v10919_v37 = vmul.f32 -1.442695, %v11837_v55  ;;  %v11839_v38 = vadd.f32 %v4785_v60, %v13991_v19  ;;  %v4787_v39 = vpop.f32.mrb[43].mxu0  ;;  %v4830_v40 = vpop.f32.mrb[43].mxu1  ;;  %v11887_v32 = vadd.f32 %v4828_v5, %v14009_v7  ;;  %v12504_v55 = vld [vmem:[#allocation6 + $0x124] ss:$16 sps:$4 sm:$0xff]  }
 0xc09   : > { %v10921_v41 = vmul.f32 -1.442695, %v11838_v58  ;;  %v11840_v42 = vadd.f32 %v4787_v39, %v13995_v20  ;;  %v10923_v30 = vmul.f32 -1.442695, %v11886_v50  ;;  %v11888_v62 = vadd.f32 %v4830_v40, %v14004_v43  ;;  %v12510_v58 = vld [vmem:[#allocation6 + $0x144] ss:$16 sps:$4 sm:$0xff]  }
 0xc0a   : > { %13035 = vpow2.f32 %v10919_v37  ;;  %v10920_v44 = vmul.f32 -1.442695, %v11839_v38  ;;  %v12513_v60 = vld [vmem:[#allocation6 + $0x14c] ss:$16 sps:$4 sm:$0xff]   ;;  %v12508_v5 = vld [vmem:[#allocation6 + $0x140] ss:$16 sps:$4 sm:$0xff]  }
 0xc0b   : > { %13037 = vpow2.f32 %v10921_v41  ;;  %v10922_v46 = vmul.f32 -1.442695, %v11840_v42  ;;  %v10924_v61 = vmul.f32 -1.442695, %v11888_v62  ;;  %v12511_v37 = vld [vmem:[#allocation6 + $0x148] ss:$16 sps:$4 sm:$0xff]  }
 0xc0c   : > { %13039 = vpow2.f32 %v10920_v44  ;;  %v12516_v38 = vld [vmem:[#allocation6 + $0x164] ss:$16 sps:$4 sm:$0xff]   ;;  %v12519_v39 = vld [vmem:[#allocation6 + $0x16c] ss:$16 sps:$4 sm:$0xff]   ;;  %v12514_v40 = vld [vmem:[#allocation6 + $0x160] ss:$16 sps:$4 sm:$0xff]  }
 0xc0d   : > { %13041 = vpow2.f32 %v10922_v46  ;;  %v12517_v41 = vld [vmem:[#allocation6 + $0x168] ss:$16 sps:$4 sm:$0xff]   ;;  %v12522_v42 = vld [vmem:[#allocation6 + $0x184] ss:$16 sps:$4 sm:$0xff]   ;;  %v12525_v44 = vld [vmem:[#allocation6 + $0x18c] ss:$16 sps:$4 sm:$0xff]  }
 0xc0e   : > { %13043 = vtanh.f32 %v11885_v22  ;;  %v12520_v46 = vld [vmem:[#allocation6 + $0x180] ss:$16 sps:$4 sm:$0xff]   ;;  %v12523_v50 = vld [vmem:[#allocation6 + $0x188] ss:$16 sps:$4 sm:$0xff]   ;;  %v12528_v22 = vld [vmem:[#allocation6 + $0x1a4] ss:$16 sps:$4 sm:$0xff]  }
 0xc0f   : > { %13045 = vpow2.f32 %v10923_v30  ;;  %v12531_v30 = vld [vmem:[#allocation6 + $0x1ac] ss:$16 sps:$4 sm:$0xff]   ;;  %v12526_v62 = vld [vmem:[#allocation6 + $0x1a0] ss:$16 sps:$4 sm:$0xff]  }
 0xc10   : > { %13047 = vtanh.f32 %v11887_v32  ;;  %v12529_v32 = vld [vmem:[#allocation6 + $0x1a8] ss:$16 sps:$4 sm:$0xff]  }
 0xc14   : > { %v13036_v33 = vpop.eup %13035 }
 0xc15   : > { %v13038_v34 = vpop.eup %13037  ;;  %v4847_v6 = vadd.f32 1.0, %v13036_v33  ;;  %v12534_v33 = vld [vmem:[#allocation6 + $0x1c4] ss:$16 sps:$4 sm:$0xff]  }
 0xc16   : > { %v4859_v59 = vadd.f32 1.0, %v13038_v34  ;;  %v13040_v9 = vpop.eup %13039  ;;  %v12537_v34 = vld [vmem:[#allocation6 + $0x1cc] ss:$16 sps:$4 sm:$0xff]  }
 0xc17   : > { %13049 = vrcp.f32 %v4847_v6  ;;  %v4848_v11 = vadd.f32 1.0, %v13040_v9  ;;  %v13042_v28 = vpop.eup %13041  ;;  %v12532_v6 = vld [vmem:[#allocation6 + $0x1c0] ss:$16 sps:$4 sm:$0xff]   ;;  %v12543_v9 = vld [vmem:[#allocation6 + $0x1ec] ss:$16 sps:$4 sm:$0xff]  }
 0xc18   : > { %13051 = vrcp.f32 %v4859_v59  ;;  %v4860_v3 = vadd.f32 1.0, %v13042_v28  ;;  %v13044_v29 = vpop.eup %13043  ;;  %v12540_v59 = vld [vmem:[#allocation6 + $0x1e4] ss:$16 sps:$4 sm:$0xff]   ;;  %v12541_v28 = vld [vmem:[#allocation6 + $0x1e8] ss:$16 sps:$4 sm:$0xff]  }
 0xc19   : > { %13053 = vpow2.f32 %v10924_v61  ;;  %v13046_v13 = vpop.eup %13045  ;;  %v12535_v61 = vld [vmem:[#allocation6 + $0x1c8] ss:$16 sps:$4 sm:$0xff]  }
 0xc1a   : > { %13055 = vrcp.f32 %v4848_v11  ;;  %v13048_v21 = vpop.eup %13047  ;;  %v4873_v4 = vadd.f32 1.0, %v13046_v13  ;;  %v12538_v11 = vld [vmem:[#allocation6 + $0x1e0] ss:$16 sps:$4 sm:$0xff]  }
 0xc1b   : > { %13057 = vrcp.f32 %v4860_v3  ;;  %v14632_v3 = vld [vmem:[#allocation8 + $0x104] ss:$16 sps:$4 sm:$0xff]  }
 0xc1c   : > { %13059 = vrcp.f32 %v4873_v4  ;;  %v12544_v13 = vld [vmem:[%s14023_s29] sm:$0xff]   ;;  %v12546_v4 = vld [vmem:[%s14023_s29 + $0x10] sm:$0xff]  }
 0xc21   : > { %v13050_v36 = vpop.eup %13049 }
 0xc22   : > { %v13052_v35 = vpop.eup %13051  ;;  %v4881_v2 = vmul.f32 %v13050_v36, %v13044_v29  ;;  %v14634_v29 = vld [vmem:[#allocation8 + $0x10c] ss:$16 sps:$4 sm:$0xff]   ;;  %v14640_v36 = vld [vmem:[#allocation8 + $0x108] ss:$16 sps:$4 sm:$0xff]  }
 0xc23   : > { %v13054_v12 = vpop.eup %13053  ;;  %v4879_v14 = vmul.f32 %v13052_v35, %v14583_v52  ;;  %v14643_v35 = vld [vmem:[#allocation8 + $0x124] ss:$16 sps:$4 sm:$0xff]  }
 0xc24   : > { %v13056_v17 = vpop.eup %13055  ;;  %v4874_v25 = vadd.f32 1.0, %v13054_v12  ;;  %v14652_v12 = vld [vmem:[#allocation8 + $0x144] ss:$16 sps:$4 sm:$0xff]  }
 0xc25   : > { %v14622_v1 = vadd.f32 %v4881_v2, %v4879_v14  ;;  %v4882_v8 = vmul.f32 %v13056_v17, %v13048_v21  ;;  %v13058_v24 = vpop.eup %13057  ;;  %v14637_v21 = vld [vmem:[#allocation8 + $0x100] ss:$16 sps:$4 sm:$0xff]   ;;  %v12545_v14 = vld [vmem:[%s14023_s29 + $0x8] sm:$0xff]  }
 0xc26   : > { %v4880_v48 = vmul.f32 %v13058_v24, %v14587_v47  ;;  %v13060_v27 = vpop.eup %13059  ;;  %v12507_v47 = vld [vmem:[#allocation6 + $0x12c] ss:$16 sps:$4 sm:$0xff]   ;;  %v14648_v2 = vld [vmem:[#allocation8 + $0x120] ss:$16 sps:$4 sm:$0xff]  }
 0xc27   : > { %13061 = vtanh.f32 %v14622_v1  ;;  %v14656_v17 = vld [vmem:[#allocation8 + $0x140] ss:$16 sps:$4 sm:$0xff]  }
 0xc28   : > { %v14626_v63 = vadd.f32 %v4882_v8, %v4880_v48  ;;  %13063 = vrcp.f32 %v4874_v25  ;;  %v12547_v8 = vld [vmem:[%s14023_s29 + $0x18] sm:$0xff]   ;;  %v12548_v24 = vld [vmem:[%s14023_s29 + $0x20] sm:$0xff]   ;;  %v12549_v25 = vld [vmem:[%s14023_s29 + $0x28] sm:$0xff]  }
 0xc29   : > { %v12550_v48 = vld [vmem:[%s14023_s29 + $0x30] sm:$0xff]  }
 0xc2a   : > { %13065 = vtanh.f32 %v14626_v63 }
 0xc31   : > { %v13062_v52 = vpop.eup %13061 }
 0xc32   : > { %v13064_v45 = vpop.eup %13063  ;;  %v4887_v49 = vmul.f32 %v13062_v52, %v13060_v27  ;;  %v12551_v27 = vld [vmem:[%s14023_s29 + $0x38] sm:$0xff]   ;;  %v12552_v52 = vld [vmem:[%s14023_s29 + $0x40] sm:$0xff]  }
 0xc34   : > { %v13066_v26 = vpop.eup %13065 }
 0xc35   : > { %v4888_v10 = vmul.f32 %v13066_v26, %v13064_v45  ;;  %v12553_v45 = vld [vmem:[%s14023_s29 + $0x48] sm:$0xff]  }
 0xc37   : > { %v4889_v54 = vpack.c.bf16 %v4888_v10, %v4887_v49  ;;  %v14687_v49 = vld [vmem:[#allocation8 + $0x128] ss:$16 sps:$4 sm:$0xff]   ;;  %v14689_v10 = vld [vmem:[#allocation8 + $0x12c] ss:$16 sps:$4 sm:$0xff]  }
 0xc39   : > { %11761 = vst [vmem:[%s14023_s29 + $0x50] sm:$0xff] %v4889_v54   ;;  %5136 = vmatmul.mubr.bf16.vlgmr.msra.gmra.mrb[44].mxu0 %v4889_v54  ;;  %5179 = vmatmul.mubr.bf16.vlgmr.msra.gmra.mrb[44].mxu1 %v4889_v54  ;;  %v14701_v54 = vld [vmem:[#allocation8 + $0x164] ss:$16 sps:$4 sm:$0xff]  }
 0xc3a   : > { %5569 = vmatpush1.bf16.msra.mxu0 %v12496_v51  ;;  %5722 = vmatpush1.bf16.msra.mxu1 %v12499_v53  ;;  %v14695_v51 = vld [vmem:[#allocation8 + $0x14c] ss:$16 sps:$4 sm:$0xff]   ;;  %v14697_v53 = vld [vmem:[#allocation8 + $0x148] ss:$16 sps:$4 sm:$0xff]  }
 0xc3b   : > { %5570 = vmatprep.subr.bf16.mxu0 %v12504_v55  ;;  %5723 = vmatprep.subr.bf16.mxu1 %v12507_v47  ;;  %v14703_v55 = vld [vmem:[#allocation8 + $0x16c] ss:$16 sps:$4 sm:$0xff]   ;;  %v14705_v47 = vld [vmem:[#allocation8 + $0x160] ss:$16 sps:$4 sm:$0xff]  }
 0xc3c   : > { %5600 = vmatprep.mubr.bf16.mxu0 %v13613_v0  ;;  %5753 = vmatprep.mubr.bf16.mxu1 %v13613_v0 }
 0xc3e   : > { %5571 = vmatpush1.bf16.msra.mxu0 %v12502_v56  ;;  %5724 = vmatpush1.bf16.msra.mxu1 %v12505_v57  ;;  %v14707_v56 = vld [vmem:[#allocation8 + $0x168] ss:$16 sps:$4 sm:$0xff]   ;;  %v14712_v57 = vld [vmem:[#allocation8 + $0x180] ss:$16 sps:$4 sm:$0xff]  }
 0xc3f   : > { %5572 = vmatprep.subr.bf16.mxu0 %v12510_v58  ;;  %5725 = vmatprep.subr.bf16.mxu1 %v12513_v60  ;;  %v14714_v58 = vld [vmem:[#allocation8 + $0x184] ss:$16 sps:$4 sm:$0xff]  }
 0xc40   : > { %v12554_v26 = vld [vmem:[%s14023_s29 + $0x50] sm:$0xff]  }
 0xc41   : > { %v14717_v60 = vld [vmem:[#allocation8 + $0x1a4] ss:$16 sps:$4 sm:$0xff]  }
 0xc42   : > { %5573 = vmatpush1.bf16.msra.mxu0 %v12508_v5  ;;  %5726 = vmatpush1.bf16.msra.mxu1 %v12511_v37  ;;  %v14719_v5 = vld [vmem:[#allocation8 + $0x188] ss:$16 sps:$4 sm:$0xff]   ;;  %v14721_v37 = vld [vmem:[#allocation8 + $0x18c] ss:$16 sps:$4 sm:$0xff]  }
 0xc43   : > { %5574 = vmatprep.subr.bf16.mxu0 %v12516_v38  ;;  %5727 = vmatprep.subr.bf16.mxu1 %v12519_v39  ;;  %v14725_v38 = vld [vmem:[#allocation8 + $0x1ac] ss:$16 sps:$4 sm:$0xff]   ;;  %v14728_v39 = vld [vmem:[#allocation8 + $0x1a0] ss:$16 sps:$4 sm:$0xff]  }
 0xc46   : > { %5575 = vmatpush1.bf16.msra.mxu0 %v12514_v40  ;;  %5728 = vmatpush1.bf16.msra.mxu1 %v12517_v41  ;;  %v14731_v40 = vld [vmem:[#allocation8 + $0x1a8] ss:$16 sps:$4 sm:$0xff]   ;;  %v14734_v41 = vld [vmem:[#allocation8 + $0x1c4] ss:$16 sps:$4 sm:$0xff]  }
 0xc47   : > { %5576 = vmatprep.subr.bf16.mxu0 %v12522_v42  ;;  %5729 = vmatprep.subr.bf16.mxu1 %v12525_v44  ;;  %v14737_v42 = vld [vmem:[#allocation8 + $0x1cc] ss:$16 sps:$4 sm:$0xff]   ;;  %v14740_v44 = vld [vmem:[#allocation8 + $0x1c0] ss:$16 sps:$4 sm:$0xff]  }
 0xc4a   : > { %5577 = vmatpush1.bf16.msra.mxu0 %v12520_v46  ;;  %5730 = vmatpush1.bf16.msra.mxu1 %v12523_v50  ;;  %v14743_v46 = vld [vmem:[#allocation8 + $0x1c8] ss:$16 sps:$4 sm:$0xff]   ;;  %v14746_v50 = vld [vmem:[#allocation8 + $0x1e4] ss:$16 sps:$4 sm:$0xff]  }
 0xc4b   : > { %5578 = vmatprep.subr.bf16.mxu0 %v12528_v22  ;;  %5731 = vmatprep.subr.bf16.mxu1 %v12531_v30  ;;  %v14749_v22 = vld [vmem:[#allocation8 + $0x1ec] ss:$16 sps:$4 sm:$0xff]   ;;  %v14752_v30 = vld [vmem:[#allocation8 + $0x1e0] ss:$16 sps:$4 sm:$0xff]  }
 0xc4e   : > { %5579 = vmatpush1.bf16.msra.mxu0 %v12526_v62  ;;  %5732 = vmatpush1.bf16.msra.mxu1 %v12529_v32  ;;  %v14755_v62 = vld [vmem:[#allocation8 + $0x1e8] ss:$16 sps:$4 sm:$0xff]  }
 0xc4f   : > { %5580 = vmatprep.subr.bf16.mxu0 %v12534_v33  ;;  %5733 = vmatprep.subr.bf16.mxu1 %v12537_v34 }
 0xc52   : > { %5581 = vmatpush1.bf16.msra.mxu0 %v12532_v6  ;;  %5734 = vmatpush1.bf16.msra.mxu1 %v12535_v61 }
 0xc53   : > { %5582 = vmatprep.subr.bf16.mxu0 %v12540_v59  ;;  %5735 = vmatprep.subr.bf16.mxu1 %v12543_v9 }
 0xc56   : > { %5583 = vmatpush1.bf16.msra.mxu0 %v12538_v11  ;;  %5736 = vmatpush1.bf16.msra.mxu1 %v12541_v28 }
 0xc57   : > { %6171 = vmatprep.subr.bf16.mxu0 %v14632_v3  ;;  %6214 = vmatprep.subr.bf16.mxu1 %v14634_v29 }
 0xc59   : > { %5601 = vmatmul.mubr.bf16.vlgmr.msra.gmra.mrb[48].mxu0 %v12544_v13  ;;  %5754 = vmatmul.mubr.bf16.vlgmr.msra.gmra.mrb[48].mxu1 %v12544_v13 }
 0xc5a   : > { %5610 = vmatprep.mubr.bf16.mxu0 %v13613_v0  ;;  %5763 = vmatprep.mubr.bf16.mxu1 %v13613_v0 }
 0xc5b   : > { %6172 = vmatpush1.bf16.msra.mxu0 %v14637_v21  ;;  %6215 = vmatpush1.bf16.msra.mxu1 %v14640_v36 }
 0xc5c   : > { %6173 = vmatprep.subr.bf16.mxu0 %v14643_v35  ;;  %6216 = vmatprep.subr.bf16.mxu1 %v14689_v10 }
 0xc5f   : > { %6174 = vmatpush1.bf16.msra.mxu0 %v14648_v2  ;;  %6217 = vmatpush1.bf16.msra.mxu1 %v14687_v49 }
 0xc60   : > { %6175 = vmatprep.subr.bf16.mxu0 %v14652_v12  ;;  %6218 = vmatprep.subr.bf16.mxu1 %v14695_v51 }
 0xc61   : > { %5611 = vmatmul.mubr.bf16.gmra.mrb[52].mxu0 %v12545_v14  ;;  %5764 = vmatmul.mubr.bf16.gmra.mrb[52].mxu1 %v12545_v14 }
 0xc62   : > { %5620 = vmatprep.mubr.bf16.mxu0 %v13613_v0  ;;  %5773 = vmatprep.mubr.bf16.mxu1 %v13613_v0 }
 0xc63   : > { %6176 = vmatpush1.bf16.msra.mxu0 %v14656_v17  ;;  %6219 = vmatpush1.bf16.msra.mxu1 %v14697_v53 }
 0xc64   : > { %6177 = vmatprep.subr.bf16.mxu0 %v14701_v54  ;;  %6220 = vmatprep.subr.bf16.mxu1 %v14703_v55 }
 0xc67   : > { %6178 = vmatpush1.bf16.msra.mxu0 %v14705_v47  ;;  %6221 = vmatpush1.bf16.msra.mxu1 %v14707_v56 }
 0xc68   : > { %6179 = vmatprep.subr.bf16.mxu0 %v14714_v58  ;;  %6222 = vmatprep.subr.bf16.mxu1 %v14721_v37 }
 0xc69   : > { %5621 = vmatmul.mubr.bf16.gmra.mrb[56].mxu0 %v12546_v4  ;;  %5774 = vmatmul.mubr.bf16.gmra.mrb[56].mxu1 %v12546_v4 }
 0xc6a   : > { %5630 = vmatprep.mubr.bf16.mxu0 %v13613_v0  ;;  %5783 = vmatprep.mubr.bf16.mxu1 %v13613_v0 }
 0xc6b   : > { %6180 = vmatpush1.bf16.msra.mxu0 %v14712_v57  ;;  %6223 = vmatpush1.bf16.msra.mxu1 %v14719_v5 }
 0xc6c   : > { %6181 = vmatprep.subr.bf16.mxu0 %v14717_v60  ;;  %6224 = vmatprep.subr.bf16.mxu1 %v14725_v38 }
 0xc6f   : > { %6182 = vmatpush1.bf16.msra.mxu0 %v14728_v39  ;;  %6225 = vmatpush1.bf16.msra.mxu1 %v14731_v40 }
 0xc70   : > { %6183 = vmatprep.subr.bf16.mxu0 %v14734_v41  ;;  %6226 = vmatprep.subr.bf16.mxu1 %v14737_v42 }
 0xc71   : > { %5631 = vmatmul.mubr.bf16.gmra.mrb[60].mxu0 %v12547_v8  ;;  %5784 = vmatmul.mubr.bf16.gmra.mrb[60].mxu1 %v12547_v8 }
 0xc72   : > { %5640 = vmatprep.mubr.bf16.mxu0 %v13613_v0  ;;  %5793 = vmatprep.mubr.bf16.mxu1 %v13613_v0 }
 0xc73   : > { %6184 = vmatpush1.bf16.msra.mxu0 %v14740_v44  ;;  %6227 = vmatpush1.bf16.msra.mxu1 %v14743_v46 }
 0xc74   : > { %6185 = vmatprep.subr.bf16.mxu0 %v14746_v50  ;;  %6228 = vmatprep.subr.bf16.mxu1 %v14749_v22 }
 0xc77   : > { %6186 = vmatpush1.bf16.msra.mxu0 %v14752_v30  ;;  %6229 = vmatpush1.bf16.msra.mxu1 %v14755_v62 }
 0xc78   : > { %6523 = vmatprep.subr.bf16.mxu0 %v14632_v3  ;;  %6566 = vmatprep.subr.bf16.mxu1 %v14634_v29 }
 0xc79   : > { %5641 = vmatmul.mubr.bf16.gmra.mrb[64].mxu0 %v12548_v24  ;;  %5794 = vmatmul.mubr.bf16.gmra.mrb[64].mxu1 %v12548_v24 }
 0xc7a   : > { %5650 = vmatprep.mubr.bf16.mxu0 %v13613_v0  ;;  %5803 = vmatprep.mubr.bf16.mxu1 %v13613_v0 }
 0xc81   : > { %5651 = vmatmul.mubr.bf16.gmra.mrb[68].mxu0 %v12549_v25  ;;  %5804 = vmatmul.mubr.bf16.gmra.mrb[68].mxu1 %v12549_v25 }
 0xc82   : > { %5660 = vmatprep.mubr.bf16.mxu0 %v13613_v0  ;;  %5813 = vmatprep.mubr.bf16.mxu1 %v13613_v0 }
 0xc89   : > { %5661 = vmatmul.mubr.bf16.gmra.mrb[72].mxu0 %v12550_v48  ;;  %5814 = vmatmul.mubr.bf16.gmra.mrb[72].mxu1 %v12550_v48 }
 0xc8a   : > { %5670 = vmatprep.mubr.bf16.mxu0 %v13613_v0  ;;  %5823 = vmatprep.mubr.bf16.mxu1 %v13613_v0 }
 0xc91   : > { %5671 = vmatmul.mubr.bf16.gmra.mrb[76].mxu0 %v12551_v27  ;;  %5824 = vmatmul.mubr.bf16.gmra.mrb[76].mxu1 %v12551_v27 }
 0xc92   : > { %5680 = vmatprep.mubr.bf16.mxu0 %v13613_v0  ;;  %5833 = vmatprep.mubr.bf16.mxu1 %v13613_v0 }
 0xc99   : > { %5681 = vmatmul.mubr.bf16.gmra.mrb[80].mxu0 %v12552_v52  ;;  %5834 = vmatmul.mubr.bf16.gmra.mrb[80].mxu1 %v12552_v52 }
 0xc9a   : > { %5690 = vmatprep.mubr.bf16.mxu0 %v13613_v0  ;;  %5843 = vmatprep.mubr.bf16.mxu1 %v13613_v0 }
 0xca1   : > { %5691 = vmatmul.mubr.bf16.gmra.mrb[84].mxu0 %v12553_v45  ;;  %5844 = vmatmul.mubr.bf16.gmra.mrb[84].mxu1 %v12553_v45 }
 0xca2   : > { %5700 = vmatprep.mubr.bf16.mxu0 %v13613_v0  ;;  %5853 = vmatprep.mubr.bf16.mxu1 %v13613_v0 }
 0xca9   : > { %5701 = vmatmul.mubr.bf16.gmra.mrb[88].mxu0 %v12554_v26  ;;  %5854 = vmatmul.mubr.bf16.gmra.mrb[88].mxu1 %v12554_v26 }
 0xcaa   : > { %5710 = vmatprep.mubr.bf16.mxu0 %v13613_v0  ;;  %5863 = vmatprep.mubr.bf16.mxu1 %v13613_v0 }
 0xd0c   : > { %v5137_v32 = vpop.f32.mrb[44].mxu0  ;;  %v5180_v33 = vpop.f32.mrb[44].mxu1 }
 0xd0d   : > { %v11841_v34 = vadd.f32 %v5137_v32, %v13991_v19  ;;  %v5139_v6 = vpop.f32.mrb[45].mxu0  ;;  %v5182_v61 = vpop.f32.mrb[45].mxu1  ;;  %v11889_v52 = vadd.f32 %v5180_v33, %v14009_v7 }
 0xd0e   : > { %v11842_v59 = vadd.f32 %v5139_v6, %v13995_v20  ;;  %v5141_v9 = vpop.f32.mrb[46].mxu0  ;;  %v5184_v11 = vpop.f32.mrb[46].mxu1  ;;  %v11890_v27 = vadd.f32 %v5182_v61, %v14004_v43 }
 0xd0f   : > { %v10961_v28 = vmul.f32 -1.442695, %v11841_v34  ;;  %v11843_v13 = vadd.f32 %v5141_v9, %v13991_v19  ;;  %v5143_v14 = vpop.f32.mrb[47].mxu0  ;;  %v5186_v4 = vpop.f32.mrb[47].mxu1  ;;  %v11891_v19 = vadd.f32 %v5184_v11, %v14009_v7 }
 0xd10   : > { %v10963_v8 = vmul.f32 -1.442695, %v11842_v59  ;;  %v11844_v24 = vadd.f32 %v5143_v14, %v13995_v20  ;;  %v10965_v45 = vmul.f32 -1.442695, %v11890_v27  ;;  %v11892_v26 = vadd.f32 %v5186_v4, %v14004_v43 }
 0xd11   : > { %13067 = vpow2.f32 %v10961_v28  ;;  %v10962_v25 = vmul.f32 -1.442695, %v11843_v13 }
 0xd12   : > { %13069 = vpow2.f32 %v10963_v8  ;;  %v10964_v48 = vmul.f32 -1.442695, %v11844_v24  ;;  %v10966_v20 = vmul.f32 -1.442695, %v11892_v26 }
 0xd13   : > { %13071 = vpow2.f32 %v10962_v25 }
 0xd14   : > { %13073 = vpow2.f32 %v10964_v48 }
 0xd15   : > { %13075 = vtanh.f32 %v11889_v52 }
 0xd16   : > { %13077 = vpow2.f32 %v10965_v45 }
 0xd17   : > { %13079 = vtanh.f32 %v11891_v19 }
 0xd1b   : > { %v13068_v32 = vpop.eup %13067 }
 0xd1c   : > { %v13070_v34 = vpop.eup %13069  ;;  %v5203_v6 = vadd.f32 1.0, %v13068_v32 }
 0xd1d   : > { %v5215_v59 = vadd.f32 1.0, %v13070_v34  ;;  %v13072_v9 = vpop.eup %13071 }
 0xd1e   : > { %13081 = vrcp.f32 %v5203_v6  ;;  %v5204_v61 = vadd.f32 1.0, %v13072_v9  ;;  %v13074_v28 = vpop.eup %13073 }
 0xd1f   : > { %13083 = vrcp.f32 %v5215_v59  ;;  %v5216_v33 = vadd.f32 1.0, %v13074_v28  ;;  %v13076_v43 = vpop.eup %13075 }
 0xd20   : > { %13085 = vpow2.f32 %v10966_v20  ;;  %v13078_v13 = vpop.eup %13077 }
 0xd21   : > { %13087 = vrcp.f32 %v5204_v61  ;;  %v13080_v7 = vpop.eup %13079  ;;  %v5229_v8 = vadd.f32 1.0, %v13078_v13 }
 0xd22   : > { %13089 = vrcp.f32 %v5216_v33 }
 0xd23   : > { %13091 = vrcp.f32 %v5229_v8 }
 0xd28   : > { %v13082_v11 = vpop.eup %13081 }
 0xd29   : > { %v13084_v14 = vpop.eup %13083  ;;  %v5237_v4 = vmul.f32 %v13082_v11, %v13076_v43 }
 0xd2a   : > { %v13086_v24 = vpop.eup %13085  ;;  %v5235_v25 = vmul.f32 %v13084_v14, %v14622_v1 }
 0xd2b   : > { %v13088_v48 = vpop.eup %13087  ;;  %v5230_v26 = vadd.f32 1.0, %v13086_v24 }
 0xd2c   : > { %v5239_v27 = vadd.f32 %v5237_v4, %v5235_v25  ;;  %v5238_v52 = vmul.f32 %v13088_v48, %v13080_v7  ;;  %v13090_v45 = vpop.eup %13089 }
 0xd2d   : > { %v5236_v19 = vmul.f32 %v13090_v45, %v14626_v63  ;;  %v13092_v34 = vpop.eup %13091  ;;  %v10971_v63 = vld [vmem:[%s15585_s3 + $0x4] sm:$0xf] }
 0xd2e   : > { %13093 = vtanh.f32 %v5239_v27  ;;  %v14818_v33 = vrot.slane %v10971_v63, %v333_v16  ;;  %v14822_v43 = vrot.slane %v10971_v63, %v337_v18  ;;  %v14829_v18 = vrot.slane %v10971_v63, %v345_v23 }
 0xd2f   : > { %v5240_v32 = vadd.f32 %v5238_v52, %v5236_v19  ;;  %13095 = vrcp.f32 %v5230_v26  ;;  %v14834_v19 = vrot.slane %v10971_v63, %v341_v31 }
 0xd31   : > { %13097 = vtanh.f32 %v5240_v32 }
 0xd38   : > { %v13094_v6 = vpop.eup %13093 }
 0xd39   : > { %v5243_v20 = vmul.f32 %v13094_v6, %v13092_v34  ;;  %v13096_v59 = vpop.eup %13095 }
 0xd3b   : > { %v13098_v9 = vpop.eup %13097 }
 0xd3c   : > { %v5244_v1 = vmul.f32 %v13098_v9, %v13096_v59 }
 0xd3e   : > { %v11630_v61 = vpack.c.bf16 %v5244_v1, %v5243_v20 }
 0xd40   : > { %11762 = vst [vmem:[%s14023_s29 + $0x58] sm:$0xff] %v11630_v61  }
 0xd47   : > { %v12600_v28 = vld [vmem:[%s14023_s29 + $0x58] sm:$0xff]  }
 0xd48   : > { %5711 = vmatmul.mubr.bf16.gmra.mrb[92].mxu0 %v12600_v28  ;;  %5864 = vmatmul.mubr.bf16.gmra.mrb[92].mxu1 %v12600_v28 }
 0xd49   : > { %6203 = vmatprep.mubr.bf16.mxu0 %v13613_v0  ;;  %6246 = vmatprep.mubr.bf16.mxu1 %v13613_v0 }
 0xd50   : > { %6204 = vmatmul.mubr.bf16.vlgmr.msra.gmra.mrb[48].mxu0 %v13613_v0  ;;  %6247 = vmatmul.mubr.bf16.vlgmr.msra.gmra.mrb[48].mxu1 %v13613_v0 }
 0xd51   : > { %6524 = vmatpush1.bf16.msra.mxu0 %v14637_v21  ;;  %6567 = vmatpush1.bf16.msra.mxu1 %v14640_v36 }
 0xd52   : > { %6525 = vmatprep.subr.bf16.mxu0 %v14643_v35  ;;  %6568 = vmatprep.subr.bf16.mxu1 %v14689_v10 }
 0xd53   : > { %6555 = vmatprep.mubr.bf16.mxu0 %v13613_v0  ;;  %6598 = vmatprep.mubr.bf16.mxu1 %v13613_v0 }
 0xd55   : > { %6526 = vmatpush1.bf16.msra.mxu0 %v14648_v2  ;;  %6569 = vmatpush1.bf16.msra.mxu1 %v14687_v49 }
 0xd56   : > { %6527 = vmatprep.subr.bf16.mxu0 %v14652_v12  ;;  %6570 = vmatprep.subr.bf16.mxu1 %v14695_v51 }
 0xd59   : > { %6528 = vmatpush1.bf16.msra.mxu0 %v14656_v17  ;;  %6571 = vmatpush1.bf16.msra.mxu1 %v14697_v53 }
 0xd5a   : > { %6529 = vmatprep.subr.bf16.mxu0 %v14701_v54  ;;  %6572 = vmatprep.subr.bf16.mxu1 %v14703_v55 }
 0xd5d   : > { %6530 = vmatpush1.bf16.msra.mxu0 %v14705_v47  ;;  %6573 = vmatpush1.bf16.msra.mxu1 %v14707_v56 }
 0xd5e   : > { %6531 = vmatprep.subr.bf16.mxu0 %v14714_v58  ;;  %6574 = vmatprep.subr.bf16.mxu1 %v14721_v37 }
 0xd61   : > { %6532 = vmatpush1.bf16.msra.mxu0 %v14712_v57  ;;  %6575 = vmatpush1.bf16.msra.mxu1 %v14719_v5 }
 0xd62   : > { %6533 = vmatprep.subr.bf16.mxu0 %v14717_v60  ;;  %6576 = vmatprep.subr.bf16.mxu1 %v14725_v38 }
 0xd65   : > { %6534 = vmatpush1.bf16.msra.mxu0 %v14728_v39  ;;  %6577 = vmatpush1.bf16.msra.mxu1 %v14731_v40 }
 0xd66   : > { %6535 = vmatprep.subr.bf16.mxu0 %v14734_v41  ;;  %6578 = vmatprep.subr.bf16.mxu1 %v14737_v42 }
 0xd69   : > { %6536 = vmatpush1.bf16.msra.mxu0 %v14740_v44  ;;  %6579 = vmatpush1.bf16.msra.mxu1 %v14743_v46 }
 0xd6a   : > { %6537 = vmatprep.subr.bf16.mxu0 %v14746_v50  ;;  %6580 = vmatprep.subr.bf16.mxu1 %v14749_v22 }
 0xd6d   : > { %6538 = vmatpush1.bf16.msra.mxu0 %v14752_v30  ;;  %6581 = vmatpush1.bf16.msra.mxu1 %v14755_v62 }
 0xd6e   : > { %6875 = vmatprep.subr.bf16.mxu0 %v14632_v3  ;;  %6918 = vmatprep.subr.bf16.mxu1 %v14634_v29 }
 0xe23   : > { %v6205_v13 = vpop.f32.mrb[48].mxu0  ;;  %v6248_v7 = vpop.f32.mrb[48].mxu1 }
 0xe24   : > { %v11893_v11 = vadd.f32 %v6205_v13, %v14818_v33  ;;  %v6207_v14 = vpop.f32.mrb[49].mxu0  ;;  %v6250_v3 = vpop.f32.mrb[49].mxu1  ;;  %v11941_v34 = vadd.f32 %v6248_v7, %v14834_v19 }
 0xe25   : > { %v11894_v29 = vadd.f32 %v6207_v14, %v14822_v43  ;;  %v6209_v4 = vpop.f32.mrb[50].mxu0  ;;  %v6252_v8 = vpop.f32.mrb[50].mxu1  ;;  %v11942_v32 = vadd.f32 %v6250_v3, %v14829_v18 }
 0xe26   : > { %v11048_v24 = vmul.f32 -1.442695, %v11893_v11  ;;  %v11895_v25 = vadd.f32 %v6209_v4, %v14818_v33  ;;  %v6211_v48 = vpop.f32.mrb[51].mxu0  ;;  %v6254_v16 = vpop.f32.mrb[51].mxu1  ;;  %v11943_v20 = vadd.f32 %v6252_v8, %v14834_v19 }
 0xe27   : > { %v11050_v27 = vmul.f32 -1.442695, %v11894_v29  ;;  %v11896_v52 = vadd.f32 %v6211_v48, %v14822_v43  ;;  %v11052_v6 = vmul.f32 -1.442695, %v11942_v32  ;;  %v11944_v23 = vadd.f32 %v6254_v16, %v14829_v18 }
 0xe28   : > { %13099 = vpow2.f32 %v11048_v24  ;;  %v11049_v45 = vmul.f32 -1.442695, %v11895_v25 }
 0xe29   : > { %13101 = vpow2.f32 %v11050_v27  ;;  %v11051_v26 = vmul.f32 -1.442695, %v11896_v52  ;;  %v11053_v61 = vmul.f32 -1.442695, %v11944_v23 }
 0xe2a   : > { %13103 = vpow2.f32 %v11049_v45 }
 0xe2b   : > { %13105 = vpow2.f32 %v11051_v26 }
 0xe2c   : > { %13107 = vtanh.f32 %v11941_v34 }
 0xe2d   : > { %13109 = vpow2.f32 %v11052_v6 }
 0xe2e   : > { %13111 = vtanh.f32 %v11943_v20 }
 0xe32   : > { %v13100_v59 = vpop.eup %13099 }
 0xe33   : > { %v13102_v9 = vpop.eup %13101  ;;  %v6271_v1 = vadd.f32 1.0, %v13100_v59 }
 0xe34   : > { %v6283_v15 = vadd.f32 1.0, %v13102_v9  ;;  %v13104_v31 = vpop.eup %13103 }
 0xe35   : > { %13113 = vrcp.f32 %v6271_v1  ;;  %v6272_v28 = vadd.f32 1.0, %v13104_v31  ;;  %v13106_v63 = vpop.eup %13105 }
 0xe36   : > { %13115 = vrcp.f32 %v6283_v15  ;;  %v6284_v13 = vadd.f32 1.0, %v13106_v63  ;;  %v13108_v7 = vpop.eup %13107 }
 0xe37   : > { %13117 = vpow2.f32 %v11053_v61  ;;  %v13110_v11 = vpop.eup %13109 }
 0xe38   : > { %13119 = vrcp.f32 %v6272_v28  ;;  %v13112_v14 = vpop.eup %13111  ;;  %v6297_v48 = vadd.f32 1.0, %v13110_v11 }
 0xe39   : > { %13121 = vrcp.f32 %v6284_v13 }
 0xe3a   : > { %13123 = vrcp.f32 %v6297_v48 }
 0xe3f   : > { %v13114_v3 = vpop.eup %13113 }
 0xe40   : > { %v13116_v29 = vpop.eup %13115  ;;  %v6305_v4 = vmul.f32 %v13114_v3, %v13108_v7 }
 0xe41   : > { %v13118_v8 = vpop.eup %13117  ;;  %v6303_v24 = vmul.f32 0.0, %v13116_v29 }
 0xe42   : > { %v13120_v25 = vpop.eup %13119  ;;  %v6298_v45 = vadd.f32 1.0, %v13118_v8 }
 0xe43   : > { %v14840_v16 = vadd.f32 %v6305_v4, %v6303_v24  ;;  %v6306_v27 = vmul.f32 %v13120_v25, %v13112_v14  ;;  %v13122_v52 = vpop.eup %13121 }
 0xe44   : > { %v6304_v26 = vmul.f32 0.0, %v13122_v52  ;;  %v13124_v34 = vpop.eup %13123 }
 0xe45   : > { %13125 = vtanh.f32 %v14840_v16 }
 0xe46   : > { %v14843_v32 = vadd.f32 %v6306_v27, %v6304_v26  ;;  %13127 = vrcp.f32 %v6298_v45 }
 0xe48   : > { %13129 = vtanh.f32 %v14843_v32 }
 0xe4f   : > { %v13126_v6 = vpop.eup %13125 }
 0xe50   : > { %v13128_v23 = vpop.eup %13127  ;;  %v6311_v59 = vmul.f32 %v13126_v6, %v13124_v34 }
 0xe52   : > { %v13130_v20 = vpop.eup %13129 }
 0xe53   : > { %v6312_v9 = vmul.f32 %v13130_v20, %v13128_v23 }
 0xe55   : > { %v6313_v1 = vpack.c.bf16 %v6312_v9, %v6311_v59 }
 0xe57   : > { %11636 = vst [vmem:[%s14023_s29] sm:$0xff] %v6313_v1   ;;  %6556 = vmatmul.mubr.bf16.vlgmr.msra.gmra.mrb[52].mxu0 %v6313_v1  ;;  %6599 = vmatmul.mubr.bf16.vlgmr.msra.gmra.mrb[52].mxu1 %v6313_v1 }
 0xe58   : > { %6876 = vmatpush1.bf16.msra.mxu0 %v14637_v21  ;;  %6919 = vmatpush1.bf16.msra.mxu1 %v14640_v36 }
 0xe59   : > { %6877 = vmatprep.subr.bf16.mxu0 %v14643_v35  ;;  %6920 = vmatprep.subr.bf16.mxu1 %v14689_v10 }
 0xe5a   : > { %6907 = vmatprep.mubr.bf16.mxu0 %v13613_v0  ;;  %6950 = vmatprep.mubr.bf16.mxu1 %v13613_v0 }
 0xe5c   : > { %6878 = vmatpush1.bf16.msra.mxu0 %v14648_v2  ;;  %6921 = vmatpush1.bf16.msra.mxu1 %v14687_v49 }
 0xe5d   : > { %6879 = vmatprep.subr.bf16.mxu0 %v14652_v12  ;;  %6922 = vmatprep.subr.bf16.mxu1 %v14695_v51 }
 0xe5e   : > { %v10195_v21 = vld [vmem:[%s14023_s29] sm:$0xf]  ;;  %v10196_v61 = vld [vmem:[%s14023_s29 + $0x4] sm:$0xf] }
 0xe5f   : > { %v10219_v36 = vmax.bf16 %v13613_v0, %v10195_v21  ;;  %v10220_v35 = vmax.bf16 %v13613_v0, %v10196_v61 }
 0xe60   : > { %6880 = vmatpush1.bf16.msra.mxu0 %v14656_v17  ;;  %6923 = vmatpush1.bf16.msra.mxu1 %v14697_v53 }
 0xe61   : > { %v11774_v10 = vcombine.low %v10219_v36, %v10220_v35  ;;  %6881 = vmatprep.subr.bf16.mxu0 %v14701_v54  ;;  %6924 = vmatprep.subr.bf16.mxu1 %v14703_v55 }
 0xe63   : > { %11696 = vst [vmem:[%s14023_s29] sm:$0xff] %v11774_v10  }
 0xe64   : > { %6882 = vmatpush1.bf16.msra.mxu0 %v14705_v47  ;;  %6925 = vmatpush1.bf16.msra.mxu1 %v14707_v56 }
 0xe65   : > { %6883 = vmatprep.subr.bf16.mxu0 %v14714_v58  ;;  %6926 = vmatprep.subr.bf16.mxu1 %v14721_v37 }
 0xe68   : > { %6884 = vmatpush1.bf16.msra.mxu0 %v14712_v57  ;;  %6927 = vmatpush1.bf16.msra.mxu1 %v14719_v5 }
 0xe69   : > { %6885 = vmatprep.subr.bf16.mxu0 %v14717_v60  ;;  %6928 = vmatprep.subr.bf16.mxu1 %v14725_v38 }
 0xe6c   : > { %6886 = vmatpush1.bf16.msra.mxu0 %v14728_v39  ;;  %6929 = vmatpush1.bf16.msra.mxu1 %v14731_v40 }
 0xe6d   : > { %6887 = vmatprep.subr.bf16.mxu0 %v14734_v41  ;;  %6930 = vmatprep.subr.bf16.mxu1 %v14737_v42 }
 0xe70   : > { %6888 = vmatpush1.bf16.msra.mxu0 %v14740_v44  ;;  %6931 = vmatpush1.bf16.msra.mxu1 %v14743_v46 }
 0xe71   : > { %6889 = vmatprep.subr.bf16.mxu0 %v14746_v50  ;;  %6932 = vmatprep.subr.bf16.mxu1 %v14749_v22 }
 0xe74   : > { %6890 = vmatpush1.bf16.msra.mxu0 %v14752_v30  ;;  %6933 = vmatpush1.bf16.msra.mxu1 %v14755_v62 }
 0xf2a   : > { %v6557_v2 = vpop.f32.mrb[52].mxu0  ;;  %v6600_v12 = vpop.f32.mrb[52].mxu1 }
 0xf2b   : > { %v11897_v17 = vadd.f32 %v6557_v2, %v14818_v33  ;;  %v6559_v49 = vpop.f32.mrb[53].mxu0  ;;  %v6602_v15 = vpop.f32.mrb[53].mxu1  ;;  %v11945_v25 = vadd.f32 %v6600_v12, %v14834_v19 }
 0xf2c   : > { %v11898_v31 = vadd.f32 %v6559_v49, %v14822_v43  ;;  %v6561_v28 = vpop.f32.mrb[54].mxu0  ;;  %v6604_v63 = vpop.f32.mrb[54].mxu1  ;;  %v11946_v24 = vadd.f32 %v6602_v15, %v14829_v18 }
 0xf2d   : > { %v11088_v13 = vmul.f32 -1.442695, %v11897_v17  ;;  %v11899_v7 = vadd.f32 %v6561_v28, %v14818_v33  ;;  %v6563_v11 = vpop.f32.mrb[55].mxu0  ;;  %v6606_v14 = vpop.f32.mrb[55].mxu1  ;;  %v11947_v52 = vadd.f32 %v6604_v63, %v14834_v19 }
 0xf2e   : > { %v11090_v3 = vmul.f32 -1.442695, %v11898_v31  ;;  %v11900_v29 = vadd.f32 %v6563_v11, %v14822_v43  ;;  %v11092_v48 = vmul.f32 -1.442695, %v11946_v24  ;;  %v11948_v27 = vadd.f32 %v6606_v14, %v14829_v18 }
 0xf2f   : > { %13131 = vpow2.f32 %v11088_v13  ;;  %v11089_v4 = vmul.f32 -1.442695, %v11899_v7 }
 0xf30   : > { %13133 = vpow2.f32 %v11090_v3  ;;  %v11091_v8 = vmul.f32 -1.442695, %v11900_v29  ;;  %v11093_v6 = vmul.f32 -1.442695, %v11948_v27 }
 0xf31   : > { %13135 = vpow2.f32 %v11089_v4 }
 0xf32   : > { %13137 = vpow2.f32 %v11091_v8 }
 0xf33   : > { %13139 = vtanh.f32 %v11945_v25 }
 0xf34   : > { %13141 = vpow2.f32 %v11092_v48 }
 0xf35   : > { %13143 = vtanh.f32 %v11947_v52 }
 0xf39   : > { %v13132_v45 = vpop.eup %13131 }
 0xf3a   : > { %v13134_v26 = vpop.eup %13133  ;;  %v6623_v34 = vadd.f32 1.0, %v13132_v45  ;;  %v14908_v45 = vld [vmem:[#allocation8 + $0x104] ss:$16 sps:$4 sm:$0xff]  }
 0xf3b   : > { %v6635_v23 = vadd.f32 1.0, %v13134_v26  ;;  %v13136_v20 = vpop.eup %13135  ;;  %v14910_v26 = vld [vmem:[#allocation8 + $0x10c] ss:$16 sps:$4 sm:$0xff]   ;;  %7227 = vmatprep.subr.bf16.mxu0 %v14908_v45 }
 0xf3c   : > { %13145 = vrcp.f32 %v6623_v34  ;;  %v6624_v59 = vadd.f32 1.0, %v13136_v20  ;;  %v13138_v9 = vpop.eup %13137  ;;  %v14912_v34 = vld [vmem:[#allocation8 + $0x100] ss:$16 sps:$4 sm:$0xff]   ;;  %7270 = vmatprep.subr.bf16.mxu1 %v14910_v26  ;;  %v14922_v20 = vld [vmem:[#allocation8 + $0x12c] ss:$16 sps:$4 sm:$0xff]  }
 0xf3d   : > { %13147 = vrcp.f32 %v6635_v23  ;;  %v6636_v1 = vadd.f32 1.0, %v13138_v9  ;;  %v13140_v21 = vpop.eup %13139  ;;  %v14920_v23 = vld [vmem:[#allocation8 + $0x124] ss:$16 sps:$4 sm:$0xff]   ;;  %v14926_v9 = vld [vmem:[#allocation8 + $0x128] ss:$16 sps:$4 sm:$0xff]  }
 0xf3e   : > { %13149 = vpow2.f32 %v11093_v6  ;;  %v13142_v61 = vpop.eup %13141  ;;  %v14914_v6 = vld [vmem:[#allocation8 + $0x108] ss:$16 sps:$4 sm:$0xff]  }
 0xf3f   : > { %13151 = vrcp.f32 %v6624_v59  ;;  %v13144_v36 = vpop.eup %13143  ;;  %v6649_v15 = vadd.f32 1.0, %v13142_v61  ;;  %v14924_v59 = vld [vmem:[#allocation8 + $0x120] ss:$16 sps:$4 sm:$0xff]  }
 0xf40   : > { %13153 = vrcp.f32 %v6636_v1  ;;  %v14932_v1 = vld [vmem:[#allocation8 + $0x144] ss:$16 sps:$4 sm:$0xff]  }
 0xf41   : > { %13155 = vrcp.f32 %v6649_v15 }
 0xf46   : > { %v13146_v35 = vpop.eup %13145 }
 0xf47   : > { %v13148_v10 = vpop.eup %13147  ;;  %v6657_v2 = vmul.f32 %v13146_v35, %v13140_v21  ;;  %v14935_v21 = vld [vmem:[#allocation8 + $0x140] ss:$16 sps:$4 sm:$0xff]  }
 0xf48   : > { %v13150_v12 = vpop.eup %13149  ;;  %v6655_v17 = vmul.f32 %v13148_v10, %v14840_v16 }
 0xf49   : > { %v13152_v49 = vpop.eup %13151  ;;  %v6650_v13 = vadd.f32 1.0, %v13150_v12 }
 0xf4a   : > { %v14893_v31 = vadd.f32 %v6657_v2, %v6655_v17  ;;  %v6658_v28 = vmul.f32 %v13152_v49, %v13144_v36  ;;  %v13154_v63 = vpop.eup %13153 }
 0xf4b   : > { %v6656_v7 = vmul.f32 %v13154_v63, %v14843_v32  ;;  %v13156_v16 = vpop.eup %13155 }
 0xf4c   : > { %13157 = vtanh.f32 %v14893_v31 }
 0xf4d   : > { %v14897_v11 = vadd.f32 %v6658_v28, %v6656_v7  ;;  %13159 = vrcp.f32 %v6650_v13 }
 0xf4f   : > { %13161 = vtanh.f32 %v14897_v11 }
 0xf56   : > { %v13158_v14 = vpop.eup %13157 }
 0xf57   : > { %v13160_v3 = vpop.eup %13159  ;;  %v6663_v4 = vmul.f32 %v13158_v14, %v13156_v16 }
 0xf59   : > { %v13162_v29 = vpop.eup %13161 }
 0xf5a   : > { %v6664_v8 = vmul.f32 %v13162_v29, %v13160_v3 }
 0xf5c   : > { %v6665_v24 = vpack.c.bf16 %v6664_v8, %v6663_v4 }
 0xf5e   : > { %11763 = vst [vmem:[%s14023_s29 + $0x8] sm:$0xff] %v6665_v24   ;;  %6908 = vmatmul.mubr.bf16.vlgmr.msra.gmra.mrb[56].mxu0 %v6665_v24  ;;  %6951 = vmatmul.mubr.bf16.vlgmr.msra.gmra.mrb[56].mxu1 %v6665_v24 }
 0xf5f   : > { %7259 = vmatprep.mubr.bf16.mxu0 %v13613_v0  ;;  %7302 = vmatprep.mubr.bf16.mxu1 %v13613_v0 }
 0xf60   : > { %7228 = vmatpush1.bf16.msra.mxu0 %v14912_v34  ;;  %7271 = vmatpush1.bf16.msra.mxu1 %v14914_v6 }
 0xf61   : > { %7229 = vmatprep.subr.bf16.mxu0 %v14920_v23  ;;  %7272 = vmatprep.subr.bf16.mxu1 %v14922_v20 }
 0xf64   : > { %7230 = vmatpush1.bf16.msra.mxu0 %v14924_v59  ;;  %7273 = vmatpush1.bf16.msra.mxu1 %v14926_v9 }
 0xf65   : > { %v10197_v32 = vld [vmem:[%s14023_s29 + $0x8] sm:$0xf]  ;;  %v10198_v25 = vld [vmem:[%s14023_s29 + $0xc] sm:$0xf]  ;;  %7274 = vmatprep.subr.bf16.mxu1 %v14695_v51  ;;  %7231 = vmatprep.subr.bf16.mxu0 %v14932_v1 }
 0xf66   : > { %v10221_v48 = vmax.bf16 %v13613_v0, %v10197_v32  ;;  %v10222_v27 = vmax.bf16 %v13613_v0, %v10198_v25 }
 0xf68   : > { %v11775_v52 = vcombine.low %v10221_v48, %v10222_v27  ;;  %7232 = vmatpush1.bf16.msra.mxu0 %v14935_v21  ;;  %7275 = vmatpush1.bf16.msra.mxu1 %v14697_v53 }
 0xf69   : > { %7233 = vmatprep.subr.bf16.mxu0 %v14701_v54  ;;  %7276 = vmatprep.subr.bf16.mxu1 %v14703_v55 }
 0xf6a   : > { %11776 = vst [vmem:[%s14023_s29 + $0x8] sm:$0xff] %v11775_v52  }
 0xf6c   : > { %7234 = vmatpush1.bf16.msra.mxu0 %v14705_v47  ;;  %7277 = vmatpush1.bf16.msra.mxu1 %v14707_v56 }
 0xf6d   : > { %7235 = vmatprep.subr.bf16.mxu0 %v14714_v58  ;;  %7278 = vmatprep.subr.bf16.mxu1 %v14721_v37 }
 0xf70   : > { %7236 = vmatpush1.bf16.msra.mxu0 %v14712_v57  ;;  %7279 = vmatpush1.bf16.msra.mxu1 %v14719_v5 }
 0xf71   : > { %7237 = vmatprep.subr.bf16.mxu0 %v14717_v60  ;;  %7280 = vmatprep.subr.bf16.mxu1 %v14725_v38 }
 0xf74   : > { %7238 = vmatpush1.bf16.msra.mxu0 %v14728_v39  ;;  %7281 = vmatpush1.bf16.msra.mxu1 %v14731_v40 }
 0xf75   : > { %7239 = vmatprep.subr.bf16.mxu0 %v14734_v41  ;;  %7282 = vmatprep.subr.bf16.mxu1 %v14737_v42 }
 0xf78   : > { %7240 = vmatpush1.bf16.msra.mxu0 %v14740_v44  ;;  %7283 = vmatpush1.bf16.msra.mxu1 %v14743_v46 }
 0xf79   : > { %7241 = vmatprep.subr.bf16.mxu0 %v14746_v50  ;;  %7284 = vmatprep.subr.bf16.mxu1 %v14749_v22 }
 0xf7c   : > { %7242 = vmatpush1.bf16.msra.mxu0 %v14752_v30  ;;  %7285 = vmatpush1.bf16.msra.mxu1 %v14755_v62 }
 0xf7d   : > { %7579 = vmatprep.subr.bf16.mxu0 %v14908_v45  ;;  %7622 = vmatprep.subr.bf16.mxu1 %v14910_v26 }
0x1031   : > { %v6909_v51 = vpop.f32.mrb[56].mxu0  ;;  %v6952_v53 = vpop.f32.mrb[56].mxu1 }
0x1032   : > { %v11901_v54 = vadd.f32 %v6909_v51, %v14818_v33  ;;  %v6911_v55 = vpop.f32.mrb[57].mxu0  ;;  %v6954_v47 = vpop.f32.mrb[57].mxu1  ;;  %v11949_v46 = vadd.f32 %v6952_v53, %v14834_v19 }
0x1033   : > { %v11902_v56 = vadd.f32 %v6911_v55, %v14822_v43  ;;  %v6913_v57 = vpop.f32.mrb[58].mxu0  ;;  %v6956_v58 = vpop.f32.mrb[58].mxu1  ;;  %v11950_v44 = vadd.f32 %v6954_v47, %v14829_v18 }
0x1034   : > { %v11130_v60 = vmul.f32 -1.442695, %v11901_v54  ;;  %v11903_v5 = vadd.f32 %v6913_v57, %v14818_v33  ;;  %v6915_v37 = vpop.f32.mrb[59].mxu0  ;;  %v6958_v38 = vpop.f32.mrb[59].mxu1  ;;  %v11951_v30 = vadd.f32 %v6956_v58, %v14834_v19 }
0x1035   : > { %v11132_v39 = vmul.f32 -1.442695, %v11902_v56  ;;  %v11904_v40 = vadd.f32 %v6915_v37, %v14822_v43  ;;  %v11134_v50 = vmul.f32 -1.442695, %v11950_v44  ;;  %v11952_v22 = vadd.f32 %v6958_v38, %v14829_v18  ;;  %v14996_v37 = vld [vmem:[#allocation8 + $0x148] ss:$16 sps:$4 sm:$0xff]  }
0x1036   : > { %13163 = vpow2.f32 %v11130_v60  ;;  %v11131_v41 = vmul.f32 -1.442695, %v11903_v5  ;;  %v14994_v5 = vld [vmem:[#allocation8 + $0x14c] ss:$16 sps:$4 sm:$0xff]   ;;  %v15000_v38 = vld [vmem:[#allocation8 + $0x164] ss:$16 sps:$4 sm:$0xff]  }
0x1037   : > { %13165 = vpow2.f32 %v11132_v39  ;;  %v11133_v42 = vmul.f32 -1.442695, %v11904_v40  ;;  %v11135_v35 = vmul.f32 -1.442695, %v11952_v22  ;;  %v15002_v39 = vld [vmem:[#allocation8 + $0x16c] ss:$16 sps:$4 sm:$0xff]  }
0x1038   : > { %13167 = vpow2.f32 %v11131_v41  ;;  %v15004_v40 = vld [vmem:[#allocation8 + $0x160] ss:$16 sps:$4 sm:$0xff]   ;;  %v15006_v41 = vld [vmem:[#allocation8 + $0x168] ss:$16 sps:$4 sm:$0xff]   ;;  %v15014_v44 = vld [vmem:[#allocation8 + $0x18c] ss:$16 sps:$4 sm:$0xff]  }
0x1039   : > { %13169 = vpow2.f32 %v11133_v42  ;;  %v15012_v42 = vld [vmem:[#allocation8 + $0x184] ss:$16 sps:$4 sm:$0xff]  }
0x103a   : > { %13171 = vtanh.f32 %v11949_v46  ;;  %v15016_v46 = vld [vmem:[#allocation8 + $0x180] ss:$16 sps:$4 sm:$0xff]   ;;  %v15022_v22 = vld [vmem:[#allocation8 + $0x1a4] ss:$16 sps:$4 sm:$0xff]  }
0x103b   : > { %13173 = vpow2.f32 %v11134_v50  ;;  %v15018_v50 = vld [vmem:[#allocation8 + $0x188] ss:$16 sps:$4 sm:$0xff]  }
0x103c   : > { %13175 = vtanh.f32 %v11951_v30  ;;  %v15024_v30 = vld [vmem:[#allocation8 + $0x1ac] ss:$16 sps:$4 sm:$0xff]  }
0x1040   : > { %v13164_v62 = vpop.eup %13163 }
0x1041   : > { %v13166_v61 = vpop.eup %13165  ;;  %v6975_v36 = vadd.f32 1.0, %v13164_v62  ;;  %v15028_v62 = vld [vmem:[#allocation8 + $0x1a0] ss:$16 sps:$4 sm:$0xff]  }
0x1042   : > { %v6987_v10 = vadd.f32 1.0, %v13166_v61  ;;  %v13168_v2 = vpop.eup %13167  ;;  %v15030_v61 = vld [vmem:[#allocation8 + $0x1a8] ss:$16 sps:$4 sm:$0xff]  }
0x1043   : > { %13177 = vrcp.f32 %v6975_v36  ;;  %v6976_v12 = vadd.f32 1.0, %v13168_v2  ;;  %v13170_v17 = vpop.eup %13169  ;;  %v15034_v36 = vld [vmem:[#allocation8 + $0x1c4] ss:$16 sps:$4 sm:$0xff]   ;;  %v15042_v2 = vld [vmem:[#allocation8 + $0x1c8] ss:$16 sps:$4 sm:$0xff]  }
0x1044   : > { %13179 = vrcp.f32 %v6987_v10  ;;  %v6988_v49 = vadd.f32 1.0, %v13170_v17  ;;  %v13172_v15 = vpop.eup %13171  ;;  %v15040_v10 = vld [vmem:[#allocation8 + $0x1c0] ss:$16 sps:$4 sm:$0xff]   ;;  %v15048_v17 = vld [vmem:[#allocation8 + $0x1ec] ss:$16 sps:$4 sm:$0xff]  }
0x1045   : > { %13181 = vpow2.f32 %v11135_v35  ;;  %v13174_v28 = vpop.eup %13173  ;;  %v15036_v35 = vld [vmem:[#allocation8 + $0x1cc] ss:$16 sps:$4 sm:$0xff]  }
0x1046   : > { %13183 = vrcp.f32 %v6976_v12  ;;  %v13176_v63 = vpop.eup %13175  ;;  %v7001_v4 = vadd.f32 1.0, %v13174_v28  ;;  %v15046_v12 = vld [vmem:[#allocation8 + $0x1e4] ss:$16 sps:$4 sm:$0xff]  }
0x1047   : > { %13185 = vrcp.f32 %v6988_v49  ;;  %v15052_v49 = vld [vmem:[#allocation8 + $0x1e0] ss:$16 sps:$4 sm:$0xff]  }
0x1048   : > { %13187 = vrcp.f32 %v7001_v4 }
0x104d   : > { %v13178_v13 = vpop.eup %13177 }
0x104e   : > { %v13180_v7 = vpop.eup %13179  ;;  %v7009_v16 = vmul.f32 %v13178_v13, %v13172_v15  ;;  %v15054_v15 = vld [vmem:[#allocation8 + $0x1e8] ss:$16 sps:$4 sm:$0xff]  }
0x104f   : > { %v13182_v14 = vpop.eup %13181  ;;  %v7007_v3 = vmul.f32 %v13180_v7, %v14893_v31 }
0x1050   : > { %v13184_v29 = vpop.eup %13183  ;;  %v7002_v25 = vadd.f32 1.0, %v13182_v14 }
0x1051   : > { %v14971_v8 = vadd.f32 %v7009_v16, %v7007_v3  ;;  %v7010_v24 = vmul.f32 %v13184_v29, %v13176_v63  ;;  %v13186_v32 = vpop.eup %13185 }
0x1052   : > { %v7008_v48 = vmul.f32 %v13186_v32, %v14897_v11  ;;  %v13188_v52 = vpop.eup %13187 }
0x1053   : > { %13189 = vtanh.f32 %v14971_v8 }
0x1054   : > { %v14975_v27 = vadd.f32 %v7010_v24, %v7008_v48  ;;  %13191 = vrcp.f32 %v7002_v25 }
0x1056   : > { %13193 = vtanh.f32 %v14975_v27 }
0x105d   : > { %v13190_v31 = vpop.eup %13189 }
0x105e   : > { %v13192_v51 = vpop.eup %13191  ;;  %v7015_v54 = vmul.f32 %v13190_v31, %v13188_v52 }
0x1060   : > { %v13194_v53 = vpop.eup %13193 }
0x1061   : > { %v7016_v55 = vmul.f32 %v13194_v53, %v13192_v51 }
0x1063   : > { %v7017_v47 = vpack.c.bf16 %v7016_v55, %v7015_v54 }
0x1065   : > { %11764 = vst [vmem:[%s14023_s29 + $0x10] sm:$0xff] %v7017_v47   ;;  %7260 = vmatmul.mubr.bf16.vlgmr.msra.gmra.mrb[60].mxu0 %v7017_v47  ;;  %7303 = vmatmul.mubr.bf16.vlgmr.msra.gmra.mrb[60].mxu1 %v7017_v47 }
0x1066   : > { %7580 = vmatpush1.bf16.msra.mxu0 %v14912_v34  ;;  %7623 = vmatpush1.bf16.msra.mxu1 %v14914_v6 }
0x1067   : > { %7581 = vmatprep.subr.bf16.mxu0 %v14920_v23  ;;  %7624 = vmatprep.subr.bf16.mxu1 %v14922_v20 }
0x1068   : > { %7611 = vmatprep.mubr.bf16.mxu0 %v13613_v0  ;;  %7654 = vmatprep.mubr.bf16.mxu1 %v13613_v0 }
0x106a   : > { %7582 = vmatpush1.bf16.msra.mxu0 %v14924_v59  ;;  %7625 = vmatpush1.bf16.msra.mxu1 %v14926_v9 }
0x106b   : > { %7583 = vmatprep.subr.bf16.mxu0 %v14932_v1  ;;  %7626 = vmatprep.subr.bf16.mxu1 %v14994_v5 }
0x106c   : > { %v10199_v11 = vld [vmem:[%s14023_s29 + $0x10] sm:$0xf]  ;;  %v10200_v56 = vld [vmem:[%s14023_s29 + $0x14] sm:$0xf] }
0x106d   : > { %v10223_v57 = vmax.bf16 %v13613_v0, %v10199_v11  ;;  %v10224_v58 = vmax.bf16 %v13613_v0, %v10200_v56 }
0x106e   : > { %7584 = vmatpush1.bf16.msra.mxu0 %v14935_v21  ;;  %7627 = vmatpush1.bf16.msra.mxu1 %v14996_v37 }
0x106f   : > { %v11777_v60 = vcombine.low %v10223_v57, %v10224_v58  ;;  %7585 = vmatprep.subr.bf16.mxu0 %v15000_v38  ;;  %7628 = vmatprep.subr.bf16.mxu1 %v15002_v39 }
0x1071   : > { %11778 = vst [vmem:[%s14023_s29 + $0x10] sm:$0xff] %v11777_v60  }
0x1072   : > { %7586 = vmatpush1.bf16.msra.mxu0 %v15004_v40  ;;  %7629 = vmatpush1.bf16.msra.mxu1 %v15006_v41 }
0x1073   : > { %7587 = vmatprep.subr.bf16.mxu0 %v15012_v42  ;;  %7630 = vmatprep.subr.bf16.mxu1 %v15014_v44 }
0x1076   : > { %7588 = vmatpush1.bf16.msra.mxu0 %v15016_v46  ;;  %7631 = vmatpush1.bf16.msra.mxu1 %v15018_v50 }
0x1077   : > { %7589 = vmatprep.subr.bf16.mxu0 %v15022_v22  ;;  %7632 = vmatprep.subr.bf16.mxu1 %v15024_v30 }
0x107a   : > { %7590 = vmatpush1.bf16.msra.mxu0 %v15028_v62  ;;  %7633 = vmatpush1.bf16.msra.mxu1 %v15030_v61 }
0x107b   : > { %7591 = vmatprep.subr.bf16.mxu0 %v15034_v36  ;;  %7634 = vmatprep.subr.bf16.mxu1 %v15036_v35 }
0x107e   : > { %7592 = vmatpush1.bf16.msra.mxu0 %v15040_v10  ;;  %7635 = vmatpush1.bf16.msra.mxu1 %v15042_v2 }
0x107f   : > { %7593 = vmatprep.subr.bf16.mxu0 %v15046_v12  ;;  %7636 = vmatprep.subr.bf16.mxu1 %v15048_v17 }
0x1082   : > { %7594 = vmatpush1.bf16.msra.mxu0 %v15052_v49  ;;  %7637 = vmatpush1.bf16.msra.mxu1 %v15054_v15 }
0x1083   : > { %7931 = vmatprep.subr.bf16.mxu0 %v14908_v45  ;;  %7974 = vmatprep.subr.bf16.mxu1 %v14910_v26 }
0x1138   : > { %v7261_v28 = vpop.f32.mrb[60].mxu0  ;;  %v7304_v63 = vpop.f32.mrb[60].mxu1 }
0x1139   : > { %v11905_v13 = vadd.f32 %v7261_v28, %v14818_v33  ;;  %v7263_v7 = vpop.f32.mrb[61].mxu0  ;;  %v7306_v16 = vpop.f32.mrb[61].mxu1  ;;  %v11953_v54 = vadd.f32 %v7304_v63, %v14834_v19 }
0x113a   : > { %v11906_v14 = vadd.f32 %v7263_v7, %v14822_v43  ;;  %v7265_v3 = vpop.f32.mrb[62].mxu0  ;;  %v7308_v29 = vpop.f32.mrb[62].mxu1  ;;  %v11954_v53 = vadd.f32 %v7306_v16, %v14829_v18 }
0x113b   : > { %v11172_v4 = vmul.f32 -1.442695, %v11905_v13  ;;  %v11907_v24 = vadd.f32 %v7265_v3, %v14818_v33  ;;  %v7267_v32 = vpop.f32.mrb[63].mxu0  ;;  %v7310_v25 = vpop.f32.mrb[63].mxu1  ;;  %v11955_v11 = vadd.f32 %v7308_v29, %v14834_v19 }
0x113c   : > { %v11174_v48 = vmul.f32 -1.442695, %v11906_v14  ;;  %v11908_v52 = vadd.f32 %v7267_v32, %v14822_v43  ;;  %v11176_v55 = vmul.f32 -1.442695, %v11954_v53  ;;  %v11956_v47 = vadd.f32 %v7310_v25, %v14829_v18 }
0x113d   : > { %13195 = vpow2.f32 %v11172_v4  ;;  %v11173_v31 = vmul.f32 -1.442695, %v11907_v24 }
0x113e   : > { %13197 = vpow2.f32 %v11174_v48  ;;  %v11175_v51 = vmul.f32 -1.442695, %v11908_v52  ;;  %v11177_v60 = vmul.f32 -1.442695, %v11956_v47 }
0x113f   : > { %13199 = vpow2.f32 %v11173_v31 }
0x1140   : > { %13201 = vpow2.f32 %v11175_v51 }
0x1141   : > { %13203 = vtanh.f32 %v11953_v54 }
0x1142   : > { %13205 = vpow2.f32 %v11176_v55 }
0x1143   : > { %13207 = vtanh.f32 %v11955_v11 }
0x1147   : > { %v13196_v56 = vpop.eup %13195 }
0x1148   : > { %v13198_v57 = vpop.eup %13197  ;;  %v7327_v58 = vadd.f32 1.0, %v13196_v56 }
0x1149   : > { %v7339_v28 = vadd.f32 1.0, %v13198_v57  ;;  %v13200_v13 = vpop.eup %13199 }
0x114a   : > { %13209 = vrcp.f32 %v7327_v58  ;;  %v7328_v7 = vadd.f32 1.0, %v13200_v13  ;;  %v13202_v16 = vpop.eup %13201 }
0x114b   : > { %13211 = vrcp.f32 %v7339_v28  ;;  %v7340_v63 = vadd.f32 1.0, %v13202_v16  ;;  %v13204_v14 = vpop.eup %13203 }
0x114c   : > { %13213 = vpow2.f32 %v11177_v60  ;;  %v13206_v3 = vpop.eup %13205 }
0x114d   : > { %13215 = vrcp.f32 %v7328_v7  ;;  %v13208_v29 = vpop.eup %13207  ;;  %v7353_v31 = vadd.f32 1.0, %v13206_v3 }
0x114e   : > { %13217 = vrcp.f32 %v7340_v63 }
0x114f   : > { %13219 = vrcp.f32 %v7353_v31 }
0x1154   : > { %v13210_v4 = vpop.eup %13209 }
0x1155   : > { %v13212_v24 = vpop.eup %13211  ;;  %v7361_v32 = vmul.f32 %v13210_v4, %v13204_v14 }
0x1156   : > { %v13214_v25 = vpop.eup %13213  ;;  %v7359_v48 = vmul.f32 %v13212_v24, %v14971_v8 }
0x1157   : > { %v13216_v52 = vpop.eup %13215  ;;  %v7354_v55 = vadd.f32 1.0, %v13214_v25 }
0x1158   : > { %v15071_v51 = vadd.f32 %v7361_v32, %v7359_v48  ;;  %v7362_v53 = vmul.f32 %v13216_v52, %v13208_v29  ;;  %v13218_v54 = vpop.eup %13217 }
0x1159   : > { %v7360_v47 = vmul.f32 %v13218_v54, %v14975_v27  ;;  %v13220_v56 = vpop.eup %13219 }
0x115a   : > { %13221 = vtanh.f32 %v15071_v51 }
0x115b   : > { %v15075_v11 = vadd.f32 %v7362_v53, %v7360_v47  ;;  %13223 = vrcp.f32 %v7354_v55 }
0x115d   : > { %13225 = vtanh.f32 %v15075_v11 }
0x1164   : > { %v13222_v8 = vpop.eup %13221 }
0x1165   : > { %v13224_v57 = vpop.eup %13223  ;;  %v7367_v60 = vmul.f32 %v13222_v8, %v13220_v56 }
0x1167   : > { %v13226_v58 = vpop.eup %13225 }
0x1168   : > { %v7368_v28 = vmul.f32 %v13226_v58, %v13224_v57 }
0x116a   : > { %v7369_v13 = vpack.c.bf16 %v7368_v28, %v7367_v60 }
0x116c   : > { %11765 = vst [vmem:[%s14023_s29 + $0x18] sm:$0xff] %v7369_v13   ;;  %7612 = vmatmul.mubr.bf16.vlgmr.msra.gmra.mrb[64].mxu0 %v7369_v13  ;;  %7655 = vmatmul.mubr.bf16.vlgmr.msra.gmra.mrb[64].mxu1 %v7369_v13 }
0x116d   : > { %7932 = vmatpush1.bf16.msra.mxu0 %v14912_v34  ;;  %7975 = vmatpush1.bf16.msra.mxu1 %v14914_v6 }
0x116e   : > { %7933 = vmatprep.subr.bf16.mxu0 %v14920_v23  ;;  %7976 = vmatprep.subr.bf16.mxu1 %v14922_v20 }
0x116f   : > { %7963 = vmatprep.mubr.bf16.mxu0 %v13613_v0  ;;  %8006 = vmatprep.mubr.bf16.mxu1 %v13613_v0 }
0x1171   : > { %7934 = vmatpush1.bf16.msra.mxu0 %v14924_v59  ;;  %7977 = vmatpush1.bf16.msra.mxu1 %v14926_v9 }
0x1172   : > { %7935 = vmatprep.subr.bf16.mxu0 %v14932_v1  ;;  %7978 = vmatprep.subr.bf16.mxu1 %v14994_v5 }
0x1173   : > { %v10201_v27 = vld [vmem:[%s14023_s29 + $0x18] sm:$0xf]  ;;  %v10202_v7 = vld [vmem:[%s14023_s29 + $0x1c] sm:$0xf] }
0x1174   : > { %v10225_v16 = vmax.bf16 %v13613_v0, %v10201_v27  ;;  %v10226_v63 = vmax.bf16 %v13613_v0, %v10202_v7 }
0x1175   : > { %7936 = vmatpush1.bf16.msra.mxu0 %v14935_v21  ;;  %7979 = vmatpush1.bf16.msra.mxu1 %v14996_v37 }
0x1176   : > { %v11779_v14 = vcombine.low %v10225_v16, %v10226_v63  ;;  %7937 = vmatprep.subr.bf16.mxu0 %v15000_v38  ;;  %7980 = vmatprep.subr.bf16.mxu1 %v15002_v39 }
0x1178   : > { %11780 = vst [vmem:[%s14023_s29 + $0x18] sm:$0xff] %v11779_v14  }
0x1179   : > { %7938 = vmatpush1.bf16.msra.mxu0 %v15004_v40  ;;  %7981 = vmatpush1.bf16.msra.mxu1 %v15006_v41 }
0x117a   : > { %7939 = vmatprep.subr.bf16.mxu0 %v15012_v42  ;;  %7982 = vmatprep.subr.bf16.mxu1 %v15014_v44 }
0x117d   : > { %7940 = vmatpush1.bf16.msra.mxu0 %v15016_v46  ;;  %7983 = vmatpush1.bf16.msra.mxu1 %v15018_v50 }
0x117e   : > { %7941 = vmatprep.subr.bf16.mxu0 %v15022_v22  ;;  %7984 = vmatprep.subr.bf16.mxu1 %v15024_v30 }
0x1181   : > { %7942 = vmatpush1.bf16.msra.mxu0 %v15028_v62  ;;  %7985 = vmatpush1.bf16.msra.mxu1 %v15030_v61 }
0x1182   : > { %7943 = vmatprep.subr.bf16.mxu0 %v15034_v36  ;;  %7986 = vmatprep.subr.bf16.mxu1 %v15036_v35 }
0x1185   : > { %7944 = vmatpush1.bf16.msra.mxu0 %v15040_v10  ;;  %7987 = vmatpush1.bf16.msra.mxu1 %v15042_v2 }
0x1186   : > { %7945 = vmatprep.subr.bf16.mxu0 %v15046_v12  ;;  %7988 = vmatprep.subr.bf16.mxu1 %v15048_v17 }
0x1189   : > { %7946 = vmatpush1.bf16.msra.mxu0 %v15052_v49  ;;  %7989 = vmatpush1.bf16.msra.mxu1 %v15054_v15 }
0x118a   : > { %8283 = vmatprep.subr.bf16.mxu0 %v14908_v45  ;;  %8326 = vmatprep.subr.bf16.mxu1 %v14910_v26 }
0x123f   : > { %v7613_v3 = vpop.f32.mrb[64].mxu0  ;;  %v7656_v29 = vpop.f32.mrb[64].mxu1 }
0x1240   : > { %v11909_v4 = vadd.f32 %v7613_v3, %v14818_v33  ;;  %v7615_v24 = vpop.f32.mrb[65].mxu0  ;;  %v7658_v32 = vpop.f32.mrb[65].mxu1  ;;  %v11957_v57 = vadd.f32 %v7656_v29, %v14834_v19 }
0x1241   : > { %v11910_v25 = vadd.f32 %v7615_v24, %v14822_v43  ;;  %v7617_v48 = vpop.f32.mrb[66].mxu0  ;;  %v7660_v52 = vpop.f32.mrb[66].mxu1  ;;  %v11958_v8 = vadd.f32 %v7658_v32, %v14829_v18 }
0x1242   : > { %v11214_v31 = vmul.f32 -1.442695, %v11909_v4  ;;  %v11911_v53 = vadd.f32 %v7617_v48, %v14818_v33  ;;  %v7619_v54 = vpop.f32.mrb[67].mxu0  ;;  %v7662_v55 = vpop.f32.mrb[67].mxu1  ;;  %v11959_v28 = vadd.f32 %v7660_v52, %v14834_v19 }
0x1243   : > { %v11216_v47 = vmul.f32 -1.442695, %v11910_v25  ;;  %v11912_v45 = vadd.f32 %v7619_v54, %v14822_v43  ;;  %v11218_v58 = vmul.f32 -1.442695, %v11958_v8  ;;  %v11960_v60 = vadd.f32 %v7662_v55, %v14829_v18 }
0x1244   : > { %13227 = vpow2.f32 %v11214_v31  ;;  %v11215_v26 = vmul.f32 -1.442695, %v11911_v53 }
0x1245   : > { %13229 = vpow2.f32 %v11216_v47  ;;  %v11217_v56 = vmul.f32 -1.442695, %v11912_v45  ;;  %v11219_v16 = vmul.f32 -1.442695, %v11960_v60 }
0x1246   : > { %13231 = vpow2.f32 %v11215_v26 }
0x1247   : > { %13233 = vpow2.f32 %v11217_v56 }
0x1248   : > { %13235 = vtanh.f32 %v11957_v57 }
0x1249   : > { %13237 = vpow2.f32 %v11218_v58 }
0x124a   : > { %13239 = vtanh.f32 %v11959_v28 }
0x124e   : > { %v13228_v13 = vpop.eup %13227 }
0x124f   : > { %v13230_v27 = vpop.eup %13229  ;;  %v7679_v7 = vadd.f32 1.0, %v13228_v13 }
0x1250   : > { %v7691_v63 = vadd.f32 1.0, %v13230_v27  ;;  %v13232_v14 = vpop.eup %13231 }
0x1251   : > { %13241 = vrcp.f32 %v7679_v7  ;;  %v7680_v3 = vadd.f32 1.0, %v13232_v14  ;;  %v13234_v4 = vpop.eup %13233 }
0x1252   : > { %13243 = vrcp.f32 %v7691_v63  ;;  %v7692_v29 = vadd.f32 1.0, %v13234_v4  ;;  %v13236_v24 = vpop.eup %13235 }
0x1253   : > { %13245 = vpow2.f32 %v11219_v16  ;;  %v13238_v32 = vpop.eup %13237 }
0x1254   : > { %13247 = vrcp.f32 %v7680_v3  ;;  %v13240_v25 = vpop.eup %13239  ;;  %v7705_v47 = vadd.f32 1.0, %v13238_v32 }
0x1255   : > { %13249 = vrcp.f32 %v7692_v29 }
0x1256   : > { %13251 = vrcp.f32 %v7705_v47 }
0x125b   : > { %v13242_v48 = vpop.eup %13241 }
0x125c   : > { %v13244_v52 = vpop.eup %13243  ;;  %v7713_v31 = vmul.f32 %v13242_v48, %v13236_v24 }
0x125d   : > { %v13246_v53 = vpop.eup %13245  ;;  %v7711_v54 = vmul.f32 %v13244_v52, %v15071_v51 }
0x125e   : > { %v13248_v55 = vpop.eup %13247  ;;  %v7706_v8 = vadd.f32 1.0, %v13246_v53 }
0x125f   : > { %v15127_v45 = vadd.f32 %v7713_v31, %v7711_v54  ;;  %v7714_v26 = vmul.f32 %v13248_v55, %v13240_v25  ;;  %v13250_v56 = vpop.eup %13249 }
0x1260   : > { %v7712_v57 = vmul.f32 %v13250_v56, %v15075_v11  ;;  %v13252_v60 = vpop.eup %13251 }
0x1261   : > { %13253 = vtanh.f32 %v15127_v45 }
0x1262   : > { %v15131_v58 = vadd.f32 %v7714_v26, %v7712_v57  ;;  %13255 = vrcp.f32 %v7706_v8 }
0x1264   : > { %13257 = vtanh.f32 %v15131_v58 }
0x126b   : > { %v13254_v51 = vpop.eup %13253 }
0x126c   : > { %v13256_v28 = vpop.eup %13255  ;;  %v7719_v27 = vmul.f32 %v13254_v51, %v13252_v60 }
0x126e   : > { %v13258_v13 = vpop.eup %13257 }
0x126f   : > { %v7720_v7 = vmul.f32 %v13258_v13, %v13256_v28 }
0x1271   : > { %v7721_v16 = vpack.c.bf16 %v7720_v7, %v7719_v27 }
0x1273   : > { %11766 = vst [vmem:[%s14023_s29 + $0x20] sm:$0xff] %v7721_v16   ;;  %7964 = vmatmul.mubr.bf16.vlgmr.msra.gmra.mrb[68].mxu0 %v7721_v16  ;;  %8007 = vmatmul.mubr.bf16.vlgmr.msra.gmra.mrb[68].mxu1 %v7721_v16 }
0x1274   : > { %8284 = vmatpush1.bf16.msra.mxu0 %v14912_v34  ;;  %8327 = vmatpush1.bf16.msra.mxu1 %v14914_v6 }
0x1275   : > { %8285 = vmatprep.subr.bf16.mxu0 %v14920_v23  ;;  %8328 = vmatprep.subr.bf16.mxu1 %v14922_v20 }
0x1276   : > { %8315 = vmatprep.mubr.bf16.mxu0 %v13613_v0  ;;  %8358 = vmatprep.mubr.bf16.mxu1 %v13613_v0 }
0x1278   : > { %8286 = vmatpush1.bf16.msra.mxu0 %v14924_v59  ;;  %8329 = vmatpush1.bf16.msra.mxu1 %v14926_v9 }
0x1279   : > { %8287 = vmatprep.subr.bf16.mxu0 %v14932_v1  ;;  %8330 = vmatprep.subr.bf16.mxu1 %v14994_v5 }
0x127a   : > { %v10203_v34 = vld [vmem:[%s14023_s29 + $0x20] sm:$0xf]  ;;  %v10204_v11 = vld [vmem:[%s14023_s29 + $0x24] sm:$0xf] }
0x127b   : > { %v10227_v6 = vmax.bf16 %v13613_v0, %v10203_v34  ;;  %v10228_v23 = vmax.bf16 %v13613_v0, %v10204_v11 }
0x127c   : > { %8288 = vmatpush1.bf16.msra.mxu0 %v14935_v21  ;;  %8331 = vmatpush1.bf16.msra.mxu1 %v14996_v37 }
0x127d   : > { %v11781_v20 = vcombine.low %v10227_v6, %v10228_v23  ;;  %8289 = vmatprep.subr.bf16.mxu0 %v15000_v38  ;;  %8332 = vmatprep.subr.bf16.mxu1 %v15002_v39 }
0x127f   : > { %11782 = vst [vmem:[%s14023_s29 + $0x20] sm:$0xff] %v11781_v20  }
0x1280   : > { %8290 = vmatpush1.bf16.msra.mxu0 %v15004_v40  ;;  %8333 = vmatpush1.bf16.msra.mxu1 %v15006_v41 }
0x1281   : > { %8291 = vmatprep.subr.bf16.mxu0 %v15012_v42  ;;  %8334 = vmatprep.subr.bf16.mxu1 %v15014_v44 }
0x1284   : > { %8292 = vmatpush1.bf16.msra.mxu0 %v15016_v46  ;;  %8335 = vmatpush1.bf16.msra.mxu1 %v15018_v50 }
0x1285   : > { %8293 = vmatprep.subr.bf16.mxu0 %v15022_v22  ;;  %8336 = vmatprep.subr.bf16.mxu1 %v15024_v30 }
0x1288   : > { %8294 = vmatpush1.bf16.msra.mxu0 %v15028_v62  ;;  %8337 = vmatpush1.bf16.msra.mxu1 %v15030_v61 }
0x1289   : > { %8295 = vmatprep.subr.bf16.mxu0 %v15034_v36  ;;  %8338 = vmatprep.subr.bf16.mxu1 %v15036_v35 }
0x128c   : > { %8296 = vmatpush1.bf16.msra.mxu0 %v15040_v10  ;;  %8339 = vmatpush1.bf16.msra.mxu1 %v15042_v2 }
0x128d   : > { %8297 = vmatprep.subr.bf16.mxu0 %v15046_v12  ;;  %8340 = vmatprep.subr.bf16.mxu1 %v15048_v17 }
0x1290   : > { %8298 = vmatpush1.bf16.msra.mxu0 %v15052_v49  ;;  %8341 = vmatpush1.bf16.msra.mxu1 %v15054_v15 }
0x1346   : > { %v7965_v59 = vpop.f32.mrb[68].mxu0  ;;  %v8008_v9 = vpop.f32.mrb[68].mxu1 }
0x1347   : > { %v11913_v1 = vadd.f32 %v7965_v59, %v14818_v33  ;;  %v7967_v21 = vpop.f32.mrb[69].mxu0  ;;  %v8010_v63 = vpop.f32.mrb[69].mxu1  ;;  %v11961_v55 = vadd.f32 %v8008_v9, %v14834_v19 }
0x1348   : > { %v11914_v14 = vadd.f32 %v7967_v21, %v14822_v43  ;;  %v7969_v3 = vpop.f32.mrb[70].mxu0  ;;  %v8012_v4 = vpop.f32.mrb[70].mxu1  ;;  %v11962_v54 = vadd.f32 %v8010_v63, %v14829_v18 }
0x1349   : > { %v11256_v29 = vmul.f32 -1.442695, %v11913_v1  ;;  %v11915_v24 = vadd.f32 %v7969_v3, %v14818_v33  ;;  %v7971_v32 = vpop.f32.mrb[71].mxu0  ;;  %v8014_v25 = vpop.f32.mrb[71].mxu1  ;;  %v11963_v56 = vadd.f32 %v8012_v4, %v14834_v19 }
0x134a   : > { %v11258_v48 = vmul.f32 -1.442695, %v11914_v14  ;;  %v11916_v52 = vadd.f32 %v7971_v32, %v14822_v43  ;;  %v11260_v47 = vmul.f32 -1.442695, %v11962_v54  ;;  %v11964_v26 = vadd.f32 %v8014_v25, %v14829_v18 }
0x134b   : > { %13259 = vpow2.f32 %v11256_v29  ;;  %v11257_v31 = vmul.f32 -1.442695, %v11915_v24 }
0x134c   : > { %13261 = vpow2.f32 %v11258_v48  ;;  %v11259_v53 = vmul.f32 -1.442695, %v11916_v52  ;;  %v11261_v51 = vmul.f32 -1.442695, %v11964_v26 }
0x134d   : > { %13263 = vpow2.f32 %v11257_v31 }
0x134e   : > { %13265 = vpow2.f32 %v11259_v53 }
0x134f   : > { %13267 = vtanh.f32 %v11961_v55 }
0x1350   : > { %13269 = vpow2.f32 %v11260_v47 }
0x1351   : > { %13271 = vtanh.f32 %v11963_v56 }
0x1355   : > { %v13260_v8 = vpop.eup %13259 }
0x1356   : > { %v13262_v57 = vpop.eup %13261  ;;  %v8031_v60 = vadd.f32 1.0, %v13260_v8  ;;  %v15196_v8 = vld [vmem:[#allocation8 + $0x104] ss:$16 sps:$4 sm:$0xff]  }
0x1357   : > { %v8043_v28 = vadd.f32 1.0, %v13262_v57  ;;  %v13264_v13 = vpop.eup %13263  ;;  %v15198_v57 = vld [vmem:[#allocation8 + $0x10c] ss:$16 sps:$4 sm:$0xff]   ;;  %8635 = vmatprep.subr.bf16.mxu0 %v15196_v8 }
0x1358   : > { %13273 = vrcp.f32 %v8031_v60  ;;  %v8032_v27 = vadd.f32 1.0, %v13264_v13  ;;  %v13266_v7 = vpop.eup %13265  ;;  %v15200_v60 = vld [vmem:[#allocation8 + $0x100] ss:$16 sps:$4 sm:$0xff]   ;;  %8678 = vmatprep.subr.bf16.mxu1 %v15198_v57  ;;  %v15210_v13 = vld [vmem:[#allocation8 + $0x12c] ss:$16 sps:$4 sm:$0xff]  }
0x1359   : > { %13275 = vrcp.f32 %v8043_v28  ;;  %v8044_v16 = vadd.f32 1.0, %v13266_v7  ;;  %v13268_v34 = vpop.eup %13267  ;;  %v15208_v28 = vld [vmem:[#allocation8 + $0x124] ss:$16 sps:$4 sm:$0xff]   ;;  %v15214_v7 = vld [vmem:[#allocation8 + $0x128] ss:$16 sps:$4 sm:$0xff]  }
0x135a   : > { %13277 = vpow2.f32 %v11261_v51  ;;  %v13270_v11 = vpop.eup %13269  ;;  %v15202_v51 = vld [vmem:[#allocation8 + $0x108] ss:$16 sps:$4 sm:$0xff]  }
0x135b   : > { %13279 = vrcp.f32 %v8032_v27  ;;  %v13272_v6 = vpop.eup %13271  ;;  %v8057_v63 = vadd.f32 1.0, %v13270_v11  ;;  %v15212_v27 = vld [vmem:[#allocation8 + $0x120] ss:$16 sps:$4 sm:$0xff]  }
0x135c   : > { %13281 = vrcp.f32 %v8044_v16  ;;  %v15220_v16 = vld [vmem:[#allocation8 + $0x144] ss:$16 sps:$4 sm:$0xff]  }
0x135d   : > { %13283 = vrcp.f32 %v8057_v63 }
0x1362   : > { %v13274_v23 = vpop.eup %13273 }
0x1363   : > { %v13276_v20 = vpop.eup %13275  ;;  %v8065_v59 = vmul.f32 %v13274_v23, %v13268_v34  ;;  %v15223_v34 = vld [vmem:[#allocation8 + $0x140] ss:$16 sps:$4 sm:$0xff]  }
0x1364   : > { %v13278_v9 = vpop.eup %13277  ;;  %v8063_v1 = vmul.f32 %v13276_v20, %v15127_v45 }
0x1365   : > { %v13280_v21 = vpop.eup %13279  ;;  %v8058_v29 = vadd.f32 1.0, %v13278_v9 }
0x1366   : > { %v15181_v14 = vadd.f32 %v8065_v59, %v8063_v1  ;;  %v8066_v3 = vmul.f32 %v13280_v21, %v13272_v6  ;;  %v13282_v4 = vpop.eup %13281 }
0x1367   : > { %v8064_v24 = vmul.f32 %v13282_v4, %v15131_v58  ;;  %v13284_v45 = vpop.eup %13283 }
0x1368   : > { %13285 = vtanh.f32 %v15181_v14 }
0x1369   : > { %v15185_v32 = vadd.f32 %v8066_v3, %v8064_v24  ;;  %13287 = vrcp.f32 %v8058_v29 }
0x136b   : > { %13289 = vtanh.f32 %v15185_v32 }
0x1372   : > { %v13286_v25 = vpop.eup %13285 }
0x1373   : > { %v13288_v48 = vpop.eup %13287  ;;  %v8071_v31 = vmul.f32 %v13286_v25, %v13284_v45 }
0x1375   : > { %v13290_v52 = vpop.eup %13289 }
0x1376   : > { %v8072_v53 = vmul.f32 %v13290_v52, %v13288_v48 }
0x1378   : > { %v8073_v54 = vpack.c.bf16 %v8072_v53, %v8071_v31 }
0x137a   : > { %11767 = vst [vmem:[%s14023_s29 + $0x28] sm:$0xff] %v8073_v54   ;;  %8316 = vmatmul.mubr.bf16.vlgmr.msra.gmra.mrb[72].mxu0 %v8073_v54  ;;  %8359 = vmatmul.mubr.bf16.vlgmr.msra.gmra.mrb[72].mxu1 %v8073_v54 }
0x137b   : > { %8667 = vmatprep.mubr.bf16.mxu0 %v13613_v0  ;;  %8710 = vmatprep.mubr.bf16.mxu1 %v13613_v0 }
0x137c   : > { %8636 = vmatpush1.bf16.msra.mxu0 %v15200_v60  ;;  %8679 = vmatpush1.bf16.msra.mxu1 %v15202_v51 }
0x137d   : > { %8637 = vmatprep.subr.bf16.mxu0 %v15208_v28  ;;  %8680 = vmatprep.subr.bf16.mxu1 %v15210_v13 }
0x1380   : > { %8638 = vmatpush1.bf16.msra.mxu0 %v15212_v27  ;;  %8681 = vmatpush1.bf16.msra.mxu1 %v15214_v7 }
0x1381   : > { %v10205_v58 = vld [vmem:[%s14023_s29 + $0x28] sm:$0xf]  ;;  %v10206_v55 = vld [vmem:[%s14023_s29 + $0x2c] sm:$0xf]  ;;  %8682 = vmatprep.subr.bf16.mxu1 %v14994_v5  ;;  %8639 = vmatprep.subr.bf16.mxu0 %v15220_v16 }
0x1382   : > { %v10229_v47 = vmax.bf16 %v13613_v0, %v10205_v58  ;;  %v10230_v26 = vmax.bf16 %v13613_v0, %v10206_v55 }
0x1384   : > { %v11783_v56 = vcombine.low %v10229_v47, %v10230_v26  ;;  %8640 = vmatpush1.bf16.msra.mxu0 %v15223_v34  ;;  %8683 = vmatpush1.bf16.msra.mxu1 %v14996_v37 }
0x1385   : > { %8641 = vmatprep.subr.bf16.mxu0 %v15000_v38  ;;  %8684 = vmatprep.subr.bf16.mxu1 %v15002_v39 }
0x1386   : > { %11784 = vst [vmem:[%s14023_s29 + $0x28] sm:$0xff] %v11783_v56  }
0x1388   : > { %8642 = vmatpush1.bf16.msra.mxu0 %v15004_v40  ;;  %8685 = vmatpush1.bf16.msra.mxu1 %v15006_v41 }
0x1389   : > { %8643 = vmatprep.subr.bf16.mxu0 %v15012_v42  ;;  %8686 = vmatprep.subr.bf16.mxu1 %v15014_v44 }
0x138c   : > { %8644 = vmatpush1.bf16.msra.mxu0 %v15016_v46  ;;  %8687 = vmatpush1.bf16.msra.mxu1 %v15018_v50 }
0x138d   : > { %8645 = vmatprep.subr.bf16.mxu0 %v15022_v22  ;;  %8688 = vmatprep.subr.bf16.mxu1 %v15024_v30 }
0x1390   : > { %8646 = vmatpush1.bf16.msra.mxu0 %v15028_v62  ;;  %8689 = vmatpush1.bf16.msra.mxu1 %v15030_v61 }
0x1391   : > { %8647 = vmatprep.subr.bf16.mxu0 %v15034_v36  ;;  %8690 = vmatprep.subr.bf16.mxu1 %v15036_v35 }
0x1394   : > { %8648 = vmatpush1.bf16.msra.mxu0 %v15040_v10  ;;  %8691 = vmatpush1.bf16.msra.mxu1 %v15042_v2 }
0x1395   : > { %8649 = vmatprep.subr.bf16.mxu0 %v15046_v12  ;;  %8692 = vmatprep.subr.bf16.mxu1 %v15048_v17 }
0x1398   : > { %8650 = vmatpush1.bf16.msra.mxu0 %v15052_v49  ;;  %8693 = vmatpush1.bf16.msra.mxu1 %v15054_v15 }
0x1399   : > { %8987 = vmatprep.subr.bf16.mxu0 %v15196_v8  ;;  %9030 = vmatprep.subr.bf16.mxu1 %v15198_v57 }
0x144d   : > { %v8317_v5 = vpop.f32.mrb[72].mxu0  ;;  %v8360_v37 = vpop.f32.mrb[72].mxu1 }
0x144e   : > { %v11917_v38 = vadd.f32 %v8317_v5, %v14818_v33  ;;  %v8319_v39 = vpop.f32.mrb[73].mxu0  ;;  %v8362_v40 = vpop.f32.mrb[73].mxu1  ;;  %v11965_v2 = vadd.f32 %v8360_v37, %v14834_v19 }
0x144f   : > { %v11918_v41 = vadd.f32 %v8319_v39, %v14822_v43  ;;  %v8321_v42 = vpop.f32.mrb[74].mxu0  ;;  %v8364_v44 = vpop.f32.mrb[74].mxu1  ;;  %v11966_v10 = vadd.f32 %v8362_v40, %v14829_v18 }
0x1450   : > { %v11298_v46 = vmul.f32 -1.442695, %v11917_v38  ;;  %v11919_v50 = vadd.f32 %v8321_v42, %v14818_v33  ;;  %v8323_v22 = vpop.f32.mrb[75].mxu0  ;;  %v8366_v30 = vpop.f32.mrb[75].mxu1  ;;  %v11967_v49 = vadd.f32 %v8364_v44, %v14834_v19 }
0x1451   : > { %v11300_v62 = vmul.f32 -1.442695, %v11918_v41  ;;  %v11920_v61 = vadd.f32 %v8323_v22, %v14822_v43  ;;  %v11302_v12 = vmul.f32 -1.442695, %v11966_v10  ;;  %v11968_v17 = vadd.f32 %v8366_v30, %v14829_v18  ;;  %v15284_v22 = vld [vmem:[#allocation8 + $0x148] ss:$16 sps:$4 sm:$0xff]  }
0x1452   : > { %13291 = vpow2.f32 %v11298_v46  ;;  %v11299_v36 = vmul.f32 -1.442695, %v11919_v50  ;;  %v15282_v50 = vld [vmem:[#allocation8 + $0x14c] ss:$16 sps:$4 sm:$0xff]   ;;  %v15288_v30 = vld [vmem:[#allocation8 + $0x164] ss:$16 sps:$4 sm:$0xff]  }
0x1453   : > { %13293 = vpow2.f32 %v11300_v62  ;;  %v11301_v35 = vmul.f32 -1.442695, %v11920_v61  ;;  %v11303_v23 = vmul.f32 -1.442695, %v11968_v17  ;;  %v15290_v62 = vld [vmem:[#allocation8 + $0x16c] ss:$16 sps:$4 sm:$0xff]  }
0x1454   : > { %13295 = vpow2.f32 %v11299_v36  ;;  %v15292_v61 = vld [vmem:[#allocation8 + $0x160] ss:$16 sps:$4 sm:$0xff]   ;;  %v15294_v36 = vld [vmem:[#allocation8 + $0x168] ss:$16 sps:$4 sm:$0xff]   ;;  %v15302_v10 = vld [vmem:[#allocation8 + $0x18c] ss:$16 sps:$4 sm:$0xff]  }
0x1455   : > { %13297 = vpow2.f32 %v11301_v35  ;;  %v15300_v35 = vld [vmem:[#allocation8 + $0x184] ss:$16 sps:$4 sm:$0xff]  }
0x1456   : > { %13299 = vtanh.f32 %v11965_v2  ;;  %v15304_v2 = vld [vmem:[#allocation8 + $0x180] ss:$16 sps:$4 sm:$0xff]   ;;  %v15310_v17 = vld [vmem:[#allocation8 + $0x1a4] ss:$16 sps:$4 sm:$0xff]  }
0x1457   : > { %13301 = vpow2.f32 %v11302_v12  ;;  %v15306_v12 = vld [vmem:[#allocation8 + $0x188] ss:$16 sps:$4 sm:$0xff]  }
0x1458   : > { %13303 = vtanh.f32 %v11967_v49  ;;  %v15312_v49 = vld [vmem:[#allocation8 + $0x1ac] ss:$16 sps:$4 sm:$0xff]  }
0x145c   : > { %v13292_v15 = vpop.eup %13291 }
0x145d   : > { %v13294_v11 = vpop.eup %13293  ;;  %v8383_v6 = vadd.f32 1.0, %v13292_v15  ;;  %v15316_v15 = vld [vmem:[#allocation8 + $0x1a0] ss:$16 sps:$4 sm:$0xff]  }
0x145e   : > { %v8395_v20 = vadd.f32 1.0, %v13294_v11  ;;  %v13296_v59 = vpop.eup %13295  ;;  %v15318_v11 = vld [vmem:[#allocation8 + $0x1a8] ss:$16 sps:$4 sm:$0xff]  }
0x145f   : > { %13305 = vrcp.f32 %v8383_v6  ;;  %v8384_v9 = vadd.f32 1.0, %v13296_v59  ;;  %v13298_v1 = vpop.eup %13297  ;;  %v15322_v6 = vld [vmem:[#allocation8 + $0x1c4] ss:$16 sps:$4 sm:$0xff]   ;;  %v15330_v59 = vld [vmem:[#allocation8 + $0x1c8] ss:$16 sps:$4 sm:$0xff]  }
0x1460   : > { %13307 = vrcp.f32 %v8395_v20  ;;  %v8396_v21 = vadd.f32 1.0, %v13298_v1  ;;  %v13300_v63 = vpop.eup %13299  ;;  %v15328_v20 = vld [vmem:[#allocation8 + $0x1c0] ss:$16 sps:$4 sm:$0xff]   ;;  %v15336_v1 = vld [vmem:[#allocation8 + $0x1ec] ss:$16 sps:$4 sm:$0xff]  }
0x1461   : > { %13309 = vpow2.f32 %v11303_v23  ;;  %v13302_v3 = vpop.eup %13301  ;;  %v15324_v23 = vld [vmem:[#allocation8 + $0x1cc] ss:$16 sps:$4 sm:$0xff]  }
0x1462   : > { %13311 = vrcp.f32 %v8384_v9  ;;  %v13304_v4 = vpop.eup %13303  ;;  %v8409_v31 = vadd.f32 1.0, %v13302_v3  ;;  %v15334_v9 = vld [vmem:[#allocation8 + $0x1e4] ss:$16 sps:$4 sm:$0xff]  }
0x1463   : > { %13313 = vrcp.f32 %v8396_v21  ;;  %v15340_v21 = vld [vmem:[#allocation8 + $0x1e0] ss:$16 sps:$4 sm:$0xff]  }
0x1464   : > { %13315 = vrcp.f32 %v8409_v31 }
0x1469   : > { %v13306_v29 = vpop.eup %13305 }
0x146a   : > { %v13308_v24 = vpop.eup %13307  ;;  %v8417_v45 = vmul.f32 %v13306_v29, %v13300_v63  ;;  %v15342_v63 = vld [vmem:[#allocation8 + $0x1e8] ss:$16 sps:$4 sm:$0xff]  }
0x146b   : > { %v13310_v25 = vpop.eup %13309  ;;  %v8415_v48 = vmul.f32 %v13308_v24, %v15181_v14 }
0x146c   : > { %v13312_v52 = vpop.eup %13311  ;;  %v8410_v55 = vadd.f32 1.0, %v13310_v25 }
0x146d   : > { %v15259_v53 = vadd.f32 %v8417_v45, %v8415_v48  ;;  %v8418_v54 = vmul.f32 %v13312_v52, %v13304_v4  ;;  %v13314_v58 = vpop.eup %13313 }
0x146e   : > { %v8416_v47 = vmul.f32 %v13314_v58, %v15185_v32  ;;  %v13316_v56 = vpop.eup %13315 }
0x146f   : > { %13317 = vtanh.f32 %v15259_v53 }
0x1470   : > { %v15263_v26 = vadd.f32 %v8418_v54, %v8416_v47  ;;  %13319 = vrcp.f32 %v8410_v55 }
0x1472   : > { %13321 = vtanh.f32 %v15263_v26 }
0x1479   : > { %v13318_v14 = vpop.eup %13317 }
0x147a   : > { %v13320_v5 = vpop.eup %13319  ;;  %v8423_v38 = vmul.f32 %v13318_v14, %v13316_v56 }
0x147c   : > { %v13322_v37 = vpop.eup %13321 }
0x147d   : > { %v8424_v39 = vmul.f32 %v13322_v37, %v13320_v5 }
0x147f   : > { %v8425_v40 = vpack.c.bf16 %v8424_v39, %v8423_v38 }
0x1481   : > { %11768 = vst [vmem:[%s14023_s29 + $0x30] sm:$0xff] %v8425_v40   ;;  %8668 = vmatmul.mubr.bf16.vlgmr.msra.gmra.mrb[76].mxu0 %v8425_v40  ;;  %8711 = vmatmul.mubr.bf16.vlgmr.msra.gmra.mrb[76].mxu1 %v8425_v40 }
0x1482   : > { %8988 = vmatpush1.bf16.msra.mxu0 %v15200_v60  ;;  %9031 = vmatpush1.bf16.msra.mxu1 %v15202_v51 }
0x1483   : > { %8989 = vmatprep.subr.bf16.mxu0 %v15208_v28  ;;  %9032 = vmatprep.subr.bf16.mxu1 %v15210_v13 }
0x1484   : > { %9019 = vmatprep.mubr.bf16.mxu0 %v13613_v0  ;;  %9062 = vmatprep.mubr.bf16.mxu1 %v13613_v0 }
0x1486   : > { %8990 = vmatpush1.bf16.msra.mxu0 %v15212_v27  ;;  %9033 = vmatpush1.bf16.msra.mxu1 %v15214_v7 }
0x1487   : > { %8991 = vmatprep.subr.bf16.mxu0 %v15220_v16  ;;  %9034 = vmatprep.subr.bf16.mxu1 %v15282_v50 }
0x1488   : > { %v10207_v32 = vld [vmem:[%s14023_s29 + $0x30] sm:$0xf]  ;;  %v10208_v41 = vld [vmem:[%s14023_s29 + $0x34] sm:$0xf] }
0x1489   : > { %v10231_v42 = vmax.bf16 %v13613_v0, %v10207_v32  ;;  %v10232_v44 = vmax.bf16 %v13613_v0, %v10208_v41 }
0x148a   : > { %8992 = vmatpush1.bf16.msra.mxu0 %v15223_v34  ;;  %9035 = vmatpush1.bf16.msra.mxu1 %v15284_v22 }
0x148b   : > { %v11785_v46 = vcombine.low %v10231_v42, %v10232_v44  ;;  %8993 = vmatprep.subr.bf16.mxu0 %v15288_v30  ;;  %9036 = vmatprep.subr.bf16.mxu1 %v15290_v62 }
0x148d   : > { %11786 = vst [vmem:[%s14023_s29 + $0x30] sm:$0xff] %v11785_v46  }
0x148e   : > { %8994 = vmatpush1.bf16.msra.mxu0 %v15292_v61  ;;  %9037 = vmatpush1.bf16.msra.mxu1 %v15294_v36 }
0x148f   : > { %8995 = vmatprep.subr.bf16.mxu0 %v15300_v35  ;;  %9038 = vmatprep.subr.bf16.mxu1 %v15302_v10 }
0x1492   : > { %8996 = vmatpush1.bf16.msra.mxu0 %v15304_v2  ;;  %9039 = vmatpush1.bf16.msra.mxu1 %v15306_v12 }
0x1493   : > { %8997 = vmatprep.subr.bf16.mxu0 %v15310_v17  ;;  %9040 = vmatprep.subr.bf16.mxu1 %v15312_v49 }
0x1496   : > { %8998 = vmatpush1.bf16.msra.mxu0 %v15316_v15  ;;  %9041 = vmatpush1.bf16.msra.mxu1 %v15318_v11 }
0x1497   : > { %8999 = vmatprep.subr.bf16.mxu0 %v15322_v6  ;;  %9042 = vmatprep.subr.bf16.mxu1 %v15324_v23 }
0x149a   : > { %9000 = vmatpush1.bf16.msra.mxu0 %v15328_v20  ;;  %9043 = vmatpush1.bf16.msra.mxu1 %v15330_v59 }
0x149b   : > { %9001 = vmatprep.subr.bf16.mxu0 %v15334_v9  ;;  %9044 = vmatprep.subr.bf16.mxu1 %v15336_v1 }
0x149e   : > { %9002 = vmatpush1.bf16.msra.mxu0 %v15340_v21  ;;  %9045 = vmatpush1.bf16.msra.mxu1 %v15342_v63 }
0x149f   : > { %9339 = vmatprep.subr.bf16.mxu0 %v15196_v8  ;;  %9382 = vmatprep.subr.bf16.mxu1 %v15198_v57 }
0x1554   : > { %v8669_v3 = vpop.f32.mrb[76].mxu0  ;;  %v8712_v4 = vpop.f32.mrb[76].mxu1 }
0x1555   : > { %v11921_v29 = vadd.f32 %v8669_v3, %v14818_v33  ;;  %v8671_v24 = vpop.f32.mrb[77].mxu0  ;;  %v8714_v45 = vpop.f32.mrb[77].mxu1  ;;  %v11969_v38 = vadd.f32 %v8712_v4, %v14834_v19 }
0x1556   : > { %v11922_v25 = vadd.f32 %v8671_v24, %v14822_v43  ;;  %v8673_v48 = vpop.f32.mrb[78].mxu0  ;;  %v8716_v52 = vpop.f32.mrb[78].mxu1  ;;  %v11970_v37 = vadd.f32 %v8714_v45, %v14829_v18 }
0x1557   : > { %v11340_v31 = vmul.f32 -1.442695, %v11921_v29  ;;  %v11923_v54 = vadd.f32 %v8673_v48, %v14818_v33  ;;  %v8675_v58 = vpop.f32.mrb[79].mxu0  ;;  %v8718_v55 = vpop.f32.mrb[79].mxu1  ;;  %v11971_v32 = vadd.f32 %v8716_v52, %v14834_v19 }
0x1558   : > { %v11342_v47 = vmul.f32 -1.442695, %v11922_v25  ;;  %v11924_v56 = vadd.f32 %v8675_v58, %v14822_v43  ;;  %v11344_v39 = vmul.f32 -1.442695, %v11970_v37  ;;  %v11972_v40 = vadd.f32 %v8718_v55, %v14829_v18 }
0x1559   : > { %13323 = vpow2.f32 %v11340_v31  ;;  %v11341_v14 = vmul.f32 -1.442695, %v11923_v54 }
0x155a   : > { %13325 = vpow2.f32 %v11342_v47  ;;  %v11343_v5 = vmul.f32 -1.442695, %v11924_v56  ;;  %v11345_v46 = vmul.f32 -1.442695, %v11972_v40 }
0x155b   : > { %13327 = vpow2.f32 %v11341_v14 }
0x155c   : > { %13329 = vpow2.f32 %v11343_v5 }
0x155d   : > { %13331 = vtanh.f32 %v11969_v38 }
0x155e   : > { %13333 = vpow2.f32 %v11344_v39 }
0x155f   : > { %13335 = vtanh.f32 %v11971_v32 }
0x1563   : > { %v13324_v41 = vpop.eup %13323 }
0x1564   : > { %v13326_v42 = vpop.eup %13325  ;;  %v8735_v44 = vadd.f32 1.0, %v13324_v41 }
0x1565   : > { %v8747_v3 = vadd.f32 1.0, %v13326_v42  ;;  %v13328_v29 = vpop.eup %13327 }
0x1566   : > { %13337 = vrcp.f32 %v8735_v44  ;;  %v8736_v24 = vadd.f32 1.0, %v13328_v29  ;;  %v13330_v45 = vpop.eup %13329 }
0x1567   : > { %13339 = vrcp.f32 %v8747_v3  ;;  %v8748_v4 = vadd.f32 1.0, %v13330_v45  ;;  %v13332_v25 = vpop.eup %13331 }
0x1568   : > { %13341 = vpow2.f32 %v11345_v46  ;;  %v13334_v48 = vpop.eup %13333 }
0x1569   : > { %13343 = vrcp.f32 %v8736_v24  ;;  %v13336_v52 = vpop.eup %13335  ;;  %v8761_v14 = vadd.f32 1.0, %v13334_v48 }
0x156a   : > { %13345 = vrcp.f32 %v8748_v4 }
0x156b   : > { %13347 = vrcp.f32 %v8761_v14 }
0x1570   : > { %v13338_v31 = vpop.eup %13337 }
0x1571   : > { %v13340_v54 = vpop.eup %13339  ;;  %v8769_v58 = vmul.f32 %v13338_v31, %v13332_v25 }
0x1572   : > { %v13342_v55 = vpop.eup %13341  ;;  %v8767_v47 = vmul.f32 %v13340_v54, %v15259_v53 }
0x1573   : > { %v13344_v56 = vpop.eup %13343  ;;  %v8762_v39 = vadd.f32 1.0, %v13342_v55 }
0x1574   : > { %v15359_v5 = vadd.f32 %v8769_v58, %v8767_v47  ;;  %v8770_v37 = vmul.f32 %v13344_v56, %v13336_v52  ;;  %v13346_v38 = vpop.eup %13345 }
0x1575   : > { %v8768_v40 = vmul.f32 %v13346_v38, %v15263_v26  ;;  %v13348_v41 = vpop.eup %13347 }
0x1576   : > { %13349 = vtanh.f32 %v15359_v5 }
0x1577   : > { %v15363_v32 = vadd.f32 %v8770_v37, %v8768_v40  ;;  %13351 = vrcp.f32 %v8762_v39 }
0x1579   : > { %13353 = vtanh.f32 %v15363_v32 }
0x1580   : > { %v13350_v53 = vpop.eup %13349 }
0x1581   : > { %v13352_v42 = vpop.eup %13351  ;;  %v8775_v46 = vmul.f32 %v13350_v53, %v13348_v41 }
0x1583   : > { %v13354_v44 = vpop.eup %13353 }
0x1584   : > { %v8776_v3 = vmul.f32 %v13354_v44, %v13352_v42 }
0x1586   : > { %v8777_v29 = vpack.c.bf16 %v8776_v3, %v8775_v46 }
0x1588   : > { %11769 = vst [vmem:[%s14023_s29 + $0x38] sm:$0xff] %v8777_v29   ;;  %9020 = vmatmul.mubr.bf16.vlgmr.msra.gmra.mrb[80].mxu0 %v8777_v29  ;;  %9063 = vmatmul.mubr.bf16.vlgmr.msra.gmra.mrb[80].mxu1 %v8777_v29 }
0x1589   : > { %9340 = vmatpush1.bf16.msra.mxu0 %v15200_v60  ;;  %9383 = vmatpush1.bf16.msra.mxu1 %v15202_v51 }
0x158a   : > { %9341 = vmatprep.subr.bf16.mxu0 %v15208_v28  ;;  %9384 = vmatprep.subr.bf16.mxu1 %v15210_v13 }
0x158b   : > { %9371 = vmatprep.mubr.bf16.mxu0 %v13613_v0  ;;  %9414 = vmatprep.mubr.bf16.mxu1 %v13613_v0 }
0x158d   : > { %9342 = vmatpush1.bf16.msra.mxu0 %v15212_v27  ;;  %9385 = vmatpush1.bf16.msra.mxu1 %v15214_v7 }
0x158e   : > { %9343 = vmatprep.subr.bf16.mxu0 %v15220_v16  ;;  %9386 = vmatprep.subr.bf16.mxu1 %v15282_v50 }
0x158f   : > { %v10209_v26 = vld [vmem:[%s14023_s29 + $0x38] sm:$0xf]  ;;  %v10210_v24 = vld [vmem:[%s14023_s29 + $0x3c] sm:$0xf] }
0x1590   : > { %v10233_v45 = vmax.bf16 %v13613_v0, %v10209_v26  ;;  %v10234_v4 = vmax.bf16 %v13613_v0, %v10210_v24 }
0x1591   : > { %9344 = vmatpush1.bf16.msra.mxu0 %v15223_v34  ;;  %9387 = vmatpush1.bf16.msra.mxu1 %v15284_v22 }
0x1592   : > { %v11787_v25 = vcombine.low %v10233_v45, %v10234_v4  ;;  %9345 = vmatprep.subr.bf16.mxu0 %v15288_v30  ;;  %9388 = vmatprep.subr.bf16.mxu1 %v15290_v62 }
0x1594   : > { %11788 = vst [vmem:[%s14023_s29 + $0x38] sm:$0xff] %v11787_v25  }
0x1595   : > { %9346 = vmatpush1.bf16.msra.mxu0 %v15292_v61  ;;  %9389 = vmatpush1.bf16.msra.mxu1 %v15294_v36 }
0x1596   : > { %9347 = vmatprep.subr.bf16.mxu0 %v15300_v35  ;;  %9390 = vmatprep.subr.bf16.mxu1 %v15302_v10 }
0x1599   : > { %9348 = vmatpush1.bf16.msra.mxu0 %v15304_v2  ;;  %9391 = vmatpush1.bf16.msra.mxu1 %v15306_v12 }
0x159a   : > { %9349 = vmatprep.subr.bf16.mxu0 %v15310_v17  ;;  %9392 = vmatprep.subr.bf16.mxu1 %v15312_v49 }
0x159d   : > { %9350 = vmatpush1.bf16.msra.mxu0 %v15316_v15  ;;  %9393 = vmatpush1.bf16.msra.mxu1 %v15318_v11 }
0x159e   : > { %9351 = vmatprep.subr.bf16.mxu0 %v15322_v6  ;;  %9394 = vmatprep.subr.bf16.mxu1 %v15324_v23 }
0x15a1   : > { %9352 = vmatpush1.bf16.msra.mxu0 %v15328_v20  ;;  %9395 = vmatpush1.bf16.msra.mxu1 %v15330_v59 }
0x15a2   : > { %9353 = vmatprep.subr.bf16.mxu0 %v15334_v9  ;;  %9396 = vmatprep.subr.bf16.mxu1 %v15336_v1 }
0x15a5   : > { %9354 = vmatpush1.bf16.msra.mxu0 %v15340_v21  ;;  %9397 = vmatpush1.bf16.msra.mxu1 %v15342_v63 }
0x15a6   : > { %9691 = vmatprep.subr.bf16.mxu0 %v15196_v8  ;;  %9734 = vmatprep.subr.bf16.mxu1 %v15198_v57 }
0x165b   : > { %v9021_v48 = vpop.f32.mrb[80].mxu0  ;;  %v9064_v52 = vpop.f32.mrb[80].mxu1 }
0x165c   : > { %v11925_v31 = vadd.f32 %v9021_v48, %v14818_v33  ;;  %v9023_v54 = vpop.f32.mrb[81].mxu0  ;;  %v9066_v58 = vpop.f32.mrb[81].mxu1  ;;  %v11973_v42 = vadd.f32 %v9064_v52, %v14834_v19 }
0x165d   : > { %v11926_v55 = vadd.f32 %v9023_v54, %v14822_v43  ;;  %v9025_v47 = vpop.f32.mrb[82].mxu0  ;;  %v9068_v56 = vpop.f32.mrb[82].mxu1  ;;  %v11974_v53 = vadd.f32 %v9066_v58, %v14829_v18 }
0x165e   : > { %v11382_v14 = vmul.f32 -1.442695, %v11925_v31  ;;  %v11927_v37 = vadd.f32 %v9025_v47, %v14818_v33  ;;  %v9027_v38 = vpop.f32.mrb[83].mxu0  ;;  %v9070_v39 = vpop.f32.mrb[83].mxu1  ;;  %v11975_v3 = vadd.f32 %v9068_v56, %v14834_v19 }
0x165f   : > { %v11384_v40 = vmul.f32 -1.442695, %v11926_v55  ;;  %v11928_v8 = vadd.f32 %v9027_v38, %v14822_v43  ;;  %v11386_v44 = vmul.f32 -1.442695, %v11974_v53  ;;  %v11976_v46 = vadd.f32 %v9070_v39, %v14829_v18 }
0x1660   : > { %13355 = vpow2.f32 %v11382_v14  ;;  %v11383_v57 = vmul.f32 -1.442695, %v11927_v37 }
0x1661   : > { %13357 = vpow2.f32 %v11384_v40  ;;  %v11385_v41 = vmul.f32 -1.442695, %v11928_v8  ;;  %v11387_v45 = vmul.f32 -1.442695, %v11976_v46 }
0x1662   : > { %13359 = vpow2.f32 %v11383_v57 }
0x1663   : > { %13361 = vpow2.f32 %v11385_v41 }
0x1664   : > { %13363 = vtanh.f32 %v11973_v42 }
0x1665   : > { %13365 = vpow2.f32 %v11386_v44 }
0x1666   : > { %13367 = vtanh.f32 %v11975_v3 }
0x166a   : > { %v13356_v29 = vpop.eup %13355 }
0x166b   : > { %v13358_v26 = vpop.eup %13357  ;;  %v9087_v24 = vadd.f32 1.0, %v13356_v29 }
0x166c   : > { %v9099_v4 = vadd.f32 1.0, %v13358_v26  ;;  %v13360_v25 = vpop.eup %13359 }
0x166d   : > { %13369 = vrcp.f32 %v9087_v24  ;;  %v9088_v48 = vadd.f32 1.0, %v13360_v25  ;;  %v13362_v31 = vpop.eup %13361 }
0x166e   : > { %13371 = vrcp.f32 %v9099_v4  ;;  %v9100_v52 = vadd.f32 1.0, %v13362_v31  ;;  %v13364_v54 = vpop.eup %13363 }
0x166f   : > { %13373 = vpow2.f32 %v11387_v45  ;;  %v13366_v58 = vpop.eup %13365 }
0x1670   : > { %13375 = vrcp.f32 %v9088_v48  ;;  %v13368_v55 = vpop.eup %13367  ;;  %v9113_v40 = vadd.f32 1.0, %v13366_v58 }
0x1671   : > { %13377 = vrcp.f32 %v9100_v52 }
0x1672   : > { %13379 = vrcp.f32 %v9113_v40 }
0x1677   : > { %v13370_v47 = vpop.eup %13369 }
0x1678   : > { %v13372_v56 = vpop.eup %13371  ;;  %v9121_v14 = vmul.f32 %v13370_v47, %v13364_v54 }
0x1679   : > { %v13374_v37 = vpop.eup %13373  ;;  %v9119_v38 = vmul.f32 %v13372_v56, %v15359_v5 }
0x167a   : > { %v13376_v39 = vpop.eup %13375  ;;  %v9114_v53 = vadd.f32 1.0, %v13374_v37 }
0x167b   : > { %v15415_v8 = vadd.f32 %v9121_v14, %v9119_v38  ;;  %v9122_v57 = vmul.f32 %v13376_v39, %v13368_v55  ;;  %v13378_v41 = vpop.eup %13377 }
0x167c   : > { %v9120_v42 = vmul.f32 %v13378_v41, %v15363_v32  ;;  %v13380_v46 = vpop.eup %13379 }
0x167d   : > { %13381 = vtanh.f32 %v15415_v8 }
0x167e   : > { %v15419_v44 = vadd.f32 %v9122_v57, %v9120_v42  ;;  %13383 = vrcp.f32 %v9114_v53 }
0x1680   : > { %13385 = vtanh.f32 %v15419_v44 }
0x1687   : > { %v13382_v5 = vpop.eup %13381 }
0x1688   : > { %v13384_v3 = vpop.eup %13383  ;;  %v9127_v26 = vmul.f32 %v13382_v5, %v13380_v46 }
0x168a   : > { %v13386_v29 = vpop.eup %13385 }
0x168b   : > { %v9128_v24 = vmul.f32 %v13386_v29, %v13384_v3 }
0x168d   : > { %v9129_v45 = vpack.c.bf16 %v9128_v24, %v9127_v26 }
0x168f   : > { %11770 = vst [vmem:[%s14023_s29 + $0x40] sm:$0xff] %v9129_v45   ;;  %9372 = vmatmul.mubr.bf16.vlgmr.msra.gmra.mrb[84].mxu0 %v9129_v45  ;;  %9415 = vmatmul.mubr.bf16.vlgmr.msra.gmra.mrb[84].mxu1 %v9129_v45 }
0x1690   : > { %9692 = vmatpush1.bf16.msra.mxu0 %v15200_v60  ;;  %9735 = vmatpush1.bf16.msra.mxu1 %v15202_v51 }
0x1691   : > { %9693 = vmatprep.subr.bf16.mxu0 %v15208_v28  ;;  %9736 = vmatprep.subr.bf16.mxu1 %v15210_v13 }
0x1692   : > { %9723 = vmatprep.mubr.bf16.mxu0 %v13613_v0  ;;  %9766 = vmatprep.mubr.bf16.mxu1 %v13613_v0 }
0x1694   : > { %9694 = vmatpush1.bf16.msra.mxu0 %v15212_v27  ;;  %9737 = vmatpush1.bf16.msra.mxu1 %v15214_v7 }
0x1695   : > { %9695 = vmatprep.subr.bf16.mxu0 %v15220_v16  ;;  %9738 = vmatprep.subr.bf16.mxu1 %v15282_v50 }
0x1696   : > { %v10211_v60 = vld [vmem:[%s14023_s29 + $0x40] sm:$0xf]  ;;  %v10212_v32 = vld [vmem:[%s14023_s29 + $0x44] sm:$0xf] }
0x1697   : > { %v10235_v51 = vmax.bf16 %v13613_v0, %v10211_v60  ;;  %v10236_v28 = vmax.bf16 %v13613_v0, %v10212_v32 }
0x1698   : > { %9696 = vmatpush1.bf16.msra.mxu0 %v15223_v34  ;;  %9739 = vmatpush1.bf16.msra.mxu1 %v15284_v22 }
0x1699   : > { %v11789_v13 = vcombine.low %v10235_v51, %v10236_v28  ;;  %9697 = vmatprep.subr.bf16.mxu0 %v15288_v30  ;;  %9740 = vmatprep.subr.bf16.mxu1 %v15290_v62 }
0x169b   : > { %11790 = vst [vmem:[%s14023_s29 + $0x40] sm:$0xff] %v11789_v13  }
0x169c   : > { %9698 = vmatpush1.bf16.msra.mxu0 %v15292_v61  ;;  %9741 = vmatpush1.bf16.msra.mxu1 %v15294_v36 }
0x169d   : > { %9699 = vmatprep.subr.bf16.mxu0 %v15300_v35  ;;  %9742 = vmatprep.subr.bf16.mxu1 %v15302_v10 }
0x16a0   : > { %9700 = vmatpush1.bf16.msra.mxu0 %v15304_v2  ;;  %9743 = vmatpush1.bf16.msra.mxu1 %v15306_v12 }
0x16a1   : > { %9701 = vmatprep.subr.bf16.mxu0 %v15310_v17  ;;  %9744 = vmatprep.subr.bf16.mxu1 %v15312_v49 }
0x16a4   : > { %9702 = vmatpush1.bf16.msra.mxu0 %v15316_v15  ;;  %9745 = vmatpush1.bf16.msra.mxu1 %v15318_v11 }
0x16a5   : > { %9703 = vmatprep.subr.bf16.mxu0 %v15322_v6  ;;  %9746 = vmatprep.subr.bf16.mxu1 %v15324_v23 }
0x16a8   : > { %9704 = vmatpush1.bf16.msra.mxu0 %v15328_v20  ;;  %9747 = vmatpush1.bf16.msra.mxu1 %v15330_v59 }
0x16a9   : > { %9705 = vmatprep.subr.bf16.mxu0 %v15334_v9  ;;  %9748 = vmatprep.subr.bf16.mxu1 %v15336_v1 }
0x16ac   : > { %9706 = vmatpush1.bf16.msra.mxu0 %v15340_v21  ;;  %9749 = vmatpush1.bf16.msra.mxu1 %v15342_v63 }
0x1762   : > { %v9373_v27 = vpop.f32.mrb[84].mxu0  ;;  %v9416_v7 = vpop.f32.mrb[84].mxu1 }
0x1763   : > { %v11929_v16 = vadd.f32 %v9373_v27, %v14818_v33  ;;  %v9375_v34 = vpop.f32.mrb[85].mxu0  ;;  %v9418_v4 = vpop.f32.mrb[85].mxu1  ;;  %v11977_v39 = vadd.f32 %v9416_v7, %v14834_v19 }
0x1764   : > { %v11930_v25 = vadd.f32 %v9375_v34, %v14822_v43  ;;  %v9377_v48 = vpop.f32.mrb[86].mxu0  ;;  %v9420_v31 = vpop.f32.mrb[86].mxu1  ;;  %v11978_v38 = vadd.f32 %v9418_v4, %v14829_v18 }
0x1765   : > { %v11424_v52 = vmul.f32 -1.442695, %v11929_v16  ;;  %v11931_v54 = vadd.f32 %v9377_v48, %v14818_v33  ;;  %v9379_v58 = vpop.f32.mrb[87].mxu0  ;;  %v9422_v55 = vpop.f32.mrb[87].mxu1  ;;  %v11979_v41 = vadd.f32 %v9420_v31, %v14834_v19 }
0x1766   : > { %v11426_v47 = vmul.f32 -1.442695, %v11930_v25  ;;  %v11932_v56 = vadd.f32 %v9379_v58, %v14822_v43  ;;  %v11428_v40 = vmul.f32 -1.442695, %v11978_v38  ;;  %v11980_v57 = vadd.f32 %v9422_v55, %v14829_v18 }
0x1767   : > { %13387 = vpow2.f32 %v11424_v52  ;;  %v11425_v14 = vmul.f32 -1.442695, %v11931_v54 }
0x1768   : > { %13389 = vpow2.f32 %v11426_v47  ;;  %v11427_v37 = vmul.f32 -1.442695, %v11932_v56  ;;  %v11429_v5 = vmul.f32 -1.442695, %v11980_v57 }
0x1769   : > { %13391 = vpow2.f32 %v11425_v14 }
0x176a   : > { %13393 = vpow2.f32 %v11427_v37 }
0x176b   : > { %13395 = vtanh.f32 %v11977_v39 }
0x176c   : > { %13397 = vpow2.f32 %v11428_v40 }
0x176d   : > { %13399 = vtanh.f32 %v11979_v41 }
0x1771   : > { %v13388_v53 = vpop.eup %13387 }
0x1772   : > { %v13390_v42 = vpop.eup %13389  ;;  %v9439_v46 = vadd.f32 1.0, %v13388_v53  ;;  %v12702_v53 = vld [vmem:[#allocation8 + $0x104] ss:$16 sps:$4 sm:$0xff]  }
0x1773   : > { %v9451_v3 = vadd.f32 1.0, %v13390_v42  ;;  %v13392_v29 = vpop.eup %13391  ;;  %v12705_v42 = vld [vmem:[#allocation8 + $0x10c] ss:$16 sps:$4 sm:$0xff]   ;;  %10043 = vmatprep.subr.bf16.mxu0 %v12702_v53 }
0x1774   : > { %13401 = vrcp.f32 %v9439_v46  ;;  %v9440_v26 = vadd.f32 1.0, %v13392_v29  ;;  %v13394_v24 = vpop.eup %13393  ;;  %v12700_v46 = vld [vmem:[#allocation8 + $0x100] ss:$16 sps:$4 sm:$0xff]   ;;  %10086 = vmatprep.subr.bf16.mxu1 %v12705_v42  ;;  %v12711_v29 = vld [vmem:[#allocation8 + $0x12c] ss:$16 sps:$4 sm:$0xff]  }
0x1775   : > { %13403 = vrcp.f32 %v9451_v3  ;;  %v9452_v45 = vadd.f32 1.0, %v13394_v24  ;;  %v13396_v60 = vpop.eup %13395  ;;  %v12708_v3 = vld [vmem:[#allocation8 + $0x124] ss:$16 sps:$4 sm:$0xff]   ;;  %v12709_v24 = vld [vmem:[#allocation8 + $0x128] ss:$16 sps:$4 sm:$0xff]  }
0x1776   : > { %13405 = vpow2.f32 %v11429_v5  ;;  %v13398_v32 = vpop.eup %13397  ;;  %v12703_v5 = vld [vmem:[#allocation8 + $0x108] ss:$16 sps:$4 sm:$0xff]  }
0x1777   : > { %13407 = vrcp.f32 %v9440_v26  ;;  %v13400_v51 = vpop.eup %13399  ;;  %v9465_v4 = vadd.f32 1.0, %v13398_v32  ;;  %v12706_v26 = vld [vmem:[#allocation8 + $0x120] ss:$16 sps:$4 sm:$0xff]  }
0x1778   : > { %13409 = vrcp.f32 %v9452_v45  ;;  %v12714_v45 = vld [vmem:[#allocation8 + $0x144] ss:$16 sps:$4 sm:$0xff]  }
0x1779   : > { %13411 = vrcp.f32 %v9465_v4 }
0x177e   : > { %v13402_v28 = vpop.eup %13401 }
0x177f   : > { %v13404_v13 = vpop.eup %13403  ;;  %v9473_v27 = vmul.f32 %v13402_v28, %v13396_v60  ;;  %v12712_v60 = vld [vmem:[#allocation8 + $0x140] ss:$16 sps:$4 sm:$0xff]  }
0x1780   : > { %v13406_v7 = vpop.eup %13405  ;;  %v9471_v16 = vmul.f32 %v13404_v13, %v15415_v8 }
0x1781   : > { %v13408_v34 = vpop.eup %13407  ;;  %v9466_v52 = vadd.f32 1.0, %v13406_v7 }
0x1782   : > { %v15469_v25 = vadd.f32 %v9473_v27, %v9471_v16  ;;  %v9474_v48 = vmul.f32 %v13408_v34, %v13400_v51  ;;  %v13410_v31 = vpop.eup %13409 }
0x1783   : > { %v9472_v54 = vmul.f32 %v13410_v31, %v15419_v44  ;;  %v13412_v8 = vpop.eup %13411 }
0x1784   : > { %13413 = vtanh.f32 %v15469_v25 }
0x1785   : > { %v15473_v58 = vadd.f32 %v9474_v48, %v9472_v54  ;;  %13415 = vrcp.f32 %v9466_v52 }
0x1787   : > { %13417 = vtanh.f32 %v15473_v58 }
0x178e   : > { %v13414_v55 = vpop.eup %13413 }
0x178f   : > { %v13416_v47 = vpop.eup %13415  ;;  %v9479_v14 = vmul.f32 %v13414_v55, %v13412_v8 }
0x1791   : > { %v13418_v56 = vpop.eup %13417 }
0x1792   : > { %v9480_v37 = vmul.f32 %v13418_v56, %v13416_v47 }
0x1794   : > { %v9481_v38 = vpack.c.bf16 %v9480_v37, %v9479_v14 }
0x1796   : > { %11771 = vst [vmem:[%s14023_s29 + $0x48] sm:$0xff] %v9481_v38   ;;  %9724 = vmatmul.mubr.bf16.vlgmr.msra.gmra.mrb[88].mxu0 %v9481_v38  ;;  %9767 = vmatmul.mubr.bf16.vlgmr.msra.gmra.mrb[88].mxu1 %v9481_v38 }
0x1797   : > { %10075 = vmatprep.mubr.bf16.mxu0 %v13613_v0  ;;  %10118 = vmatprep.mubr.bf16.mxu1 %v13613_v0 }
0x1798   : > { %10044 = vmatpush1.bf16.msra.mxu0 %v12700_v46  ;;  %10087 = vmatpush1.bf16.msra.mxu1 %v12703_v5 }
0x1799   : > { %10045 = vmatprep.subr.bf16.mxu0 %v12708_v3  ;;  %10088 = vmatprep.subr.bf16.mxu1 %v12711_v29 }
0x179c   : > { %10046 = vmatpush1.bf16.msra.mxu0 %v12706_v26  ;;  %10089 = vmatpush1.bf16.msra.mxu1 %v12709_v24 }
0x179d   : > { %v10213_v44 = vld [vmem:[%s14023_s29 + $0x48] sm:$0xf]  ;;  %v10214_v39 = vld [vmem:[%s14023_s29 + $0x4c] sm:$0xf]  ;;  %10090 = vmatprep.subr.bf16.mxu1 %v15282_v50  ;;  %10047 = vmatprep.subr.bf16.mxu0 %v12714_v45 }
0x179e   : > { %v10237_v40 = vmax.bf16 %v13613_v0, %v10213_v44  ;;  %v10238_v57 = vmax.bf16 %v13613_v0, %v10214_v39 }
0x17a0   : > { %v11791_v41 = vcombine.low %v10237_v40, %v10238_v57  ;;  %10048 = vmatpush1.bf16.msra.mxu0 %v12712_v60  ;;  %10091 = vmatpush1.bf16.msra.mxu1 %v15284_v22 }
0x17a1   : > { %10049 = vmatprep.subr.bf16.mxu0 %v15288_v30  ;;  %10092 = vmatprep.subr.bf16.mxu1 %v15290_v62 }
0x17a2   : > { %11792 = vst [vmem:[%s14023_s29 + $0x48] sm:$0xff] %v11791_v41  }
0x17a4   : > { %10050 = vmatpush1.bf16.msra.mxu0 %v15292_v61  ;;  %10093 = vmatpush1.bf16.msra.mxu1 %v15294_v36 }
0x17a5   : > { %10051 = vmatprep.subr.bf16.mxu0 %v15300_v35  ;;  %10094 = vmatprep.subr.bf16.mxu1 %v15302_v10 }
0x17a8   : > { %10052 = vmatpush1.bf16.msra.mxu0 %v15304_v2  ;;  %10095 = vmatpush1.bf16.msra.mxu1 %v15306_v12 }
0x17a9   : > { %10053 = vmatprep.subr.bf16.mxu0 %v15310_v17  ;;  %10096 = vmatprep.subr.bf16.mxu1 %v15312_v49 }
0x17ac   : > { %10054 = vmatpush1.bf16.msra.mxu0 %v15316_v15  ;;  %10097 = vmatpush1.bf16.msra.mxu1 %v15318_v11 }
0x17ad   : > { %10055 = vmatprep.subr.bf16.mxu0 %v15322_v6  ;;  %10098 = vmatprep.subr.bf16.mxu1 %v15324_v23 }
0x17b0   : > { %10056 = vmatpush1.bf16.msra.mxu0 %v15328_v20  ;;  %10099 = vmatpush1.bf16.msra.mxu1 %v15330_v59 }
0x17b1   : > { %10057 = vmatprep.subr.bf16.mxu0 %v15334_v9  ;;  %10100 = vmatprep.subr.bf16.mxu1 %v15336_v1 }
0x17b4   : > { %10058 = vmatpush1.bf16.msra.mxu0 %v15340_v21  ;;  %10101 = vmatpush1.bf16.msra.mxu1 %v15342_v63 }
0x1869   : > { %v9725_v50 = vpop.f32.mrb[88].mxu0  ;;  %v9768_v22 = vpop.f32.mrb[88].mxu1 }
0x186a   : > { %v11933_v30 = vadd.f32 %v9725_v50, %v14818_v33  ;;  %v9727_v62 = vpop.f32.mrb[89].mxu0  ;;  %v9770_v61 = vpop.f32.mrb[89].mxu1  ;;  %v11981_v59 = vadd.f32 %v9768_v22, %v14834_v19 }
0x186b   : > { %v11934_v36 = vadd.f32 %v9727_v62, %v14822_v43  ;;  %v9729_v35 = vpop.f32.mrb[90].mxu0  ;;  %v9772_v10 = vpop.f32.mrb[90].mxu1  ;;  %v11982_v20 = vadd.f32 %v9770_v61, %v14829_v18 }
0x186c   : > { %v11466_v2 = vmul.f32 -1.442695, %v11933_v30  ;;  %v11935_v12 = vadd.f32 %v9729_v35, %v14818_v33  ;;  %v9731_v17 = vpop.f32.mrb[91].mxu0  ;;  %v9774_v49 = vpop.f32.mrb[91].mxu1  ;;  %v11983_v21 = vadd.f32 %v9772_v10, %v14834_v19 }
0x186d   : > { %v11468_v15 = vmul.f32 -1.442695, %v11934_v36  ;;  %v11936_v11 = vadd.f32 %v9731_v17, %v14822_v43  ;;  %v11470_v9 = vmul.f32 -1.442695, %v11982_v20  ;;  %v11984_v1 = vadd.f32 %v9774_v49, %v14829_v18 }
0x186e   : > { %13419 = vpow2.f32 %v11466_v2  ;;  %v11467_v6 = vmul.f32 -1.442695, %v11935_v12 }
0x186f   : > { %13421 = vpow2.f32 %v11468_v15  ;;  %v11469_v23 = vmul.f32 -1.442695, %v11936_v11  ;;  %v11471_v28 = vmul.f32 -1.442695, %v11984_v1 }
0x1870   : > { %13423 = vpow2.f32 %v11467_v6 }
0x1871   : > { %13425 = vpow2.f32 %v11469_v23 }
0x1872   : > { %13427 = vtanh.f32 %v11981_v59 }
0x1873   : > { %13429 = vpow2.f32 %v11470_v9 }
0x1874   : > { %13431 = vtanh.f32 %v11983_v21 }
0x1878   : > { %v13420_v63 = vpop.eup %13419 }
0x1879   : > { %v13422_v32 = vpop.eup %13421  ;;  %v9791_v51 = vadd.f32 1.0, %v13420_v63 }
0x187a   : > { %v9803_v13 = vadd.f32 1.0, %v13422_v32  ;;  %v13424_v27 = vpop.eup %13423 }
0x187b   : > { %13433 = vrcp.f32 %v9791_v51  ;;  %v9792_v7 = vadd.f32 1.0, %v13424_v27  ;;  %v13426_v16 = vpop.eup %13425 }
0x187c   : > { %13435 = vrcp.f32 %v9803_v13  ;;  %v9804_v34 = vadd.f32 1.0, %v13426_v16  ;;  %v13428_v4 = vpop.eup %13427 }
0x187d   : > { %13437 = vpow2.f32 %v11471_v28  ;;  %v13430_v48 = vpop.eup %13429 }
0x187e   : > { %13439 = vrcp.f32 %v9792_v7  ;;  %v13432_v31 = vpop.eup %13431  ;;  %v9817_v14 = vadd.f32 1.0, %v13430_v48 }
0x187f   : > { %13441 = vrcp.f32 %v9804_v34 }
0x1880   : > { %13443 = vrcp.f32 %v9817_v14 }
0x1885   : > { %v13434_v52 = vpop.eup %13433 }
0x1886   : > { %v13436_v54 = vpop.eup %13435  ;;  %v9825_v8 = vmul.f32 %v13434_v52, %v13428_v4 }
0x1887   : > { %v13438_v55 = vpop.eup %13437  ;;  %v9823_v47 = vmul.f32 %v13436_v54, %v15469_v25 }
0x1888   : > { %v13440_v56 = vpop.eup %13439  ;;  %v9818_v39 = vadd.f32 1.0, %v13438_v55 }
0x1889   : > { %v15515_v37 = vadd.f32 %v9825_v8, %v9823_v47  ;;  %v9826_v38 = vmul.f32 %v13440_v56, %v13432_v31  ;;  %v13442_v44 = vpop.eup %13441 }
0x188a   : > { %v9824_v40 = vmul.f32 %v13442_v44, %v15473_v58  ;;  %v13444_v25 = vpop.eup %13443 }
0x188b   : > { %13445 = vtanh.f32 %v15515_v37 }
0x188c   : > { %v15519_v57 = vadd.f32 %v9826_v38, %v9824_v40  ;;  %13447 = vrcp.f32 %v9818_v39 }
0x188e   : > { %13449 = vtanh.f32 %v15519_v57 }
0x1895   : > { %v13446_v41 = vpop.eup %13445 }
0x1896   : > { %v13448_v53 = vpop.eup %13447  ;;  %v9831_v46 = vmul.f32 %v13446_v41, %v13444_v25 }
0x1898   : > { %v13450_v42 = vpop.eup %13449 }
0x1899   : > { %v9832_v5 = vmul.f32 %v13450_v42, %v13448_v53 }
0x189b   : > { %v9833_v3 = vpack.c.bf16 %v9832_v5, %v9831_v46 }
0x189d   : > { %11772 = vst [vmem:[%s14023_s29 + $0x50] sm:$0xff] %v9833_v3   ;;  %10076 = vmatmul.mubr.bf16.vlgmr.msra.gmra.mrb[92].mxu0 %v9833_v3  ;;  %10119 = vmatmul.mubr.bf16.vlgmr.msra.gmra.mrb[92].mxu1 %v9833_v3 }
0x18a4   : > { %v10215_v58 = vld [vmem:[%s14023_s29 + $0x50] sm:$0xf]  ;;  %v10216_v29 = vld [vmem:[%s14023_s29 + $0x54] sm:$0xf] }
0x18a5   : > { %v10239_v26 = vmax.bf16 %v13613_v0, %v10215_v58  ;;  %v10240_v24 = vmax.bf16 %v13613_v0, %v10216_v29 }
0x18a7   : > { %v11793_v45 = vcombine.low %v10239_v26, %v10240_v24 }
0x18a9   : > { %11794 = vst [vmem:[%s14023_s29 + $0x50] sm:$0xff] %v11793_v45  }
0x1970   : > { %v10077_v60 = vpop.f32.mrb[92].mxu0  ;;  %v10120_v50 = vpop.f32.mrb[92].mxu1 }
0x1971   : > { %v11937_v22 = vadd.f32 %v10077_v60, %v14818_v33  ;;  %v10079_v30 = vpop.f32.mrb[93].mxu0  ;;  %v10122_v62 = vpop.f32.mrb[93].mxu1  ;;  %v11985_v20 = vadd.f32 %v10120_v50, %v14834_v19 }
0x1972   : > { %v11938_v61 = vadd.f32 %v10079_v30, %v14822_v43  ;;  %v10081_v36 = vpop.f32.mrb[94].mxu0  ;;  %v10124_v35 = vpop.f32.mrb[94].mxu1  ;;  %v11986_v23 = vadd.f32 %v10122_v62, %v14829_v18 }
0x1973   : > { %v11508_v10 = vmul.f32 -1.442695, %v11937_v22  ;;  %v11939_v2 = vadd.f32 %v10081_v36, %v14818_v33  ;;  %v10083_v12 = vpop.f32.mrb[95].mxu0  ;;  %v10126_v17 = vpop.f32.mrb[95].mxu1  ;;  %v11987_v33 = vadd.f32 %v10124_v35, %v14834_v19 }
0x1974   : > { %v11510_v49 = vmul.f32 -1.442695, %v11938_v61  ;;  %v11940_v15 = vadd.f32 %v10083_v12, %v14822_v43  ;;  %v11512_v59 = vmul.f32 -1.442695, %v11986_v23  ;;  %v11988_v9 = vadd.f32 %v10126_v17, %v14829_v18 }
0x1975   : > { %13451 = vpow2.f32 %v11508_v10  ;;  %v11509_v11 = vmul.f32 -1.442695, %v11939_v2 }
0x1976   : > { %13453 = vpow2.f32 %v11510_v49  ;;  %v11511_v6 = vmul.f32 -1.442695, %v11940_v15  ;;  %v11513_v43 = vmul.f32 -1.442695, %v11988_v9 }
0x1977   : > { %13455 = vpow2.f32 %v11509_v11 }
0x1978   : > { %13457 = vpow2.f32 %v11511_v6 }
0x1979   : > { %13459 = vtanh.f32 %v11985_v20 }
0x197a   : > { %13461 = vpow2.f32 %v11512_v59 }
0x197b   : > { %13463 = vtanh.f32 %v11987_v33 }
0x197f   : > { %v13452_v1 = vpop.eup %13451 }
0x1980   : > { %v13454_v21 = vpop.eup %13453  ;;  %v10143_v63 = vadd.f32 1.0, %v13452_v1 }
0x1981   : > { %v10155_v32 = vadd.f32 1.0, %v13454_v21  ;;  %v13456_v51 = vpop.eup %13455 }
0x1982   : > { %13465 = vrcp.f32 %v10143_v63  ;;  %v10144_v28 = vadd.f32 1.0, %v13456_v51  ;;  %v13458_v13 = vpop.eup %13457 }
0x1983   : > { %13467 = vrcp.f32 %v10155_v32  ;;  %v10156_v27 = vadd.f32 1.0, %v13458_v13  ;;  %v13460_v18 = vpop.eup %13459 }
0x1984   : > { %13469 = vpow2.f32 %v11513_v43  ;;  %v13462_v7 = vpop.eup %13461 }
0x1985   : > { %13471 = vrcp.f32 %v10144_v28  ;;  %v13464_v19 = vpop.eup %13463  ;;  %v10169_v48 = vadd.f32 1.0, %v13462_v7 }
0x1986   : > { %13473 = vrcp.f32 %v10156_v27 }
0x1987   : > { %13475 = vrcp.f32 %v10169_v48 }
0x198c   : > { %v13466_v16 = vpop.eup %13465 }
0x198d   : > { %v13468_v34 = vpop.eup %13467  ;;  %v10177_v4 = vmul.f32 %v13466_v16, %v13460_v18 }
0x198e   : > { %v13470_v31 = vpop.eup %13469  ;;  %v10175_v52 = vmul.f32 %v13468_v34, %v15515_v37 }
0x198f   : > { %v13472_v54 = vpop.eup %13471  ;;  %v10170_v56 = vadd.f32 1.0, %v13470_v31 }
0x1990   : > { %v10179_v8 = vadd.f32 %v10177_v4, %v10175_v52  ;;  %v10178_v55 = vmul.f32 %v13472_v54, %v13464_v19  ;;  %v13474_v47 = vpop.eup %13473 }
0x1991   : > { %v10176_v14 = vmul.f32 %v13474_v47, %v15519_v57  ;;  %v13476_v44 = vpop.eup %13475 }
0x1992   : > { %13477 = vtanh.f32 %v10179_v8 }
0x1993   : > { %v10180_v38 = vadd.f32 %v10178_v55, %v10176_v14  ;;  %13479 = vrcp.f32 %v10170_v56 }
0x1995   : > { %13481 = vtanh.f32 %v10180_v38 }
0x199c   : > { %v13478_v39 = vpop.eup %13477 }
0x199d   : > { %v10183_v37 = vmul.f32 %v13478_v39, %v13476_v44  ;;  %v13480_v40 = vpop.eup %13479 }
0x199f   : > { %v13482_v25 = vpop.eup %13481 }
0x19a0   : > { %v10184_v41 = vmul.f32 %v13482_v25, %v13480_v40 }
0x19a2   : > { %v11690_v53 = vpack.c.bf16 %v10184_v41, %v10183_v37 }
0x19a4   : > { %11773 = vst [vmem:[%s14023_s29 + $0x58] sm:$0xff] %v11690_v53  }
0x19ab   : > { %v10217_v42 = vld [vmem:[%s14023_s29 + $0x58] sm:$0xf]  ;;  %v10218_v46 = vld [vmem:[%s14023_s29 + $0x5c] sm:$0xf] }
0x19ac   : > { %v10241_v5 = vmax.bf16 %v13613_v0, %v10217_v42  ;;  %v10242_v3 = vmax.bf16 %v13613_v0, %v10218_v46 }
0x19ae   : > { %v11795_v57 = vcombine.low %v10241_v5, %v10242_v3 }
0x19b0   : > { %11796 = vst [vmem:[%s14023_s29 + $0x58] sm:$0xff] %v11795_v57  }
0x19b1   : > { %s11571_s7 = sshll.u32 %s13667_s19, 7  ;;  %s10297_s9 = sshll.u32 %s14023_s29, 4  ;;  %s10298_s9 = int_to_ptr.vmem [resolvable:$true] %s10297_s9 }
0x19b2   : > { %s10280_s8 = scalar_lea.hbm %s15586_s4, %s11571_s7  ;;  %s13614_s11 = smov 128  }
0x19b3   : > { %p15603_p12 = scmp.ne.s32.totalorder %s15594_s27, 0  ;;  %s13615_s23 = smov 256  }
0x19b4   : > { %s13616_s30 = smov 2   ;;  %s13617_s20 = smov 64  }
0x19b5   : > { %12200 = sst [smem:[#allocation13]] (%p15603_p12), %s13614_s11  ;;  %s13618_s19 = smov 4  }
0x19b6   : > { %12201 = sst [smem:[#allocation13 + $0x1]] (%p15603_p12), %s13615_s23  ;;  %s13619_s5 = smov [#allocation12]  }
0x19b7   : > { %12202 = sst [smem:[#allocation13 + $0x2]] (%p15603_p12), %s13616_s30  ;;  %s13620_s14 = smov 0  }
0x19b8   : > { %12203 = sst [smem:[#allocation13 + $0x3]] (%p15603_p12), %s13617_s20 }
0x19b9   : > { %12204 = sst [smem:[#allocation13 + $0x4]] (%p15603_p12), %s13617_s20 }
0x19ba   : > { %12205 = sst [smem:[#allocation13 + $0x5]] (%p15603_p12), %s13618_s19 }
0x19bb   : > { %12206 = dma.general (%p15603_p12), %s10298_s9, 1536, %s10280_s8, %s10268_s22, %s13619_s5, [#allocation13], %s13620_s14, 0  }
0x19bc PF: > { %s10325_s25 = sand.u32 1, %s13589_s15   ;;  %p15604_p13 = scmp.ne.s32.totalorder %s15595_s28, 0 }
0x19bd   : > { %s10326_s26 = scalar_lea.sflag [#allocation5], %s10325_s25 }
0x19be   : > { %p12216_p0 = pnand %p10417_p4, %p15604_p13 }
0x19c0   : > { %13584 = dma.done.wait (!%p12216_p0), %s10326_s26, 1536  }
0x19c1   : > { %13586 = vsyncadd (!%p12216_p0), %s10326_s26, 4294965760  ;;  %p18_p7 = scmp.ge.s32.totalorder %s13671_s21, 4   ;;  %s15605_s15 = smov %s13593_s16 }
0x19c2   : > { %s15606_s16 = smov %s13597_s17  ;;  %s15607_s17 = smov %s13683_s24 }
0x19c3   : > { %s15608_s18 = smov %s13671_s21  ;;  %20 = sbr.rel (!%p18_p7) target bundleno = 6 (0x6), region = 125 }
0x19ca   :  { %10331 = vsyncpa [#allocation4], 1 }
0x19cb   :  { %10333 = vsyncpa [#allocation4 + $0x1], 1 }
0x19cc   :  { %10334 = vsyncpa [#allocation7], 1 }
0x19cd   :  { %10335 = vsyncpa [#allocation5], 1 }
0x19ce   :  { %10337 = vsyncpa [#allocation5 + $0x1], 1 }

</bundles_post_ra>
